<compile_context>
chip_gen: v6e
topology: v6e:2x2x1
jax: 0.10.0
libtpu: 0.0.40
codegen_flags: <defaults>
</compile_context>

<pallas_src>
import functools

import numpy as np
import jax
import jax.numpy as jnp
from jax.experimental import pallas as pl
from jax.experimental.pallas import tpu as pltpu

WINDOW_SIZE = 11
SIGMA = 1.5
PAD = WINDOW_SIZE // 2
C1 = 0.01 ** 2
C2 = 0.03 ** 2
_NOPS = 5  # x1, x2, x1*x1, x2*x2, x1*x2


def _gaussian_1d(window_size, sigma):
    g = np.exp(-(np.arange(window_size) - window_size // 2) ** 2
               / (2.0 * sigma ** 2))
    return (g / g.sum()).astype(np.float32)


def _banded_gaussian(n):
    """Banded (n, n) matrix B with B[i, r] = g[r - i + PAD].

    B @ x is the vertical 'same' (zero-padded) 1-D Gaussian conv along axis 0;
    because g is symmetric, x @ B is the horizontal pass along axis 1.
    """
    g = _gaussian_1d(WINDOW_SIZE, SIGMA)
    m = np.zeros((n, n), np.float32)
    for i in range(n):
        for k in range(WINDOW_SIZE):
            r = i + k - PAD
            if 0 <= r < n:
                m[i, r] = g[k]
    return m


def _ssim_kernel(gh_ref, gw_ref, x1_ref, x2_ref, sum_ref, s_ref,
                 *, C, H, W, SW):
    # gh_ref : (H, H)          banded vertical Gaussian factor (resident)
    # gw_ref : (SW, SW)        banded horizontal Gaussian factor (resident)
    # x1_ref / x2_ref : (C, H, W)  all channels of one batch element
    # sum_ref : (1, 1)         per-batch partial sum of the SSIM map
    # s_ref   : (H, 5*C*SW)    packed conv operands, lane slabs of width SW
    if SW != W:
        # Keep the padded lanes of every slab zero: zero lanes reproduce the
        # zero "same" padding of conv2d exactly.
        s_ref[...] = jnp.zeros_like(s_ref)

    for c in range(C):
        x1 = x1_ref[c].astype(jnp.float32)
        x2 = x2_ref[c].astype(jnp.float32)
        base = _NOPS * c * SW
        s_ref[:, base + 0 * SW: base + 0 * SW + W] = x1
        s_ref[:, base + 1 * SW: base + 1 * SW + W] = x2
        s_ref[:, base + 2 * SW: base + 2 * SW + W] = x1 * x1
        s_ref[:, base + 3 * SW: base + 3 * SW + W] = x2 * x2
        s_ref[:, base + 4 * SW: base + 4 * SW + W] = x1 * x2

    # Vertical pass for all 5*C operands at once: one wide MXU matmul.
    vert = jnp.dot(gh_ref[...], s_ref[...],
                   preferred_element_type=jnp.float32,
                   precision=jax.lax.Precision.HIGHEST)
    gw = gw_ref[...]

    if SW != W:
        lane = jax.lax.broadcasted_iota(jnp.int32, (H, SW), 1)
        valid = lane < W
    else:
        valid = None

    acc = jnp.zeros((1, 1), jnp.float32)
    for c in range(C):
        # Horizontal pass per lane slab: (H, SW) @ (SW, SW).  No block-diagonal
        # kron factor -> no wasted MXU FLOPs / VMEM.
        conv = [
            jnp.dot(vert[:, (_NOPS * c + k) * SW:(_NOPS * c + k + 1) * SW], gw,
                    preferred_element_type=jnp.float32,
                    precision=jax.lax.Precision.HIGHEST)
            for k in range(_NOPS)
        ]
        mu1, mu2, e11, e22, e12 = conv

        mu1_sq = mu1 * mu1
        mu2_sq = mu2 * mu2
        mu1_mu2 = mu1 * mu2
        sigma1_sq = e11 - mu1_sq
        sigma2_sq = e22 - mu2_sq
        sigma12 = e12 - mu1_mu2

        num = (2.0 * mu1_mu2 + C1) * (2.0 * sigma12 + C2)
        den = (mu1_sq + mu2_sq + C1) * (sigma1_sq + sigma2_sq + C2)
        # EUP reciprocal keeps the divide off the VALU slots.
        ssim_map = num * pl.reciprocal(den, approx=False)
        if valid is not None:
            ssim_map = jnp.where(valid, ssim_map, 0.0)
        acc = acc + jnp.sum(ssim_map, keepdims=True)

    sum_ref[...] = acc


def _round_up(x, m):
    return ((x + m - 1) // m) * m


def ssim(img1, img2, size_average=True):
    """Pallas SSIM forward. img1, img2: (B, C, H, W) float32."""
    B, C, H, W = img1.shape
    SW = W if W % 128 == 0 else _round_up(W, 128)   # lane-aligned slab width
    packed_w = _NOPS * C * SW

    gh = jnp.asarray(_banded_gaussian(H))      # (H, H)
    gw = jnp.asarray(_banded_gaussian(SW))     # (SW, SW); zero padded lanes keep
                                               # the "same"-padding semantics exact.

    kernel = functools.partial(_ssim_kernel, C=C, H=H, W=W, SW=SW)

    # Rough per-step VMEM footprint -> scoped limit; capped at 64 MiB so the
    # same code path stays legal on v7x (v5e/v6e could go higher).
    est = 4 * (2 * H * H + 2 * SW * SW          # double-buffered constants
               + 2 * 2 * C * H * W              # double-buffered image blocks
               + 4 * H * packed_w)              # scratch + live intermediates
    vmem_limit = int(min(max(2 * est, 32 << 20), 64 << 20))

    batch_sums = pl.pallas_call(
        kernel,
        out_shape=jax.ShapeDtypeStruct((B, 1, 1), jnp.float32),
        grid_spec=pltpu.PrefetchScalarGridSpec(
            num_scalar_prefetch=0,
            grid=(B,),
            in_specs=[
                # Constant factors: same block every step -> fetched once.
                pl.BlockSpec((H, H), lambda b: (0, 0)),
                pl.BlockSpec((SW, SW), lambda b: (0, 0)),
                # All channels of one batch element per grid step.
                pl.BlockSpec((None, C, H, W), lambda b: (b, 0, 0, 0)),
                pl.BlockSpec((None, C, H, W), lambda b: (b, 0, 0, 0)),
            ],
            out_specs=pl.BlockSpec((None, 1, 1), lambda b: (b, 0, 0)),
            scratch_shapes=[pltpu.VMEM((H, packed_w), jnp.float32)],
        ),
        compiler_params=pltpu.CompilerParams(
            dimension_semantics=("parallel",),
            vmem_limit_bytes=vmem_limit),
    )(gh, gw, img1, img2)

    sums = batch_sums[:, 0, 0]                 # (B,)
    if size_average:
        return jnp.sum(sums) / (B * C * H * W)
    # size_average=False: mean over C, H, W per batch element.
    return sums / (C * H * W)


def _ssim_map_reference(img1, img2):
    """Pure-JAX reference matching torch.nn.functional.conv2d semantics."""
    _, C, _, _ = img1.shape
    g = jnp.asarray(_gaussian_1d(WINDOW_SIZE, SIGMA))
    win2d = jnp.outer(g, g)
    window = jnp.broadcast_to(win2d, (C, 1, WINDOW_SIZE, WINDOW_SIZE))

    def conv(x):
        return jax.lax.conv_general_dilated(
            x, window, window_strides=(1, 1),
            padding=[(PAD, PAD), (PAD, PAD)],
            feature_group_count=C,
            dimension_numbers=("NCHW", "OIHW", "NCHW"),
            precision=jax.lax.Precision.HIGHEST)

    mu1, mu2 = conv(img1), conv(img2)
    mu1_sq, mu2_sq, mu1_mu2 = mu1 * mu1, mu2 * mu2, mu1 * mu2
    s1 = conv(img1 * img1) - mu1_sq
    s2 = conv(img2 * img2) - mu2_sq
    s12 = conv(img1 * img2) - mu1_mu2
    return ((2 * mu1_mu2 + C1) * (2 * s12 + C2)) / (
        (mu1_sq + mu2_sq + C1) * (s1 + s2 + C2))


if __name__ == "__main__":
    key = jax.random.PRNGKey(0)
    k1, k2 = jax.random.split(key)
    B, C, H, W = 2, 3, 16, 16
    img1 = jax.random.uniform(k1, (B, C, H, W), dtype=jnp.float32)
    img2 = jnp.clip(img1 + 0.1 * jax.random.normal(k2, (B, C, H, W),
                                                   dtype=jnp.float32), 0.0, 1.0)

    out = jax.block_until_ready(ssim(img1, img2, size_average=True))
    out_per_batch = jax.block_until_ready(ssim(img1, img2, size_average=False))

    ref_map = _ssim_map_reference(img1, img2)
    ref = jax.block_until_ready(jnp.mean(ref_map))
    ref_per_batch = jax.block_until_ready(jnp.mean(ref_map, axis=(1, 2, 3)))

    np.testing.assert_allclose(np.asarray(out), np.asarray(ref),
                               rtol=1e-4, atol=1e-4)
    np.testing.assert_allclose(np.asarray(out_per_batch),
                               np.asarray(ref_per_batch),
                               rtol=1e-4, atol=1e-4)
    print("KERNEL_OK")
</pallas_src>

<mosaic_0001>
module attributes {stable_mosaic.version = 11 : i64} {
  func.func @_ssim_kernel(%arg0: i32, %arg1: memref<16x16xf32, #tpu.memory_space<vmem>>, %arg2: memref<128x128xf32, #tpu.memory_space<vmem>>, %arg3: memref<1x3x16x16xf32, #tpu.memory_space<vmem>>, %arg4: memref<1x3x16x16xf32, #tpu.memory_space<vmem>>, %arg5: memref<1x1x1xf32, #tpu.memory_space<vmem>>, %arg6: memref<16x1920xf32, #tpu.memory_space<vmem>>) attributes {dimension_semantics = [#tpu.dimension_semantics<parallel>], iteration_bounds = array<i64: 2>, scalar_prefetch = 0 : i64, scratch_operands = 1 : i64, tpu.core_type = #tpu.core_type<tc>, window_params = [{pipeline_mode = #tpu.pipeline_mode<synchronous>, transform_indices = @transform_0, window_bounds = array<i64: 16, 16>}, {pipeline_mode = #tpu.pipeline_mode<synchronous>, transform_indices = @transform_1, window_bounds = array<i64: 128, 128>}, {transform_indices = @transform_2, window_bounds = array<i64: 1, 3, 16, 16>}, {transform_indices = @transform_3, window_bounds = array<i64: 1, 3, 16, 16>}, {transform_indices = @transform_4, window_bounds = array<i64: 1, 1, 1>}]} {
    %cst = arith.constant 0.000000e+00 : f32
    %0 = vector.broadcast %cst : f32 to vector<16x1920xf32>
    %c0 = arith.constant 0 : index
    %c0_0 = arith.constant 0 : index
    %1 = vector.load %arg6[%c0, %c0_0] : memref<16x1920xf32, #tpu.memory_space<vmem>>, vector<16x1920xf32>
    tpu.vector_store %arg6[%c0, %c0_0], %0 {strides = array<i32>} : memref<16x1920xf32, #tpu.memory_space<vmem>>, vector<16x1920xf32>,
    %c0_1 = arith.constant 0 : index
    %c0_2 = arith.constant 0 : index
    %c0_3 = arith.constant 0 : index
    %c0_4 = arith.constant 0 : index
    %2 = vector.load %arg3[%c0_1, %c0_2, %c0_3, %c0_4] : memref<1x3x16x16xf32, #tpu.memory_space<vmem>>, vector<1x1x16x16xf32>
    %3 = vector.shape_cast %2 : vector<1x1x16x16xf32> to vector<16x16xf32>
    %c0_5 = arith.constant 0 : index
    %c0_6 = arith.constant 0 : index
    %c0_7 = arith.constant 0 : index
    %c0_8 = arith.constant 0 : index
    %4 = vector.load %arg4[%c0_5, %c0_6, %c0_7, %c0_8] : memref<1x3x16x16xf32, #tpu.memory_space<vmem>>, vector<1x1x16x16xf32>
    %5 = vector.shape_cast %4 : vector<1x1x16x16xf32> to vector<16x16xf32>
    %c0_9 = arith.constant 0 : index
    %c0_10 = arith.constant 0 : index
    %6 = vector.load %arg6[%c0_9, %c0_10] : memref<16x1920xf32, #tpu.memory_space<vmem>>, vector<16x16xf32>
    tpu.vector_store %arg6[%c0_9, %c0_10], %3 {strides = array<i32>} : memref<16x1920xf32, #tpu.memory_space<vmem>>, vector<16x16xf32>,
    %c0_11 = arith.constant 0 : index
    %c128 = arith.constant 128 : index
    %7 = vector.load %arg6[%c0_11, %c128] : memref<16x1920xf32, #tpu.memory_space<vmem>>, vector<16x16xf32>
    tpu.vector_store %arg6[%c0_11, %c128], %5 {strides = array<i32>} : memref<16x1920xf32, #tpu.memory_space<vmem>>, vector<16x16xf32>,
    %8 = arith.mulf %3, %3 : vector<16x16xf32>
    %c0_12 = arith.constant 0 : index
    %c256 = arith.constant 256 : index
    %9 = vector.load %arg6[%c0_12, %c256] : memref<16x1920xf32, #tpu.memory_space<vmem>>, vector<16x16xf32>
    tpu.vector_store %arg6[%c0_12, %c256], %8 {strides = array<i32>} : memref<16x1920xf32, #tpu.memory_space<vmem>>, vector<16x16xf32>,
    %10 = arith.mulf %5, %5 : vector<16x16xf32>
    %c0_13 = arith.constant 0 : index
    %c384 = arith.constant 384 : index
    %11 = vector.load %arg6[%c0_13, %c384] : memref<16x1920xf32, #tpu.memory_space<vmem>>, vector<16x16xf32>
    tpu.vector_store %arg6[%c0_13, %c384], %10 {strides = array<i32>} : memref<16x1920xf32, #tpu.memory_space<vmem>>, vector<16x16xf32>,
    %12 = arith.mulf %3, %5 : vector<16x16xf32>
    %c0_14 = arith.constant 0 : index
    %c512 = arith.constant 512 : index
    %13 = vector.load %arg6[%c0_14, %c512] : memref<16x1920xf32, #tpu.memory_space<vmem>>, vector<16x16xf32>
    tpu.vector_store %arg6[%c0_14, %c512], %12 {strides = array<i32>} : memref<16x1920xf32, #tpu.memory_space<vmem>>, vector<16x16xf32>,
    %c0_15 = arith.constant 0 : index
    %c1 = arith.constant 1 : index
    %c0_16 = arith.constant 0 : index
    %c0_17 = arith.constant 0 : index
    %14 = vector.load %arg3[%c0_15, %c1, %c0_16, %c0_17] : memref<1x3x16x16xf32, #tpu.memory_space<vmem>>, vector<1x1x16x16xf32>
    %15 = vector.shape_cast %14 : vector<1x1x16x16xf32> to vector<16x16xf32>
    %c0_18 = arith.constant 0 : index
    %c1_19 = arith.constant 1 : index
    %c0_20 = arith.constant 0 : index
    %c0_21 = arith.constant 0 : index
    %16 = vector.load %arg4[%c0_18, %c1_19, %c0_20, %c0_21] : memref<1x3x16x16xf32, #tpu.memory_space<vmem>>, vector<1x1x16x16xf32>
    %17 = vector.shape_cast %16 : vector<1x1x16x16xf32> to vector<16x16xf32>
    %c0_22 = arith.constant 0 : index
    %c640 = arith.constant 640 : index
    %18 = vector.load %arg6[%c0_22, %c640] : memref<16x1920xf32, #tpu.memory_space<vmem>>, vector<16x16xf32>
    tpu.vector_store %arg6[%c0_22, %c640], %15 {strides = array<i32>} : memref<16x1920xf32, #tpu.memory_space<vmem>>, vector<16x16xf32>,
    %c0_23 = arith.constant 0 : index
    %c768 = arith.constant 768 : index
    %19 = vector.load %arg6[%c0_23, %c768] : memref<16x1920xf32, #tpu.memory_space<vmem>>, vector<16x16xf32>
    tpu.vector_store %arg6[%c0_23, %c768], %17 {strides = array<i32>} : memref<16x1920xf32, #tpu.memory_space<vmem>>, vector<16x16xf32>,
    %20 = arith.mulf %15, %15 : vector<16x16xf32>
    %c0_24 = arith.constant 0 : index
    %c896 = arith.constant 896 : index
    %21 = vector.load %arg6[%c0_24, %c896] : memref<16x1920xf32, #tpu.memory_space<vmem>>, vector<16x16xf32>
    tpu.vector_store %arg6[%c0_24, %c896], %20 {strides = array<i32>} : memref<16x1920xf32, #tpu.memory_space<vmem>>, vector<16x16xf32>,
    %22 = arith.mulf %17, %17 : vector<16x16xf32>
    %c0_25 = arith.constant 0 : index
    %c1024 = arith.constant 1024 : index
    %23 = vector.load %arg6[%c0_25, %c1024] : memref<16x1920xf32, #tpu.memory_space<vmem>>, vector<16x16xf32>
    tpu.vector_store %arg6[%c0_25, %c1024], %22 {strides = array<i32>} : memref<16x1920xf32, #tpu.memory_space<vmem>>, vector<16x16xf32>,
    %24 = arith.mulf %15, %17 : vector<16x16xf32>
    %c0_26 = arith.constant 0 : index
    %c1152 = arith.constant 1152 : index
    %25 = vector.load %arg6[%c0_26, %c1152] : memref<16x1920xf32, #tpu.memory_space<vmem>>, vector<16x16xf32>
    tpu.vector_store %arg6[%c0_26, %c1152], %24 {strides = array<i32>} : memref<16x1920xf32, #tpu.memory_space<vmem>>, vector<16x16xf32>,
    %c0_27 = arith.constant 0 : index
    %c2 = arith.constant 2 : index
    %c0_28 = arith.constant 0 : index
    %c0_29 = arith.constant 0 : index
    %26 = vector.load %arg3[%c0_27, %c2, %c0_28, %c0_29] : memref<1x3x16x16xf32, #tpu.memory_space<vmem>>, vector<1x1x16x16xf32>
    %27 = vector.shape_cast %26 : vector<1x1x16x16xf32> to vector<16x16xf32>
    %c0_30 = arith.constant 0 : index
    %c2_31 = arith.constant 2 : index
    %c0_32 = arith.constant 0 : index
    %c0_33 = arith.constant 0 : index
    %28 = vector.load %arg4[%c0_30, %c2_31, %c0_32, %c0_33] : memref<1x3x16x16xf32, #tpu.memory_space<vmem>>, vector<1x1x16x16xf32>
    %29 = vector.shape_cast %28 : vector<1x1x16x16xf32> to vector<16x16xf32>
    %c0_34 = arith.constant 0 : index
    %c1280 = arith.constant 1280 : index
    %30 = vector.load %arg6[%c0_34, %c1280] : memref<16x1920xf32, #tpu.memory_space<vmem>>, vector<16x16xf32>
    tpu.vector_store %arg6[%c0_34, %c1280], %27 {strides = array<i32>} : memref<16x1920xf32, #tpu.memory_space<vmem>>, vector<16x16xf32>,
    %c0_35 = arith.constant 0 : index
    %c1408 = arith.constant 1408 : index
    %31 = vector.load %arg6[%c0_35, %c1408] : memref<16x1920xf32, #tpu.memory_space<vmem>>, vector<16x16xf32>
    tpu.vector_store %arg6[%c0_35, %c1408], %29 {strides = array<i32>} : memref<16x1920xf32, #tpu.memory_space<vmem>>, vector<16x16xf32>,
    %32 = arith.mulf %27, %27 : vector<16x16xf32>
    %c0_36 = arith.constant 0 : index
    %c1536 = arith.constant 1536 : index
    %33 = vector.load %arg6[%c0_36, %c1536] : memref<16x1920xf32, #tpu.memory_space<vmem>>, vector<16x16xf32>
    tpu.vector_store %arg6[%c0_36, %c1536], %32 {strides = array<i32>} : memref<16x1920xf32, #tpu.memory_space<vmem>>, vector<16x16xf32>,
    %34 = arith.mulf %29, %29 : vector<16x16xf32>
    %c0_37 = arith.constant 0 : index
    %c1664 = arith.constant 1664 : index
    %35 = vector.load %arg6[%c0_37, %c1664] : memref<16x1920xf32, #tpu.memory_space<vmem>>, vector<16x16xf32>
    tpu.vector_store %arg6[%c0_37, %c1664], %34 {strides = array<i32>} : memref<16x1920xf32, #tpu.memory_space<vmem>>, vector<16x16xf32>,
    %36 = arith.mulf %27, %29 : vector<16x16xf32>
    %c0_38 = arith.constant 0 : index
    %c1792 = arith.constant 1792 : index
    %37 = vector.load %arg6[%c0_38, %c1792] : memref<16x1920xf32, #tpu.memory_space<vmem>>, vector<16x16xf32>
    tpu.vector_store %arg6[%c0_38, %c1792], %36 {strides = array<i32>} : memref<16x1920xf32, #tpu.memory_space<vmem>>, vector<16x16xf32>,
    %c0_39 = arith.constant 0 : index
    %c0_40 = arith.constant 0 : index
    %38 = vector.load %arg1[%c0_39, %c0_40] : memref<16x16xf32, #tpu.memory_space<vmem>>, vector<16x16xf32>
    %c0_41 = arith.constant 0 : index
    %c0_42 = arith.constant 0 : index
    %39 = vector.load %arg6[%c0_41, %c0_42] : memref<16x1920xf32, #tpu.memory_space<vmem>>, vector<16x1920xf32>
    %cst_43 = arith.constant dense<0.000000e+00> : vector<16x1920xf32>
    %40 = tpu.matmul %38, %39, %cst_43 {dimension_numbers = #tpu.dot_dimension_numbers<[1], [0], [0], [1], [0, 0, 1, 1], [], []>, precision = #tpu.contract_precision<fp32>} : vector<16x16xf32>, vector<16x1920xf32>, vector<16x1920xf32> -> vector<16x1920xf32>
    %c0_44 = arith.constant 0 : index
    %c0_45 = arith.constant 0 : index
    %41 = vector.load %arg2[%c0_44, %c0_45] : memref<128x128xf32, #tpu.memory_space<vmem>>, vector<128x128xf32>
    %42 = tpu.iota {dimensions = array<i32: 1>} : vector<16x128xi32>
    %c16_i32 = arith.constant 16 : i32
    %43 = vector.broadcast %c16_i32 : i32 to vector<16x128xi32>
    %44 = arith.cmpi slt, %42, %43 : vector<16x128xi32>
    %cst_46 = arith.constant 0.000000e+00 : f32
    %45 = vector.broadcast %cst_46 : f32 to vector<1x1xf32>
    %46 = vector.extract_strided_slice %40 {offsets = [0, 0], sizes = [16, 128], strides = [1, 1]} : vector<16x1920xf32> to vector<16x128xf32>
    %cst_47 = arith.constant dense<0.000000e+00> : vector<16x128xf32>
    %47 = tpu.matmul %46, %41, %cst_47 {dimension_numbers = #tpu.dot_dimension_numbers<[1], [0], [0], [1], [0, 0, 1, 1], [], []>, precision = #tpu.contract_precision<fp32>} : vector<16x128xf32>, vector<128x128xf32>, vector<16x128xf32> -> vector<16x128xf32>
    %48 = vector.extract_strided_slice %40 {offsets = [0, 128], sizes = [16, 128], strides = [1, 1]} : vector<16x1920xf32> to vector<16x128xf32>
    %cst_48 = arith.constant dense<0.000000e+00> : vector<16x128xf32>
    %49 = tpu.matmul %48, %41, %cst_48 {dimension_numbers = #tpu.dot_dimension_numbers<[1], [0], [0], [1], [0, 0, 1, 1], [], []>, precision = #tpu.contract_precision<fp32>} : vector<16x128xf32>, vector<128x128xf32>, vector<16x128xf32> -> vector<16x128xf32>
    %50 = vector.extract_strided_slice %40 {offsets = [0, 256], sizes = [16, 128], strides = [1, 1]} : vector<16x1920xf32> to vector<16x128xf32>
    %cst_49 = arith.constant dense<0.000000e+00> : vector<16x128xf32>
    %51 = tpu.matmul %50, %41, %cst_49 {dimension_numbers = #tpu.dot_dimension_numbers<[1], [0], [0], [1], [0, 0, 1, 1], [], []>, precision = #tpu.contract_precision<fp32>} : vector<16x128xf32>, vector<128x128xf32>, vector<16x128xf32> -> vector<16x128xf32>
    %52 = vector.extract_strided_slice %40 {offsets = [0, 384], sizes = [16, 128], strides = [1, 1]} : vector<16x1920xf32> to vector<16x128xf32>
    %cst_50 = arith.constant dense<0.000000e+00> : vector<16x128xf32>
    %53 = tpu.matmul %52, %41, %cst_50 {dimension_numbers = #tpu.dot_dimension_numbers<[1], [0], [0], [1], [0, 0, 1, 1], [], []>, precision = #tpu.contract_precision<fp32>} : vector<16x128xf32>, vector<128x128xf32>, vector<16x128xf32> -> vector<16x128xf32>
    %54 = vector.extract_strided_slice %40 {offsets = [0, 512], sizes = [16, 128], strides = [1, 1]} : vector<16x1920xf32> to vector<16x128xf32>
    %cst_51 = arith.constant dense<0.000000e+00> : vector<16x128xf32>
    %55 = tpu.matmul %54, %41, %cst_51 {dimension_numbers = #tpu.dot_dimension_numbers<[1], [0], [0], [1], [0, 0, 1, 1], [], []>, precision = #tpu.contract_precision<fp32>} : vector<16x128xf32>, vector<128x128xf32>, vector<16x128xf32> -> vector<16x128xf32>
    %56 = arith.mulf %47, %47 : vector<16x128xf32>
    %57 = arith.mulf %49, %49 : vector<16x128xf32>
    %58 = arith.mulf %47, %49 : vector<16x128xf32>
    %59 = arith.subf %51, %56 : vector<16x128xf32>
    %60 = arith.subf %53, %57 : vector<16x128xf32>
    %61 = arith.subf %55, %58 : vector<16x128xf32>
    %cst_52 = arith.constant 2.000000e+00 : f32
    %62 = vector.broadcast %cst_52 : f32 to vector<16x128xf32>
    %63 = arith.mulf %62, %58 : vector<16x128xf32>
    %cst_53 = arith.constant 9.99999974E-5 : f32
    %64 = vector.broadcast %cst_53 : f32 to vector<16x128xf32>
    %65 = arith.addf %63, %64 : vector<16x128xf32>
    %cst_54 = arith.constant 2.000000e+00 : f32
    %66 = vector.broadcast %cst_54 : f32 to vector<16x128xf32>
    %67 = arith.mulf %66, %61 : vector<16x128xf32>
    %cst_55 = arith.constant 8.99999984E-4 : f32
    %68 = vector.broadcast %cst_55 : f32 to vector<16x128xf32>
    %69 = arith.addf %67, %68 : vector<16x128xf32>
    %70 = arith.mulf %65, %69 : vector<16x128xf32>
    %71 = arith.addf %56, %57 : vector<16x128xf32>
    %cst_56 = arith.constant 9.99999974E-5 : f32
    %72 = vector.broadcast %cst_56 : f32 to vector<16x128xf32>
    %73 = arith.addf %71, %72 : vector<16x128xf32>
    %74 = arith.addf %59, %60 : vector<16x128xf32>
    %cst_57 = arith.constant 8.99999984E-4 : f32
    %75 = vector.broadcast %cst_57 : f32 to vector<16x128xf32>
    %76 = arith.addf %74, %75 : vector<16x128xf32>
    %77 = arith.mulf %73, %76 : vector<16x128xf32>
    %78 = tpu.reciprocal %77 : vector<16x128xf32> -> vector<16x128xf32>
    %79 = arith.mulf %70, %78 : vector<16x128xf32>
    %cst_58 = arith.constant 0.000000e+00 : f32
    %80 = vector.broadcast %cst_58 : f32 to vector<16x128xf32>
    %81 = arith.select %44, %79, %80 : vector<16x128xi1>, vector<16x128xf32>
    %82 = vector.shape_cast %81 : vector<16x128xf32> to vector<1x16x128xf32>
    %cst_59 = arith.constant dense<0.000000e+00> : vector<1xf32>
    %83 = vector.multi_reduction <add>, %82, %cst_59 [1, 2] : vector<1x16x128xf32> to vector<1xf32>
    %84 = vector.shape_cast %83 : vector<1xf32> to vector<1x1x1xf32>
    %85 = vector.extract %84[0, 0, 0] : f32 from vector<1x1x1xf32>
    %86 = vector.broadcast %85 : f32 to vector<1x1xf32>
    %87 = arith.addf %45, %86 : vector<1x1xf32>
    %88 = vector.extract_strided_slice %40 {offsets = [0, 640], sizes = [16, 128], strides = [1, 1]} : vector<16x1920xf32> to vector<16x128xf32>
    %cst_60 = arith.constant dense<0.000000e+00> : vector<16x128xf32>
    %89 = tpu.matmul %88, %41, %cst_60 {dimension_numbers = #tpu.dot_dimension_numbers<[1], [0], [0], [1], [0, 0, 1, 1], [], []>, precision = #tpu.contract_precision<fp32>} : vector<16x128xf32>, vector<128x128xf32>, vector<16x128xf32> -> vector<16x128xf32>
    %90 = vector.extract_strided_slice %40 {offsets = [0, 768], sizes = [16, 128], strides = [1, 1]} : vector<16x1920xf32> to vector<16x128xf32>
    %cst_61 = arith.constant dense<0.000000e+00> : vector<16x128xf32>
    %91 = tpu.matmul %90, %41, %cst_61 {dimension_numbers = #tpu.dot_dimension_numbers<[1], [0], [0], [1], [0, 0, 1, 1], [], []>, precision = #tpu.contract_precision<fp32>} : vector<16x128xf32>, vector<128x128xf32>, vector<16x128xf32> -> vector<16x128xf32>
    %92 = vector.extract_strided_slice %40 {offsets = [0, 896], sizes = [16, 128], strides = [1, 1]} : vector<16x1920xf32> to vector<16x128xf32>
    %cst_62 = arith.constant dense<0.000000e+00> : vector<16x128xf32>
    %93 = tpu.matmul %92, %41, %cst_62 {dimension_numbers = #tpu.dot_dimension_numbers<[1], [0], [0], [1], [0, 0, 1, 1], [], []>, precision = #tpu.contract_precision<fp32>} : vector<16x128xf32>, vector<128x128xf32>, vector<16x128xf32> -> vector<16x128xf32>
    %94 = vector.extract_strided_slice %40 {offsets = [0, 1024], sizes = [16, 128], strides = [1, 1]} : vector<16x1920xf32> to vector<16x128xf32>
    %cst_63 = arith.constant dense<0.000000e+00> : vector<16x128xf32>
    %95 = tpu.matmul %94, %41, %cst_63 {dimension_numbers = #tpu.dot_dimension_numbers<[1], [0], [0], [1], [0, 0, 1, 1], [], []>, precision = #tpu.contract_precision<fp32>} : vector<16x128xf32>, vector<128x128xf32>, vector<16x128xf32> -> vector<16x128xf32>
    %96 = vector.extract_strided_slice %40 {offsets = [0, 1152], sizes = [16, 128], strides = [1, 1]} : vector<16x1920xf32> to vector<16x128xf32>
    %cst_64 = arith.constant dense<0.000000e+00> : vector<16x128xf32>
    %97 = tpu.matmul %96, %41, %cst_64 {dimension_numbers = #tpu.dot_dimension_numbers<[1], [0], [0], [1], [0, 0, 1, 1], [], []>, precision = #tpu.contract_precision<fp32>} : vector<16x128xf32>, vector<128x128xf32>, vector<16x128xf32> -> vector<16x128xf32>
    %98 = arith.mulf %89, %89 : vector<16x128xf32>
    %99 = arith.mulf %91, %91 : vector<16x128xf32>
    %100 = arith.mulf %89, %91 : vector<16x128xf32>
    %101 = arith.subf %93, %98 : vector<16x128xf32>
    %102 = arith.subf %95, %99 : vector<16x128xf32>
    %103 = arith.subf %97, %100 : vector<16x128xf32>
    %cst_65 = arith.constant 2.000000e+00 : f32
    %104 = vector.broadcast %cst_65 : f32 to vector<16x128xf32>
    %105 = arith.mulf %104, %100 : vector<16x128xf32>
    %cst_66 = arith.constant 9.99999974E-5 : f32
    %106 = vector.broadcast %cst_66 : f32 to vector<16x128xf32>
    %107 = arith.addf %105, %106 : vector<16x128xf32>
    %cst_67 = arith.constant 2.000000e+00 : f32
    %108 = vector.broadcast %cst_67 : f32 to vector<16x128xf32>
    %109 = arith.mulf %108, %103 : vector<16x128xf32>
    %cst_68 = arith.constant 8.99999984E-4 : f32
    %110 = vector.broadcast %cst_68 : f32 to vector<16x128xf32>
    %111 = arith.addf %109, %110 : vector<16x128xf32>
    %112 = arith.mulf %107, %111 : vector<16x128xf32>
    %113 = arith.addf %98, %99 : vector<16x128xf32>
    %cst_69 = arith.constant 9.99999974E-5 : f32
    %114 = vector.broadcast %cst_69 : f32 to vector<16x128xf32>
    %115 = arith.addf %113, %114 : vector<16x128xf32>
    %116 = arith.addf %101, %102 : vector<16x128xf32>
    %cst_70 = arith.constant 8.99999984E-4 : f32
    %117 = vector.broadcast %cst_70 : f32 to vector<16x128xf32>
    %118 = arith.addf %116, %117 : vector<16x128xf32>
    %119 = arith.mulf %115, %118 : vector<16x128xf32>
    %120 = tpu.reciprocal %119 : vector<16x128xf32> -> vector<16x128xf32>
    %121 = arith.mulf %112, %120 : vector<16x128xf32>
    %cst_71 = arith.constant 0.000000e+00 : f32
    %122 = vector.broadcast %cst_71 : f32 to vector<16x128xf32>
    %123 = arith.select %44, %121, %122 : vector<16x128xi1>, vector<16x128xf32>
    %124 = vector.shape_cast %123 : vector<16x128xf32> to vector<1x16x128xf32>
    %cst_72 = arith.constant dense<0.000000e+00> : vector<1xf32>
    %125 = vector.multi_reduction <add>, %124, %cst_72 [1, 2] : vector<1x16x128xf32> to vector<1xf32>
    %126 = vector.shape_cast %125 : vector<1xf32> to vector<1x1x1xf32>
    %127 = vector.extract %126[0, 0, 0] : f32 from vector<1x1x1xf32>
    %128 = vector.broadcast %127 : f32 to vector<1x1xf32>
    %129 = arith.addf %87, %128 : vector<1x1xf32>
    %130 = vector.extract_strided_slice %40 {offsets = [0, 1280], sizes = [16, 128], strides = [1, 1]} : vector<16x1920xf32> to vector<16x128xf32>
    %cst_73 = arith.constant dense<0.000000e+00> : vector<16x128xf32>
    %131 = tpu.matmul %130, %41, %cst_73 {dimension_numbers = #tpu.dot_dimension_numbers<[1], [0], [0], [1], [0, 0, 1, 1], [], []>, precision = #tpu.contract_precision<fp32>} : vector<16x128xf32>, vector<128x128xf32>, vector<16x128xf32> -> vector<16x128xf32>
    %132 = vector.extract_strided_slice %40 {offsets = [0, 1408], sizes = [16, 128], strides = [1, 1]} : vector<16x1920xf32> to vector<16x128xf32>
    %cst_74 = arith.constant dense<0.000000e+00> : vector<16x128xf32>
    %133 = tpu.matmul %132, %41, %cst_74 {dimension_numbers = #tpu.dot_dimension_numbers<[1], [0], [0], [1], [0, 0, 1, 1], [], []>, precision = #tpu.contract_precision<fp32>} : vector<16x128xf32>, vector<128x128xf32>, vector<16x128xf32> -> vector<16x128xf32>
    %134 = vector.extract_strided_slice %40 {offsets = [0, 1536], sizes = [16, 128], strides = [1, 1]} : vector<16x1920xf32> to vector<16x128xf32>
    %cst_75 = arith.constant dense<0.000000e+00> : vector<16x128xf32>
    %135 = tpu.matmul %134, %41, %cst_75 {dimension_numbers = #tpu.dot_dimension_numbers<[1], [0], [0], [1], [0, 0, 1, 1], [], []>, precision = #tpu.contract_precision<fp32>} : vector<16x128xf32>, vector<128x128xf32>, vector<16x128xf32> -> vector<16x128xf32>
    %136 = vector.extract_strided_slice %40 {offsets = [0, 1664], sizes = [16, 128], strides = [1, 1]} : vector<16x1920xf32> to vector<16x128xf32>
    %cst_76 = arith.constant dense<0.000000e+00> : vector<16x128xf32>
    %137 = tpu.matmul %136, %41, %cst_76 {dimension_numbers = #tpu.dot_dimension_numbers<[1], [0], [0], [1], [0, 0, 1, 1], [], []>, precision = #tpu.contract_precision<fp32>} : vector<16x128xf32>, vector<128x128xf32>, vector<16x128xf32> -> vector<16x128xf32>
    %138 = vector.extract_strided_slice %40 {offsets = [0, 1792], sizes = [16, 128], strides = [1, 1]} : vector<16x1920xf32> to vector<16x128xf32>
    %cst_77 = arith.constant dense<0.000000e+00> : vector<16x128xf32>
    %139 = tpu.matmul %138, %41, %cst_77 {dimension_numbers = #tpu.dot_dimension_numbers<[1], [0], [0], [1], [0, 0, 1, 1], [], []>, precision = #tpu.contract_precision<fp32>} : vector<16x128xf32>, vector<128x128xf32>, vector<16x128xf32> -> vector<16x128xf32>
    %140 = arith.mulf %131, %131 : vector<16x128xf32>
    %141 = arith.mulf %133, %133 : vector<16x128xf32>
    %142 = arith.mulf %131, %133 : vector<16x128xf32>
    %143 = arith.subf %135, %140 : vector<16x128xf32>
    %144 = arith.subf %137, %141 : vector<16x128xf32>
    %145 = arith.subf %139, %142 : vector<16x128xf32>
    %cst_78 = arith.constant 2.000000e+00 : f32
    %146 = vector.broadcast %cst_78 : f32 to vector<16x128xf32>
    %147 = arith.mulf %146, %142 : vector<16x128xf32>
    %cst_79 = arith.constant 9.99999974E-5 : f32
    %148 = vector.broadcast %cst_79 : f32 to vector<16x128xf32>
    %149 = arith.addf %147, %148 : vector<16x128xf32>
    %cst_80 = arith.constant 2.000000e+00 : f32
    %150 = vector.broadcast %cst_80 : f32 to vector<16x128xf32>
    %151 = arith.mulf %150, %145 : vector<16x128xf32>
    %cst_81 = arith.constant 8.99999984E-4 : f32
    %152 = vector.broadcast %cst_81 : f32 to vector<16x128xf32>
    %153 = arith.addf %151, %152 : vector<16x128xf32>
    %154 = arith.mulf %149, %153 : vector<16x128xf32>
    %155 = arith.addf %140, %141 : vector<16x128xf32>
    %cst_82 = arith.constant 9.99999974E-5 : f32
    %156 = vector.broadcast %cst_82 : f32 to vector<16x128xf32>
    %157 = arith.addf %155, %156 : vector<16x128xf32>
    %158 = arith.addf %143, %144 : vector<16x128xf32>
    %cst_83 = arith.constant 8.99999984E-4 : f32
    %159 = vector.broadcast %cst_83 : f32 to vector<16x128xf32>
    %160 = arith.addf %158, %159 : vector<16x128xf32>
    %161 = arith.mulf %157, %160 : vector<16x128xf32>
    %162 = tpu.reciprocal %161 : vector<16x128xf32> -> vector<16x128xf32>
    %163 = arith.mulf %154, %162 : vector<16x128xf32>
    %cst_84 = arith.constant 0.000000e+00 : f32
    %164 = vector.broadcast %cst_84 : f32 to vector<16x128xf32>
    %165 = arith.select %44, %163, %164 : vector<16x128xi1>, vector<16x128xf32>
    %166 = vector.shape_cast %165 : vector<16x128xf32> to vector<1x16x128xf32>
    %cst_85 = arith.constant dense<0.000000e+00> : vector<1xf32>
    %167 = vector.multi_reduction <add>, %166, %cst_85 [1, 2] : vector<1x16x128xf32> to vector<1xf32>
    %168 = vector.shape_cast %167 : vector<1xf32> to vector<1x1x1xf32>
    %169 = vector.extract %168[0, 0, 0] : f32 from vector<1x1x1xf32>
    %170 = vector.broadcast %169 : f32 to vector<1x1xf32>
    %171 = arith.addf %129, %170 : vector<1x1xf32>
    %c0_86 = arith.constant 0 : index
    %c0_87 = arith.constant 0 : index
    %c0_88 = arith.constant 0 : index
    %172 = vector.load %arg5[%c0_86, %c0_87, %c0_88] : memref<1x1x1xf32, #tpu.memory_space<vmem>>, vector<1x1x1xf32>
    %173 = vector.shape_cast %172 : vector<1x1x1xf32> to vector<1x1xf32>
    %174 = vector.shape_cast %171 : vector<1x1xf32> to vector<1x1x1xf32>
    tpu.vector_store %arg5[%c0_86, %c0_87, %c0_88], %174 {strides = array<i32>} : memref<1x1x1xf32, #tpu.memory_space<vmem>>, vector<1x1x1xf32>,
    return
  }
  func.func @transform_0(%arg0: i32) -> (i32, i32) {
    %c0_i32 = arith.constant 0 : i32
    %c0_i32_0 = arith.constant 0 : i32
    %c0_i32_1 = arith.constant 0 : i32
    return %c0_i32, %c0_i32_0 : i32, i32
  }
  func.func @transform_1(%arg0: i32) -> (i32, i32) {
    %c0_i32 = arith.constant 0 : i32
    %c0_i32_0 = arith.constant 0 : i32
    %c0_i32_1 = arith.constant 0 : i32
    return %c0_i32, %c0_i32_0 : i32, i32
  }
  func.func @transform_2(%arg0: i32) -> (i32, i32, i32, i32) {
    %c0_i32 = arith.constant 0 : i32
    %c0_i32_0 = arith.constant 0 : i32
    %c0_i32_1 = arith.constant 0 : i32
    %c0_i32_2 = arith.constant 0 : i32
    return %arg0, %c0_i32, %c0_i32_0, %c0_i32_1 : i32, i32, i32, i32
  }
  func.func @transform_3(%arg0: i32) -> (i32, i32, i32, i32) {
    %c0_i32 = arith.constant 0 : i32
    %c0_i32_0 = arith.constant 0 : i32
    %c0_i32_1 = arith.constant 0 : i32
    %c0_i32_2 = arith.constant 0 : i32
    return %arg0, %c0_i32, %c0_i32_0, %c0_i32_1 : i32, i32, i32, i32
  }
  func.func @transform_4(%arg0: i32) -> (i32, i32, i32) {
    %c0_i32 = arith.constant 0 : i32
    %c0_i32_0 = arith.constant 0 : i32
    %c0_i32_1 = arith.constant 0 : i32
    return %arg0, %c0_i32, %c0_i32_0 : i32, i32, i32
  }
}

</mosaic_0001>

<bundles_post_ra>
// kernel: tpu_custom_call.1
= control target key start
LH: loop header
LB: loop body
LE: loop exit
PB: predicated region body
PF: predicated region fallthrough
CT: control target
= control target key end

     0   :  { %9 = vsyncpa [#allocation4], 0  ;;  %s25379_s0 = inlined_call_operand.hbm [shape: f32[16,16], index: 0, kind: input, shape index: {}]   ;;  %s25380_s1 = inlined_call_operand.hbm [shape: f32[128,128], index: 1, kind: input, shape index: {}]   ;;  %s25381_s2 = inlined_call_operand.hbm [shape: f32[2,3,16,16], index: 2, kind: input, shape index: {}]   ;;  %s25382_s3 = inlined_call_operand.hbm [shape: f32[2,3,16,16], index: 3, kind: input, shape index: {}]   ;;  %s25383_s4 = inlined_call_operand.vmem [shape: f32[2,1,1], index: 4, kind: output, shape index: {}]  }
   0x1   :  { %10 = vsyncpa [#allocation6], 0  ;;  %s20353_s15 = smov 0   ;;  %s20355_s16 = smov 0  }
   0x2   :  { %s20357_s17 = smov 0   ;;  %s20359_s18 = smov 0  }
   0x3 LB: > { %s20372_s19 = sadd.s32 4294967295, %s20319_s18   ;;  %s20375_s20 = sadd.s32 1, %s20319_s18   ;;  %s20319_s18 = sphi %s20359_s18, %s26191_s18   ;;  %s20315_s17 = sphi %s20357_s17, %s26190_s17   ;;  %s20311_s16 = sphi %s20355_s16, %s26189_s16   ;;  %s20307_s15 = sphi %s20353_s15, %s26188_s15  }
   0x4   : > { %s62_s21 = ssub.s32 %s20319_s18, %s20375_s20  ;;  %s65_s22 = sadd.s32 1, %s20315_s17 }
   0x5   : > { %p63_p0 = scmp.eq.s32.totalorder %s62_s21, 0  ;;  %p72_p1 = scmp.ne.s32.totalorder %s20315_s17, %s20311_s16 }
   0x6   : > { %p73_p2 = scmp.eq.s32.totalorder %s20319_s18, 0  ;;  %p78_p3 = scmp.ne.s32.totalorder %s20311_s16, %s20307_s15 }
   0x7   : > { %s20385_s23 = scalar_select %p63_p0, %s20315_s17, %s65_s22  }
   0x8   : > { %p20387_p4 = por %p73_p2, %p72_p1  ;;  %p25384_p5 = scmp.eq.s32.totalorder %s20372_s19, 0 }
   0x9   : > { %p15223_p6 = scmp.ge.s32.totalorder %s20319_s18, 1  ;;  %p141_p7 = scmp.lt.s32.totalorder %s20319_s18, 3 }
   0xa   : > { %p20396_p8 = por %p25384_p5, %p78_p3  ;;  %s20321_s27 = smov [#allocation3]  }
   0xb   : > { %p20400_p9 = pnand %p15223_p6, %p141_p7  ;;  %s153_s28 = sshll.u32 %s20321_s27, 4  ;;  %s154_s28 = int_to_ptr.vmem [resolvable:$true] %s153_s28 }
   0xc   : > { %s25688_s25 = scalar_select %p20396_p8, 1, 0 }
   0xd   : > { %s25689_s26 = scalar_select %p20400_p9, 1, 0 }
   0xe   : > { %p20101_p10 = pneg %p20400_p9  ;;  %p20117_p12 = scmp.lt.s32.totalorder %s20319_s18, 2 }
   0xf   : > { %s180_s30 = sand.u32 1, %s20319_s18   ;;  %s182_s5 = sand.u32 1, %s20315_s17  }
  0x10   : > { %p20408_p11 = pnand %p20101_p10, %p25384_p5  ;;  %p20417_p13 = pnand %p20117_p12, %p20387_p4 }
  0x11   : > { %s20180_s7 = scalar_lea.vmem %s154_s28, 256  ;;  %p20188_p6 = scmp.lt.s32.totalorder %s154_s28, %s154_s28 }
  0x12   : > { %p25385_p0 = pneg %p20408_p11  ;;  %p20181_p1 = scmp.ne.s32.totalorder %s154_s28, %s20180_s7 }
  0x13   : > { %p20189_p7 = scmp.lt.s32.totalorder %s20180_s7, %s20180_s7 }
  0x14   : > { %p20183_p2 = pnand %p20181_p1, %p25385_p0 }
  0x15   : > { %p20190_p10 = por %p20189_p7, %p20188_p6 }
  0x16   : > { %p20184_p3 = pneg %p20183_p2 }
  0x18   : > { %p20191_p5 = pnand %p20190_p10, %p20184_p3 }
  0x1a   : > { %20194 = shalt.err (!%p20191_p5)
}
  0x1b   : > { %s20322_s8 = smov 128   ;;  %s20323_s9 = smov 8  }
  0x1c   : > { %20104 = dma.hbm_to_vmem [thread:$0]  (!%p20408_p11), %s25379_s0, 256, %s154_s28, [#allocation4], %s20322_s8, %s20322_s8, %s20323_s9  }
  0x1d   : > { %s20434_s12 = smul.u32 48, %s182_s5  ;;  %s20324_s14 = smov [#allocation5]  }
  0x1e   : > { %s20079_s13 = smul.u32 768, %s20319_s18  ;;  %s166_s15 = sshll.u32 %s20324_s14, 4  ;;  %s20437_s15 = int_to_ptr.vmem [resolvable:$true] %s166_s15 }
  0x1f   : > { %s184_s27 = scalar_lea.vmem [#allocation7], %s20434_s12  ;;  %s20449_s28 = scalar_lea.sflag [#allocation4], %s180_s30 }
  0x20   : > { %s20444_s24 = scalar_lea.hbm %s25381_s2, %s20079_s13  ;;  %s191_s7 = sshll.u32 %s184_s27, 4  ;;  %s20447_s7 = int_to_ptr.vmem [resolvable:$true] %s191_s7 }
  0x21   : > { %s20195_s5 = scalar_lea.hbm %s20444_s24, 768  ;;  %p20197_p5 = pneg %p20417_p13 }
  0x22   : > { %p20196_p4 = scmp.ne.s32.totalorder %s20444_s24, %s20195_s5  ;;  %s20200_s14 = scalar_lea.hbm %s25381_s2, 1536 }
  0x23   : > { %p20201_p2 = scmp.lt.s32.totalorder %s20444_s24, %s25381_s2  ;;  %p20202_p3 = scmp.lt.s32.totalorder %s20200_s14, %s20195_s5 }
  0x24   : > { %p20198_p12 = pnand %p20197_p5, %p20196_p4 }
  0x25   : > { %p20203_p6 = por %p20202_p3, %p20201_p2 }
  0x26   : > { %p20199_p1 = pneg %p20198_p12 }
  0x28   : > { %p20204_p7 = pnand %p20203_p6, %p20199_p1 }
  0x2a   : > { %20207 = shalt.err (!%p20204_p7)
}
  0x2b   : > { %s20208_s30 = scalar_lea.vmem %s20447_s7, 768  ;;  %s20325_s27 = smov [#allocation7]  }
  0x2c   : > { %p20209_p10 = scmp.ne.s32.totalorder %s20447_s7, %s20208_s30  ;;  %s20213_s10 = sshll.u32 %s20325_s27, 4  ;;  %s20214_s10 = int_to_ptr.vmem [resolvable:$false] %s20213_s10 }
  0x2d   : > { %s20215_s11 = scalar_lea.vmem %s20214_s10, 1536  ;;  %p20216_p0 = scmp.lt.s32.totalorder %s20447_s7, %s20214_s10 }
  0x2e   : > { %p20211_p4 = pnand %p20209_p10, %p20197_p5  ;;  %p20217_p8 = scmp.lt.s32.totalorder %s20215_s11, %s20208_s30 }
  0x30   : > { %p20212_p12 = pneg %p20211_p4  ;;  %p20218_p9 = por %p20217_p8, %p20216_p0 }
  0x32   : > { %p20219_p2 = pnand %p20218_p9, %p20212_p12 }
  0x34   : > { %20222 = shalt.err (!%p20219_p2)
}
  0x35   : > { %20111 = dma.hbm_to_vmem [thread:$0]  (!%p20417_p13), %s20444_s24, 768, %s20447_s7, %s20449_s28, %s20322_s8, %s20322_s8, %s20323_s9  }
  0x36   : > { %s20234_s5 = scalar_lea.vmem %s20437_s15, 2048  ;;  %p25692_p3 = pneg %p20408_p11 }
  0x37   : > { %p20235_p1 = scmp.ne.s32.totalorder %s20437_s15, %s20234_s5  ;;  %p20242_p0 = scmp.lt.s32.totalorder %s20437_s15, %s20437_s15 }
  0x38   : > { %p20243_p6 = scmp.lt.s32.totalorder %s20234_s5, %s20234_s5 }
  0x39   : > { %p20237_p8 = pnand %p20235_p1, %p25692_p3 }
  0x3a   : > { %p20244_p7 = por %p20243_p6, %p20242_p0 }
  0x3b   : > { %p20238_p9 = pneg %p20237_p8 }
  0x3d   : > { %p20245_p10 = pnand %p20244_p7, %p20238_p9 }
  0x3f   : > { %20248 = shalt.err (!%p20245_p10)
}
  0x40   : > { %20107 = dma.hbm_to_vmem [thread:$0]  (!%p20408_p11), %s25380_s1, 2048, %s20437_s15, [#allocation6], %s20322_s8, %s20322_s8, %s20323_s9  }
  0x41   : > { %s20500_s22 = scalar_lea.hbm %s25382_s3, %s20079_s13  ;;  %s205_s29 = scalar_lea.vmem [#allocation8], %s20434_s12 }
  0x42   : > { %s212_s30 = sshll.u32 %s205_s29, 4  ;;  %s20249_s27 = scalar_lea.hbm %s20500_s22, 768  ;;  %s213_s30 = int_to_ptr.vmem [resolvable:$true] %s212_s30 }
  0x43   : > { %p20250_p4 = scmp.ne.s32.totalorder %s20500_s22, %s20249_s27  ;;  %s20254_s18 = scalar_lea.hbm %s25382_s3, 1536 }
  0x44   : > { %p20255_p11 = scmp.lt.s32.totalorder %s20500_s22, %s25382_s3  ;;  %p20256_p1 = scmp.lt.s32.totalorder %s20254_s18, %s20249_s27 }
  0x45   : > { %p20252_p12 = pnand %p20250_p4, %p20197_p5 }
  0x46   : > { %p20257_p3 = por %p20256_p1, %p20255_p11 }
  0x47   : > { %p20253_p2 = pneg %p20252_p12 }
  0x49   : > { %p20258_p8 = pnand %p20257_p3, %p20253_p2 }
  0x4b   : > { %20261 = shalt.err (!%p20258_p8)
}
  0x4c   : > { %s20262_s12 = scalar_lea.vmem %s213_s30, 768  ;;  %s20326_s13 = smov [#allocation8]  }
  0x4d   : > { %p20263_p9 = scmp.ne.s32.totalorder %s213_s30, %s20262_s12  ;;  %s20267_s14 = sshll.u32 %s20326_s13, 4  ;;  %s20268_s14 = int_to_ptr.vmem [resolvable:$false] %s20267_s14 }
  0x4e   : > { %s20269_s24 = scalar_lea.vmem %s20268_s14, 1536  ;;  %p20270_p7 = scmp.lt.s32.totalorder %s213_s30, %s20268_s14 }
  0x4f   : > { %p20265_p0 = pnand %p20263_p9, %p20197_p5  ;;  %p20271_p10 = scmp.lt.s32.totalorder %s20269_s24, %s20262_s12 }
  0x51   : > { %p20266_p6 = pneg %p20265_p0  ;;  %p20272_p4 = por %p20271_p10, %p20270_p7 }
  0x53   : > { %p20273_p12 = pnand %p20272_p4, %p20266_p6 }
  0x55   : > { %20276 = shalt.err (!%p20273_p12)
}
  0x56   : > { %20114 = dma.hbm_to_vmem [thread:$0]  (!%p20417_p13), %s20500_s22, 768, %s213_s30, %s20449_s28, %s20322_s8, %s20322_s8, %s20323_s9  }
  0x57   : > { %p25693_p5 = scmp.ne.s32.totalorder %s25689_s26, 0 }
  0x59   : > { %224 = sbr.rel (%p25693_p5) target bundleno = 2279 (0x8e7), region = 36 }
  0x5e   : > { %p25694_p2 = scmp.eq.s32.totalorder %s20372_s19, 0 }
  0x60   : > { %20294 = dma.done.wait (%p25694_p2), [#allocation4], 256   ;;  %p25695_p11 = pmov %p25694_p2 }
  0x61   : > { %p25696_p1 = pmov %p25694_p2 }
  0x62   : > { %20296 = vsyncadd (%p25695_p11), [#allocation4], 4294967040 }
  0x63   : > { %20298 = dma.done.wait (%p25696_p1), [#allocation6], 2048   ;;  %p25697_p3 = pmov %p25696_p1 }
  0x64   : > { %s234_s6 = sand.u32 1, %s20372_s19   ;;  %s236_s8 = sand.u32 1, %s20311_s16  }
  0x65   : > { %20300 = vsyncadd (%p25697_p3), [#allocation6], 4294965248  ;;  %s20537_s9 = smul.u32 48, %s236_s8  ;;  %s235_s26 = scalar_lea.sflag [#allocation4], %s234_s6 }
  0x66   : > { %p25698_p13 = scmp.ne.s32.totalorder %s25688_s25, 0 }
  0x67   : > { %s20540_s28 = scalar_lea.vmem [#allocation7], %s20537_s9 }
  0x68   : > { %20302 = dma.done.wait (%p25698_p13), %s235_s26, 1536  }
  0x69   : > { %20304 = vsyncadd (%p25698_p13), %s235_s26, 4294965760  ;;  %v20327_v0 = vmov 0.0   ;;  %vm312_vm0 = vcmask 130048   ;;  %s20579_s25 = scalar_lea.vmem [#allocation8], %s20537_s9  ;;  %v309_v2 = vld [vmem:[%s20540_s28 + $0x8] sm:$0xff]  ;;  %v308_v8 = vld [vmem:[%s20540_s28] sm:$0xff] }
  0x6a   : > { %294 = vst [vmem:[#allocation2 + $0x80] sm:$0xff] %v20327_v0  ;;  %278 = vst [vmem:[#allocation2] sm:$0xff] %v20327_v0  ;;  %479 = vmatprep.mubr.f32.mxu0 %v20327_v0  ;;  %586 = vmatprep.mubr.f32.mxu1 %v20327_v0  ;;  %v311_v1 = vld [vmem:[%s20579_s25 + $0x8] sm:$0xff]  ;;  %v310_v3 = vld [vmem:[%s20579_s25] sm:$0xff]  ;;  %v318_v5 = vmul.f32 %v309_v2, %v309_v2  ;;  %v317_v11 = vmul.f32 %v308_v8, %v308_v8  ;;  %p275_p8 = scmp.lt.s32.totalorder %s20372_s19, 1  ;;  %vm15122_vm2 = vcmask 0  }
  0x6b   : > { %279 = vst [vmem:[#allocation2 + $0x8] sm:$0xff] %v20327_v0  ;;  %280 = vst [vmem:[#allocation2 + $0x10] sm:$0xff] %v20327_v0  ;;  %v322_v4 = vmul.f32 %v311_v1, %v311_v1  ;;  %v326_v6 = vmul.f32 %v311_v1, %v309_v2  ;;  %v321_v7 = vmul.f32 %v310_v3, %v310_v3  ;;  %v373_v9 = vld [vmem:[#allocation3] sm:$0xff]  ;;  %v374_v10 = vld [vmem:[#allocation3 + $0x8] sm:$0xff] }
  0x6c   : > { %281 = vst [vmem:[#allocation2 + $0x18] sm:$0xff] %v20327_v0  ;;  %282 = vst [vmem:[#allocation2 + $0x20] sm:$0xff] %v20327_v0  ;;  %v325_v12 = vmul.f32 %v310_v3, %v308_v8  ;;  %v406_v13 = vsel %vm312_vm0, %v373_v9, 0  ;;  %v409_v14 = vsel %vm312_vm0, %v374_v10, 0  ;;  %v15233_v15 = vld [vmem:[%s20540_s28 + $0x18] sm:$0xff]  ;;  %v15232_v16 = vld [vmem:[%s20540_s28 + $0x10] sm:$0xff] }
  0x6d   : > { %283 = vst [vmem:[#allocation2 + $0x28] sm:$0xff] %v20327_v0  ;;  %284 = vst [vmem:[#allocation2 + $0x30] sm:$0xff] %v20327_v0  ;;  %v15235_v17 = vld [vmem:[%s20579_s25 + $0x18] sm:$0xff]  ;;  %v20598_v18 = vand.u32 4294901760, %v406_v13  ;;  %v20600_v19 = vand.u32 4294901760, %v409_v14  ;;  %v340_v20 = vmul.f32 %v15233_v15, %v15233_v15  ;;  %v339_v21 = vmul.f32 %v15232_v16, %v15232_v16  ;;  %v15234_v22 = vld [vmem:[%s20579_s25 + $0x10] sm:$0xff] }
  0x6e   : > { %285 = vst [vmem:[#allocation2 + $0x38] sm:$0xff] %v20327_v0  ;;  %286 = vst [vmem:[#allocation2 + $0x40] sm:$0xff] %v20327_v0  ;;  %v15239_v23 = vld [vmem:[%s20579_s25 + $0x28] sm:$0xff]  ;;  %v344_v25 = vmul.f32 %v15235_v17, %v15235_v17  ;;  %v348_v26 = vmul.f32 %v15235_v17, %v15233_v15  ;;  %v343_v27 = vmul.f32 %v15234_v22, %v15234_v22  ;;  %v20614_v29 = vld [vmem:[%s20579_s25 + $0x20] sm:$0xff]  ;;  %s26193_s19 = smov (!%p275_p8, %s20372_s19), 1 }
  0x6f   : > { %287 = vst [vmem:[#allocation2 + $0x48] sm:$0xff] %v20327_v0  ;;  %288 = vst [vmem:[#allocation2 + $0x50] sm:$0xff] %v20327_v0  ;;  %v15237_v24 = vld [vmem:[%s20540_s28 + $0x28] sm:$0xff]  ;;  %v347_v28 = vmul.f32 %v15234_v22, %v15232_v16  ;;  %v20617_v30 = vld [vmem:[%s20540_s28 + $0x20] sm:$0xff]  ;;  %v20620_v31 = vsub.f32 %v406_v13, %v20598_v18  ;;  %v20623_v32 = vsub.f32 %v409_v14, %v20600_v19  ;;  %s277_s27 = scalar_lea.vmem %s25383_s4, %s26193_s19 }
  0x70   : > { %289 = vst [vmem:[#allocation2 + $0x58] sm:$0xff] %v20327_v0  ;;  %290 = vst [vmem:[#allocation2 + $0x60] sm:$0xff] %v20327_v0  ;;  %v366_v35 = vmul.f32 %v15239_v23, %v15239_v23  ;;  %v362_v39 = vmul.f32 %v15237_v24, %v15237_v24  ;;  %v370_v40 = vmul.f32 %v15239_v23, %v15237_v24 }
  0x71   : > { %291 = vst [vmem:[#allocation2 + $0x68] sm:$0xff] %v20327_v0  ;;  %292 = vst [vmem:[#allocation2 + $0x70] sm:$0xff] %v20327_v0  ;;  %v20636_v33 = vand.u32 4294901760, %v20620_v31  ;;  %v20639_v34 = vand.u32 4294901760, %v20623_v32 }
  0x72   : > { %293 = vst [vmem:[#allocation2 + $0x78] sm:$0xff] %v20327_v0  ;;  %295 = vst [vmem:[#allocation2 + $0x88] sm:$0xff] %v20327_v0 }
  0x73   : > { %296 = vst [vmem:[#allocation2 + $0x90] sm:$0xff] %v20327_v0  ;;  %297 = vst [vmem:[#allocation2 + $0x98] sm:$0xff] %v20327_v0  ;;  %v483_v45 = vsub.f32 %v20620_v31, %v20636_v33  ;;  %v494_v47 = vsub.f32 %v20623_v32, %v20639_v34 }
  0x74   : > { %298 = vst [vmem:[#allocation2 + $0xa0] sm:$0xff] %v20327_v0  ;;  %299 = vst [vmem:[#allocation2 + $0xa8] sm:$0xff] %v20327_v0 }
  0x75   : > { %300 = vst [vmem:[#allocation2 + $0xb0] sm:$0xff] %v20327_v0  ;;  %301 = vst [vmem:[#allocation2 + $0xb8] sm:$0xff] %v20327_v0  ;;  %v20657_v48 = vand.u32 4294901760, %v483_v45  ;;  %v20667_v60 = vand.u32 4294901760, %v494_v47 }
  0x76   : > { %302 = vst [vmem:[#allocation2 + $0xc0] sm:$0xff] %v20327_v0  ;;  %303 = vst [vmem:[#allocation2 + $0xc8] sm:$0xff] %v20327_v0 }
  0x77   : > { %304 = vst [vmem:[#allocation2 + $0xd0] sm:$0xff] %v20327_v0  ;;  %305 = vst [vmem:[#allocation2 + $0xd8] sm:$0xff] %v20327_v0 }
  0x78   : > { %306 = vst [vmem:[#allocation2 + $0xe0] sm:$0xff] %v20327_v0  ;;  %307 = vst [vmem:[#allocation2 + $0xe8] sm:$0xff] %v20327_v0 }
  0x79   : > { %316 = vst.msk [vmem:[#allocation2 + $0x80] sm:$0xff] %vm312_vm0, %v311_v1  ;;  %314 = vst.msk [vmem:[#allocation2 + $0x78] sm:$0xff] %vm312_vm0, %v309_v2 }
  0x7a   : > { %315 = vst.msk [vmem:[#allocation2 + $0x8] sm:$0xff] %vm312_vm0, %v310_v3  ;;  %313 = vst.msk [vmem:[#allocation2] sm:$0xff] %vm312_vm0, %v308_v8 }
  0x7b   : > { %320 = vst.msk [vmem:[#allocation2 + $0x88] sm:$0xff] %vm312_vm0, %v318_v5  ;;  %324 = vst.msk [vmem:[#allocation2 + $0x90] sm:$0xff] %vm312_vm0, %v322_v4 }
  0x7c   : > { %328 = vst.msk [vmem:[#allocation2 + $0x98] sm:$0xff] %vm312_vm0, %v326_v6  ;;  %323 = vst.msk [vmem:[#allocation2 + $0x18] sm:$0xff] %vm312_vm0, %v321_v7 }
  0x7d   : > { %336 = vst.msk [vmem:[#allocation2 + $0xa0] sm:$0xff] %vm312_vm0, %v15233_v15  ;;  %335 = vst.msk [vmem:[#allocation2 + $0x28] sm:$0xff] %vm312_vm0, %v15232_v16 }
  0x7e   : > { %338 = vst.msk [vmem:[#allocation2 + $0xa8] sm:$0xff] %vm312_vm0, %v15235_v17  ;;  %319 = vst.msk [vmem:[#allocation2 + $0x10] sm:$0xff] %vm312_vm0, %v317_v11 }
  0x7f   : > { %327 = vst.msk [vmem:[#allocation2 + $0x20] sm:$0xff] %vm312_vm0, %v325_v12  ;;  %337 = vst.msk [vmem:[#allocation2 + $0x30] sm:$0xff] %vm312_vm0, %v15234_v22 }
  0x80   : > { %360 = vst.msk [vmem:[#allocation2 + $0xd0] sm:$0xff] %vm312_vm0, %v15239_v23  ;;  %358 = vst.msk [vmem:[#allocation2 + $0xc8] sm:$0xff] %vm312_vm0, %v15237_v24  ;;  %v391_v36 = vld [vmem:[#allocation2 + $0x80] sm:$0xff]  ;;  %v390_v37 = vld [vmem:[#allocation2 + $0x78] sm:$0xff] }
  0x81   : > { %342 = vst.msk [vmem:[#allocation2 + $0xb0] sm:$0xff] %vm312_vm0, %v340_v20  ;;  %341 = vst.msk [vmem:[#allocation2 + $0x38] sm:$0xff] %vm312_vm0, %v339_v21  ;;  %v376_v38 = vld [vmem:[#allocation2 + $0x8] sm:$0xff]  ;;  %v20641_v41 = vand.u32 4294901760, %v391_v36  ;;  %v20643_v42 = vand.u32 4294901760, %v390_v37  ;;  %v375_v44 = vld [vmem:[#allocation2] sm:$0xff] }
  0x82   : > { %359 = vst.msk [vmem:[#allocation2 + $0x58] sm:$0xff] %vm312_vm0, %v20614_v29  ;;  %357 = vst.msk [vmem:[#allocation2 + $0x50] sm:$0xff] %vm312_vm0, %v20617_v30  ;;  %v20645_v43 = vand.u32 4294901760, %v376_v38  ;;  %v20650_v46 = vand.u32 4294901760, %v375_v44  ;;  %v393_v57 = vld [vmem:[#allocation2 + $0x90] sm:$0xff]  ;;  %v392_v4 = vld [vmem:[#allocation2 + $0x88] sm:$0xff] }
  0x83   : > { %346 = vst.msk [vmem:[#allocation2 + $0xb8] sm:$0xff] %vm312_vm0, %v344_v25  ;;  %350 = vst.msk [vmem:[#allocation2 + $0xc0] sm:$0xff] %vm312_vm0, %v348_v26  ;;  %440 = vmatprep.subr.mxu0 %v20641_v41  ;;  %v531_v49 = vsub.f32 %v391_v36, %v20641_v41  ;;  %v537_v50 = vsub.f32 %v390_v37, %v20643_v42  ;;  %v20670_v3 = vand.u32 4294901760, %v393_v57  ;;  %v378_v6 = vld [vmem:[#allocation2 + $0x18] sm:$0xff]  ;;  %v20674_v8 = vand.u32 4294901760, %v392_v4 }
  0x84   : > { %345 = vst.msk [vmem:[#allocation2 + $0x40] sm:$0xff] %vm312_vm0, %v343_v27  ;;  %349 = vst.msk [vmem:[#allocation2 + $0x48] sm:$0xff] %vm312_vm0, %v347_v28  ;;  %v543_v51 = vsub.f32 %v376_v38, %v20645_v43  ;;  %442 = vmatpush1.msra.mxu0 %v20643_v42  ;;  %v549_v52 = vsub.f32 %v375_v44, %v20650_v46  ;;  %v20676_v9 = vand.u32 4294901760, %v378_v6  ;;  %v395_v38 = vld [vmem:[#allocation2 + $0xa0] sm:$0xff] }
  0x85   : > { %368 = vst.msk [vmem:[#allocation2 + $0xe0] sm:$0xff] %vm312_vm0, %v366_v35  ;;  %364 = vst.msk [vmem:[#allocation2 + $0xd8] sm:$0xff] %vm312_vm0, %v362_v39  ;;  %444 = vmatprep.subr.mxu0 %v20645_v43  ;;  %v532_v53 = vand.u32 4294901760, %v531_v49  ;;  %v538_v54 = vand.u32 4294901760, %v537_v50  ;;  %v377_v7 = vld [vmem:[#allocation2 + $0x10] sm:$0xff]  ;;  %v20679_v10 = vsub.f32 %v393_v57, %v20670_v3  ;;  %v20688_v12 = vsub.f32 %v392_v4, %v20674_v8  ;;  %v380_v39 = vld [vmem:[#allocation2 + $0x28] sm:$0xff] }
  0x86   : > { %372 = vst.msk [vmem:[#allocation2 + $0xe8] sm:$0xff] %vm312_vm0, %v370_v40  ;;  %v544_v55 = vand.u32 4294901760, %v543_v51  ;;  %446 = vmatpush1.msra.mxu0 %v20650_v46  ;;  %v550_v56 = vand.u32 4294901760, %v549_v52  ;;  %v20681_v11 = vand.u32 4294901760, %v377_v7  ;;  %v20694_v14 = vsub.f32 %v378_v6, %v20676_v9  ;;  %v379_v40 = vld [vmem:[#allocation2 + $0x20] sm:$0xff] }
  0x87   : > { %485 = vmatmul.mubr.f32.vlgmr.msra.gmra.mxu0 %v20657_v48  ;;  %v533_v58 = vsub.f32 %v531_v49, %v532_v53  ;;  %v539_v59 = vsub.f32 %v537_v50, %v538_v54  ;;  %631 = vmatprep.subr.mxu0 %v531_v49  ;;  %v1072_v13 = vand.u32 4294901760, %v20679_v10  ;;  %v1078_v16 = vand.u32 4294901760, %v20688_v12 }
  0x88   : > { %v545_v61 = vsub.f32 %v543_v51, %v544_v55  ;;  %490 = vmatprep.mubr.f32.mxu0 %v20327_v0  ;;  %v551_v62 = vsub.f32 %v549_v52, %v550_v56  ;;  %634 = vmatpush1.msra.mxu0 %v537_v50  ;;  %v20699_v15 = vsub.f32 %v377_v7, %v20681_v11  ;;  %v1084_v20 = vand.u32 4294901760, %v20694_v14 }
  0x89   : > { %v534_v63 = vand.u32 4294901760, %v533_v58  ;;  %v540_v1 = vand.u32 4294901760, %v539_v59  ;;  %637 = vmatprep.subr.mxu0 %v543_v51  ;;  %v1073_v17 = vsub.f32 %v20679_v10, %v1072_v13  ;;  %v1079_v22 = vsub.f32 %v20688_v12, %v1078_v16 }
  0x8a   : > { %v546_v2 = vand.u32 4294901760, %v545_v61  ;;  %v552_v5 = vand.u32 4294901760, %v551_v62  ;;  %640 = vmatpush1.msra.mxu0 %v549_v52  ;;  %v1090_v21 = vand.u32 4294901760, %v20699_v15  ;;  %v1085_v24 = vsub.f32 %v20694_v14, %v1084_v20  ;;  %v397_v62 = vld [vmem:[#allocation2 + $0xb0] sm:$0xff] }
  0x8b   : > { %535 = vmatprep.subr.mxu1 %v534_v63  ;;  %496 = vmatmul.mubr.f32.gmra.mxu0 %v20667_v60  ;;  %v1074_v23 = vand.u32 4294901760, %v1073_v17  ;;  %v365_v26 = vmul.f32 %v20614_v29, %v20614_v29  ;;  %v1080_v27 = vand.u32 4294901760, %v1079_v22  ;;  %v361_v28 = vmul.f32 %v20617_v30, %v20617_v30 }
  0x8c   : > { %541 = vmatpush1.msra.mxu1 %v540_v1  ;;  %673 = vmatprep.mubr.f32.mxu0 %v20327_v0  ;;  %v1091_v25 = vsub.f32 %v20699_v15, %v1090_v21  ;;  %v369_v35 = vmul.f32 %v20614_v29, %v20617_v30  ;;  %v1086_v36 = vand.u32 4294901760, %v1085_v24  ;;  %v20749_v29 = vand.u32 4294901760, %v395_v38  ;;  %v394_v30 = vld [vmem:[#allocation2 + $0x98] sm:$0xff]  ;;  %v396_v1 = vld [vmem:[#allocation2 + $0xa8] sm:$0xff] }
  0x8d   : > { %547 = vmatprep.subr.mxu1 %v546_v2  ;;  %808 = vmatprep.subr.mxu0 %v532_v53  ;;  %367 = vst.msk [vmem:[#allocation2 + $0x68] sm:$0xff] %vm312_vm0, %v365_v26  ;;  %363 = vst.msk [vmem:[#allocation2 + $0x60] sm:$0xff] %vm312_vm0, %v361_v28  ;;  %v20767_v44 = vand.u32 4294901760, %v379_v40  ;;  %v20833_v63 = vand.u32 4294901760, %v397_v62  ;;  %v382_v2 = vld [vmem:[#allocation2 + $0x38] sm:$0xff]  ;;  %v20840_v4 = vand.u32 4294901760, %v396_v1 }
  0x8e   : > { %553 = vmatpush1.msra.mxu1 %v552_v5  ;;  %v1092_v37 = vand.u32 4294901760, %v1091_v25  ;;  %371 = vst.msk [vmem:[#allocation2 + $0x70] sm:$0xff] %vm312_vm0, %v369_v35  ;;  %v20844_v5 = vand.u32 4294901760, %v382_v2  ;;  %v399_v25 = vld [vmem:[#allocation2 + $0xc0] sm:$0xff]  ;;  %v384_v28 = vld [vmem:[#allocation2 + $0x48] sm:$0xff] }
  0x8f   : > { %588 = vmatmul.mubr.f32.vlgmr.msra.gmra.mxu1 %v20598_v18  ;;  %719 = vmatprep.subr.mxu1 %v20641_v41  ;;  %v20786_v49 = vsub.f32 %v379_v40, %v20767_v44  ;;  %v20847_v6 = vsub.f32 %v397_v62, %v20833_v63  ;;  %v20917_v26 = vand.u32 4294901760, %v399_v25  ;;  %v383_v35 = vld [vmem:[#allocation2 + $0x40] sm:$0xff] }
  0x90   : > { %721 = vmatpush1.msra.mxu1 %v20643_v42  ;;  %676 = vmatmul.mubr.f32.vlgmr.msra.gmra.mxu0 %v20620_v31 }
  0x91   : > { %593 = vmatprep.mubr.f32.mxu1 %v20327_v0  ;;  %723 = vmatprep.subr.mxu1 %v20645_v43  ;;  %v1630_v53 = vand.u32 4294901760, %v20786_v49 }
  0x92   : > { %681 = vmatprep.mubr.f32.mxu0 %v20327_v0  ;;  %725 = vmatpush1.msra.mxu1 %v20650_v46 }
  0x93   : > { %595 = vmatmul.mubr.f32.gmra.mxu1 %v20600_v19  ;;  %812 = vmatpush1.msra.mxu0 %v538_v54  ;;  %v1631_v57 = vsub.f32 %v20786_v49, %v1630_v53 }
  0x94   : > { %684 = vmatmul.mubr.f32.gmra.mxu0 %v20623_v32  ;;  %758 = vmatprep.mubr.f32.mxu1 %v20327_v0 }
  0x95   : > { %816 = vmatprep.subr.mxu0 %v544_v55  ;;  %897 = vmatprep.subr.mxu1 %v20641_v41  ;;  %v20756_v41 = vand.u32 4294901760, %v394_v30  ;;  %v1632_v61 = vand.u32 4294901760, %v1631_v57  ;;  %v386_v57 = vld [vmem:[#allocation2 + $0x58] sm:$0xff] }
  0x96   : > { %820 = vmatpush1.msra.mxu0 %v550_v56  ;;  %853 = vmatprep.mubr.f32.mxu0 %v20327_v0 }
  0x97   : > { %762 = vmatmul.mubr.f32.vlgmr.msra.gmra.mxu1 %v20636_v33  ;;  %980 = vmatprep.subr.mxu0 %v20670_v3  ;;  %v20775_v45 = vsub.f32 %v394_v30, %v20756_v41 }
  0x98   : > { %899 = vmatpush1.msra.mxu1 %v20643_v42  ;;  %855 = vmatmul.mubr.f32.vlgmr.msra.gmra.mxu0 %v20598_v18  ;;  %v20760_v42 = vand.u32 4294901760, %v380_v39 }
  0x99   : > { %767 = vmatprep.mubr.f32.mxu1 %v20327_v0  ;;  %901 = vmatprep.subr.mxu1 %v20645_v43  ;;  %v20763_v43 = vsub.f32 %v395_v38, %v20749_v29  ;;  %v1618_v50 = vand.u32 4294901760, %v20775_v45  ;;  %v20931_v38 = vsub.f32 %v399_v25, %v20917_v26 }
  0x9a   : > { %860 = vmatprep.mubr.f32.mxu0 %v20327_v0  ;;  %903 = vmatpush1.msra.mxu1 %v20650_v46  ;;  %v20781_v47 = vsub.f32 %v380_v39, %v20760_v42 }
  0x9b   : > { %771 = vmatmul.mubr.f32.gmra.mxu1 %v20639_v34  ;;  %982 = vmatpush1.msra.mxu0 %v20674_v8  ;;  %v1612_v46 = vand.u32 4294901760, %v20763_v43  ;;  %v1619_v54 = vsub.f32 %v20775_v45, %v1618_v50  ;;  %v2692_v39 = vand.u32 4294901760, %v20931_v38 }
  0x9c   : > { %862 = vmatmul.mubr.f32.gmra.mxu0 %v20600_v19  ;;  %936 = vmatprep.mubr.f32.mxu1 %v20327_v0  ;;  %v1624_v52 = vand.u32 4294901760, %v20781_v47 }
  0x9d   : > { %984 = vmatprep.subr.mxu0 %v20676_v9  ;;  %1075 = vmatprep.subr.mxu1 %v1074_v23  ;;  %v1613_v51 = vsub.f32 %v20763_v43, %v1612_v46  ;;  %v1620_v58 = vand.u32 4294901760, %v1619_v54  ;;  %v401_v54 = vld [vmem:[#allocation2 + $0xd0] sm:$0xff] }
  0x9e   : > { %986 = vmatpush1.msra.mxu0 %v20681_v11  ;;  %1019 = vmatprep.mubr.f32.mxu0 %v20327_v0  ;;  %v1625_v56 = vsub.f32 %v20781_v47, %v1624_v52 }
  0x9f   : > { %938 = vmatmul.mubr.f32.vlgmr.msra.gmra.mxu1 %v20598_v18  ;;  %1171 = vmatprep.subr.mxu0 %v20679_v10  ;;  %v1614_v55 = vand.u32 4294901760, %v1613_v51  ;;  %v20865_v10 = vsub.f32 %v382_v2, %v20844_v5 }
  0xa0   : > { %943 = vmatprep.mubr.f32.mxu1 %v20327_v0  ;;  %1081 = vmatpush1.msra.mxu1 %v1080_v27  ;;  %v1626_v59 = vand.u32 4294901760, %v1625_v56  ;;  %v398_v27 = vld [vmem:[#allocation2 + $0xb8] sm:$0xff]  ;;  %v400_v56 = vld [vmem:[#allocation2 + $0xc8] sm:$0xff] }
  0xa1   : > { %1025 = vmatmul.mubr.f32.vlgmr.msra.gmra.mxu0 %v20657_v48  ;;  %1087 = vmatprep.subr.mxu1 %v1086_v36  ;;  %v20924_v36 = vand.u32 4294901760, %v398_v27 }
  0xa2   : > { %1093 = vmatpush1.msra.mxu1 %v1092_v37  ;;  %1030 = vmatprep.mubr.f32.mxu0 %v20327_v0  ;;  %v20928_v37 = vand.u32 4294901760, %v384_v28 }
  0xa3   : > { %945 = vmatmul.mubr.f32.gmra.mxu1 %v20600_v19  ;;  %1174 = vmatpush1.msra.mxu0 %v20688_v12  ;;  %v20943_v30 = vsub.f32 %v398_v27, %v20924_v36 }
  0xa4   : > { %1126 = vmatprep.mubr.f32.mxu1 %v20327_v0  ;;  %1177 = vmatprep.subr.mxu0 %v20694_v14  ;;  %v2164_v14 = vand.u32 4294901760, %v20865_v10  ;;  %v20949_v40 = vsub.f32 %v384_v28, %v20928_v37 }
  0xa5   : > { %1036 = vmatmul.mubr.f32.gmra.mxu0 %v20667_v60  ;;  %1259 = vmatprep.subr.mxu1 %v20670_v3 }
  0xa6   : > { %1180 = vmatpush1.msra.mxu0 %v20699_v15  ;;  %1213 = vmatprep.mubr.f32.mxu0 %v20327_v0 }
  0xa7   : > { %1128 = vmatmul.mubr.f32.vlgmr.msra.gmra.mxu1 %v20598_v18  ;;  %1348 = vmatprep.subr.mxu0 %v1072_v13 }
  0xa8   : > { %1133 = vmatprep.mubr.f32.mxu1 %v20327_v0  ;;  %1261 = vmatpush1.msra.mxu1 %v20674_v8 }
  0xa9   : > { %1216 = vmatmul.mubr.f32.vlgmr.msra.gmra.mxu0 %v20620_v31  ;;  %1263 = vmatprep.subr.mxu1 %v20676_v9 }
  0xaa   : > { %1265 = vmatpush1.msra.mxu1 %v20681_v11  ;;  %1221 = vmatprep.mubr.f32.mxu0 %v20327_v0 }
  0xab   : > { %1135 = vmatmul.mubr.f32.gmra.mxu1 %v20600_v19  ;;  %1352 = vmatpush1.msra.mxu0 %v1078_v16 }
  0xac   : > { %1298 = vmatprep.mubr.f32.mxu1 %v20327_v0  ;;  %1356 = vmatprep.subr.mxu0 %v1084_v20  ;;  %v2165_v20 = vsub.f32 %v20865_v10, %v2164_v14 }
  0xad   : > { %1224 = vmatmul.mubr.f32.gmra.mxu0 %v20623_v32  ;;  %1437 = vmatprep.subr.mxu1 %v20670_v3  ;;  %v381_v3 = vld [vmem:[#allocation2 + $0x30] sm:$0xff] }
  0xae   : > { %1360 = vmatpush1.msra.mxu0 %v1090_v21  ;;  %1393 = vmatprep.mubr.f32.mxu0 %v20327_v0  ;;  %v20851_v7 = vand.u32 4294901760, %v381_v3  ;;  %v2166_v23 = vand.u32 4294901760, %v2165_v20  ;;  %v402_v20 = vld [vmem:[#allocation2 + $0xd8] sm:$0xff] }
  0xaf   : > { %1302 = vmatmul.mubr.f32.vlgmr.msra.gmra.mxu1 %v20636_v33  ;;  %1520 = vmatprep.subr.mxu0 %v20749_v29 }
  0xb0   : > { %1307 = vmatprep.mubr.f32.mxu1 %v20327_v0  ;;  %1439 = vmatpush1.msra.mxu1 %v20674_v8  ;;  %v20859_v8 = vsub.f32 %v396_v1, %v20840_v4 }
  0xb1   : > { %1395 = vmatmul.mubr.f32.vlgmr.msra.gmra.mxu0 %v20598_v18  ;;  %1441 = vmatprep.subr.mxu1 %v20676_v9  ;;  %v2152_v9 = vand.u32 4294901760, %v20847_v6 }
  0xb2   : > { %1443 = vmatpush1.msra.mxu1 %v20681_v11  ;;  %1400 = vmatprep.mubr.f32.mxu0 %v20327_v0  ;;  %v20870_v11 = vsub.f32 %v381_v3, %v20851_v7  ;;  %v2158_v12 = vand.u32 4294901760, %v20859_v8 }
  0xb3   : > { %1311 = vmatmul.mubr.f32.gmra.mxu1 %v20639_v34  ;;  %1522 = vmatpush1.msra.mxu0 %v20756_v41  ;;  %v2153_v13 = vsub.f32 %v20847_v6, %v2152_v9 }
  0xb4   : > { %1476 = vmatprep.mubr.f32.mxu1 %v20327_v0  ;;  %1524 = vmatprep.subr.mxu0 %v20760_v42  ;;  %v2170_v15 = vand.u32 4294901760, %v20870_v11  ;;  %v2159_v16 = vsub.f32 %v20859_v8, %v2158_v12 }
  0xb5   : > { %1402 = vmatmul.mubr.f32.gmra.mxu0 %v20600_v19  ;;  %1615 = vmatprep.subr.mxu1 %v1614_v55  ;;  %v2154_v17 = vand.u32 4294901760, %v2153_v13  ;;  %v21001_v55 = vand.u32 4294901760, %v401_v54 }
  0xb6   : > { %1526 = vmatpush1.msra.mxu0 %v20767_v44  ;;  %1559 = vmatprep.mubr.f32.mxu0 %v20327_v0  ;;  %v2171_v21 = vsub.f32 %v20870_v11, %v2170_v15  ;;  %v2160_v22 = vand.u32 4294901760, %v2159_v16  ;;  %v403_v16 = vld [vmem:[#allocation2 + $0xe0] sm:$0xff] }
  0xb7   : > { %1478 = vmatmul.mubr.f32.vlgmr.msra.gmra.mxu1 %v20598_v18  ;;  %1711 = vmatprep.subr.mxu0 %v20763_v43  ;;  %v2693_v43 = vsub.f32 %v20931_v38, %v2692_v39  ;;  %v21015_v62 = vsub.f32 %v401_v54, %v21001_v55 }
  0xb8   : > { %1483 = vmatprep.mubr.f32.mxu1 %v20327_v0  ;;  %1621 = vmatpush1.msra.mxu1 %v1620_v58  ;;  %v2172_v24 = vand.u32 4294901760, %v2171_v21  ;;  %v385_v58 = vld [vmem:[#allocation2 + $0x50] sm:$0xff]  ;;  %v388_v21 = vld [vmem:[#allocation2 + $0x68] sm:$0xff] }
  0xb9   : > { %1565 = vmatmul.mubr.f32.vlgmr.msra.gmra.mxu0 %v20657_v48  ;;  %1627 = vmatprep.subr.mxu1 %v1626_v59  ;;  %v21008_v59 = vand.u32 4294901760, %v400_v56  ;;  %v3232_v2 = vand.u32 4294901760, %v21015_v62 }
  0xba   : > { %1633 = vmatpush1.msra.mxu1 %v1632_v61  ;;  %1570 = vmatprep.mubr.f32.mxu0 %v20327_v0  ;;  %v21012_v61 = vand.u32 4294901760, %v386_v57 }
  0xbb   : > { %1485 = vmatmul.mubr.f32.gmra.mxu1 %v20600_v19  ;;  %1714 = vmatpush1.msra.mxu0 %v20775_v45  ;;  %v21027_v1 = vsub.f32 %v400_v56, %v21008_v59 }
  0xbc   : > { %1666 = vmatprep.mubr.f32.mxu1 %v20327_v0  ;;  %1717 = vmatprep.subr.mxu0 %v20781_v47  ;;  %v2694_v47 = vand.u32 4294901760, %v2693_v43  ;;  %v21033_v3 = vsub.f32 %v386_v57, %v21012_v61  ;;  %v4708_v57 = vld [vmem:[#allocation5 + $0x78] sm:$0xff] }
  0xbd   : > { %1576 = vmatmul.mubr.f32.gmra.mxu0 %v20667_v60  ;;  %1799 = vmatprep.subr.mxu1 %v20749_v29 }
  0xbe   : > { %1720 = vmatpush1.msra.mxu0 %v20786_v49  ;;  %1753 = vmatprep.mubr.f32.mxu0 %v20327_v0 }
  0xbf   : > { %1668 = vmatmul.mubr.f32.vlgmr.msra.gmra.mxu1 %v20598_v18  ;;  %1888 = vmatprep.subr.mxu0 %v1612_v46 }
  0xc0   : > { %1673 = vmatprep.mubr.f32.mxu1 %v20327_v0  ;;  %1801 = vmatpush1.msra.mxu1 %v20756_v41 }
  0xc1   : > { %1756 = vmatmul.mubr.f32.vlgmr.msra.gmra.mxu0 %v20620_v31  ;;  %1803 = vmatprep.subr.mxu1 %v20760_v42 }
  0xc2   : > { %1805 = vmatpush1.msra.mxu1 %v20767_v44  ;;  %1761 = vmatprep.mubr.f32.mxu0 %v20327_v0 }
  0xc3   : > { %1675 = vmatmul.mubr.f32.gmra.mxu1 %v20600_v19  ;;  %1892 = vmatpush1.msra.mxu0 %v1618_v50 }
  0xc4   : > { %1838 = vmatprep.mubr.f32.mxu1 %v20327_v0  ;;  %1896 = vmatprep.subr.mxu0 %v1624_v52 }
  0xc5   : > { %1764 = vmatmul.mubr.f32.gmra.mxu0 %v20623_v32  ;;  %1977 = vmatprep.subr.mxu1 %v20749_v29  ;;  %v20935_v29 = vand.u32 4294901760, %v383_v35 }
  0xc6   : > { %1900 = vmatpush1.msra.mxu0 %v1630_v53  ;;  %1933 = vmatprep.mubr.f32.mxu0 %v20327_v0 }
  0xc7   : > { %1842 = vmatmul.mubr.f32.vlgmr.msra.gmra.mxu1 %v20636_v33  ;;  %2060 = vmatprep.subr.mxu0 %v20833_v63 }
  0xc8   : > { %1847 = vmatprep.mubr.f32.mxu1 %v20327_v0  ;;  %1979 = vmatpush1.msra.mxu1 %v20756_v41  ;;  %v20954_v41 = vsub.f32 %v383_v35, %v20935_v29 }
  0xc9   : > { %1935 = vmatmul.mubr.f32.vlgmr.msra.gmra.mxu0 %v20598_v18  ;;  %1981 = vmatprep.subr.mxu1 %v20760_v42  ;;  %v2698_v42 = vand.u32 4294901760, %v20943_v30 }
  0xca   : > { %1983 = vmatpush1.msra.mxu1 %v20767_v44  ;;  %1940 = vmatprep.mubr.f32.mxu0 %v20327_v0  ;;  %v2704_v44 = vand.u32 4294901760, %v20949_v40  ;;  %v2710_v45 = vand.u32 4294901760, %v20954_v41 }
  0xcb   : > { %1851 = vmatmul.mubr.f32.gmra.mxu1 %v20639_v34  ;;  %2062 = vmatpush1.msra.mxu0 %v20840_v4  ;;  %v2699_v46 = vsub.f32 %v20943_v30, %v2698_v42 }
  0xcc   : > { %2016 = vmatprep.mubr.f32.mxu1 %v20327_v0  ;;  %2064 = vmatprep.subr.mxu0 %v20844_v5  ;;  %v2705_v49 = vsub.f32 %v20949_v40, %v2704_v44  ;;  %v2711_v50 = vsub.f32 %v20954_v41, %v2710_v45 }
  0xcd   : > { %1942 = vmatmul.mubr.f32.gmra.mxu0 %v20600_v19  ;;  %2155 = vmatprep.subr.mxu1 %v2154_v17  ;;  %v2700_v51 = vand.u32 4294901760, %v2699_v46  ;;  %v21085_v17 = vand.u32 4294901760, %v403_v16 }
  0xce   : > { %2066 = vmatpush1.msra.mxu0 %v20851_v7  ;;  %2099 = vmatprep.mubr.f32.mxu0 %v20327_v0  ;;  %v2706_v52 = vand.u32 4294901760, %v2705_v49  ;;  %v2712_v53 = vand.u32 4294901760, %v2711_v50  ;;  %v389_v49 = vld [vmem:[#allocation2 + $0x70] sm:$0xff] }
  0xcf   : > { %2018 = vmatmul.mubr.f32.vlgmr.msra.gmra.mxu1 %v20598_v18  ;;  %2251 = vmatprep.subr.mxu0 %v20847_v6  ;;  %v3233_v6 = vsub.f32 %v21015_v62, %v3232_v2  ;;  %v21099_v25 = vsub.f32 %v403_v16, %v21085_v17 }
  0xd0   : > { %2023 = vmatprep.mubr.f32.mxu1 %v20327_v0  ;;  %2161 = vmatpush1.msra.mxu1 %v2160_v22  ;;  %v387_v22 = vld [vmem:[#allocation2 + $0x60] sm:$0xff] }
  0xd1   : > { %2105 = vmatmul.mubr.f32.vlgmr.msra.gmra.mxu0 %v20657_v48  ;;  %2167 = vmatprep.subr.mxu1 %v2166_v23  ;;  %v21092_v23 = vand.u32 4294901760, %v402_v20  ;;  %v3772_v28 = vand.u32 4294901760, %v21099_v25 }
  0xd2   : > { %2173 = vmatpush1.msra.mxu1 %v2172_v24  ;;  %2110 = vmatprep.mubr.f32.mxu0 %v20327_v0  ;;  %v21096_v24 = vand.u32 4294901760, %v388_v21 }
  0xd3   : > { %2025 = vmatmul.mubr.f32.gmra.mxu1 %v20600_v19  ;;  %2254 = vmatpush1.msra.mxu0 %v20859_v8  ;;  %v21111_v27 = vsub.f32 %v402_v20, %v21092_v23 }
  0xd4   : > { %2206 = vmatprep.mubr.f32.mxu1 %v20327_v0  ;;  %2257 = vmatprep.subr.mxu0 %v20865_v10  ;;  %v3234_v10 = vand.u32 4294901760, %v3233_v6  ;;  %v21117_v35 = vsub.f32 %v388_v21, %v21096_v24 }
  0xd5   : > { %2116 = vmatmul.mubr.f32.gmra.mxu0 %v20667_v60  ;;  %2339 = vmatprep.subr.mxu1 %v20833_v63 }
  0xd6   : > { %2260 = vmatpush1.msra.mxu0 %v20870_v11  ;;  %2293 = vmatprep.mubr.f32.mxu0 %v20327_v0 }
  0xd7   : > { %2208 = vmatmul.mubr.f32.vlgmr.msra.gmra.mxu1 %v20598_v18  ;;  %2428 = vmatprep.subr.mxu0 %v2152_v9 }
  0xd8   : > { %2213 = vmatprep.mubr.f32.mxu1 %v20327_v0  ;;  %2341 = vmatpush1.msra.mxu1 %v20840_v4 }
  0xd9   : > { %2296 = vmatmul.mubr.f32.vlgmr.msra.gmra.mxu0 %v20620_v31  ;;  %2343 = vmatprep.subr.mxu1 %v20844_v5 }
  0xda   : > { %2345 = vmatpush1.msra.mxu1 %v20851_v7  ;;  %2301 = vmatprep.mubr.f32.mxu0 %v20327_v0 }
  0xdb   : > { %2215 = vmatmul.mubr.f32.gmra.mxu1 %v20600_v19  ;;  %2432 = vmatpush1.msra.mxu0 %v2158_v12 }
  0xdc   : > { %2378 = vmatprep.mubr.f32.mxu1 %v20327_v0  ;;  %2436 = vmatprep.subr.mxu0 %v2164_v14 }
  0xdd   : > { %2304 = vmatmul.mubr.f32.gmra.mxu0 %v20623_v32  ;;  %2517 = vmatprep.subr.mxu1 %v20833_v63  ;;  %v21019_v63 = vand.u32 4294901760, %v385_v58 }
  0xde   : > { %2440 = vmatpush1.msra.mxu0 %v2170_v15  ;;  %2473 = vmatprep.mubr.f32.mxu0 %v20327_v0 }
  0xdf   : > { %2382 = vmatmul.mubr.f32.vlgmr.msra.gmra.mxu1 %v20636_v33  ;;  %2600 = vmatprep.subr.mxu0 %v20917_v26 }
  0xe0   : > { %2387 = vmatprep.mubr.f32.mxu1 %v20327_v0  ;;  %2519 = vmatpush1.msra.mxu1 %v20840_v4  ;;  %v21038_v4 = vsub.f32 %v385_v58, %v21019_v63 }
  0xe1   : > { %2475 = vmatmul.mubr.f32.vlgmr.msra.gmra.mxu0 %v20598_v18  ;;  %2521 = vmatprep.subr.mxu1 %v20844_v5  ;;  %v3238_v5 = vand.u32 4294901760, %v21027_v1 }
  0xe2   : > { %2523 = vmatpush1.msra.mxu1 %v20851_v7  ;;  %2480 = vmatprep.mubr.f32.mxu0 %v20327_v0  ;;  %v3244_v7 = vand.u32 4294901760, %v21033_v3  ;;  %v3250_v8 = vand.u32 4294901760, %v21038_v4 }
  0xe3   : > { %2391 = vmatmul.mubr.f32.gmra.mxu1 %v20639_v34  ;;  %2602 = vmatpush1.msra.mxu0 %v20924_v36  ;;  %v3239_v9 = vsub.f32 %v21027_v1, %v3238_v5 }
  0xe4   : > { %2556 = vmatprep.mubr.f32.mxu1 %v20327_v0  ;;  %2604 = vmatprep.subr.mxu0 %v20928_v37  ;;  %v3245_v11 = vsub.f32 %v21033_v3, %v3244_v7  ;;  %v3251_v12 = vsub.f32 %v21038_v4, %v3250_v8 }
  0xe5   : > { %2482 = vmatmul.mubr.f32.gmra.mxu0 %v20600_v19  ;;  %2695 = vmatprep.subr.mxu1 %v2694_v47  ;;  %v3240_v13 = vand.u32 4294901760, %v3239_v9  ;;  %v4702_v9 = vld [vmem:[#allocation5 + $0x48] sm:$0xff] }
  0xe6   : > { %2606 = vmatpush1.msra.mxu0 %v20935_v29  ;;  %2639 = vmatprep.mubr.f32.mxu0 %v20327_v0  ;;  %v3246_v14 = vand.u32 4294901760, %v3245_v11  ;;  %v3252_v15 = vand.u32 4294901760, %v3251_v12 }
  0xe7   : > { %2558 = vmatmul.mubr.f32.vlgmr.msra.gmra.mxu1 %v20598_v18  ;;  %2791 = vmatprep.subr.mxu0 %v20931_v38  ;;  %v3773_v38 = vsub.f32 %v21099_v25, %v3772_v28 }
  0xe8   : > { %2563 = vmatprep.mubr.f32.mxu1 %v20327_v0  ;;  %2701 = vmatpush1.msra.mxu1 %v2700_v51  ;;  %v21173_v51 = vand.u32 4294901760, %v389_v49 }
  0xe9   : > { %2645 = vmatmul.mubr.f32.vlgmr.msra.gmra.mxu0 %v20657_v48  ;;  %2707 = vmatprep.subr.mxu1 %v2706_v52 }
  0xea   : > { %2713 = vmatpush1.msra.mxu1 %v2712_v53  ;;  %2650 = vmatprep.mubr.f32.mxu0 %v20327_v0  ;;  %v4315_v53 = vsub.f32 %v389_v49, %v21173_v51  ;;  %v4695_v49 = vld [vmem:[#allocation5 + $0x10] sm:$0xff] }
  0xeb   : > { %2565 = vmatmul.mubr.f32.gmra.mxu1 %v20600_v19  ;;  %2794 = vmatpush1.msra.mxu0 %v20943_v30 }
  0xec   : > { %2746 = vmatprep.mubr.f32.mxu1 %v20327_v0  ;;  %2797 = vmatprep.subr.mxu0 %v20949_v40  ;;  %v3774_v40 = vand.u32 4294901760, %v3773_v38 }
  0xed   : > { %2656 = vmatmul.mubr.f32.gmra.mxu0 %v20667_v60  ;;  %2879 = vmatprep.subr.mxu1 %v20917_v26 }
  0xee   : > { %2800 = vmatpush1.msra.mxu0 %v20954_v41  ;;  %2833 = vmatprep.mubr.f32.mxu0 %v20327_v0 }
  0xef   : > { %2748 = vmatmul.mubr.f32.vlgmr.msra.gmra.mxu1 %v20598_v18  ;;  %2968 = vmatprep.subr.mxu0 %v2692_v39 }
  0xf0   : > { %2753 = vmatprep.mubr.f32.mxu1 %v20327_v0  ;;  %2881 = vmatpush1.msra.mxu1 %v20924_v36 }
  0xf1   : > { %2836 = vmatmul.mubr.f32.vlgmr.msra.gmra.mxu0 %v20620_v31  ;;  %2883 = vmatprep.subr.mxu1 %v20928_v37 }
  0xf2   : > { %2885 = vmatpush1.msra.mxu1 %v20935_v29  ;;  %2841 = vmatprep.mubr.f32.mxu0 %v20327_v0 }
  0xf3   : > { %2755 = vmatmul.mubr.f32.gmra.mxu1 %v20600_v19  ;;  %2972 = vmatpush1.msra.mxu0 %v2698_v42 }
  0xf4   : > { %2918 = vmatprep.mubr.f32.mxu1 %v20327_v0  ;;  %2976 = vmatprep.subr.mxu0 %v2704_v44  ;;  %v404_v44 = vld [vmem:[#allocation2 + $0xe8] sm:$0xff] }
  0xf5   : > { %2844 = vmatmul.mubr.f32.gmra.mxu0 %v20623_v32  ;;  %3057 = vmatprep.subr.mxu1 %v20917_v26  ;;  %v21103_v26 = vand.u32 4294901760, %v387_v22  ;;  %v21159_v47 = vand.u32 4294901760, %v404_v44 }
  0xf6   : > { %2980 = vmatpush1.msra.mxu0 %v2710_v45  ;;  %3013 = vmatprep.mubr.f32.mxu0 %v20327_v0 }
  0xf7   : > { %2922 = vmatmul.mubr.f32.vlgmr.msra.gmra.mxu1 %v20636_v33  ;;  %3140 = vmatprep.subr.mxu0 %v21001_v55  ;;  %v21167_v50 = vsub.f32 %v404_v44, %v21159_v47 }
  0xf8   : > { %2927 = vmatprep.mubr.f32.mxu1 %v20327_v0  ;;  %3059 = vmatpush1.msra.mxu1 %v20924_v36  ;;  %v21122_v36 = vsub.f32 %v387_v22, %v21103_v26 }
  0xf9   : > { %3015 = vmatmul.mubr.f32.vlgmr.msra.gmra.mxu0 %v20598_v18  ;;  %3061 = vmatprep.subr.mxu1 %v20928_v37  ;;  %v3778_v37 = vand.u32 4294901760, %v21111_v27  ;;  %v21179_v52 = vand.u32 4294901760, %v21167_v50 }
  0xfa   : > { %3063 = vmatpush1.msra.mxu1 %v20935_v29  ;;  %3020 = vmatprep.mubr.f32.mxu0 %v20327_v0  ;;  %v3784_v29 = vand.u32 4294901760, %v21117_v35  ;;  %v3790_v30 = vand.u32 4294901760, %v21122_v36 }
  0xfb   : > { %2931 = vmatmul.mubr.f32.gmra.mxu1 %v20639_v34  ;;  %3142 = vmatpush1.msra.mxu0 %v21008_v59  ;;  %v3779_v39 = vsub.f32 %v21111_v27, %v3778_v37  ;;  %v4310_v54 = vsub.f32 %v21167_v50, %v21179_v52 }
  0xfc   : > { %3096 = vmatprep.mubr.f32.mxu1 %v20327_v0  ;;  %3144 = vmatprep.subr.mxu0 %v21012_v61  ;;  %v3785_v41 = vsub.f32 %v21117_v35, %v3784_v29  ;;  %v3791_v42 = vsub.f32 %v21122_v36, %v3790_v30 }
  0xfd   : > { %3022 = vmatmul.mubr.f32.gmra.mxu0 %v20600_v19  ;;  %3235 = vmatprep.subr.mxu1 %v3234_v10  ;;  %v3780_v43 = vand.u32 4294901760, %v3779_v39  ;;  %v4311_v56 = vand.u32 4294901760, %v4310_v54 }
  0xfe   : > { %3146 = vmatpush1.msra.mxu0 %v21019_v63  ;;  %3179 = vmatprep.mubr.f32.mxu0 %v20327_v0  ;;  %v3786_v45 = vand.u32 4294901760, %v3785_v41  ;;  %v3792_v46 = vand.u32 4294901760, %v3791_v42 }
  0xff   : > { %3098 = vmatmul.mubr.f32.vlgmr.msra.gmra.mxu1 %v20598_v18  ;;  %3331 = vmatprep.subr.mxu0 %v21015_v62  ;;  %v4706_v62 = vld [vmem:[#allocation5 + $0x68] sm:$0xff] }
 0x100   : > { %3103 = vmatprep.mubr.f32.mxu1 %v20327_v0  ;;  %3241 = vmatpush1.msra.mxu1 %v3240_v13  ;;  %v4701_v13 = vld [vmem:[#allocation5 + $0x40] sm:$0xff] }
 0x101   : > { %3185 = vmatmul.mubr.f32.vlgmr.msra.gmra.mxu0 %v20657_v48  ;;  %3247 = vmatprep.subr.mxu1 %v3246_v14  ;;  %v21254_v14 = vand.u32 4294901760, %v4702_v9 }
 0x102   : > { %3253 = vmatpush1.msra.mxu1 %v3252_v15  ;;  %3190 = vmatprep.mubr.f32.mxu0 %v20327_v0 }
 0x103   : > { %3105 = vmatmul.mubr.f32.gmra.mxu1 %v20600_v19  ;;  %3334 = vmatpush1.msra.mxu0 %v21027_v1 }
 0x104   : > { %3286 = vmatprep.mubr.f32.mxu1 %v20327_v0  ;;  %3337 = vmatprep.subr.mxu0 %v21033_v3 }
 0x105   : > { %3196 = vmatmul.mubr.f32.gmra.mxu0 %v20667_v60  ;;  %3419 = vmatprep.subr.mxu1 %v21001_v55 }
 0x106   : > { %3340 = vmatpush1.msra.mxu0 %v21038_v4  ;;  %3373 = vmatprep.mubr.f32.mxu0 %v20327_v0  ;;  %v21222_v4 = vand.u32 4294901760, %v4706_v62 }
 0x107   : > { %3288 = vmatmul.mubr.f32.vlgmr.msra.gmra.mxu1 %v20598_v18  ;;  %3508 = vmatprep.subr.mxu0 %v3232_v2  ;;  %v4705_v2 = vld [vmem:[#allocation5 + $0x60] sm:$0xff] }
 0x108   : > { %3293 = vmatprep.mubr.f32.mxu1 %v20327_v0  ;;  %3421 = vmatpush1.msra.mxu1 %v21008_v59 }
 0x109   : > { %3376 = vmatmul.mubr.f32.vlgmr.msra.gmra.mxu0 %v20620_v31  ;;  %3423 = vmatprep.subr.mxu1 %v21012_v61 }
 0x10a   : > { %3425 = vmatpush1.msra.mxu1 %v21019_v63  ;;  %3381 = vmatprep.mubr.f32.mxu0 %v20327_v0 }
 0x10b   : > { %3295 = vmatmul.mubr.f32.gmra.mxu1 %v20600_v19  ;;  %3512 = vmatpush1.msra.mxu0 %v3238_v5  ;;  %v4704_v5 = vld [vmem:[#allocation5 + $0x58] sm:$0xff] }
 0x10c   : > { %3458 = vmatprep.mubr.f32.mxu1 %v20327_v0  ;;  %3516 = vmatprep.subr.mxu0 %v3244_v7  ;;  %v4703_v7 = vld [vmem:[#allocation5 + $0x50] sm:$0xff] }
 0x10d   : > { %3384 = vmatmul.mubr.f32.gmra.mxu0 %v20623_v32  ;;  %3597 = vmatprep.subr.mxu1 %v21001_v55  ;;  %v21194_v55 = vand.u32 4294901760, %v4315_v53  ;;  %v21250_v12 = vand.u32 4294901760, %v4703_v7 }
 0x10e   : > { %3520 = vmatpush1.msra.mxu0 %v3250_v8  ;;  %3553 = vmatprep.mubr.f32.mxu0 %v20327_v0  ;;  %v21238_v8 = vsub.f32 %v4706_v62, %v21222_v4 }
 0x10f   : > { %3462 = vmatmul.mubr.f32.vlgmr.msra.gmra.mxu1 %v20636_v33  ;;  %3680 = vmatprep.subr.mxu0 %v21085_v17  ;;  %v4317_v58 = vsub.f32 %v4315_v53, %v21194_v55  ;;  %v21278_v22 = vsub.f32 %v4703_v7, %v21250_v12 }
 0x110   : > { %3467 = vmatprep.mubr.f32.mxu1 %v20327_v0  ;;  %3599 = vmatpush1.msra.mxu1 %v21008_v59  ;;  %v4707_v59 = vld [vmem:[#allocation5 + $0x70] sm:$0xff]  ;;  %25703 = vst [vmem:[#allocation16_spill] sm:$0xff] %v21238_v8  ;;  %v21261_v15 = vand.u32 4294901760, %v21238_v8 }
 0x111   : > { %3555 = vmatmul.mubr.f32.vlgmr.msra.gmra.mxu0 %v20598_v18  ;;  %3601 = vmatprep.subr.mxu1 %v21012_v61  ;;  %v21207_v61 = vand.u32 4294901760, %v4708_v57  ;;  %v21213_v1 = vand.u32 4294901760, %v4707_v59  ;;  %25706 = vst [vmem:[#allocation19_spill] sm:$0xff] %v21278_v22 }
 0x112   : > { %3603 = vmatpush1.msra.mxu1 %v21019_v63  ;;  %3560 = vmatprep.mubr.f32.mxu0 %v20327_v0  ;;  %v4318_v63 = vand.u32 4294901760, %v4317_v58 }
 0x113   : > { %3471 = vmatmul.mubr.f32.gmra.mxu1 %v20639_v34  ;;  %3682 = vmatpush1.msra.mxu0 %v21092_v23  ;;  %25699 = vst [vmem:[#allocation12_spill] sm:$0xff] %v21207_v61  ;;  %25700 = vst [vmem:[#allocation13_spill] sm:$0xff] %v21213_v1  ;;  %v21220_v3 = vsub.f32 %v4708_v57, %v21207_v61  ;;  %v21227_v6 = vsub.f32 %v4707_v59, %v21213_v1  ;;  %v21374_v59 = vand.u32 4294901760, %v4695_v49 }
 0x114   : > { %3636 = vmatprep.mubr.f32.mxu1 %v20327_v0  ;;  %3684 = vmatprep.subr.mxu0 %v21096_v24 }
 0x115   : > { %3562 = vmatmul.mubr.f32.gmra.mxu0 %v20600_v19  ;;  %3775 = vmatprep.subr.mxu1 %v3774_v40  ;;  %25701 = vst [vmem:[#allocation14_spill] sm:$0xff] %v21220_v3  ;;  %25702 = vst [vmem:[#allocation15_spill] sm:$0xff] %v21227_v6  ;;  %v21245_v10 = vand.u32 4294901760, %v21227_v6 }
 0x116   : > { %3686 = vmatpush1.msra.mxu0 %v21103_v26  ;;  %3719 = vmatprep.mubr.f32.mxu0 %v20327_v0  ;;  %25728 = vst [vmem:[#allocation41_spill] sm:$0xff] %v21374_v59 }
 0x117   : > { %3638 = vmatmul.mubr.f32.vlgmr.msra.gmra.mxu1 %v20598_v18  ;;  %3871 = vmatprep.subr.mxu0 %v21099_v25  ;;  %v4824_v20 = vsub.f32 %v21227_v6, %v21245_v10  ;;  %v4831_v25 = vsub.f32 %v21238_v8, %v21261_v15 }
 0x118   : > { %3643 = vmatprep.mubr.f32.mxu1 %v20327_v0  ;;  %3781 = vmatpush1.msra.mxu1 %v3780_v43  ;;  %v4696_v43 = vld [vmem:[#allocation5 + $0x18] sm:$0xff] }
 0x119   : > { %3725 = vmatmul.mubr.f32.vlgmr.msra.gmra.mxu0 %v20657_v48  ;;  %3787 = vmatprep.subr.mxu1 %v3786_v45 }
 0x11a   : > { %3793 = vmatpush1.msra.mxu1 %v3792_v46  ;;  %3730 = vmatprep.mubr.f32.mxu0 %v20327_v0 }
 0x11b   : > { %3645 = vmatmul.mubr.f32.gmra.mxu1 %v20600_v19  ;;  %3874 = vmatpush1.msra.mxu0 %v21111_v27 }
 0x11c   : > { %3826 = vmatprep.mubr.f32.mxu1 %v20327_v0  ;;  %3877 = vmatprep.subr.mxu0 %v21117_v35  ;;  %v4698_v35 = vld [vmem:[#allocation5 + $0x28] sm:$0xff] }
 0x11d   : > { %3736 = vmatmul.mubr.f32.gmra.mxu0 %v20667_v60  ;;  %3959 = vmatprep.subr.mxu1 %v21085_v17  ;;  %v21326_v41 = vand.u32 4294901760, %v4698_v35 }
 0x11e   : > { %3880 = vmatpush1.msra.mxu0 %v21122_v36  ;;  %3913 = vmatprep.mubr.f32.mxu0 %v20327_v0 }
 0x11f   : > { %3828 = vmatmul.mubr.f32.vlgmr.msra.gmra.mxu1 %v20598_v18  ;;  %4048 = vmatprep.subr.mxu0 %v3772_v28  ;;  %25716 = vst [vmem:[#allocation29_spill] sm:$0xff] %v21326_v41 }
 0x120   : > { %3833 = vmatprep.mubr.f32.mxu1 %v20327_v0  ;;  %3961 = vmatpush1.msra.mxu1 %v21092_v23 }
 0x121   : > { %3916 = vmatmul.mubr.f32.vlgmr.msra.gmra.mxu0 %v20620_v31  ;;  %3963 = vmatprep.subr.mxu1 %v21096_v24 }
 0x122   : > { %3965 = vmatpush1.msra.mxu1 %v21103_v26  ;;  %3921 = vmatprep.mubr.f32.mxu0 %v20327_v0 }
 0x123   : > { %3835 = vmatmul.mubr.f32.gmra.mxu1 %v20600_v19  ;;  %4052 = vmatpush1.msra.mxu0 %v3778_v37  ;;  %v21308_v37 = vand.u32 4294901760, %v21278_v22 }
 0x124   : > { %3998 = vmatprep.mubr.f32.mxu1 %v20327_v0  ;;  %4056 = vmatprep.subr.mxu0 %v3784_v29 }
 0x125   : > { %3924 = vmatmul.mubr.f32.gmra.mxu0 %v20623_v32  ;;  %4137 = vmatprep.subr.mxu1 %v21085_v17  ;;  %v4700_v17 = vld [vmem:[#allocation5 + $0x38] sm:$0xff]  ;;  %25711 = vst [vmem:[#allocation24_spill] sm:$0xff] %v21308_v37  ;;  %v4852_v44 = vsub.f32 %v21278_v22, %v21308_v37 }
 0x126   : > { %4060 = vmatpush1.msra.mxu0 %v3790_v30  ;;  %4093 = vmatprep.mubr.f32.mxu0 %v20327_v0  ;;  %v21294_v27 = vand.u32 4294901760, %v4700_v17  ;;  %v4697_v30 = vld [vmem:[#allocation5 + $0x20] sm:$0xff] }
 0x127   : > { %4002 = vmatmul.mubr.f32.vlgmr.msra.gmra.mxu1 %v20636_v33  ;;  %16886 = vmatprep.subr.mxu0 %v21159_v47  ;;  %v21342_v46 = vand.u32 4294901760, %v4697_v30 }
 0x128   : > { %4007 = vmatprep.mubr.f32.mxu1 %v20327_v0  ;;  %4139 = vmatpush1.msra.mxu1 %v21092_v23  ;;  %v4699_v23 = vld [vmem:[#allocation5 + $0x30] sm:$0xff]  ;;  %v21324_v40 = vsub.f32 %v4700_v17, %v21294_v27 }
 0x129   : > { %4095 = vmatmul.mubr.f32.vlgmr.msra.gmra.mxu0 %v20598_v18  ;;  %4141 = vmatprep.subr.mxu1 %v21096_v24  ;;  %v21310_v38 = vand.u32 4294901760, %v4699_v23  ;;  %25720 = vst [vmem:[#allocation33_spill] sm:$0xff] %v21342_v46  ;;  %v21372_v58 = vsub.f32 %v4697_v30, %v21342_v46 }
 0x12a   : > { %4143 = vmatpush1.msra.mxu1 %v21103_v26  ;;  %4100 = vmatprep.mubr.f32.mxu0 %v20327_v0  ;;  %25715 = vst [vmem:[#allocation28_spill] sm:$0xff] %v21324_v40 }
 0x12b   : > { %4011 = vmatmul.mubr.f32.gmra.mxu1 %v20639_v34  ;;  %16893 = vmatprep.subr.mxu1 %v4311_v56  ;;  %25712 = vst [vmem:[#allocation25_spill] sm:$0xff] %v21310_v38  ;;  %v21340_v45 = vsub.f32 %v4699_v23, %v21310_v38  ;;  %25727 = vst [vmem:[#allocation40_spill] sm:$0xff] %v21372_v58  ;;  %v21403_v23 = vand.u32 4294901760, %v21372_v58 }
 0x12c   : > { %4176 = vmatprep.mubr.f32.mxu1 %v20327_v0  ;;  %16887 = vmatpush3.msra.mxu0 %v21159_v47 }
 0x12d   : > { %4102 = vmatmul.mubr.f32.gmra.mxu0 %v20600_v19  ;;  %16888 = vmatprep.subr.mxu0 %v21173_v51  ;;  %25719 = vst [vmem:[#allocation32_spill] sm:$0xff] %v21340_v45  ;;  %v21369_v57 = vand.u32 4294901760, %v21340_v45  ;;  %25734 = vst [vmem:[#allocation47_spill] sm:$0xff] %v21403_v23 }
 0x12e   : > { %16889 = vmatpush3.msra.mxu0 %v21173_v51  ;;  %16890 = vmatprep.mubr.f32.mxu0 %v20657_v48  ;;  %v21229_v48 = vand.u32 4294901760, %v4705_v2 }
 0x12f   : > { %4178 = vmatmul.mubr.f32.vlgmr.msra.gmra.mxu1 %v20598_v18  ;;  %16900 = vmatprep.subr.mxu0 %v21167_v50  ;;  %25726 = vst [vmem:[#allocation39_spill] sm:$0xff] %v21369_v57 }
 0x130   : > { %4183 = vmatprep.mubr.f32.mxu1 %v20327_v0  ;;  %16894 = vmatpush3.msra.mxu1 %v4311_v56  ;;  %v21235_v0 = vand.u32 4294901760, %v21220_v3  ;;  %v21248_v11 = vsub.f32 %v4705_v2, %v21229_v48  ;;  %v21365_v56 = vand.u32 4294901760, %v4852_v44 }
 0x131   : > { %16895 = vmatprep.subr.mxu1 %v4318_v63  ;;  %16891 = vmatmul.mubr.f32.vlgmr.msra.gmra.mxu0 %v20667_v60  ;;  %v21240_v60 = vand.u32 4294901760, %v4704_v5 }
 0x132   : > { %16896 = vmatpush3.msra.mxu1 %v4318_v63  ;;  %16901 = vmatpush3.msra.mxu0 %v21167_v50  ;;  %25704 = vst [vmem:[#allocation17_spill] sm:$0xff] %v21248_v11  ;;  %v21275_v21 = vand.u32 4294901760, %v21248_v11  ;;  %25725 = vst [vmem:[#allocation38_spill] sm:$0xff] %v21365_v56  ;;  %v4693_v63 = vld [vmem:[#allocation5] sm:$0xff] }
 0x133   : > { %4185 = vmatmul.mubr.f32.gmra.mxu1 %v20600_v19  ;;  %16907 = vmatprep.subr.mxu1 %v21159_v47  ;;  %v21264_v16 = vsub.f32 %v4704_v5, %v21240_v60 }
 0x134   : > { %16897 = vmatprep.mubr.f32.mxu1 %v20598_v18  ;;  %16902 = vmatprep.subr.mxu0 %v4315_v53  ;;  %v4838_v36 = vsub.f32 %v21248_v11, %v21275_v21 }
 0x135   : > { %16903 = vmatpush3.msra.mxu0 %v4315_v53  ;;  %16904 = vmatprep.mubr.f32.mxu0 %v20620_v31  ;;  %v4817_v31 = vsub.f32 %v21220_v3, %v21235_v0  ;;  %25705 = vst [vmem:[#allocation18_spill] sm:$0xff] %v21264_v16  ;;  %v21292_v26 = vand.u32 4294901760, %v21264_v16  ;;  %v21358_v53 = vand.u32 4294901760, %v4696_v43 }
 0x136   : > { %16905 = vmatmul.mubr.f32.vlgmr.msra.gmra.mxu0 %v20623_v32  ;;  %16914 = vmatprep.subr.mxu0 %v21179_v52  ;;  %v21268_v32 = vand.u32 4294901760, %v4701_v13 }
 0x137   : > { %16898 = vmatmul.mubr.f32.vlgmr.msra.gmra.mxu1 %v20600_v19  ;;  %16915 = vmatpush3.msra.mxu0 %v21179_v52  ;;  %v21287_v24 = vand.u32 4294901760, %v4817_v31  ;;  %v4845_v39 = vsub.f32 %v21264_v16, %v21292_v26  ;;  %v21356_v52 = vsub.f32 %v4698_v35, %v21326_v41  ;;  %25724 = vst [vmem:[#allocation37_spill] sm:$0xff] %v21358_v53  ;;  %v21408_v35 = vand.u32 4294901760, %v4693_v63 }
 0x138   : > { %16908 = vmatpush3.msra.mxu1 %v21159_v47  ;;  %16911 = vmatprep.mubr.f32.mxu1 %v20636_v33  ;;  %v21283_v33 = vsub.f32 %v4702_v9, %v21254_v14  ;;  %v21299_v28 = vsub.f32 %v4701_v13, %v21268_v32  ;;  %v21388_v9 = vsub.f32 %v4696_v43, %v21358_v53 }
 0x139   : > { %16909 = vmatprep.subr.mxu1 %v21173_v51  ;;  %16916 = vmatprep.subr.mxu0 %v21194_v55  ;;  %25708 = vst [vmem:[#allocation21_spill] sm:$0xff] %v21287_v24  ;;  %v21349_v50 = vand.u32 4294901760, %v4845_v39  ;;  %25723 = vst [vmem:[#allocation36_spill] sm:$0xff] %v21356_v52  ;;  %v21385_v7 = vand.u32 4294901760, %v21356_v52 }
 0x13a   : > { %16910 = vmatpush3.msra.mxu1 %v21173_v51  ;;  %16917 = vmatpush3.msra.mxu0 %v21194_v55  ;;  %25707 = vst [vmem:[#allocation20_spill] sm:$0xff] %v21283_v33  ;;  %25709 = vst [vmem:[#allocation22_spill] sm:$0xff] %v21299_v28  ;;  %v21315_v29 = vand.u32 4294901760, %v21283_v33  ;;  %v21331_v42 = vand.u32 4294901760, %v21299_v28  ;;  %v4694_v55 = vld [vmem:[#allocation5 + $0x8] sm:$0xff]  ;;  %v21419_v43 = vand.u32 4294901760, %v21388_v9 }
 0x13b   : > { %16921 = vmatprep.subr.mxu1 %v21159_v47  ;;  %16912 = vmatmul.mubr.f32.vlgmr.msra.gmra.mxu1 %v20639_v34  ;;  %v21303_v34 = vand.u32 4294901760, %v4824_v20  ;;  %25721 = vst [vmem:[#allocation34_spill] sm:$0xff] %v21349_v50  ;;  %25730 = vst [vmem:[#allocation43_spill] sm:$0xff] %v21385_v7  ;;  %v21390_v13 = vand.u32 4294901760, %v4694_v55  ;;  %v4880_v20 = vsub.f32 %v21340_v45, %v21369_v57 }
 0x13c   : > { %16922 = vmatpush3.msra.mxu1 %v21159_v47  ;;  %16925 = vmatprep.mubr.f32.mxu1 %v20598_v18  ;;  %25713 = vst [vmem:[#allocation26_spill] sm:$0xff] %v21315_v29  ;;  %25717 = vst [vmem:[#allocation30_spill] sm:$0xff] %v21331_v42  ;;  %v4859_v47 = vsub.f32 %v21283_v33, %v21315_v29  ;;  %v4866_v54 = vsub.f32 %v21299_v28, %v21331_v42 }
 0x13d   : > { %16923 = vmatprep.subr.mxu1 %v21173_v51  ;;  %16918 = vmatprep.mubr.f32.mxu0 %v20598_v18  ;;  %25710 = vst [vmem:[#allocation23_spill] sm:$0xff] %v21303_v34  ;;  %v21319_v18 = vand.u32 4294901760, %v4831_v25  ;;  %25731 = vst [vmem:[#allocation44_spill] sm:$0xff] %v21388_v9  ;;  %v21406_v25 = vsub.f32 %v4695_v49, %v21374_v59  ;;  %v4887_v39 = vsub.f32 %v21356_v52, %v21385_v7 }
 0x13e   : > { %16924 = vmatpush3.msra.mxu1 %v21173_v51  ;;  %16919 = vmatmul.mubr.f32.vlgmr.msra.gmra.mxu0 %v20600_v19  ;;  %v21353_v51 = vand.u32 4294901760, %v21324_v40  ;;  %v21377_v62 = vand.u32 4294901760, %v4859_v47  ;;  %25732 = vst [vmem:[#allocation45_spill] sm:$0xff] %v21390_v13  ;;  %v21393_v31 = vand.u32 4294901760, %v4866_v54  ;;  %25736 = vst [vmem:[#allocation49_spill] sm:$0xff] %v21408_v35  ;;  %v21422_v44 = vsub.f32 %v4694_v55, %v21390_v13 }
 0x13f   : > { %16963 = vmatprep.subr.mxu1 %v21287_v24  ;;  %16926 = vmatmul.mubr.f32.vlgmr.msra.gmra.mxu1 %v20600_v19  ;;  %25714 = vst [vmem:[#allocation27_spill] sm:$0xff] %v21319_v18  ;;  %v21334_v19 = vand.u32 4294901760, %v4838_v36  ;;  %25735 = vst [vmem:[#allocation48_spill] sm:$0xff] %v21406_v25  ;;  %v21429_v49 = vand.u32 4294901760, %v4880_v20  ;;  %v4894_v54 = vsub.f32 %v21372_v58, %v21403_v23  ;;  %v21443_v20 = vand.u32 4294901760, %v4887_v39 }
 0x140   : > { %16964 = vmatpush3.msra.mxu1 %v21287_v24  ;;  %16928 = vmatprep.subr.mxu0 %v21207_v61  ;;  %25722 = vst [vmem:[#allocation35_spill] sm:$0xff] %v21353_v51  ;;  %25729 = vst [vmem:[#allocation42_spill] sm:$0xff] %v21377_v62  ;;  %v4873_v5 = vsub.f32 %v21324_v40, %v21353_v51  ;;  %v21438_v55 = vsub.f32 %v4693_v63, %v21408_v35 }
 0x141   : > { %16965 = vmatprep.subr.mxu1 %v21303_v34  ;;  %25718 = vst [vmem:[#allocation31_spill] sm:$0xff] %v21334_v19  ;;  %16929 = vmatpush3.msra.mxu0 %v21207_v61  ;;  %25733 = vst [vmem:[#allocation46_spill] sm:$0xff] %v21393_v31 }
 0x142   : > { %16966 = vmatpush3.msra.mxu1 %v21303_v34  ;;  %16930 = vmatprep.subr.mxu0 %v21213_v1  ;;  %v21413_v30 = vand.u32 4294901760, %v4873_v5  ;;  %25738 = vst [vmem:[#allocation51_spill] sm:$0xff] %v21419_v43  ;;  %25739 = vst [vmem:[#allocation52_spill] sm:$0xff] %v21422_v44  ;;  %v21435_v5 = vand.u32 4294901760, %v21406_v25 }
 0x143   : > { %16967 = vmatprep.subr.mxu1 %v21319_v18  ;;  %16931 = vmatpush3.msra.mxu0 %v21213_v1  ;;  %25741 = vst [vmem:[#allocation54_spill] sm:$0xff] %v21429_v49  ;;  %25743 = vst [vmem:[#allocation56_spill] sm:$0xff] %v21443_v20 }
 0x144   : > { %16968 = vmatpush3.msra.mxu1 %v21319_v18  ;;  %16932 = vmatprep.subr.mxu0 %v21222_v4  ;;  %25737 = vst [vmem:[#allocation50_spill] sm:$0xff] %v21413_v30  ;;  %25742 = vst [vmem:[#allocation55_spill] sm:$0xff] %v21435_v5  ;;  %v4908_v39 = vsub.f32 %v21406_v25, %v21435_v5 }
 0x145   : > { %16969 = vmatprep.subr.mxu1 %v21334_v19  ;;  %16933 = vmatpush3.msra.mxu0 %v21222_v4 }
 0x146   : > { %16970 = vmatpush3.msra.mxu1 %v21334_v19  ;;  %16934 = vmatprep.subr.mxu0 %v21229_v48  ;;  %v21462_v19 = vand.u32 4294901760, %v21438_v55 }
 0x147   : > { %v486_v2 = vpop.f32.mrf.mxu0  ;;  %16971 = vmatprep.subr.mxu1 %v21349_v50  ;;  %16935 = vmatpush3.msra.mxu0 %v21229_v48 }
 0x148   : > { %16972 = vmatpush3.msra.mxu1 %v21349_v50  ;;  %16936 = vmatprep.subr.mxu0 %v21240_v60  ;;  %v21449_v50 = vand.u32 4294901760, %v21422_v44  ;;  %25746 = vst [vmem:[#allocation59_spill] sm:$0xff] %v21462_v19 }
 0x149   : > { %v21396_v17 = vpop.f32.mrf.mxu0  ;;  %16973 = vmatprep.subr.mxu1 %v21365_v56  ;;  %16937 = vmatpush3.msra.mxu0 %v21240_v60 }
 0x14a   : > { %16974 = vmatpush3.msra.mxu1 %v21365_v56  ;;  %16938 = vmatprep.subr.mxu0 %v21250_v12  ;;  %v4901_v56 = vsub.f32 %v21388_v9, %v21419_v43  ;;  %25744 = vst [vmem:[#allocation57_spill] sm:$0xff] %v21449_v50 }
 0x14b   : > { %v497_v36 = vpop.f32.mrf.mxu0  ;;  %16975 = vmatprep.subr.mxu1 %v21377_v62  ;;  %16939 = vmatpush3.msra.mxu0 %v21250_v12 }
 0x14c   : > { %16976 = vmatpush3.msra.mxu1 %v21377_v62  ;;  %16940 = vmatprep.subr.mxu0 %v21254_v14  ;;  %v21469_v34 = vand.u32 4294901760, %v4901_v56  ;;  %v4922_v56 = vsub.f32 %v21438_v55, %v21462_v19 }
 0x14d   : > { %v21426_v47 = vpop.f32.mrf.mxu0  ;;  %16977 = vmatprep.subr.mxu1 %v21393_v31  ;;  %16941 = vmatpush3.msra.mxu0 %v21254_v14 }
 0x14e   : > { %25740 = vst [vmem:[#allocation53_spill] sm:$0xff] %v21426_v47  ;;  %16978 = vmatpush3.msra.mxu1 %v21393_v31  ;;  %16942 = vmatprep.subr.mxu0 %v21268_v32  ;;  %v21456_v31 = vand.u32 4294901760, %v4894_v54  ;;  %25747 = vst [vmem:[#allocation60_spill] sm:$0xff] %v21469_v34  ;;  %v4915_v54 = vsub.f32 %v21422_v44, %v21449_v50 }
 0x14f   : > { %v589_v62 = vpop.f32.mrf.mxu1  ;;  %16979 = vmatprep.subr.mxu1 %v21413_v30  ;;  %16943 = vmatpush3.msra.mxu0 %v21268_v32 }
 0x150   : > { %v677_v47 = vpop.f32.mrf.mxu0  ;;  %16980 = vmatpush3.msra.mxu1 %v21413_v30  ;;  %16944 = vmatprep.subr.mxu0 %v21294_v27  ;;  %25745 = vst [vmem:[#allocation58_spill] sm:$0xff] %v21456_v31  ;;  %v590_v5 = vadd.f32 %v589_v62, %v486_v2  ;;  %v21489_v2 = vand.u32 4294901760, %v4915_v54 }
 0x151   : > { %v21453_v63 = vpop.f32.mrf.mxu1  ;;  %16981 = vmatprep.subr.mxu1 %v21429_v49  ;;  %16945 = vmatpush3.msra.mxu0 %v21294_v27 }
 0x152   : > { %v21464_v18 = vpop.f32.mrf.mxu0  ;;  %16982 = vmatpush3.msra.mxu1 %v21429_v49  ;;  %16946 = vmatprep.subr.mxu0 %v21310_v38  ;;  %v21479_v49 = vand.u32 4294901760, %v4908_v39  ;;  %25751 = vst [vmem:[#allocation64_spill] sm:$0xff] %v21489_v2  ;;  %v678_v39 = vadd.f32 %v677_v47, %v590_v5 }
 0x153   : > { %v596_v30 = vpop.f32.mrf.mxu1  ;;  %16983 = vmatprep.subr.mxu1 %v21443_v20  ;;  %16947 = vmatpush3.msra.mxu0 %v21310_v38 }
 0x154   : > { %v685_v24 = vpop.f32.mrf.mxu0  ;;  %16984 = vmatpush3.msra.mxu1 %v21443_v20  ;;  %16948 = vmatprep.subr.mxu0 %v21326_v41  ;;  %25749 = vst [vmem:[#allocation62_spill] sm:$0xff] %v21479_v49  ;;  %v597_v20 = vadd.f32 %v596_v30, %v497_v36 }
 0x155   : > { %v21476_v43 = vpop.f32.mrf.mxu1  ;;  %16985 = vmatprep.subr.mxu1 %v21456_v31  ;;  %16949 = vmatpush3.msra.mxu0 %v21326_v41 }
 0x156   : > { %25748 = vst [vmem:[#allocation61_spill] sm:$0xff] %v21476_v43  ;;  %v21484_v23 = vpop.f32.mrf.mxu0  ;;  %16986 = vmatpush3.msra.mxu1 %v21456_v31  ;;  %16950 = vmatprep.subr.mxu0 %v21342_v46  ;;  %v21497_v31 = vand.u32 4294901760, %v4922_v56  ;;  %v686_v30 = vadd.f32 %v685_v24, %v597_v20 }
 0x157   : > { %25750 = vst [vmem:[#allocation63_spill] sm:$0xff] %v21484_v23  ;;  %v763_v62 = vpop.f32.mrf.mxu1  ;;  %16987 = vmatprep.subr.mxu1 %v21469_v34  ;;  %16951 = vmatpush3.msra.mxu0 %v21342_v46 }
 0x158   : > { %v856_v43 = vpop.f32.mrf.mxu0  ;;  %16988 = vmatpush3.msra.mxu1 %v21469_v34  ;;  %16952 = vmatprep.subr.mxu0 %v21358_v53  ;;  %25752 = vst [vmem:[#allocation65_spill] sm:$0xff] %v21497_v31  ;;  %v764_v23 = vadd.f32 %v763_v62, %v678_v39 }
 0x159   : > { %v21494_v19 = vpop.f32.mrf.mxu1  ;;  %16989 = vmatprep.subr.mxu1 %v21479_v49  ;;  %16953 = vmatpush3.msra.mxu0 %v21358_v53 }
 0x15a   : > { %v21500_v54 = vpop.f32.mrf.mxu0  ;;  %16990 = vmatpush3.msra.mxu1 %v21479_v49  ;;  %16954 = vmatprep.subr.mxu0 %v21374_v59  ;;  %v857_v56 = vadd.f32 %v856_v43, %v764_v23 }
 0x15b   : > { %v772_v36 = vpop.f32.mrf.mxu1  ;;  %16991 = vmatprep.subr.mxu1 %v21489_v2  ;;  %16955 = vmatpush3.msra.mxu0 %v21374_v59 }
 0x15c   : > { %v863_v47 = vpop.f32.mrf.mxu0  ;;  %16992 = vmatpush3.msra.mxu1 %v21489_v2  ;;  %16956 = vmatprep.subr.mxu0 %v21390_v13  ;;  %v773_v62 = vadd.f32 %v772_v36, %v686_v30 }
 0x15d   : > { %v21508_v5 = vpop.f32.mrf.mxu1  ;;  %16993 = vmatprep.subr.mxu1 %v21497_v31  ;;  %16957 = vmatpush3.msra.mxu0 %v21390_v13 }
 0x15e   : > { %25753 = vst [vmem:[#allocation66_spill] sm:$0xff] %v21508_v5  ;;  %16994 = vmatpush3.msra.mxu1 %v21497_v31  ;;  %16958 = vmatprep.subr.mxu0 %v21408_v35  ;;  %v21514_v39 = vpop.f32.mrf.mxu0  ;;  %v864_v23 = vadd.f32 %v863_v47, %v773_v62 }
 0x15f   : > { %25754 = vst [vmem:[#allocation67_spill] sm:$0xff] %v21514_v39  ;;  %v939_v24 = vpop.f32.mrf.mxu1  ;;  %17033 = vmatprep.subr.mxu1 %v21207_v61  ;;  %16959 = vmatpush3.msra.mxu0 %v21408_v35 }
 0x160   : > { %v940_v20 = vadd.f32 %v939_v24, %v857_v56  ;;  %16998 = vmatprep.subr.mxu0 %v21220_v3 }
 0x161   : > { %v21519_v2 = vpop.f32.mrf.mxu1  ;;  %v21521_v49 = vpop.f32.mrf.mxu0 }
 0x162   : > { %v21523_v43 = vand.u32 4294901760, %v940_v20 }
 0x163   : > { %v946_v36 = vpop.f32.mrf.mxu1  ;;  %v21525_v30 = vpop.f32.mrf.mxu0 }
 0x164   : > { %25755 = vst [vmem:[#allocation68_spill] sm:$0xff] %v21525_v30  ;;  %v4794_v31 = vsub.f32 %v940_v20, %v21523_v43  ;;  %v947_v34 = vadd.f32 %v946_v36, %v864_v23  ;;  %16995 = vmatprep.mubr.f32.mxu1 %v21523_v43 }
 0x165   : > { %v21529_v39 = vpop.f32.mrf.mxu1  ;;  %v21531_v56 = vpop.f32.mrf.mxu0 }
 0x166   : > { %25756 = vst [vmem:[#allocation69_spill] sm:$0xff] %v21531_v56  ;;  %v21533_v24 = vand.u32 4294901760, %v947_v34  ;;  %v4795_v5 = vand.u32 4294901760, %v4794_v31 }
 0x167   : > { %v21535_v50 = vpop.f32.mrf.mxu1  ;;  %v21537_v47 = vpop.f32.mrf.mxu0 }
 0x168   : > { %25757 = vst [vmem:[#allocation70_spill] sm:$0xff] %v21535_v50  ;;  %25758 = vst [vmem:[#allocation71_spill] sm:$0xff] %v21537_v47  ;;  %v21540_v62 = vsub.f32 %v947_v34, %v21533_v24  ;;  %16996 = vmatmul.mubr.f32.vlgmr.msra.gmra.mxu1 %v21533_v24  ;;  %v4796_v20 = vsub.f32 %v4794_v31, %v4795_v5 }
 0x169   : > { %17034 = vmatpush3.msra.mxu1 %v21207_v61  ;;  %17065 = vmatprep.mubr.f32.mxu1 %v4795_v5  ;;  %v21544_v23 = vpop.f32.mrf.mxu1  ;;  %v21546_v36 = vpop.f32.mrf.mxu0 }
 0x16a   : > { %25759 = vst [vmem:[#allocation72_spill] sm:$0xff] %v21544_v23  ;;  %v25430_v30 = vand.u32 4294901760, %v21540_v62  ;;  %17035 = vmatprep.subr.mxu1 %v21213_v1  ;;  %v4797_v56 = vand.u32 4294901760, %v4796_v20 }
 0x16b   : > { %17036 = vmatpush3.msra.mxu1 %v21213_v1  ;;  %v21551_v47 = vpop.f32.mrf.mxu1  ;;  %v21553_v34 = vpop.f32.mrf.mxu0 }
 0x16c   : > { %25760 = vst [vmem:[#allocation73_spill] sm:$0xff] %v21551_v47  ;;  %25761 = vst [vmem:[#allocation74_spill] sm:$0xff] %v21553_v34  ;;  %v4806_v50 = vsub.f32 %v21540_v62, %v25430_v30  ;;  %17037 = vmatprep.subr.mxu1 %v21222_v4  ;;  %16960 = vmatprep.mubr.f32.mxu0 %v4797_v56 }
 0x16d   : > { %17038 = vmatpush3.msra.mxu1 %v21222_v4  ;;  %v21560_v5 = vpop.f32.mrf.mxu1  ;;  %v21562_v23 = vpop.f32.mrf.mxu0 }
 0x16e   : > { %25762 = vst [vmem:[#allocation75_spill] sm:$0xff] %v21560_v5  ;;  %25763 = vst [vmem:[#allocation76_spill] sm:$0xff] %v21562_v23  ;;  %17039 = vmatprep.subr.mxu1 %v21229_v48  ;;  %v4807_v20 = vand.u32 4294901760, %v4806_v50 }
 0x16f   : > { %17040 = vmatpush3.msra.mxu1 %v21229_v48  ;;  %v21566_v47 = vpop.f32.mrf.mxu1  ;;  %v21568_v34 = vpop.f32.mrf.mxu0 }
 0x170   : > { %25764 = vst [vmem:[#allocation77_spill] sm:$0xff] %v21568_v34  ;;  %17041 = vmatprep.subr.mxu1 %v21240_v60  ;;  %16961 = vmatmul.mubr.f32.vlgmr.msra.gmra.mxu0 %v4807_v20 }
 0x171   : > { %16999 = vmatpush3.msra.mxu0 %v21220_v3  ;;  %17042 = vmatpush3.msra.mxu1 %v21240_v60  ;;  %v21573_v56 = vpop.f32.mrf.mxu1  ;;  %v21575_v30 = vpop.f32.mrf.mxu0 }
 0x172   : > { %25765 = vst [vmem:[#allocation78_spill] sm:$0xff] %v21573_v56  ;;  %17000 = vmatprep.subr.mxu0 %v21227_v6  ;;  %17030 = vmatprep.mubr.f32.mxu0 %v4794_v31 }
 0x173   : > { %17043 = vmatprep.subr.mxu1 %v21250_v12  ;;  %17001 = vmatpush3.msra.mxu0 %v21227_v6  ;;  %v21580_v50 = vpop.f32.mrf.mxu1  ;;  %v21582_v34 = vpop.f32.mrf.mxu0 }
 0x174   : > { %25766 = vst [vmem:[#allocation79_spill] sm:$0xff] %v21580_v50  ;;  %25767 = vst [vmem:[#allocation80_spill] sm:$0xff] %v21582_v34  ;;  %17044 = vmatpush3.msra.mxu1 %v21250_v12  ;;  %17002 = vmatprep.subr.mxu0 %v21238_v8 }
 0x175   : > { %17045 = vmatprep.subr.mxu1 %v21254_v14  ;;  %17003 = vmatpush3.msra.mxu0 %v21238_v8  ;;  %v21588_v20 = vpop.f32.mrf.mxu1  ;;  %v21590_v5 = vpop.f32.mrf.mxu0 }
 0x176   : > { %25768 = vst [vmem:[#allocation81_spill] sm:$0xff] %v21588_v20  ;;  %25769 = vst [vmem:[#allocation82_spill] sm:$0xff] %v21590_v5  ;;  %17046 = vmatpush3.msra.mxu1 %v21254_v14  ;;  %17004 = vmatprep.subr.mxu0 %v21248_v11 }
 0x177   : > { %17047 = vmatprep.subr.mxu1 %v21268_v32  ;;  %17005 = vmatpush3.msra.mxu0 %v21248_v11  ;;  %v21596_v31 = vpop.f32.mrf.mxu1  ;;  %v21598_v34 = vpop.f32.mrf.mxu0 }
 0x178   : > { %25770 = vst [vmem:[#allocation83_spill] sm:$0xff] %v21598_v34  ;;  %17048 = vmatpush3.msra.mxu1 %v21268_v32  ;;  %17006 = vmatprep.subr.mxu0 %v21264_v16 }
 0x179   : > { %17049 = vmatprep.subr.mxu1 %v21294_v27  ;;  %17007 = vmatpush3.msra.mxu0 %v21264_v16  ;;  %v21604_v20 = vpop.f32.mrf.mxu1  ;;  %v21606_v56 = vpop.f32.mrf.mxu0 }
 0x17a   : > { %25771 = vst [vmem:[#allocation84_spill] sm:$0xff] %v21604_v20  ;;  %25772 = vst [vmem:[#allocation85_spill] sm:$0xff] %v21606_v56  ;;  %17050 = vmatpush3.msra.mxu1 %v21294_v27  ;;  %17008 = vmatprep.subr.mxu0 %v21278_v22 }
 0x17b   : > { %17051 = vmatprep.subr.mxu1 %v21310_v38  ;;  %17009 = vmatpush3.msra.mxu0 %v21278_v22  ;;  %v21612_v34 = vpop.f32.mrf.mxu1  ;;  %v21614_v5 = vpop.f32.mrf.mxu0 }
 0x17c   : > { %25773 = vst [vmem:[#allocation86_spill] sm:$0xff] %v21612_v34  ;;  %25774 = vst [vmem:[#allocation87_spill] sm:$0xff] %v21614_v5  ;;  %17052 = vmatpush3.msra.mxu1 %v21310_v38  ;;  %17010 = vmatprep.subr.mxu0 %v21283_v33 }
 0x17d   : > { %17053 = vmatprep.subr.mxu1 %v21326_v41  ;;  %17011 = vmatpush3.msra.mxu0 %v21283_v33  ;;  %v21620_v56 = vpop.f32.mrf.mxu1  ;;  %v21622_v20 = vpop.f32.mrf.mxu0 }
 0x17e   : > { %25775 = vst [vmem:[#allocation88_spill] sm:$0xff] %v21620_v56  ;;  %25776 = vst [vmem:[#allocation89_spill] sm:$0xff] %v21622_v20  ;;  %17054 = vmatpush3.msra.mxu1 %v21326_v41  ;;  %17012 = vmatprep.subr.mxu0 %v21299_v28 }
 0x17f   : > { %17055 = vmatprep.subr.mxu1 %v21342_v46  ;;  %17013 = vmatpush3.msra.mxu0 %v21299_v28  ;;  %v21628_v5 = vpop.f32.mrf.mxu1  ;;  %v21630_v34 = vpop.f32.mrf.mxu0 }
 0x180   : > { %25777 = vst [vmem:[#allocation90_spill] sm:$0xff] %v21628_v5  ;;  %25778 = vst [vmem:[#allocation91_spill] sm:$0xff] %v21630_v34  ;;  %17056 = vmatpush3.msra.mxu1 %v21342_v46  ;;  %17014 = vmatprep.subr.mxu0 %v21324_v40 }
 0x181   : > { %17057 = vmatprep.subr.mxu1 %v21358_v53  ;;  %17015 = vmatpush3.msra.mxu0 %v21324_v40  ;;  %v21636_v20 = vpop.f32.mrf.mxu1  ;;  %v21638_v56 = vpop.f32.mrf.mxu0 }
 0x182   : > { %25779 = vst [vmem:[#allocation92_spill] sm:$0xff] %v21636_v20  ;;  %25780 = vst [vmem:[#allocation93_spill] sm:$0xff] %v21638_v56  ;;  %17058 = vmatpush3.msra.mxu1 %v21358_v53  ;;  %17016 = vmatprep.subr.mxu0 %v21340_v45 }
 0x183   : > { %17059 = vmatprep.subr.mxu1 %v21374_v59  ;;  %17017 = vmatpush3.msra.mxu0 %v21340_v45  ;;  %v21644_v34 = vpop.f32.mrf.mxu1  ;;  %v21646_v5 = vpop.f32.mrf.mxu0 }
 0x184   : > { %25781 = vst [vmem:[#allocation94_spill] sm:$0xff] %v21644_v34  ;;  %25782 = vst [vmem:[#allocation95_spill] sm:$0xff] %v21646_v5  ;;  %17060 = vmatpush3.msra.mxu1 %v21374_v59  ;;  %17018 = vmatprep.subr.mxu0 %v21356_v52 }
 0x185   : > { %17061 = vmatprep.subr.mxu1 %v21390_v13  ;;  %17019 = vmatpush3.msra.mxu0 %v21356_v52  ;;  %v21652_v20 = vpop.f32.mrf.mxu1  ;;  %v21654_v56 = vpop.f32.mrf.mxu0 }
 0x186   : > { %25783 = vst [vmem:[#allocation96_spill] sm:$0xff] %v21652_v20  ;;  %25784 = vst [vmem:[#allocation97_spill] sm:$0xff] %v21654_v56  ;;  %17062 = vmatpush3.msra.mxu1 %v21390_v13  ;;  %17020 = vmatprep.subr.mxu0 %v21372_v58  ;;  %v25787_v20 = vand.u32 4294901760, %v21540_v62 }
 0x187   : > { %17063 = vmatprep.subr.mxu1 %v21408_v35  ;;  %17021 = vmatpush3.msra.mxu0 %v21372_v58  ;;  %v21660_v5 = vpop.f32.mrf.mxu1  ;;  %v21662_v34 = vpop.f32.mrf.mxu0 }
 0x188   : > { %25785 = vst [vmem:[#allocation98_spill] sm:$0xff] %v21660_v5  ;;  %25786 = vst [vmem:[#allocation99_spill] sm:$0xff] %v21662_v34  ;;  %17064 = vmatpush3.msra.mxu1 %v21408_v35  ;;  %17022 = vmatprep.subr.mxu0 %v21388_v9 }
 0x189   : > { %17066 = vmatmul.mubr.f32.vlgmr.msra.gmra.mxu1 %v25787_v20  ;;  %17103 = vmatprep.subr.mxu1 %v21207_v61  ;;  %v21669_v56 = vpop.f32.mrf.mxu1  ;;  %v21671_v50 = vpop.f32.mrf.mxu0 }
 0x18a   : > { %25788 = vst [vmem:[#allocation100_spill] sm:$0xff] %v21669_v56  ;;  %25789 = vst [vmem:[#allocation101_spill] sm:$0xff] %v21671_v50  ;;  %17023 = vmatpush3.msra.mxu0 %v21388_v9  ;;  %17104 = vmatpush3.msra.mxu1 %v21207_v61 }
 0x18b   : > { %17135 = vmatprep.mubr.f32.mxu1 %v21523_v43  ;;  %17024 = vmatprep.subr.mxu0 %v21406_v25  ;;  %v21677_v34 = vpop.f32.mrf.mxu1  ;;  %v21679_v5 = vpop.f32.mrf.mxu0 }
 0x18c   : > { %25790 = vst [vmem:[#allocation102_spill] sm:$0xff] %v21677_v34  ;;  %25791 = vst [vmem:[#allocation103_spill] sm:$0xff] %v21679_v5  ;;  %17105 = vmatprep.subr.mxu1 %v21213_v1  ;;  %17025 = vmatpush3.msra.mxu0 %v21406_v25 }
 0x18d   : > { %17106 = vmatpush3.msra.mxu1 %v21213_v1  ;;  %17026 = vmatprep.subr.mxu0 %v21422_v44  ;;  %v21685_v20 = vpop.f32.mrf.mxu1  ;;  %v21687_v56 = vpop.f32.mrf.mxu0 }
 0x18e   : > { %25792 = vst [vmem:[#allocation104_spill] sm:$0xff] %v21685_v20  ;;  %25793 = vst [vmem:[#allocation105_spill] sm:$0xff] %v21687_v56  ;;  %17107 = vmatprep.subr.mxu1 %v21222_v4  ;;  %17027 = vmatpush3.msra.mxu0 %v21422_v44 }
 0x18f   : > { %17108 = vmatpush3.msra.mxu1 %v21222_v4  ;;  %17028 = vmatprep.subr.mxu0 %v21438_v55  ;;  %v21693_v5 = vpop.f32.mrf.mxu1  ;;  %v21695_v34 = vpop.f32.mrf.mxu0 }
 0x190   : > { %25794 = vst [vmem:[#allocation106_spill] sm:$0xff] %v21693_v5  ;;  %25795 = vst [vmem:[#allocation107_spill] sm:$0xff] %v21695_v34  ;;  %17109 = vmatprep.subr.mxu1 %v21229_v48  ;;  %17029 = vmatpush3.msra.mxu0 %v21438_v55  ;;  %v592_v5 = vadd.f32 %v21453_v63, %v21396_v17 }
 0x191   : > { %17110 = vmatpush3.msra.mxu1 %v21229_v48  ;;  %17031 = vmatmul.mubr.f32.vlgmr.msra.gmra.mxu0 %v21540_v62  ;;  %v21701_v20 = vpop.f32.mrf.mxu1  ;;  %v21703_v56 = vpop.f32.mrf.mxu0 }
 0x192   : > { %25796 = vst [vmem:[#allocation108_spill] sm:$0xff] %v21701_v20  ;;  %25797 = vst [vmem:[#allocation109_spill] sm:$0xff] %v21703_v56  ;;  %17068 = vmatprep.subr.mxu0 %v21235_v0  ;;  %17111 = vmatprep.subr.mxu1 %v21240_v60  ;;  %v680_v17 = vadd.f32 %v21464_v18, %v592_v5 }
 0x193   : > { %17069 = vmatpush3.msra.mxu0 %v21235_v0  ;;  %17100 = vmatprep.mubr.f32.mxu0 %v21523_v43  ;;  %v21711_v34 = vpop.f32.mrf.mxu1  ;;  %v21713_v50 = vpop.f32.mrf.mxu0 }
 0x194   : > { %25798 = vst [vmem:[#allocation110_spill] sm:$0xff] %v21711_v34  ;;  %25799 = vst [vmem:[#allocation111_spill] sm:$0xff] %v21713_v50  ;;  %17112 = vmatpush3.msra.mxu1 %v21240_v60  ;;  %17070 = vmatprep.subr.mxu0 %v21245_v10  ;;  %v766_v50 = vadd.f32 %v21494_v19, %v680_v17  ;;  %v25825_v34 = vld [vmem:[#allocation23_spill] sm:$0xff] }
 0x195   : > { %17113 = vmatprep.subr.mxu1 %v21250_v12  ;;  %17071 = vmatpush3.msra.mxu0 %v21245_v10  ;;  %v21719_v62 = vpop.f32.mrf.mxu1  ;;  %v2117_v56 = vpop.f32.mrf.mxu0 }
 0x196   : > { %25800 = vst [vmem:[#allocation112_spill] sm:$0xff] %v21719_v62  ;;  %17114 = vmatpush3.msra.mxu1 %v21250_v12  ;;  %17072 = vmatprep.subr.mxu0 %v21261_v15  ;;  %v859_v17 = vadd.f32 %v21500_v54, %v766_v50 }
 0x197   : > { %17115 = vmatprep.subr.mxu1 %v21254_v14  ;;  %17073 = vmatpush3.msra.mxu0 %v21261_v15  ;;  %v21726_v63 = vpop.f32.mrf.mxu1  ;;  %v21728_v43 = vpop.f32.mrf.mxu0 }
 0x198   : > { %25801 = vst [vmem:[#allocation113_spill] sm:$0xff] %v21726_v63  ;;  %25802 = vst [vmem:[#allocation114_spill] sm:$0xff] %v21728_v43  ;;  %17116 = vmatpush3.msra.mxu1 %v21254_v14  ;;  %17074 = vmatprep.subr.mxu0 %v21275_v21 }
 0x199   : > { %17117 = vmatprep.subr.mxu1 %v21268_v32  ;;  %17075 = vmatpush3.msra.mxu0 %v21275_v21  ;;  %v21735_v62 = vpop.f32.mrf.mxu1  ;;  %v21737_v18 = vpop.f32.mrf.mxu0 }
 0x19a   : > { %25803 = vst [vmem:[#allocation115_spill] sm:$0xff] %v21735_v62  ;;  %25804 = vst [vmem:[#allocation116_spill] sm:$0xff] %v21737_v18  ;;  %17118 = vmatpush3.msra.mxu1 %v21268_v32  ;;  %17076 = vmatprep.subr.mxu0 %v21292_v26 }
 0x19b   : > { %17119 = vmatprep.subr.mxu1 %v21294_v27  ;;  %17077 = vmatpush3.msra.mxu0 %v21292_v26  ;;  %v2216_v5 = vpop.f32.mrf.mxu1  ;;  %v21743_v43 = vpop.f32.mrf.mxu0 }
 0x19c   : > { %25805 = vst [vmem:[#allocation117_spill] sm:$0xff] %v21743_v43  ;;  %17120 = vmatpush3.msra.mxu1 %v21294_v27  ;;  %17078 = vmatprep.subr.mxu0 %v21308_v37  ;;  %v2217_v19 = vadd.f32 %v2216_v5, %v2117_v56  ;;  %v942_v43 = vadd.f32 %v21519_v2, %v859_v17 }
 0x19d   : > { %17121 = vmatprep.subr.mxu1 %v21310_v38  ;;  %17079 = vmatpush3.msra.mxu0 %v21308_v37  ;;  %v21750_v62 = vpop.f32.mrf.mxu1  ;;  %v2305_v18 = vpop.f32.mrf.mxu0 }
 0x19e   : > { %25806 = vst [vmem:[#allocation118_spill] sm:$0xff] %v21750_v62  ;;  %17122 = vmatpush3.msra.mxu1 %v21310_v38  ;;  %17080 = vmatprep.subr.mxu0 %v21315_v29  ;;  %v2306_v63 = vadd.f32 %v2305_v18, %v2217_v19  ;;  %v21771_v2 = vand.u32 4294901760, %v942_v43 }
 0x19f   : > { %17123 = vmatprep.subr.mxu1 %v21326_v41  ;;  %17081 = vmatpush3.msra.mxu0 %v21315_v29  ;;  %v21757_v56 = vpop.f32.mrf.mxu1  ;;  %v21759_v54 = vpop.f32.mrf.mxu0 }
 0x1a0   : > { %25807 = vst [vmem:[#allocation119_spill] sm:$0xff] %v21757_v56  ;;  %25808 = vst [vmem:[#allocation120_spill] sm:$0xff] %v21759_v54  ;;  %17124 = vmatpush3.msra.mxu1 %v21326_v41  ;;  %17082 = vmatprep.subr.mxu0 %v21331_v42 }
 0x1a1   : > { %17125 = vmatprep.subr.mxu1 %v21342_v46  ;;  %17083 = vmatpush3.msra.mxu0 %v21331_v42  ;;  %v21765_v50 = vpop.f32.mrf.mxu1  ;;  %v21767_v18 = vpop.f32.mrf.mxu0 }
 0x1a2   : > { %25809 = vst [vmem:[#allocation121_spill] sm:$0xff] %v21765_v50  ;;  %25810 = vst [vmem:[#allocation122_spill] sm:$0xff] %v21767_v18  ;;  %17126 = vmatpush3.msra.mxu1 %v21342_v46  ;;  %17084 = vmatprep.subr.mxu0 %v21353_v51 }
 0x1a3   : > { %17127 = vmatprep.subr.mxu1 %v21358_v53  ;;  %17085 = vmatpush3.msra.mxu0 %v21353_v51  ;;  %v2392_v5 = vpop.f32.mrf.mxu1  ;;  %v21775_v19 = vpop.f32.mrf.mxu0  ;;  %v25834_v51 = vld [vmem:[#allocation61_spill] sm:$0xff] }
 0x1a4   : > { %25811 = vst [vmem:[#allocation123_spill] sm:$0xff] %v21775_v19  ;;  %17128 = vmatpush3.msra.mxu1 %v21358_v53  ;;  %17086 = vmatprep.subr.mxu0 %v21369_v57  ;;  %v21779_v17 = vadd.f32 %v2392_v5, %v2306_v63  ;;  %v21790_v19 = vsub.f32 %v942_v43, %v21771_v2 }
 0x1a5   : > { %17129 = vmatprep.subr.mxu1 %v21374_v59  ;;  %17087 = vmatpush3.msra.mxu0 %v21369_v57  ;;  %v21783_v54 = vpop.f32.mrf.mxu1  ;;  %v21785_v62 = vpop.f32.mrf.mxu0  ;;  %v25833_v57 = vld [vmem:[#allocation53_spill] sm:$0xff] }
 0x1a6   : > { %25812 = vst [vmem:[#allocation124_spill] sm:$0xff] %v21779_v17  ;;  %25813 = vst [vmem:[#allocation125_spill] sm:$0xff] %v21783_v54  ;;  %17130 = vmatpush3.msra.mxu1 %v21374_v59  ;;  %17088 = vmatprep.subr.mxu0 %v21385_v7  ;;  %v25817_v54 = vld [vmem:[#allocation47_spill] sm:$0xff]  ;;  %v25820_v17 = vld [vmem:[#allocation21_spill] sm:$0xff] }
 0x1a7   : > { %25814 = vst [vmem:[#allocation126_spill] sm:$0xff] %v21785_v62  ;;  %17131 = vmatprep.subr.mxu1 %v21390_v13  ;;  %17089 = vmatpush3.msra.mxu0 %v21385_v7  ;;  %v21794_v63 = vpop.f32.mrf.mxu1  ;;  %v21796_v5 = vpop.f32.mrf.mxu0  ;;  %v25819_v62 = vld [vmem:[#allocation51_spill] sm:$0xff] }
 0x1a8   : > { %25815 = vst [vmem:[#allocation127_spill] sm:$0xff] %v21794_v63  ;;  %25816 = vst [vmem:[#allocation128_spill] sm:$0xff] %v21796_v5  ;;  %17132 = vmatpush3.msra.mxu1 %v21390_v13  ;;  %17090 = vmatprep.subr.mxu0 %v25817_v54  ;;  %v25826_v63 = vld [vmem:[#allocation57_spill] sm:$0xff]  ;;  %v25832_v7 = vld [vmem:[#allocation31_spill] sm:$0xff] }
 0x1a9   : > { %17133 = vmatprep.subr.mxu1 %v21408_v35  ;;  %17091 = vmatpush3.msra.mxu0 %v25817_v54  ;;  %v21802_v50 = vpop.f32.mrf.mxu1  ;;  %v2646_v43 = vpop.f32.mrf.mxu0  ;;  %v25830_v54 = vld [vmem:[#allocation59_spill] sm:$0xff] }
 0x1aa   : > { %25818 = vst [vmem:[#allocation129_spill] sm:$0xff] %v21802_v50  ;;  %17134 = vmatpush3.msra.mxu1 %v21408_v35  ;;  %17092 = vmatprep.subr.mxu0 %v25819_v62  ;;  %v25823_v50 = vld [vmem:[#allocation55_spill] sm:$0xff] }
 0x1ab   : > { %17136 = vmatmul.mubr.f32.vlgmr.msra.gmra.mxu1 %v21533_v24  ;;  %17173 = vmatprep.subr.mxu1 %v25820_v17  ;;  %v21808_v5 = vpop.f32.mrf.mxu1  ;;  %v21811_v18 = vpop.f32.mrf.mxu0 }
 0x1ac   : > { %25821 = vst [vmem:[#allocation130_spill] sm:$0xff] %v21808_v5  ;;  %25822 = vst [vmem:[#allocation131_spill] sm:$0xff] %v21811_v18  ;;  %17093 = vmatpush3.msra.mxu0 %v25819_v62  ;;  %17174 = vmatpush3.msra.mxu1 %v25820_v17  ;;  %v25827_v18 = vand.u32 4294901760, %v21790_v19  ;;  %v25829_v62 = vld [vmem:[#allocation27_spill] sm:$0xff] }
 0x1ad   : > { %17205 = vmatprep.mubr.f32.mxu1 %v21771_v2  ;;  %17094 = vmatprep.subr.mxu0 %v25823_v50  ;;  %v21817_v56 = vpop.f32.mrf.mxu1  ;;  %v2657_v20 = vpop.f32.mrf.mxu0 }
 0x1ae   : > { %25824 = vst [vmem:[#allocation132_spill] sm:$0xff] %v21817_v56  ;;  %17175 = vmatprep.subr.mxu1 %v25825_v34  ;;  %17095 = vmatpush3.msra.mxu0 %v25823_v50  ;;  %v5480_v5 = vsub.f32 %v21790_v19, %v25827_v18 }
 0x1af   : > { %17176 = vmatpush3.msra.mxu1 %v25825_v34  ;;  %17096 = vmatprep.subr.mxu0 %v25826_v63  ;;  %v2749_v23 = vpop.f32.mrf.mxu1  ;;  %v21826_v17 = vpop.f32.mrf.mxu0 }
 0x1b0   : > { %25828 = vst [vmem:[#allocation133_spill] sm:$0xff] %v21826_v17  ;;  %17177 = vmatprep.subr.mxu1 %v25829_v62  ;;  %17097 = vmatpush3.msra.mxu0 %v25826_v63  ;;  %v2750_v56 = vadd.f32 %v2749_v23, %v2646_v43  ;;  %v599_v17 = vadd.f32 %v25834_v51, %v25833_v57  ;;  %v5481_v23 = vand.u32 4294901760, %v5480_v5  ;;  %v25838_v57 = vld [vmem:[#allocation63_spill] sm:$0xff]  ;;  %v25839_v5 = vld [vmem:[#allocation38_spill] sm:$0xff] }
 0x1b1   : > { %17178 = vmatpush3.msra.mxu1 %v25829_v62  ;;  %17098 = vmatprep.subr.mxu0 %v25830_v54  ;;  %v21832_v50 = vpop.f32.mrf.mxu1  ;;  %v2837_v34 = vpop.f32.mrf.mxu0 }
 0x1b2   : > { %25831 = vst [vmem:[#allocation134_spill] sm:$0xff] %v21832_v50  ;;  %17179 = vmatprep.subr.mxu1 %v25832_v7  ;;  %17099 = vmatpush3.msra.mxu0 %v25830_v54  ;;  %v2838_v18 = vadd.f32 %v2837_v34, %v2750_v56  ;;  %v25836_v50 = vld [vmem:[#allocation34_spill] sm:$0xff] }
 0x1b3   : > { %17180 = vmatpush3.msra.mxu1 %v25832_v7  ;;  %17101 = vmatmul.mubr.f32.vlgmr.msra.gmra.mxu0 %v21533_v24  ;;  %v2756_v43 = vpop.f32.mrf.mxu1  ;;  %v21840_v62 = vpop.f32.mrf.mxu0  ;;  %v688_v24 = vadd.f32 %v25838_v57, %v599_v17  ;;  %v25844_v57 = vld [vmem:[#allocation46_spill] sm:$0xff] }
 0x1b4   : > { %25835 = vst [vmem:[#allocation53_spill] sm:$0xff] %v21840_v62  ;;  %17138 = vmatprep.subr.mxu0 %v21207_v61  ;;  %17181 = vmatprep.subr.mxu1 %v25836_v50  ;;  %v2757_v63 = vadd.f32 %v2756_v43, %v2657_v20 }
 0x1b5   : > { %17139 = vmatpush3.msra.mxu0 %v21207_v61  ;;  %17170 = vmatprep.mubr.f32.mxu0 %v5481_v23  ;;  %v21845_v34 = vpop.f32.mrf.mxu1  ;;  %v2845_v56 = vpop.f32.mrf.mxu0  ;;  %v25841_v23 = vld [vmem:[#allocation66_spill] sm:$0xff] }
 0x1b6   : > { %25837 = vst [vmem:[#allocation61_spill] sm:$0xff] %v21845_v34  ;;  %17182 = vmatpush3.msra.mxu1 %v25836_v50  ;;  %17140 = vmatprep.subr.mxu0 %v21213_v1  ;;  %v2846_v51 = vadd.f32 %v2845_v56, %v2757_v63  ;;  %v775_v43 = vadd.f32 %v25841_v23, %v688_v24  ;;  %v25842_v34 = vld [vmem:[#allocation42_spill] sm:$0xff]  ;;  %v25846_v24 = vld [vmem:[#allocation67_spill] sm:$0xff]  ;;  %v25861_v50 = vld [vmem:[#allocation65_spill] sm:$0xff] }
 0x1b7   : > { %17183 = vmatprep.subr.mxu1 %v25839_v5  ;;  %17141 = vmatpush3.msra.mxu0 %v21213_v1  ;;  %v2923_v62 = vpop.f32.mrf.mxu1  ;;  %v21852_v7 = vpop.f32.mrf.mxu0 }
 0x1b8   : > { %25840 = vst [vmem:[#allocation63_spill] sm:$0xff] %v21852_v7  ;;  %17184 = vmatpush3.msra.mxu1 %v25839_v5  ;;  %17142 = vmatprep.subr.mxu0 %v21222_v4  ;;  %v2924_v20 = vadd.f32 %v2923_v62, %v2838_v18  ;;  %v866_v23 = vadd.f32 %v25846_v24, %v775_v43  ;;  %v25852_v24 = vld [vmem:[#allocation56_spill] sm:$0xff]  ;;  %v25862_v5 = vand.u32 4294901760, %v21790_v19 }
 0x1b9   : > { %17185 = vmatprep.subr.mxu1 %v25842_v34  ;;  %17143 = vmatpush3.msra.mxu0 %v21222_v4  ;;  %v21859_v63 = vpop.f32.mrf.mxu1  ;;  %v3016_v17 = vpop.f32.mrf.mxu0 }
 0x1ba   : > { %25843 = vst [vmem:[#allocation66_spill] sm:$0xff] %v21859_v63  ;;  %17186 = vmatpush3.msra.mxu1 %v25842_v34  ;;  %17144 = vmatprep.subr.mxu0 %v21229_v48  ;;  %v3017_v56 = vadd.f32 %v3016_v17, %v2924_v20  ;;  %v25847_v63 = vld [vmem:[#allocation50_spill] sm:$0xff] }
 0x1bb   : > { %17187 = vmatprep.subr.mxu1 %v25844_v57  ;;  %17145 = vmatpush3.msra.mxu0 %v21229_v48  ;;  %v2932_v7 = vpop.f32.mrf.mxu1  ;;  %v21865_v62 = vpop.f32.mrf.mxu0 }
 0x1bc   : > { %25845 = vst [vmem:[#allocation135_spill] sm:$0xff] %v21865_v62  ;;  %17188 = vmatpush3.msra.mxu1 %v25844_v57  ;;  %17146 = vmatprep.subr.mxu0 %v21240_v60  ;;  %v2933_v18 = vadd.f32 %v2932_v7, %v2846_v51  ;;  %v949_v62 = vadd.f32 %v21529_v39, %v866_v23  ;;  %v25849_v57 = vld [vmem:[#allocation54_spill] sm:$0xff] }
 0x1bd   : > { %17189 = vmatprep.subr.mxu1 %v25847_v63  ;;  %17147 = vmatpush3.msra.mxu0 %v21240_v60  ;;  %v21872_v34 = vpop.f32.mrf.mxu1  ;;  %v3023_v20 = vpop.f32.mrf.mxu0 }
 0x1be   : > { %25848 = vst [vmem:[#allocation67_spill] sm:$0xff] %v21872_v34  ;;  %17190 = vmatpush3.msra.mxu1 %v25847_v63  ;;  %17148 = vmatprep.subr.mxu0 %v21250_v12  ;;  %v3024_v17 = vadd.f32 %v3023_v20, %v2933_v18  ;;  %v21891_v23 = vand.u32 4294901760, %v949_v62  ;;  %v25855_v20 = vld [vmem:[#allocation58_spill] sm:$0xff]  ;;  %v25857_v34 = vld [vmem:[#allocation60_spill] sm:$0xff] }
 0x1bf   : > { %17191 = vmatprep.subr.mxu1 %v25849_v57  ;;  %17149 = vmatpush3.msra.mxu0 %v21250_v12  ;;  %v3099_v7 = vpop.f32.mrf.mxu1  ;;  %v21879_v51 = vpop.f32.mrf.mxu0 }
 0x1c0   : > { %25850 = vst [vmem:[#allocation136_spill] sm:$0xff] %v21879_v51  ;;  %17192 = vmatpush3.msra.mxu1 %v25849_v57  ;;  %17150 = vmatprep.subr.mxu0 %v21254_v14  ;;  %v21883_v43 = vadd.f32 %v3099_v7, %v3017_v56  ;;  %25854 = vst [vmem:[#allocation139_spill] sm:$0xff] %v21891_v23  ;;  %v25859_v57 = vld [vmem:[#allocation62_spill] sm:$0xff] }
 0x1c1   : > { %17193 = vmatprep.subr.mxu1 %v25852_v24  ;;  %17151 = vmatpush3.msra.mxu0 %v21254_v14  ;;  %v21887_v18 = vpop.f32.mrf.mxu1  ;;  %v3186_v39 = vpop.f32.mrf.mxu0 }
 0x1c2   : > { %25851 = vst [vmem:[#allocation137_spill] sm:$0xff] %v21883_v43  ;;  %25853 = vst [vmem:[#allocation138_spill] sm:$0xff] %v21887_v18  ;;  %17194 = vmatpush3.msra.mxu1 %v25852_v24  ;;  %17152 = vmatprep.subr.mxu0 %v21268_v32  ;;  %v21906_v24 = vsub.f32 %v949_v62, %v21891_v23 }
 0x1c3   : > { %17195 = vmatprep.subr.mxu1 %v25855_v20  ;;  %17153 = vmatpush3.msra.mxu0 %v21268_v32  ;;  %v3106_v51 = vpop.f32.mrf.mxu1  ;;  %v3188_v56 = vpop.f32.mrf.mxu0 }
 0x1c4   : > { %17196 = vmatpush3.msra.mxu1 %v25855_v20  ;;  %17154 = vmatprep.subr.mxu0 %v21294_v27  ;;  %v21897_v7 = vadd.f32 %v3106_v51, %v3024_v17 }
 0x1c5   : > { %17197 = vmatprep.subr.mxu1 %v25857_v34  ;;  %17155 = vmatpush3.msra.mxu0 %v21294_v27  ;;  %v21901_v18 = vpop.f32.mrf.mxu1  ;;  %v3197_v43 = vpop.f32.mrf.mxu0 }
 0x1c6   : > { %25856 = vst [vmem:[#allocation140_spill] sm:$0xff] %v21897_v7  ;;  %25858 = vst [vmem:[#allocation141_spill] sm:$0xff] %v21901_v18  ;;  %17198 = vmatpush3.msra.mxu1 %v25857_v34  ;;  %17156 = vmatprep.subr.mxu0 %v21310_v38  ;;  %v25860_v18 = vld [vmem:[#allocation64_spill] sm:$0xff] }
 0x1c7   : > { %17199 = vmatprep.subr.mxu1 %v25859_v57  ;;  %17157 = vmatpush3.msra.mxu0 %v21310_v38  ;;  %v3289_v17 = vpop.f32.mrf.mxu1  ;;  %v3199_v51 = vpop.f32.mrf.mxu0 }
 0x1c8   : > { %17200 = vmatpush3.msra.mxu1 %v25859_v57  ;;  %17158 = vmatprep.subr.mxu0 %v21326_v41  ;;  %v3290_v7 = vadd.f32 %v3289_v17, %v3186_v39 }
 0x1c9   : > { %17201 = vmatprep.subr.mxu1 %v25860_v18  ;;  %17159 = vmatpush3.msra.mxu0 %v21326_v41  ;;  %v3291_v34 = vpop.f32.mrf.mxu1  ;;  %v3377_v20 = vpop.f32.mrf.mxu0 }
 0x1ca   : > { %17202 = vmatpush3.msra.mxu1 %v25860_v18  ;;  %17160 = vmatprep.subr.mxu0 %v21342_v46  ;;  %v3292_v62 = vadd.f32 %v3291_v34, %v3188_v56  ;;  %v3378_v63 = vadd.f32 %v3377_v20, %v3290_v7 }
 0x1cb   : > { %17203 = vmatprep.subr.mxu1 %v25861_v50  ;;  %17161 = vmatpush3.msra.mxu0 %v21342_v46  ;;  %v3296_v57 = vpop.f32.mrf.mxu1  ;;  %v3379_v39 = vpop.f32.mrf.mxu0 }
 0x1cc   : > { %17204 = vmatpush3.msra.mxu1 %v25861_v50  ;;  %17162 = vmatprep.subr.mxu0 %v21358_v53  ;;  %v3297_v17 = vadd.f32 %v3296_v57, %v3197_v43  ;;  %v3380_v56 = vadd.f32 %v3379_v39, %v3292_v62  ;;  %v25863_v57 = vand.u32 4294901760, %v21906_v24 }
 0x1cd   : > { %17206 = vmatmul.mubr.f32.vlgmr.msra.gmra.mxu1 %v21891_v23  ;;  %17243 = vmatprep.subr.mxu1 %v21207_v61  ;;  %v3298_v18 = vpop.f32.mrf.mxu1  ;;  %v3385_v34 = vpop.f32.mrf.mxu0 }
 0x1ce   : > { %17163 = vmatpush3.msra.mxu0 %v21358_v53  ;;  %17244 = vmatpush3.msra.mxu1 %v21207_v61  ;;  %v3299_v20 = vadd.f32 %v3298_v18, %v3199_v51  ;;  %v3386_v7 = vadd.f32 %v3385_v34, %v3297_v17  ;;  %v5490_v43 = vsub.f32 %v21906_v24, %v25863_v57 }
 0x1cf   : > { %17275 = vmatprep.mubr.f32.mxu1 %v25862_v5  ;;  %17164 = vmatprep.subr.mxu0 %v21374_v59  ;;  %v3463_v50 = vpop.f32.mrf.mxu1  ;;  %v3387_v54 = vpop.f32.mrf.mxu0 }
 0x1d0   : > { %17245 = vmatprep.subr.mxu1 %v21213_v1  ;;  %17165 = vmatpush3.msra.mxu0 %v21374_v59  ;;  %v3464_v23 = vadd.f32 %v3463_v50, %v3378_v63  ;;  %v3388_v62 = vadd.f32 %v3387_v54, %v3299_v20  ;;  %v5491_v17 = vand.u32 4294901760, %v5490_v43 }
 0x1d1   : > { %17246 = vmatpush3.msra.mxu1 %v21213_v1  ;;  %17166 = vmatprep.subr.mxu0 %v21390_v13  ;;  %v3465_v18 = vpop.f32.mrf.mxu1  ;;  %v3556_v51 = vpop.f32.mrf.mxu0 }
 0x1d2   : > { %17247 = vmatprep.subr.mxu1 %v21222_v4  ;;  %17167 = vmatpush3.msra.mxu0 %v21390_v13  ;;  %v3466_v5 = vadd.f32 %v3465_v18, %v3380_v56  ;;  %v3557_v39 = vadd.f32 %v3556_v51, %v3464_v23 }
 0x1d3   : > { %17248 = vmatpush3.msra.mxu1 %v21222_v4  ;;  %17168 = vmatprep.subr.mxu0 %v21408_v35  ;;  %v3472_v34 = vpop.f32.mrf.mxu1  ;;  %v3558_v50 = vpop.f32.mrf.mxu0 }
 0x1d4   : > { %17249 = vmatprep.subr.mxu1 %v21229_v48  ;;  %17169 = vmatpush3.msra.mxu0 %v21408_v35  ;;  %v3473_v63 = vadd.f32 %v3472_v34, %v3386_v7  ;;  %v3559_v23 = vadd.f32 %v3558_v50, %v3466_v5 }
 0x1d5   : > { %17250 = vmatpush3.msra.mxu1 %v21229_v48  ;;  %17171 = vmatmul.mubr.f32.vlgmr.msra.gmra.mxu0 %v5491_v17  ;;  %v3474_v57 = vpop.f32.mrf.mxu1  ;;  %v3563_v42 = vpop.f32.mrf.mxu0 }
 0x1d6   : > { %17208 = vmatprep.subr.mxu0 %v21220_v3  ;;  %17251 = vmatprep.subr.mxu1 %v21240_v60  ;;  %v3475_v54 = vadd.f32 %v3474_v57, %v3388_v62  ;;  %v3564_v20 = vadd.f32 %v3563_v42, %v3473_v63 }
 0x1d7   : > { %17209 = vmatpush3.msra.mxu0 %v21220_v3  ;;  %17240 = vmatprep.mubr.f32.mxu0 %v21790_v19  ;;  %v3639_v56 = vpop.f32.mrf.mxu1  ;;  %v3565_v43 = vpop.f32.mrf.mxu0 }
 0x1d8   : > { %17252 = vmatpush3.msra.mxu1 %v21240_v60  ;;  %17210 = vmatprep.subr.mxu0 %v21227_v6  ;;  %v21948_v7 = vadd.f32 %v3639_v56, %v3557_v39  ;;  %v3566_v19 = vadd.f32 %v3565_v43, %v3475_v54 }
 0x1d9   : > { %17253 = vmatprep.subr.mxu1 %v21250_v12  ;;  %17211 = vmatpush3.msra.mxu0 %v21227_v6  ;;  %v3641_v18 = vpop.f32.mrf.mxu1  ;;  %v3726_v51 = vpop.f32.mrf.mxu0 }
 0x1da   : > { %25864 = vst [vmem:[#allocation142_spill] sm:$0xff] %v21948_v7  ;;  %17254 = vmatpush3.msra.mxu1 %v21250_v12  ;;  %17212 = vmatprep.subr.mxu0 %v21238_v8  ;;  %v21954_v42 = vadd.f32 %v3641_v18, %v3559_v23  ;;  %v25895_v7 = vld [vmem:[#allocation38_spill] sm:$0xff] }
 0x1db   : > { %17255 = vmatprep.subr.mxu1 %v21254_v14  ;;  %17213 = vmatpush3.msra.mxu0 %v21238_v8  ;;  %v3646_v5 = vpop.f32.mrf.mxu1  ;;  %v3728_v62 = vpop.f32.mrf.mxu0 }
 0x1dc   : > { %25865 = vst [vmem:[#allocation143_spill] sm:$0xff] %v21954_v42  ;;  %17256 = vmatpush3.msra.mxu1 %v21254_v14  ;;  %17214 = vmatprep.subr.mxu0 %v21248_v11  ;;  %v21960_v39 = vadd.f32 %v3646_v5, %v3564_v20  ;;  %v25894_v42 = vld [vmem:[#allocation79_spill] sm:$0xff] }
 0x1dd   : > { %17257 = vmatprep.subr.mxu1 %v21268_v32  ;;  %17215 = vmatpush3.msra.mxu0 %v21248_v11  ;;  %v3648_v17 = vpop.f32.mrf.mxu1  ;;  %v3737_v34 = vpop.f32.mrf.mxu0 }
 0x1de   : > { %25866 = vst [vmem:[#allocation144_spill] sm:$0xff] %v21960_v39  ;;  %17258 = vmatpush3.msra.mxu1 %v21268_v32  ;;  %17216 = vmatprep.subr.mxu0 %v21264_v16  ;;  %v21966_v50 = vadd.f32 %v3648_v17, %v3566_v19 }
 0x1df   : > { %17259 = vmatprep.subr.mxu1 %v21294_v27  ;;  %17217 = vmatpush3.msra.mxu0 %v21264_v16  ;;  %v3829_v63 = vpop.f32.mrf.mxu1  ;;  %v3739_v57 = vpop.f32.mrf.mxu0 }
 0x1e0   : > { %25867 = vst [vmem:[#allocation145_spill] sm:$0xff] %v21966_v50  ;;  %17260 = vmatpush3.msra.mxu1 %v21294_v27  ;;  %17218 = vmatprep.subr.mxu0 %v21278_v22  ;;  %v3830_v54 = vadd.f32 %v3829_v63, %v3726_v51 }
 0x1e1   : > { %17261 = vmatprep.subr.mxu1 %v21310_v38  ;;  %17219 = vmatpush3.msra.mxu0 %v21278_v22  ;;  %v3831_v23 = vpop.f32.mrf.mxu1  ;;  %v3917_v20 = vpop.f32.mrf.mxu0 }
 0x1e2   : > { %17262 = vmatpush3.msra.mxu1 %v21310_v38  ;;  %17220 = vmatprep.subr.mxu0 %v21283_v33  ;;  %v3832_v56 = vadd.f32 %v3831_v23, %v3728_v62  ;;  %v3918_v43 = vadd.f32 %v3917_v20, %v3830_v54 }
 0x1e3   : > { %17263 = vmatprep.subr.mxu1 %v21326_v41  ;;  %17221 = vmatpush3.msra.mxu0 %v21283_v33  ;;  %v3836_v18 = vpop.f32.mrf.mxu1  ;;  %v3919_v19 = vpop.f32.mrf.mxu0 }
 0x1e4   : > { %17264 = vmatpush3.msra.mxu1 %v21326_v41  ;;  %17222 = vmatprep.subr.mxu0 %v21299_v28  ;;  %v3837_v51 = vadd.f32 %v3836_v18, %v3737_v34  ;;  %v3920_v5 = vadd.f32 %v3919_v19, %v3832_v56 }
 0x1e5   : > { %17265 = vmatprep.subr.mxu1 %v21342_v46  ;;  %17223 = vmatpush3.msra.mxu0 %v21299_v28  ;;  %v3838_v17 = vpop.f32.mrf.mxu1  ;;  %v3925_v63 = vpop.f32.mrf.mxu0 }
 0x1e6   : > { %17266 = vmatpush3.msra.mxu1 %v21342_v46  ;;  %17224 = vmatprep.subr.mxu0 %v21324_v40  ;;  %v3839_v62 = vadd.f32 %v3838_v17, %v3739_v57  ;;  %v3926_v54 = vadd.f32 %v3925_v63, %v3837_v51 }
 0x1e7   : > { %17267 = vmatprep.subr.mxu1 %v21358_v53  ;;  %17225 = vmatpush3.msra.mxu0 %v21324_v40  ;;  %v4003_v23 = vpop.f32.mrf.mxu1  ;;  %v3927_v20 = vpop.f32.mrf.mxu0 }
 0x1e8   : > { %17268 = vmatpush3.msra.mxu1 %v21358_v53  ;;  %17226 = vmatprep.subr.mxu0 %v21340_v45  ;;  %v4004_v34 = vadd.f32 %v4003_v23, %v3918_v43  ;;  %v3928_v56 = vadd.f32 %v3927_v20, %v3839_v62 }
 0x1e9   : > { %17269 = vmatprep.subr.mxu1 %v21374_v59  ;;  %17227 = vmatpush3.msra.mxu0 %v21340_v45  ;;  %v4005_v18 = vpop.f32.mrf.mxu1  ;;  %v4096_v19 = vpop.f32.mrf.mxu0 }
 0x1ea   : > { %17270 = vmatpush3.msra.mxu1 %v21374_v59  ;;  %17228 = vmatprep.subr.mxu0 %v21356_v52  ;;  %v4006_v57 = vadd.f32 %v4005_v18, %v3920_v5  ;;  %v4097_v51 = vadd.f32 %v4096_v19, %v4004_v34  ;;  %v25868_v18 = vand.u32 4294901760, %v21906_v24 }
 0x1eb   : > { %17271 = vmatprep.subr.mxu1 %v21390_v13  ;;  %17229 = vmatpush3.msra.mxu0 %v21356_v52  ;;  %v4012_v17 = vpop.f32.mrf.mxu1  ;;  %v4098_v63 = vpop.f32.mrf.mxu0 }
 0x1ec   : > { %17272 = vmatpush3.msra.mxu1 %v21390_v13  ;;  %17230 = vmatprep.subr.mxu0 %v21372_v58  ;;  %v4013_v43 = vadd.f32 %v4012_v17, %v3926_v54  ;;  %v4099_v62 = vadd.f32 %v4098_v63, %v4006_v57 }
 0x1ed   : > { %17273 = vmatprep.subr.mxu1 %v21408_v35  ;;  %17231 = vmatpush3.msra.mxu0 %v21372_v58  ;;  %v4014_v23 = vpop.f32.mrf.mxu1  ;;  %v4103_v20 = vpop.f32.mrf.mxu0 }
 0x1ee   : > { %17274 = vmatpush3.msra.mxu1 %v21408_v35  ;;  %17232 = vmatprep.subr.mxu0 %v21388_v9  ;;  %v4015_v5 = vadd.f32 %v4014_v23, %v3928_v56  ;;  %v4104_v34 = vadd.f32 %v4103_v20, %v4013_v43 }
 0x1ef   : > { %17276 = vmatmul.mubr.f32.vlgmr.msra.gmra.mxu1 %v25868_v18  ;;  %17313 = vmatprep.subr.mxu1 %v21207_v61  ;;  %v4179_v19 = vpop.f32.mrf.mxu1  ;;  %v4105_v54 = vpop.f32.mrf.mxu0 }
 0x1f0   : > { %17233 = vmatpush3.msra.mxu0 %v21388_v9  ;;  %17314 = vmatpush3.msra.mxu1 %v21207_v61  ;;  %v22005_v57 = vadd.f32 %v4179_v19, %v4097_v51  ;;  %v4106_v17 = vadd.f32 %v4105_v54, %v4015_v5  ;;  %v25872_v5 = vld [vmem:[#allocation70_spill] sm:$0xff] }
 0x1f1   : > { %17345 = vmatprep.mubr.f32.mxu1 %v21771_v2  ;;  %17234 = vmatprep.subr.mxu0 %v21406_v25  ;;  %v4181_v56 = vpop.f32.mrf.mxu1  ;;  %v16892_v63 = vpop.f32.mrf.mxu0  ;;  %v1130_v18 = vadd.f32 %v25872_v5, %v21521_v49 }
 0x1f2   : > { %25869 = vst [vmem:[#allocation146_spill] sm:$0xff] %v22005_v57  ;;  %17315 = vmatprep.subr.mxu1 %v21213_v1  ;;  %17235 = vmatpush3.msra.mxu0 %v21406_v25  ;;  %v22011_v43 = vadd.f32 %v4181_v56, %v4099_v62  ;;  %v25891_v57 = vld [vmem:[#allocation31_spill] sm:$0xff] }
 0x1f3   : > { %17316 = vmatpush3.msra.mxu1 %v21213_v1  ;;  %17236 = vmatprep.subr.mxu0 %v21422_v44  ;;  %v4186_v23 = vpop.f32.mrf.mxu1  ;;  %v4264_v51 = vpop.f32.mrf.mxu0  ;;  %v1218_v56 = vadd.f32 %v21546_v36, %v1130_v18 }
 0x1f4   : > { %25870 = vst [vmem:[#allocation147_spill] sm:$0xff] %v22011_v43  ;;  %17317 = vmatprep.subr.mxu1 %v21222_v4  ;;  %17237 = vmatpush3.msra.mxu0 %v21422_v44  ;;  %v22017_v20 = vadd.f32 %v4186_v23, %v4104_v34  ;;  %v25889_v43 = vld [vmem:[#allocation27_spill] sm:$0xff] }
 0x1f5   : > { %17318 = vmatpush3.msra.mxu1 %v21222_v4  ;;  %17238 = vmatprep.subr.mxu0 %v21438_v55  ;;  %v4188_v62 = vpop.f32.mrf.mxu1 }
 0x1f6   : > { %25871 = vst [vmem:[#allocation148_spill] sm:$0xff] %v22017_v20  ;;  %17319 = vmatprep.subr.mxu1 %v21229_v48  ;;  %17239 = vmatpush3.msra.mxu0 %v21438_v55  ;;  %v22025_v19 = vadd.f32 %v4188_v62, %v4106_v17  ;;  %v16906_v54 = vpop.f32.mrf.mxu0  ;;  %v25890_v20 = vld [vmem:[#allocation59_spill] sm:$0xff] }
 0x1f7   : > { %17320 = vmatpush3.msra.mxu1 %v21229_v48  ;;  %17241 = vmatmul.mubr.f32.vlgmr.msra.gmra.mxu0 %v21906_v24  ;;  %v16899_v34 = vpop.f32.mrf.mxu1 }
 0x1f8   : > { %25873 = vst [vmem:[#allocation70_spill] sm:$0xff] %v22025_v19  ;;  %17278 = vmatprep.subr.mxu0 %v21235_v0  ;;  %17321 = vmatprep.subr.mxu1 %v21240_v60  ;;  %v4362_v49 = vadd.f32 %v16899_v34, %v16892_v63  ;;  %v4437_v17 = vpop.f32.mrf.mxu0 }
 0x1f9   : > { %17279 = vmatpush3.msra.mxu0 %v21235_v0  ;;  %17310 = vmatprep.mubr.f32.mxu0 %v21771_v2  ;;  %v4355_v23 = vpop.f32.mrf.mxu1  ;;  %v1304_v2 = vadd.f32 %v21566_v47, %v1218_v56 }
 0x1fa   : > { %17322 = vmatpush3.msra.mxu1 %v21240_v60  ;;  %17280 = vmatprep.subr.mxu0 %v21245_v10  ;;  %v4356_v5 = vadd.f32 %v4355_v23, %v4264_v51  ;;  %v4445_v24 = vadd.f32 %v16906_v54, %v4362_v49 }
 0x1fb   : > { %17323 = vmatprep.subr.mxu1 %v21250_v12  ;;  %17281 = vmatpush3.msra.mxu0 %v21245_v10  ;;  %v16913_v62 = vpop.f32.mrf.mxu1  ;;  %v1397_v56 = vadd.f32 %v21575_v30, %v1304_v2  ;;  %v25879_v2 = vld [vmem:[#allocation43_spill] sm:$0xff] }
 0x1fc   : > { %17324 = vmatpush3.msra.mxu1 %v21250_v12  ;;  %17282 = vmatprep.subr.mxu0 %v21261_v15  ;;  %v4438_v36 = vadd.f32 %v4437_v17, %v4356_v5  ;;  %v4528_v63 = vadd.f32 %v16913_v62, %v4445_v24  ;;  %v25876_v62 = vld [vmem:[#allocation30_spill] sm:$0xff] }
 0x1fd   : > { %17325 = vmatprep.subr.mxu1 %v21254_v14  ;;  %17283 = vmatpush3.msra.mxu0 %v21261_v15  ;;  %v4519_v18 = vpop.f32.mrf.mxu1  ;;  %v1480_v30 = vadd.f32 %v21596_v31, %v1397_v56  ;;  %v25878_v31 = vld [vmem:[#allocation39_spill] sm:$0xff] }
 0x1fe   : > { %17326 = vmatpush3.msra.mxu1 %v21254_v14  ;;  %17284 = vmatprep.subr.mxu0 %v21275_v21  ;;  %v4520_v51 = vadd.f32 %v4519_v18, %v4438_v36  ;;  %v16920_v54 = vpop.f32.mrf.mxu0  ;;  %v25877_v36 = vld [vmem:[#allocation35_spill] sm:$0xff] }
 0x1ff   : > { %17327 = vmatprep.subr.mxu1 %v21268_v32  ;;  %17285 = vmatpush3.msra.mxu0 %v21275_v21  ;;  %v4611_v34 = vadd.f32 %v16920_v54, %v4528_v63  ;;  %v16927_v49 = vpop.f32.mrf.mxu1  ;;  %v22071_v63 = vand.u32 4294901760, %v1480_v30  ;;  %v25881_v54 = vld [vmem:[#allocation51_spill] sm:$0xff] }
 0x200   : > { %17328 = vmatpush3.msra.mxu1 %v21268_v32  ;;  %17286 = vmatprep.subr.mxu0 %v21292_v26  ;;  %v4604_v47 = vpop.f32.mrf.mxu0  ;;  %v25884_v56 = vld [vmem:[#allocation55_spill] sm:$0xff] }
 0x201   : > { %17329 = vmatprep.subr.mxu1 %v21294_v27  ;;  %17287 = vmatpush3.msra.mxu0 %v21292_v26  ;;  %v4605_v23 = vadd.f32 %v4604_v47, %v4520_v51  ;;  %v22052_v17 = vadd.f32 %v16927_v49, %v4611_v34  ;;  %v4683_v5 = vpop.f32.mrf.mxu1  ;;  %v22082_v18 = vsub.f32 %v1480_v30, %v22071_v63  ;;  %v25880_v51 = vld [vmem:[#allocation47_spill] sm:$0xff]  ;;  %v25883_v49 = vld [vmem:[#allocation21_spill] sm:$0xff] }
 0x202   : > { %17330 = vmatpush3.msra.mxu1 %v21294_v27  ;;  %17288 = vmatprep.subr.mxu0 %v21308_v37  ;;  %v25882_v34 = vld [vmem:[#allocation139_spill] sm:$0xff]  ;;  %v25887_v30 = vld [vmem:[#allocation73_spill] sm:$0xff] }
 0x203   : > { %25874 = vst [vmem:[#allocation149_spill] sm:$0xff] %v22052_v17  ;;  %17331 = vmatprep.subr.mxu1 %v21310_v38  ;;  %17289 = vmatpush3.msra.mxu0 %v21308_v37  ;;  %v22058_v24 = vadd.f32 %v4683_v5, %v4605_v23  ;;  %v25471_v47 = vand.u32 4294901760, %v22082_v18  ;;  %v25885_v23 = vld [vmem:[#allocation23_spill] sm:$0xff]  ;;  %v25886_v5 = vld [vmem:[#allocation69_spill] sm:$0xff] }
 0x204   : > { %17332 = vmatpush3.msra.mxu1 %v21310_v38  ;;  %17290 = vmatprep.subr.mxu0 %v21315_v29  ;;  %v1137_v17 = vadd.f32 %v25887_v30, %v25886_v5  ;;  %v25892_v5 = vld [vmem:[#allocation76_spill] sm:$0xff] }
 0x205   : > { %25875 = vst [vmem:[#allocation150_spill] sm:$0xff] %v22058_v24  ;;  %17333 = vmatprep.subr.mxu1 %v21326_v41  ;;  %17291 = vmatpush3.msra.mxu0 %v21315_v29  ;;  %v25888_v24 = vld [vmem:[#allocation57_spill] sm:$0xff]  ;;  %v6164_v19 = vsub.f32 %v22082_v18, %v25471_v47  ;;  %v25893_v47 = vld [vmem:[#allocation34_spill] sm:$0xff] }
 0x206   : > { %17334 = vmatpush3.msra.mxu1 %v21326_v41  ;;  %17292 = vmatprep.subr.mxu0 %v25876_v62  ;;  %v1226_v30 = vadd.f32 %v25892_v5, %v1137_v17  ;;  %v25900_v5 = vld [vmem:[#allocation86_spill] sm:$0xff] }
 0x207   : > { %17335 = vmatprep.subr.mxu1 %v21342_v46  ;;  %17293 = vmatpush3.msra.mxu0 %v25876_v62  ;;  %v6165_v50 = vand.u32 4294901760, %v6164_v19  ;;  %v25896_v19 = vld [vmem:[#allocation42_spill] sm:$0xff] }
 0x208   : > { %17336 = vmatpush3.msra.mxu1 %v21342_v46  ;;  %17294 = vmatprep.subr.mxu0 %v25877_v36  ;;  %v1313_v39 = vadd.f32 %v25894_v42, %v1226_v30  ;;  %v25899_v42 = vld [vmem:[#allocation50_spill] sm:$0xff] }
 0x209   : > { %17337 = vmatprep.subr.mxu1 %v21358_v53  ;;  %17295 = vmatpush3.msra.mxu0 %v25877_v36 }
 0x20a   : > { %17338 = vmatpush3.msra.mxu1 %v21358_v53  ;;  %17296 = vmatprep.subr.mxu0 %v25878_v31 }
 0x20b   : > { %17339 = vmatprep.subr.mxu1 %v21374_v59  ;;  %17297 = vmatpush3.msra.mxu0 %v25878_v31 }
 0x20c   : > { %17340 = vmatpush3.msra.mxu1 %v21374_v59  ;;  %17298 = vmatprep.subr.mxu0 %v25879_v2 }
 0x20d   : > { %17341 = vmatprep.subr.mxu1 %v21390_v13  ;;  %17299 = vmatpush3.msra.mxu0 %v25879_v2 }
 0x20e   : > { %17342 = vmatpush3.msra.mxu1 %v21390_v13  ;;  %17300 = vmatprep.subr.mxu0 %v25880_v51 }
 0x20f   : > { %17343 = vmatprep.subr.mxu1 %v21408_v35  ;;  %17301 = vmatpush3.msra.mxu0 %v25880_v51 }
 0x210   : > { %17344 = vmatpush3.msra.mxu1 %v21408_v35  ;;  %17302 = vmatprep.subr.mxu0 %v25881_v54 }
 0x211   : > { %17346 = vmatmul.mubr.f32.vlgmr.msra.gmra.mxu1 %v25882_v34  ;;  %17383 = vmatprep.subr.mxu1 %v25883_v49 }
 0x212   : > { %17303 = vmatpush3.msra.mxu0 %v25881_v54  ;;  %17384 = vmatpush3.msra.mxu1 %v25883_v49 }
 0x213   : > { %17415 = vmatprep.mubr.f32.mxu1 %v22071_v63  ;;  %17304 = vmatprep.subr.mxu0 %v25884_v56 }
 0x214   : > { %17385 = vmatprep.subr.mxu1 %v25885_v23  ;;  %17305 = vmatpush3.msra.mxu0 %v25884_v56 }
 0x215   : > { %17386 = vmatpush3.msra.mxu1 %v25885_v23  ;;  %17306 = vmatprep.subr.mxu0 %v25888_v24 }
 0x216   : > { %17387 = vmatprep.subr.mxu1 %v25889_v43  ;;  %17307 = vmatpush3.msra.mxu0 %v25888_v24 }
 0x217   : > { %17388 = vmatpush3.msra.mxu1 %v25889_v43  ;;  %17308 = vmatprep.subr.mxu0 %v25890_v20 }
 0x218   : > { %17389 = vmatprep.subr.mxu1 %v25891_v57  ;;  %17309 = vmatpush3.msra.mxu0 %v25890_v20 }
 0x219   : > { %17390 = vmatpush3.msra.mxu1 %v25891_v57  ;;  %17311 = vmatmul.mubr.f32.vlgmr.msra.gmra.mxu0 %v25882_v34  ;;  %v25898_v34 = vld [vmem:[#allocation46_spill] sm:$0xff] }
 0x21a   : > { %17348 = vmatprep.subr.mxu0 %v21207_v61  ;;  %17391 = vmatprep.subr.mxu1 %v25893_v47 }
 0x21b   : > { %17349 = vmatpush3.msra.mxu0 %v21207_v61  ;;  %17380 = vmatprep.mubr.f32.mxu0 %v6165_v50  ;;  %v25897_v50 = vld [vmem:[#allocation82_spill] sm:$0xff] }
 0x21c   : > { %17392 = vmatpush3.msra.mxu1 %v25893_v47  ;;  %17350 = vmatprep.subr.mxu0 %v21213_v1  ;;  %v1404_v17 = vadd.f32 %v25897_v50, %v1313_v39  ;;  %v25902_v39 = vld [vmem:[#allocation56_spill] sm:$0xff] }
 0x21d   : > { %17393 = vmatprep.subr.mxu1 %v25895_v7  ;;  %17351 = vmatpush3.msra.mxu0 %v21213_v1 }
 0x21e   : > { %17394 = vmatpush3.msra.mxu1 %v25895_v7  ;;  %17352 = vmatprep.subr.mxu0 %v21222_v4  ;;  %v1487_v30 = vadd.f32 %v25900_v5, %v1404_v17  ;;  %v25904_v17 = vld [vmem:[#allocation60_spill] sm:$0xff] }
 0x21f   : > { %17395 = vmatprep.subr.mxu1 %v25896_v19  ;;  %17353 = vmatpush3.msra.mxu0 %v21222_v4 }
 0x220   : > { %17396 = vmatpush3.msra.mxu1 %v25896_v19  ;;  %17354 = vmatprep.subr.mxu0 %v21229_v48  ;;  %v25901_v19 = vld [vmem:[#allocation54_spill] sm:$0xff]  ;;  %v22149_v50 = vand.u32 4294901760, %v1487_v30 }
 0x221   : > { %17397 = vmatprep.subr.mxu1 %v25898_v34  ;;  %17355 = vmatpush3.msra.mxu0 %v21229_v48 }
 0x222   : > { %17398 = vmatpush3.msra.mxu1 %v25898_v34  ;;  %17356 = vmatprep.subr.mxu0 %v21240_v60  ;;  %v22160_v5 = vsub.f32 %v1487_v30, %v22149_v50  ;;  %v25907_v30 = vld [vmem:[#allocation65_spill] sm:$0xff] }
 0x223   : > { %17399 = vmatprep.subr.mxu1 %v25899_v42  ;;  %17357 = vmatpush3.msra.mxu0 %v21240_v60 }
 0x224   : > { %17400 = vmatpush3.msra.mxu1 %v25899_v42  ;;  %17358 = vmatprep.subr.mxu0 %v21250_v12  ;;  %v25903_v42 = vld [vmem:[#allocation58_spill] sm:$0xff] }
 0x225   : > { %17401 = vmatprep.subr.mxu1 %v25901_v19  ;;  %17359 = vmatpush3.msra.mxu0 %v21250_v12 }
 0x226   : > { %17402 = vmatpush3.msra.mxu1 %v25901_v19  ;;  %17360 = vmatprep.subr.mxu0 %v21254_v14 }
 0x227   : > { %17403 = vmatprep.subr.mxu1 %v25902_v39  ;;  %17361 = vmatpush3.msra.mxu0 %v21254_v14 }
 0x228   : > { %17404 = vmatpush3.msra.mxu1 %v25902_v39  ;;  %17362 = vmatprep.subr.mxu0 %v21268_v32  ;;  %v25905_v39 = vld [vmem:[#allocation62_spill] sm:$0xff] }
 0x229   : > { %17405 = vmatprep.subr.mxu1 %v25903_v42  ;;  %17363 = vmatpush3.msra.mxu0 %v21268_v32 }
 0x22a   : > { %17406 = vmatpush3.msra.mxu1 %v25903_v42  ;;  %17364 = vmatprep.subr.mxu0 %v21294_v27  ;;  %v25906_v42 = vld [vmem:[#allocation64_spill] sm:$0xff] }
 0x22b   : > { %17407 = vmatprep.subr.mxu1 %v25904_v17  ;;  %17365 = vmatpush3.msra.mxu0 %v21294_v27 }
 0x22c   : > { %17408 = vmatpush3.msra.mxu1 %v25904_v17  ;;  %17366 = vmatprep.subr.mxu0 %v21310_v38  ;;  %v25482_v17 = vand.u32 4294901760, %v22160_v5 }
 0x22d   : > { %17409 = vmatprep.subr.mxu1 %v25905_v39  ;;  %17367 = vmatpush3.msra.mxu0 %v21310_v38 }
 0x22e   : > { %17410 = vmatpush3.msra.mxu1 %v25905_v39  ;;  %17368 = vmatprep.subr.mxu0 %v21326_v41  ;;  %v25908_v39 = vand.u32 4294901760, %v22082_v18 }
 0x22f   : > { %17411 = vmatprep.subr.mxu1 %v25906_v42  ;;  %17369 = vmatpush3.msra.mxu0 %v21326_v41 }
 0x230   : > { %17412 = vmatpush3.msra.mxu1 %v25906_v42  ;;  %17370 = vmatprep.subr.mxu0 %v21342_v46  ;;  %v6174_v42 = vsub.f32 %v22160_v5, %v25482_v17 }
 0x231   : > { %17413 = vmatprep.subr.mxu1 %v25907_v30  ;;  %17371 = vmatpush3.msra.mxu0 %v21342_v46 }
 0x232   : > { %17414 = vmatpush3.msra.mxu1 %v25907_v30  ;;  %17372 = vmatprep.subr.mxu0 %v21358_v53  ;;  %v6175_v17 = vand.u32 4294901760, %v6174_v42  ;;  %v25910_v42 = vld [vmem:[#allocation68_spill] sm:$0xff] }
 0x233   : > { %17416 = vmatmul.mubr.f32.vlgmr.msra.gmra.mxu1 %v22149_v50  ;;  %17453 = vmatprep.subr.mxu1 %v21207_v61 }
 0x234   : > { %17373 = vmatpush3.msra.mxu0 %v21358_v53  ;;  %17454 = vmatpush3.msra.mxu1 %v21207_v61 }
 0x235   : > { %17485 = vmatprep.mubr.f32.mxu1 %v25908_v39  ;;  %17374 = vmatprep.subr.mxu0 %v21374_v59  ;;  %v25911_v39 = vld [vmem:[#allocation72_spill] sm:$0xff] }
 0x236   : > { %17455 = vmatprep.subr.mxu1 %v21213_v1  ;;  %17375 = vmatpush3.msra.mxu0 %v21374_v59 }
 0x237   : > { %17456 = vmatpush3.msra.mxu1 %v21213_v1  ;;  %17376 = vmatprep.subr.mxu0 %v21390_v13 }
 0x238   : > { %17457 = vmatprep.subr.mxu1 %v21222_v4  ;;  %17377 = vmatpush3.msra.mxu0 %v21390_v13 }
 0x239   : > { %17458 = vmatpush3.msra.mxu1 %v21222_v4  ;;  %17378 = vmatprep.subr.mxu0 %v21408_v35 }
 0x23a   : > { %17459 = vmatprep.subr.mxu1 %v21229_v48  ;;  %17379 = vmatpush3.msra.mxu0 %v21408_v35 }
 0x23b   : > { %17460 = vmatpush3.msra.mxu1 %v21229_v48  ;;  %17381 = vmatmul.mubr.f32.vlgmr.msra.gmra.mxu0 %v6175_v17  ;;  %v1132_v17 = vadd.f32 %v25911_v39, %v25910_v42 }
 0x23c   : > { %17418 = vmatprep.subr.mxu0 %v21220_v3  ;;  %17461 = vmatprep.subr.mxu1 %v21240_v60 }
 0x23d   : > { %17419 = vmatpush3.msra.mxu0 %v21220_v3  ;;  %17450 = vmatprep.mubr.f32.mxu0 %v22082_v18  ;;  %v25909_v18 = vand.u32 4294901760, %v22160_v5 }
 0x23e   : > { %17462 = vmatpush3.msra.mxu1 %v21240_v60  ;;  %17420 = vmatprep.subr.mxu0 %v21227_v6 }
 0x23f   : > { %17463 = vmatprep.subr.mxu1 %v21250_v12  ;;  %17421 = vmatpush3.msra.mxu0 %v21227_v6 }
 0x240   : > { %17464 = vmatpush3.msra.mxu1 %v21250_v12  ;;  %17422 = vmatprep.subr.mxu0 %v21238_v8 }
 0x241   : > { %17465 = vmatprep.subr.mxu1 %v21254_v14  ;;  %17423 = vmatpush3.msra.mxu0 %v21238_v8 }
 0x242   : > { %17466 = vmatpush3.msra.mxu1 %v21254_v14  ;;  %17424 = vmatprep.subr.mxu0 %v21248_v11 }
 0x243   : > { %17467 = vmatprep.subr.mxu1 %v21268_v32  ;;  %17425 = vmatpush3.msra.mxu0 %v21248_v11 }
 0x244   : > { %17468 = vmatpush3.msra.mxu1 %v21268_v32  ;;  %17426 = vmatprep.subr.mxu0 %v21264_v16 }
 0x245   : > { %17469 = vmatprep.subr.mxu1 %v21294_v27  ;;  %17427 = vmatpush3.msra.mxu0 %v21264_v16 }
 0x246   : > { %17470 = vmatpush3.msra.mxu1 %v21294_v27  ;;  %17428 = vmatprep.subr.mxu0 %v21278_v22 }
 0x247   : > { %17471 = vmatprep.subr.mxu1 %v21310_v38  ;;  %17429 = vmatpush3.msra.mxu0 %v21278_v22 }
 0x248   : > { %17472 = vmatpush3.msra.mxu1 %v21310_v38  ;;  %17430 = vmatprep.subr.mxu0 %v21283_v33 }
 0x249   : > { %17473 = vmatprep.subr.mxu1 %v21326_v41  ;;  %17431 = vmatpush3.msra.mxu0 %v21283_v33 }
 0x24a   : > { %17474 = vmatpush3.msra.mxu1 %v21326_v41  ;;  %17432 = vmatprep.subr.mxu0 %v21299_v28 }
 0x24b   : > { %17475 = vmatprep.subr.mxu1 %v21342_v46  ;;  %17433 = vmatpush3.msra.mxu0 %v21299_v28 }
 0x24c   : > { %17476 = vmatpush3.msra.mxu1 %v21342_v46  ;;  %17434 = vmatprep.subr.mxu0 %v21324_v40 }
 0x24d   : > { %17477 = vmatprep.subr.mxu1 %v21358_v53  ;;  %17435 = vmatpush3.msra.mxu0 %v21324_v40 }
 0x24e   : > { %17478 = vmatpush3.msra.mxu1 %v21358_v53  ;;  %17436 = vmatprep.subr.mxu0 %v21340_v45 }
 0x24f   : > { %17479 = vmatprep.subr.mxu1 %v21374_v59  ;;  %17437 = vmatpush3.msra.mxu0 %v21340_v45 }
 0x250   : > { %17480 = vmatpush3.msra.mxu1 %v21374_v59  ;;  %17438 = vmatprep.subr.mxu0 %v21356_v52 }
 0x251   : > { %17481 = vmatprep.subr.mxu1 %v21390_v13  ;;  %17439 = vmatpush3.msra.mxu0 %v21356_v52 }
 0x252   : > { %17482 = vmatpush3.msra.mxu1 %v21390_v13  ;;  %17440 = vmatprep.subr.mxu0 %v21372_v58 }
 0x253   : > { %17483 = vmatprep.subr.mxu1 %v21408_v35  ;;  %17441 = vmatpush3.msra.mxu0 %v21372_v58 }
 0x254   : > { %17484 = vmatpush3.msra.mxu1 %v21408_v35  ;;  %17442 = vmatprep.subr.mxu0 %v21388_v9 }
 0x255   : > { %17486 = vmatmul.mubr.f32.vlgmr.msra.gmra.mxu1 %v25909_v18  ;;  %17523 = vmatprep.subr.mxu1 %v21207_v61  ;;  %v25912_v18 = vld [vmem:[#allocation74_spill] sm:$0xff] }
 0x256   : > { %17443 = vmatpush3.msra.mxu0 %v21388_v9  ;;  %17524 = vmatpush3.msra.mxu1 %v21207_v61 }
 0x257   : > { %17555 = vmatprep.mubr.f32.mxu1 %v22071_v63  ;;  %17444 = vmatprep.subr.mxu0 %v21406_v25 }
 0x258   : > { %17525 = vmatprep.subr.mxu1 %v21213_v1  ;;  %17445 = vmatpush3.msra.mxu0 %v21406_v25 }
 0x259   : > { %17526 = vmatpush3.msra.mxu1 %v21213_v1  ;;  %17446 = vmatprep.subr.mxu0 %v21422_v44 }
 0x25a   : > { %17527 = vmatprep.subr.mxu1 %v21222_v4  ;;  %17447 = vmatpush3.msra.mxu0 %v21422_v44  ;;  %v1220_v44 = vadd.f32 %v25912_v18, %v1132_v17 }
 0x25b   : > { %17528 = vmatpush3.msra.mxu1 %v21222_v4  ;;  %17448 = vmatprep.subr.mxu0 %v21438_v55 }
 0x25c   : > { %17529 = vmatprep.subr.mxu1 %v21229_v48  ;;  %17449 = vmatpush3.msra.mxu0 %v21438_v55 }
 0x25d   : > { %17530 = vmatpush3.msra.mxu1 %v21229_v48  ;;  %17451 = vmatmul.mubr.f32.vlgmr.msra.gmra.mxu0 %v22160_v5  ;;  %v25913_v5 = vld [vmem:[#allocation78_spill] sm:$0xff] }
 0x25e   : > { %17488 = vmatprep.subr.mxu0 %v21235_v0  ;;  %17531 = vmatprep.subr.mxu1 %v21240_v60  ;;  %v1306_v42 = vadd.f32 %v25913_v5, %v1220_v44  ;;  %v25915_v44 = vld [vmem:[#allocation84_spill] sm:$0xff] }
 0x25f   : > { %17489 = vmatpush3.msra.mxu0 %v21235_v0  ;;  %17520 = vmatprep.mubr.f32.mxu0 %v22071_v63  ;;  %v25914_v63 = vld [vmem:[#allocation80_spill] sm:$0xff] }
 0x260   : > { %17532 = vmatpush3.msra.mxu1 %v21240_v60  ;;  %17490 = vmatprep.subr.mxu0 %v21245_v10  ;;  %v1399_v39 = vadd.f32 %v25914_v63, %v1306_v42  ;;  %v25916_v63 = vld [vmem:[#allocation71_spill] sm:$0xff] }
 0x261   : > { %17533 = vmatprep.subr.mxu1 %v21250_v12  ;;  %17491 = vmatpush3.msra.mxu0 %v21245_v10 }
 0x262   : > { %17534 = vmatpush3.msra.mxu1 %v21250_v12  ;;  %17492 = vmatprep.subr.mxu0 %v21261_v15  ;;  %v1482_v17 = vadd.f32 %v25915_v44, %v1399_v39  ;;  %v25917_v39 = vld [vmem:[#allocation75_spill] sm:$0xff] }
 0x263   : > { %17535 = vmatprep.subr.mxu1 %v21254_v14  ;;  %17493 = vmatpush3.msra.mxu0 %v21261_v15  ;;  %v1139_v44 = vadd.f32 %v25917_v39, %v25916_v63  ;;  %v25918_v63 = vld [vmem:[#allocation77_spill] sm:$0xff] }
 0x264   : > { %17536 = vmatpush3.msra.mxu1 %v21254_v14  ;;  %17494 = vmatprep.subr.mxu0 %v21275_v21  ;;  %v22305_v18 = vand.u32 4294901760, %v1482_v17 }
 0x265   : > { %17537 = vmatprep.subr.mxu1 %v21268_v32  ;;  %17495 = vmatpush3.msra.mxu0 %v21275_v21  ;;  %v1228_v39 = vadd.f32 %v25918_v63, %v1139_v44 }
 0x266   : > { %17538 = vmatpush3.msra.mxu1 %v21268_v32  ;;  %17496 = vmatprep.subr.mxu0 %v21292_v26  ;;  %v22316_v5 = vsub.f32 %v1482_v17, %v22305_v18 }
 0x267   : > { %17539 = vmatprep.subr.mxu1 %v21294_v27  ;;  %17497 = vmatpush3.msra.mxu0 %v21292_v26 }
 0x268   : > { %17540 = vmatpush3.msra.mxu1 %v21294_v27  ;;  %17498 = vmatprep.subr.mxu0 %v21308_v37  ;;  %v25486_v42 = vand.u32 4294901760, %v22316_v5 }
 0x269   : > { %17541 = vmatprep.subr.mxu1 %v21310_v38  ;;  %17499 = vmatpush3.msra.mxu0 %v21308_v37 }
 0x26a   : > { %17542 = vmatpush3.msra.mxu1 %v21310_v38  ;;  %17500 = vmatprep.subr.mxu0 %v21315_v29  ;;  %v6848_v17 = vsub.f32 %v22316_v5, %v25486_v42  ;;  %v25919_v42 = vld [vmem:[#allocation81_spill] sm:$0xff] }
 0x26b   : > { %17543 = vmatprep.subr.mxu1 %v21326_v41  ;;  %17501 = vmatpush3.msra.mxu0 %v21315_v29 }
 0x26c   : > { %17544 = vmatpush3.msra.mxu1 %v21326_v41  ;;  %17502 = vmatprep.subr.mxu0 %v25876_v62 }
 0x26d   : > { %17545 = vmatprep.subr.mxu1 %v21342_v46  ;;  %17503 = vmatpush3.msra.mxu0 %v25876_v62 }
 0x26e   : > { %17546 = vmatpush3.msra.mxu1 %v21342_v46  ;;  %17504 = vmatprep.subr.mxu0 %v25877_v36 }
 0x26f   : > { %17547 = vmatprep.subr.mxu1 %v21358_v53  ;;  %17505 = vmatpush3.msra.mxu0 %v25877_v36 }
 0x270   : > { %17548 = vmatpush3.msra.mxu1 %v21358_v53  ;;  %17506 = vmatprep.subr.mxu0 %v25878_v31 }
 0x271   : > { %17549 = vmatprep.subr.mxu1 %v21374_v59  ;;  %17507 = vmatpush3.msra.mxu0 %v25878_v31 }
 0x272   : > { %17550 = vmatpush3.msra.mxu1 %v21374_v59  ;;  %17508 = vmatprep.subr.mxu0 %v25879_v2 }
 0x273   : > { %17551 = vmatprep.subr.mxu1 %v21390_v13  ;;  %17509 = vmatpush3.msra.mxu0 %v25879_v2 }
 0x274   : > { %17552 = vmatpush3.msra.mxu1 %v21390_v13  ;;  %17510 = vmatprep.subr.mxu0 %v25880_v51 }
 0x275   : > { %17553 = vmatprep.subr.mxu1 %v21408_v35  ;;  %17511 = vmatpush3.msra.mxu0 %v25880_v51 }
 0x276   : > { %17554 = vmatpush3.msra.mxu1 %v21408_v35  ;;  %17512 = vmatprep.subr.mxu0 %v25881_v54 }
 0x277   : > { %17556 = vmatmul.mubr.f32.vlgmr.msra.gmra.mxu1 %v22149_v50  ;;  %17593 = vmatprep.subr.mxu1 %v25883_v49 }
 0x278   : > { %17513 = vmatpush3.msra.mxu0 %v25881_v54  ;;  %17594 = vmatpush3.msra.mxu1 %v25883_v49 }
 0x279   : > { %17625 = vmatprep.mubr.f32.mxu1 %v22305_v18  ;;  %17514 = vmatprep.subr.mxu0 %v25884_v56 }
 0x27a   : > { %17595 = vmatprep.subr.mxu1 %v25885_v23  ;;  %17515 = vmatpush3.msra.mxu0 %v25884_v56 }
 0x27b   : > { %17596 = vmatpush3.msra.mxu1 %v25885_v23  ;;  %17516 = vmatprep.subr.mxu0 %v25888_v24  ;;  %v6849_v23 = vand.u32 4294901760, %v6848_v17  ;;  %v25923_v17 = vld [vmem:[#allocation88_spill] sm:$0xff] }
 0x27c   : > { %17597 = vmatprep.subr.mxu1 %v25889_v43  ;;  %17517 = vmatpush3.msra.mxu0 %v25888_v24 }
 0x27d   : > { %17598 = vmatpush3.msra.mxu1 %v25889_v43  ;;  %17518 = vmatprep.subr.mxu0 %v25890_v20 }
 0x27e   : > { %17599 = vmatprep.subr.mxu1 %v25891_v57  ;;  %17519 = vmatpush3.msra.mxu0 %v25890_v20  ;;  %v1315_v20 = vadd.f32 %v25919_v42, %v1228_v39  ;;  %v25922_v42 = vld [vmem:[#allocation50_spill] sm:$0xff] }
 0x27f   : > { %17600 = vmatpush3.msra.mxu1 %v25891_v57  ;;  %17521 = vmatmul.mubr.f32.vlgmr.msra.gmra.mxu0 %v22149_v50  ;;  %v25920_v50 = vld [vmem:[#allocation42_spill] sm:$0xff] }
 0x280   : > { %17558 = vmatprep.subr.mxu0 %v21207_v61  ;;  %17601 = vmatprep.subr.mxu1 %v25893_v47 }
 0x281   : > { %17559 = vmatpush3.msra.mxu0 %v21207_v61  ;;  %17590 = vmatprep.mubr.f32.mxu0 %v6849_v23  ;;  %v25921_v23 = vld [vmem:[#allocation83_spill] sm:$0xff] }
 0x282   : > { %17602 = vmatpush3.msra.mxu1 %v25893_v47  ;;  %17560 = vmatprep.subr.mxu0 %v21213_v1  ;;  %v1406_v44 = vadd.f32 %v25921_v23, %v1315_v20  ;;  %v25924_v20 = vld [vmem:[#allocation56_spill] sm:$0xff]  ;;  %v25925_v23 = vld [vmem:[#allocation58_spill] sm:$0xff] }
 0x283   : > { %17603 = vmatprep.subr.mxu1 %v25895_v7  ;;  %17561 = vmatpush3.msra.mxu0 %v21213_v1 }
 0x284   : > { %17604 = vmatpush3.msra.mxu1 %v25895_v7  ;;  %17562 = vmatprep.subr.mxu0 %v21222_v4  ;;  %v1489_v63 = vadd.f32 %v25923_v17, %v1406_v44  ;;  %v25926_v44 = vld [vmem:[#allocation60_spill] sm:$0xff] }
 0x285   : > { %17605 = vmatprep.subr.mxu1 %v25920_v50  ;;  %17563 = vmatpush3.msra.mxu0 %v21222_v4 }
 0x286   : > { %17606 = vmatpush3.msra.mxu1 %v25920_v50  ;;  %17564 = vmatprep.subr.mxu0 %v21229_v48  ;;  %v22383_v39 = vand.u32 4294901760, %v1489_v63 }
 0x287   : > { %17607 = vmatprep.subr.mxu1 %v25898_v34  ;;  %17565 = vmatpush3.msra.mxu0 %v21229_v48 }
 0x288   : > { %17608 = vmatpush3.msra.mxu1 %v25898_v34  ;;  %17566 = vmatprep.subr.mxu0 %v21240_v60  ;;  %v22394_v17 = vsub.f32 %v1489_v63, %v22383_v39  ;;  %v25929_v63 = vand.u32 4294901760, %v22316_v5 }
 0x289   : > { %17609 = vmatprep.subr.mxu1 %v25922_v42  ;;  %17567 = vmatpush3.msra.mxu0 %v21240_v60 }
 0x28a   : > { %17610 = vmatpush3.msra.mxu1 %v25922_v42  ;;  %17568 = vmatprep.subr.mxu0 %v21250_v12 }
 0x28b   : > { %17611 = vmatprep.subr.mxu1 %v25901_v19  ;;  %17569 = vmatpush3.msra.mxu0 %v21250_v12 }
 0x28c   : > { %17612 = vmatpush3.msra.mxu1 %v25901_v19  ;;  %17570 = vmatprep.subr.mxu0 %v21254_v14 }
 0x28d   : > { %17613 = vmatprep.subr.mxu1 %v25924_v20  ;;  %17571 = vmatpush3.msra.mxu0 %v21254_v14 }
 0x28e   : > { %17614 = vmatpush3.msra.mxu1 %v25924_v20  ;;  %17572 = vmatprep.subr.mxu0 %v21268_v32  ;;  %v25927_v20 = vld [vmem:[#allocation62_spill] sm:$0xff] }
 0x28f   : > { %17615 = vmatprep.subr.mxu1 %v25925_v23  ;;  %17573 = vmatpush3.msra.mxu0 %v21268_v32 }
 0x290   : > { %17616 = vmatpush3.msra.mxu1 %v25925_v23  ;;  %17574 = vmatprep.subr.mxu0 %v21294_v27  ;;  %v25928_v23 = vld [vmem:[#allocation64_spill] sm:$0xff] }
 0x291   : > { %17617 = vmatprep.subr.mxu1 %v25926_v44  ;;  %17575 = vmatpush3.msra.mxu0 %v21294_v27 }
 0x292   : > { %17618 = vmatpush3.msra.mxu1 %v25926_v44  ;;  %17576 = vmatprep.subr.mxu0 %v21310_v38  ;;  %v6857_v44 = vand.u32 4294901760, %v22394_v17 }
 0x293   : > { %17619 = vmatprep.subr.mxu1 %v25927_v20  ;;  %17577 = vmatpush3.msra.mxu0 %v21310_v38 }
 0x294   : > { %17620 = vmatpush3.msra.mxu1 %v25927_v20  ;;  %17578 = vmatprep.subr.mxu0 %v21326_v41 }
 0x295   : > { %17621 = vmatprep.subr.mxu1 %v25928_v23  ;;  %17579 = vmatpush3.msra.mxu0 %v21326_v41 }
 0x296   : > { %17622 = vmatpush3.msra.mxu1 %v25928_v23  ;;  %17580 = vmatprep.subr.mxu0 %v21342_v46  ;;  %v6858_v23 = vsub.f32 %v22394_v17, %v6857_v44 }
 0x297   : > { %17623 = vmatprep.subr.mxu1 %v25907_v30  ;;  %17581 = vmatpush3.msra.mxu0 %v21342_v46 }
 0x298   : > { %17624 = vmatpush3.msra.mxu1 %v25907_v30  ;;  %17582 = vmatprep.subr.mxu0 %v21358_v53 }
 0x299   : > { %17626 = vmatmul.mubr.f32.vlgmr.msra.gmra.mxu1 %v22383_v39  ;;  %17663 = vmatprep.subr.mxu1 %v21207_v61 }
 0x29a   : > { %17583 = vmatpush3.msra.mxu0 %v21358_v53  ;;  %17664 = vmatpush3.msra.mxu1 %v21207_v61 }
 0x29b   : > { %17695 = vmatprep.mubr.f32.mxu1 %v25929_v63  ;;  %17584 = vmatprep.subr.mxu0 %v21374_v59  ;;  %v6859_v63 = vand.u32 4294901760, %v6858_v23  ;;  %v25931_v23 = vld [vmem:[#allocation85_spill] sm:$0xff] }
 0x29c   : > { %17665 = vmatprep.subr.mxu1 %v21213_v1  ;;  %17585 = vmatpush3.msra.mxu0 %v21374_v59 }
 0x29d   : > { %17666 = vmatpush3.msra.mxu1 %v21213_v1  ;;  %17586 = vmatprep.subr.mxu0 %v21390_v13 }
 0x29e   : > { %17667 = vmatprep.subr.mxu1 %v21222_v4  ;;  %17587 = vmatpush3.msra.mxu0 %v21390_v13 }
 0x29f   : > { %17668 = vmatpush3.msra.mxu1 %v21222_v4  ;;  %17588 = vmatprep.subr.mxu0 %v21408_v35 }
 0x2a0   : > { %17669 = vmatprep.subr.mxu1 %v21229_v48  ;;  %17589 = vmatpush3.msra.mxu0 %v21408_v35 }
 0x2a1   : > { %17670 = vmatpush3.msra.mxu1 %v21229_v48  ;;  %17591 = vmatmul.mubr.f32.vlgmr.msra.gmra.mxu0 %v6859_v63 }
 0x2a2   : > { %17628 = vmatprep.subr.mxu0 %v21220_v3  ;;  %17671 = vmatprep.subr.mxu1 %v21240_v60 }
 0x2a3   : > { %17629 = vmatpush3.msra.mxu0 %v21220_v3  ;;  %17660 = vmatprep.mubr.f32.mxu0 %v22316_v5  ;;  %v25930_v5 = vld [vmem:[#allocation52_spill] sm:$0xff] }
 0x2a4   : > { %17672 = vmatpush3.msra.mxu1 %v21240_v60  ;;  %17630 = vmatprep.subr.mxu0 %v21227_v6 }
 0x2a5   : > { %17673 = vmatprep.subr.mxu1 %v21250_v12  ;;  %17631 = vmatpush3.msra.mxu0 %v21227_v6 }
 0x2a6   : > { %17674 = vmatpush3.msra.mxu1 %v21250_v12  ;;  %17632 = vmatprep.subr.mxu0 %v21238_v8 }
 0x2a7   : > { %17675 = vmatprep.subr.mxu1 %v21254_v14  ;;  %17633 = vmatpush3.msra.mxu0 %v21238_v8 }
 0x2a8   : > { %17676 = vmatpush3.msra.mxu1 %v21254_v14  ;;  %17634 = vmatprep.subr.mxu0 %v21248_v11 }
 0x2a9   : > { %17677 = vmatprep.subr.mxu1 %v21268_v32  ;;  %17635 = vmatpush3.msra.mxu0 %v21248_v11 }
 0x2aa   : > { %17678 = vmatpush3.msra.mxu1 %v21268_v32  ;;  %17636 = vmatprep.subr.mxu0 %v21264_v16 }
 0x2ab   : > { %17679 = vmatprep.subr.mxu1 %v21294_v27  ;;  %17637 = vmatpush3.msra.mxu0 %v21264_v16 }
 0x2ac   : > { %17680 = vmatpush3.msra.mxu1 %v21294_v27  ;;  %17638 = vmatprep.subr.mxu0 %v21278_v22 }
 0x2ad   : > { %17681 = vmatprep.subr.mxu1 %v21310_v38  ;;  %17639 = vmatpush3.msra.mxu0 %v21278_v22 }
 0x2ae   : > { %17682 = vmatpush3.msra.mxu1 %v21310_v38  ;;  %17640 = vmatprep.subr.mxu0 %v21283_v33 }
 0x2af   : > { %17683 = vmatprep.subr.mxu1 %v21326_v41  ;;  %17641 = vmatpush3.msra.mxu0 %v21283_v33 }
 0x2b0   : > { %17684 = vmatpush3.msra.mxu1 %v21326_v41  ;;  %17642 = vmatprep.subr.mxu0 %v21299_v28 }
 0x2b1   : > { %17685 = vmatprep.subr.mxu1 %v21342_v46  ;;  %17643 = vmatpush3.msra.mxu0 %v21299_v28 }
 0x2b2   : > { %17686 = vmatpush3.msra.mxu1 %v21342_v46  ;;  %17644 = vmatprep.subr.mxu0 %v21324_v40 }
 0x2b3   : > { %17687 = vmatprep.subr.mxu1 %v21358_v53  ;;  %17645 = vmatpush3.msra.mxu0 %v21324_v40 }
 0x2b4   : > { %17688 = vmatpush3.msra.mxu1 %v21358_v53  ;;  %17646 = vmatprep.subr.mxu0 %v21340_v45 }
 0x2b5   : > { %17689 = vmatprep.subr.mxu1 %v21374_v59  ;;  %17647 = vmatpush3.msra.mxu0 %v21340_v45 }
 0x2b6   : > { %17690 = vmatpush3.msra.mxu1 %v21374_v59  ;;  %17648 = vmatprep.subr.mxu0 %v21356_v52 }
 0x2b7   : > { %17691 = vmatprep.subr.mxu1 %v21390_v13  ;;  %17649 = vmatpush3.msra.mxu0 %v21356_v52 }
 0x2b8   : > { %17692 = vmatpush3.msra.mxu1 %v21390_v13  ;;  %17650 = vmatprep.subr.mxu0 %v21372_v58 }
 0x2b9   : > { %17693 = vmatprep.subr.mxu1 %v21408_v35  ;;  %17651 = vmatpush3.msra.mxu0 %v21372_v58 }
 0x2ba   : > { %17694 = vmatpush3.msra.mxu1 %v21408_v35  ;;  %17652 = vmatprep.subr.mxu0 %v21388_v9 }
 0x2bb   : > { %17696 = vmatmul.mubr.f32.vlgmr.msra.gmra.mxu1 %v6857_v44  ;;  %17733 = vmatprep.subr.mxu1 %v21207_v61  ;;  %v25932_v44 = vld [vmem:[#allocation90_spill] sm:$0xff] }
 0x2bc   : > { %17653 = vmatpush3.msra.mxu0 %v21388_v9  ;;  %17734 = vmatpush3.msra.mxu1 %v21207_v61  ;;  %v1670_v63 = vadd.f32 %v25932_v44, %v25931_v23 }
 0x2bd   : > { %17765 = vmatprep.mubr.f32.mxu1 %v22305_v18  ;;  %17654 = vmatprep.subr.mxu0 %v21406_v25 }
 0x2be   : > { %17735 = vmatprep.subr.mxu1 %v21213_v1  ;;  %17655 = vmatpush3.msra.mxu0 %v21406_v25 }
 0x2bf   : > { %17736 = vmatpush3.msra.mxu1 %v21213_v1  ;;  %17656 = vmatprep.subr.mxu0 %v25930_v5 }
 0x2c0   : > { %17737 = vmatprep.subr.mxu1 %v21222_v4  ;;  %17657 = vmatpush3.msra.mxu0 %v25930_v5  ;;  %v25933_v5 = vld [vmem:[#allocation93_spill] sm:$0xff] }
 0x2c1   : > { %17738 = vmatpush3.msra.mxu1 %v21222_v4  ;;  %17658 = vmatprep.subr.mxu0 %v21438_v55  ;;  %v1758_v25 = vadd.f32 %v25933_v5, %v1670_v63 }
 0x2c2   : > { %17739 = vmatprep.subr.mxu1 %v21229_v48  ;;  %17659 = vmatpush3.msra.mxu0 %v21438_v55 }
 0x2c3   : > { %17740 = vmatpush3.msra.mxu1 %v21229_v48  ;;  %17661 = vmatmul.mubr.f32.vlgmr.msra.gmra.mxu0 %v22394_v17  ;;  %v25934_v17 = vld [vmem:[#allocation98_spill] sm:$0xff] }
 0x2c4   : > { %17698 = vmatprep.subr.mxu0 %v21235_v0  ;;  %17741 = vmatprep.subr.mxu1 %v21240_v60  ;;  %v1844_v23 = vadd.f32 %v25934_v17, %v1758_v25  ;;  %v25936_v25 = vld [vmem:[#allocation106_spill] sm:$0xff] }
 0x2c5   : > { %17699 = vmatpush3.msra.mxu0 %v21235_v0  ;;  %17730 = vmatprep.mubr.f32.mxu0 %v22305_v18  ;;  %v25935_v18 = vld [vmem:[#allocation101_spill] sm:$0xff] }
 0x2c6   : > { %17742 = vmatpush3.msra.mxu1 %v21240_v60  ;;  %17700 = vmatprep.subr.mxu0 %v21245_v10  ;;  %v1937_v5 = vadd.f32 %v25935_v18, %v1844_v23  ;;  %v25937_v18 = vld [vmem:[#allocation23_spill] sm:$0xff] }
 0x2c7   : > { %17743 = vmatprep.subr.mxu1 %v21250_v12  ;;  %17701 = vmatpush3.msra.mxu0 %v21245_v10 }
 0x2c8   : > { %17744 = vmatpush3.msra.mxu1 %v21250_v12  ;;  %17702 = vmatprep.subr.mxu0 %v21261_v15  ;;  %v2020_v44 = vadd.f32 %v25936_v25, %v1937_v5  ;;  %v25938_v5 = vld [vmem:[#allocation89_spill] sm:$0xff]  ;;  %v25939_v25 = vld [vmem:[#allocation94_spill] sm:$0xff] }
 0x2c9   : > { %17745 = vmatprep.subr.mxu1 %v21254_v14  ;;  %17703 = vmatpush3.msra.mxu0 %v21261_v15 }
 0x2ca   : > { %17746 = vmatpush3.msra.mxu1 %v21254_v14  ;;  %17704 = vmatprep.subr.mxu0 %v21275_v21  ;;  %v22539_v63 = vand.u32 4294901760, %v2020_v44 }
 0x2cb   : > { %17747 = vmatprep.subr.mxu1 %v21268_v32  ;;  %17705 = vmatpush3.msra.mxu0 %v21275_v21 }
 0x2cc   : > { %17748 = vmatpush3.msra.mxu1 %v21268_v32  ;;  %17706 = vmatprep.subr.mxu0 %v21292_v26  ;;  %v22550_v17 = vsub.f32 %v2020_v44, %v22539_v63  ;;  %v1677_v44 = vadd.f32 %v25939_v25, %v25938_v5  ;;  %v25941_v5 = vld [vmem:[#allocation97_spill] sm:$0xff] }
 0x2cd   : > { %17749 = vmatprep.subr.mxu1 %v21294_v27  ;;  %17707 = vmatpush3.msra.mxu0 %v21292_v26 }
 0x2ce   : > { %17750 = vmatpush3.msra.mxu1 %v21294_v27  ;;  %17708 = vmatprep.subr.mxu0 %v21308_v37  ;;  %v25498_v23 = vand.u32 4294901760, %v22550_v17  ;;  %v1766_v25 = vadd.f32 %v25941_v5, %v1677_v44  ;;  %v25946_v5 = vld [vmem:[#allocation58_spill] sm:$0xff] }
 0x2cf   : > { %17751 = vmatprep.subr.mxu1 %v21310_v38  ;;  %17709 = vmatpush3.msra.mxu0 %v21308_v37 }
 0x2d0   : > { %17752 = vmatpush3.msra.mxu1 %v21310_v38  ;;  %17710 = vmatprep.subr.mxu0 %v21315_v29 }
 0x2d1   : > { %17753 = vmatprep.subr.mxu1 %v21326_v41  ;;  %17711 = vmatpush3.msra.mxu0 %v21315_v29 }
 0x2d2   : > { %17754 = vmatpush3.msra.mxu1 %v21326_v41  ;;  %17712 = vmatprep.subr.mxu0 %v25876_v62 }
 0x2d3   : > { %17755 = vmatprep.subr.mxu1 %v21342_v46  ;;  %17713 = vmatpush3.msra.mxu0 %v25876_v62 }
 0x2d4   : > { %17756 = vmatpush3.msra.mxu1 %v21342_v46  ;;  %17714 = vmatprep.subr.mxu0 %v25877_v36 }
 0x2d5   : > { %17757 = vmatprep.subr.mxu1 %v21358_v53  ;;  %17715 = vmatpush3.msra.mxu0 %v25877_v36 }
 0x2d6   : > { %17758 = vmatpush3.msra.mxu1 %v21358_v53  ;;  %17716 = vmatprep.subr.mxu0 %v25878_v31 }
 0x2d7   : > { %17759 = vmatprep.subr.mxu1 %v21374_v59  ;;  %17717 = vmatpush3.msra.mxu0 %v25878_v31 }
 0x2d8   : > { %17760 = vmatpush3.msra.mxu1 %v21374_v59  ;;  %17718 = vmatprep.subr.mxu0 %v25879_v2 }
 0x2d9   : > { %17761 = vmatprep.subr.mxu1 %v21390_v13  ;;  %17719 = vmatpush3.msra.mxu0 %v25879_v2 }
 0x2da   : > { %17762 = vmatpush3.msra.mxu1 %v21390_v13  ;;  %17720 = vmatprep.subr.mxu0 %v25880_v51 }
 0x2db   : > { %17763 = vmatprep.subr.mxu1 %v21408_v35  ;;  %17721 = vmatpush3.msra.mxu0 %v25880_v51 }
 0x2dc   : > { %17764 = vmatpush3.msra.mxu1 %v21408_v35  ;;  %17722 = vmatprep.subr.mxu0 %v25881_v54 }
 0x2dd   : > { %17766 = vmatmul.mubr.f32.vlgmr.msra.gmra.mxu1 %v22383_v39  ;;  %17803 = vmatprep.subr.mxu1 %v25883_v49 }
 0x2de   : > { %17723 = vmatpush3.msra.mxu0 %v25881_v54  ;;  %17804 = vmatpush3.msra.mxu1 %v25883_v49  ;;  %v7532_v54 = vsub.f32 %v22550_v17, %v25498_v23  ;;  %v25940_v49 = vld [vmem:[#allocation59_spill] sm:$0xff]  ;;  %v25942_v23 = vld [vmem:[#allocation102_spill] sm:$0xff] }
 0x2df   : > { %17835 = vmatprep.mubr.f32.mxu1 %v22539_v63  ;;  %17724 = vmatprep.subr.mxu0 %v25884_v56 }
 0x2e0   : > { %17805 = vmatprep.subr.mxu1 %v25937_v18  ;;  %17725 = vmatpush3.msra.mxu0 %v25884_v56 }
 0x2e1   : > { %17806 = vmatpush3.msra.mxu1 %v25937_v18  ;;  %17726 = vmatprep.subr.mxu0 %v25888_v24  ;;  %v7533_v18 = vand.u32 4294901760, %v7532_v54  ;;  %v25943_v54 = vld [vmem:[#allocation105_spill] sm:$0xff] }
 0x2e2   : > { %17807 = vmatprep.subr.mxu1 %v25889_v43  ;;  %17727 = vmatpush3.msra.mxu0 %v25888_v24 }
 0x2e3   : > { %17808 = vmatpush3.msra.mxu1 %v25889_v43  ;;  %17728 = vmatprep.subr.mxu0 %v25940_v49 }
 0x2e4   : > { %17809 = vmatprep.subr.mxu1 %v25891_v57  ;;  %17729 = vmatpush3.msra.mxu0 %v25940_v49  ;;  %v1853_v49 = vadd.f32 %v25942_v23, %v1766_v25  ;;  %v25944_v23 = vld [vmem:[#allocation110_spill] sm:$0xff]  ;;  %v25947_v25 = vld [vmem:[#allocation60_spill] sm:$0xff] }
 0x2e5   : > { %17810 = vmatpush3.msra.mxu1 %v25891_v57  ;;  %17731 = vmatmul.mubr.f32.vlgmr.msra.gmra.mxu0 %v22383_v39 }
 0x2e6   : > { %17768 = vmatprep.subr.mxu0 %v21207_v61  ;;  %17811 = vmatprep.subr.mxu1 %v25893_v47  ;;  %v1944_v39 = vadd.f32 %v25943_v54, %v1853_v49  ;;  %v25945_v49 = vld [vmem:[#allocation56_spill] sm:$0xff] }
 0x2e7   : > { %17769 = vmatpush3.msra.mxu0 %v21207_v61  ;;  %17800 = vmatprep.mubr.f32.mxu0 %v7533_v18 }
 0x2e8   : > { %17812 = vmatpush3.msra.mxu1 %v25893_v47  ;;  %17770 = vmatprep.subr.mxu0 %v21213_v1  ;;  %v2027_v18 = vadd.f32 %v25944_v23, %v1944_v39  ;;  %v25948_v39 = vld [vmem:[#allocation64_spill] sm:$0xff] }
 0x2e9   : > { %17813 = vmatprep.subr.mxu1 %v25895_v7  ;;  %17771 = vmatpush3.msra.mxu0 %v21213_v1 }
 0x2ea   : > { %17814 = vmatpush3.msra.mxu1 %v25895_v7  ;;  %17772 = vmatprep.subr.mxu0 %v21222_v4  ;;  %v22617_v44 = vand.u32 4294901760, %v2027_v18 }
 0x2eb   : > { %17815 = vmatprep.subr.mxu1 %v25920_v50  ;;  %17773 = vmatpush3.msra.mxu0 %v21222_v4 }
 0x2ec   : > { %17816 = vmatpush3.msra.mxu1 %v25920_v50  ;;  %17774 = vmatprep.subr.mxu0 %v21229_v48  ;;  %v22628_v54 = vsub.f32 %v2027_v18, %v22617_v44 }
 0x2ed   : > { %17817 = vmatprep.subr.mxu1 %v25898_v34  ;;  %17775 = vmatpush3.msra.mxu0 %v21229_v48 }
 0x2ee   : > { %17818 = vmatpush3.msra.mxu1 %v25898_v34  ;;  %17776 = vmatprep.subr.mxu0 %v21240_v60  ;;  %v7541_v23 = vand.u32 4294901760, %v22628_v54 }
 0x2ef   : > { %17819 = vmatprep.subr.mxu1 %v25922_v42  ;;  %17777 = vmatpush3.msra.mxu0 %v21240_v60 }
 0x2f0   : > { %17820 = vmatpush3.msra.mxu1 %v25922_v42  ;;  %17778 = vmatprep.subr.mxu0 %v21250_v12  ;;  %v7542_v18 = vsub.f32 %v22628_v54, %v7541_v23 }
 0x2f1   : > { %17821 = vmatprep.subr.mxu1 %v25901_v19  ;;  %17779 = vmatpush3.msra.mxu0 %v21250_v12 }
 0x2f2   : > { %17822 = vmatpush3.msra.mxu1 %v25901_v19  ;;  %17780 = vmatprep.subr.mxu0 %v21254_v14 }
 0x2f3   : > { %17823 = vmatprep.subr.mxu1 %v25945_v49  ;;  %17781 = vmatpush3.msra.mxu0 %v21254_v14 }
 0x2f4   : > { %17824 = vmatpush3.msra.mxu1 %v25945_v49  ;;  %17782 = vmatprep.subr.mxu0 %v21268_v32 }
 0x2f5   : > { %17825 = vmatprep.subr.mxu1 %v25946_v5  ;;  %17783 = vmatpush3.msra.mxu0 %v21268_v32 }
 0x2f6   : > { %17826 = vmatpush3.msra.mxu1 %v25946_v5  ;;  %17784 = vmatprep.subr.mxu0 %v21294_v27 }
 0x2f7   : > { %17827 = vmatprep.subr.mxu1 %v25947_v25  ;;  %17785 = vmatpush3.msra.mxu0 %v21294_v27 }
 0x2f8   : > { %17828 = vmatpush3.msra.mxu1 %v25947_v25  ;;  %17786 = vmatprep.subr.mxu0 %v21310_v38 }
 0x2f9   : > { %17829 = vmatprep.subr.mxu1 %v25927_v20  ;;  %17787 = vmatpush3.msra.mxu0 %v21310_v38 }
 0x2fa   : > { %17830 = vmatpush3.msra.mxu1 %v25927_v20  ;;  %17788 = vmatprep.subr.mxu0 %v21326_v41 }
 0x2fb   : > { %17831 = vmatprep.subr.mxu1 %v25948_v39  ;;  %17789 = vmatpush3.msra.mxu0 %v21326_v41 }
 0x2fc   : > { %17832 = vmatpush3.msra.mxu1 %v25948_v39  ;;  %17790 = vmatprep.subr.mxu0 %v21342_v46  ;;  %v25949_v39 = vand.u32 4294901760, %v22550_v17 }
 0x2fd   : > { %17833 = vmatprep.subr.mxu1 %v25907_v30  ;;  %17791 = vmatpush3.msra.mxu0 %v21342_v46 }
 0x2fe   : > { %17834 = vmatpush3.msra.mxu1 %v25907_v30  ;;  %17792 = vmatprep.subr.mxu0 %v21358_v53  ;;  %v7543_v30 = vand.u32 4294901760, %v7542_v18 }
 0x2ff   : > { %17836 = vmatmul.mubr.f32.vlgmr.msra.gmra.mxu1 %v22617_v44  ;;  %17873 = vmatprep.subr.mxu1 %v21207_v61 }
 0x300   : > { %17793 = vmatpush3.msra.mxu0 %v21358_v53  ;;  %17874 = vmatpush3.msra.mxu1 %v21207_v61 }
 0x301   : > { %17905 = vmatprep.mubr.f32.mxu1 %v25949_v39  ;;  %17794 = vmatprep.subr.mxu0 %v21374_v59  ;;  %v25952_v39 = vld [vmem:[#allocation87_spill] sm:$0xff] }
 0x302   : > { %17875 = vmatprep.subr.mxu1 %v21213_v1  ;;  %17795 = vmatpush3.msra.mxu0 %v21374_v59 }
 0x303   : > { %17876 = vmatpush3.msra.mxu1 %v21213_v1  ;;  %17796 = vmatprep.subr.mxu0 %v21390_v13 }
 0x304   : > { %17877 = vmatprep.subr.mxu1 %v21222_v4  ;;  %17797 = vmatpush3.msra.mxu0 %v21390_v13 }
 0x305   : > { %17878 = vmatpush3.msra.mxu1 %v21222_v4  ;;  %17798 = vmatprep.subr.mxu0 %v21408_v35 }
 0x306   : > { %17879 = vmatprep.subr.mxu1 %v21229_v48  ;;  %17799 = vmatpush3.msra.mxu0 %v21408_v35 }
 0x307   : > { %17880 = vmatpush3.msra.mxu1 %v21229_v48  ;;  %17801 = vmatmul.mubr.f32.vlgmr.msra.gmra.mxu0 %v7543_v30  ;;  %v25950_v30 = vld [vmem:[#allocation48_spill] sm:$0xff] }
 0x308   : > { %17838 = vmatprep.subr.mxu0 %v21220_v3  ;;  %17881 = vmatprep.subr.mxu1 %v21240_v60 }
 0x309   : > { %17839 = vmatpush3.msra.mxu0 %v21220_v3  ;;  %17870 = vmatprep.mubr.f32.mxu0 %v22550_v17  ;;  %v25951_v17 = vld [vmem:[#allocation52_spill] sm:$0xff] }
 0x30a   : > { %17882 = vmatpush3.msra.mxu1 %v21240_v60  ;;  %17840 = vmatprep.subr.mxu0 %v21227_v6 }
 0x30b   : > { %17883 = vmatprep.subr.mxu1 %v21250_v12  ;;  %17841 = vmatpush3.msra.mxu0 %v21227_v6 }
 0x30c   : > { %17884 = vmatpush3.msra.mxu1 %v21250_v12  ;;  %17842 = vmatprep.subr.mxu0 %v21238_v8 }
 0x30d   : > { %17885 = vmatprep.subr.mxu1 %v21254_v14  ;;  %17843 = vmatpush3.msra.mxu0 %v21238_v8 }
 0x30e   : > { %17886 = vmatpush3.msra.mxu1 %v21254_v14  ;;  %17844 = vmatprep.subr.mxu0 %v21248_v11 }
 0x30f   : > { %17887 = vmatprep.subr.mxu1 %v21268_v32  ;;  %17845 = vmatpush3.msra.mxu0 %v21248_v11 }
 0x310   : > { %17888 = vmatpush3.msra.mxu1 %v21268_v32  ;;  %17846 = vmatprep.subr.mxu0 %v21264_v16 }
 0x311   : > { %17889 = vmatprep.subr.mxu1 %v21294_v27  ;;  %17847 = vmatpush3.msra.mxu0 %v21264_v16 }
 0x312   : > { %17890 = vmatpush3.msra.mxu1 %v21294_v27  ;;  %17848 = vmatprep.subr.mxu0 %v21278_v22 }
 0x313   : > { %17891 = vmatprep.subr.mxu1 %v21310_v38  ;;  %17849 = vmatpush3.msra.mxu0 %v21278_v22 }
 0x314   : > { %17892 = vmatpush3.msra.mxu1 %v21310_v38  ;;  %17850 = vmatprep.subr.mxu0 %v21283_v33 }
 0x315   : > { %17893 = vmatprep.subr.mxu1 %v21326_v41  ;;  %17851 = vmatpush3.msra.mxu0 %v21283_v33 }
 0x316   : > { %17894 = vmatpush3.msra.mxu1 %v21326_v41  ;;  %17852 = vmatprep.subr.mxu0 %v21299_v28 }
 0x317   : > { %17895 = vmatprep.subr.mxu1 %v21342_v46  ;;  %17853 = vmatpush3.msra.mxu0 %v21299_v28 }
 0x318   : > { %17896 = vmatpush3.msra.mxu1 %v21342_v46  ;;  %17854 = vmatprep.subr.mxu0 %v21324_v40 }
 0x319   : > { %17897 = vmatprep.subr.mxu1 %v21358_v53  ;;  %17855 = vmatpush3.msra.mxu0 %v21324_v40 }
 0x31a   : > { %17898 = vmatpush3.msra.mxu1 %v21358_v53  ;;  %17856 = vmatprep.subr.mxu0 %v21340_v45 }
 0x31b   : > { %17899 = vmatprep.subr.mxu1 %v21374_v59  ;;  %17857 = vmatpush3.msra.mxu0 %v21340_v45 }
 0x31c   : > { %17900 = vmatpush3.msra.mxu1 %v21374_v59  ;;  %17858 = vmatprep.subr.mxu0 %v21356_v52 }
 0x31d   : > { %17901 = vmatprep.subr.mxu1 %v21390_v13  ;;  %17859 = vmatpush3.msra.mxu0 %v21356_v52 }
 0x31e   : > { %17902 = vmatpush3.msra.mxu1 %v21390_v13  ;;  %17860 = vmatprep.subr.mxu0 %v21372_v58 }
 0x31f   : > { %17903 = vmatprep.subr.mxu1 %v21408_v35  ;;  %17861 = vmatpush3.msra.mxu0 %v21372_v58 }
 0x320   : > { %17904 = vmatpush3.msra.mxu1 %v21408_v35  ;;  %17862 = vmatprep.subr.mxu0 %v21388_v9 }
 0x321   : > { %17906 = vmatmul.mubr.f32.vlgmr.msra.gmra.mxu1 %v7541_v23  ;;  %17943 = vmatprep.subr.mxu1 %v21207_v61  ;;  %v25953_v23 = vld [vmem:[#allocation92_spill] sm:$0xff] }
 0x322   : > { %17863 = vmatpush3.msra.mxu0 %v21388_v9  ;;  %17944 = vmatpush3.msra.mxu1 %v21207_v61  ;;  %v1672_v18 = vadd.f32 %v25953_v23, %v25952_v39 }
 0x323   : > { %17975 = vmatprep.mubr.f32.mxu1 %v22539_v63  ;;  %17864 = vmatprep.subr.mxu0 %v25950_v30 }
 0x324   : > { %17945 = vmatprep.subr.mxu1 %v21213_v1  ;;  %17865 = vmatpush3.msra.mxu0 %v25950_v30 }
 0x325   : > { %17946 = vmatpush3.msra.mxu1 %v21213_v1  ;;  %17866 = vmatprep.subr.mxu0 %v25951_v17 }
 0x326   : > { %17947 = vmatprep.subr.mxu1 %v21222_v4  ;;  %17867 = vmatpush3.msra.mxu0 %v25951_v17  ;;  %v25954_v17 = vld [vmem:[#allocation95_spill] sm:$0xff] }
 0x327   : > { %17948 = vmatpush3.msra.mxu1 %v21222_v4  ;;  %17868 = vmatprep.subr.mxu0 %v21438_v55  ;;  %v1760_v30 = vadd.f32 %v25954_v17, %v1672_v18 }
 0x328   : > { %17949 = vmatprep.subr.mxu1 %v21229_v48  ;;  %17869 = vmatpush3.msra.mxu0 %v21438_v55 }
 0x329   : > { %17950 = vmatpush3.msra.mxu1 %v21229_v48  ;;  %17871 = vmatmul.mubr.f32.vlgmr.msra.gmra.mxu0 %v22628_v54  ;;  %v25955_v54 = vld [vmem:[#allocation100_spill] sm:$0xff] }
 0x32a   : > { %17908 = vmatprep.subr.mxu0 %v21235_v0  ;;  %17951 = vmatprep.subr.mxu1 %v21240_v60  ;;  %v1846_v39 = vadd.f32 %v25955_v54, %v1760_v30  ;;  %v25957_v30 = vld [vmem:[#allocation108_spill] sm:$0xff] }
 0x32b   : > { %17909 = vmatpush3.msra.mxu0 %v21235_v0  ;;  %17940 = vmatprep.mubr.f32.mxu0 %v22539_v63  ;;  %v25956_v63 = vld [vmem:[#allocation103_spill] sm:$0xff] }
 0x32c   : > { %17952 = vmatpush3.msra.mxu1 %v21240_v60  ;;  %17910 = vmatprep.subr.mxu0 %v21245_v10  ;;  %v1939_v17 = vadd.f32 %v25956_v63, %v1846_v39  ;;  %v25958_v39 = vld [vmem:[#allocation51_spill] sm:$0xff]  ;;  %v25959_v63 = vld [vmem:[#allocation21_spill] sm:$0xff] }
 0x32d   : > { %17953 = vmatprep.subr.mxu1 %v21250_v12  ;;  %17911 = vmatpush3.msra.mxu0 %v21245_v10 }
 0x32e   : > { %17954 = vmatpush3.msra.mxu1 %v21250_v12  ;;  %17912 = vmatprep.subr.mxu0 %v21261_v15  ;;  %v2022_v23 = vadd.f32 %v25957_v30, %v1939_v17  ;;  %v25960_v30 = vld [vmem:[#allocation23_spill] sm:$0xff] }
 0x32f   : > { %17955 = vmatprep.subr.mxu1 %v21254_v14  ;;  %17913 = vmatpush3.msra.mxu0 %v21261_v15 }
 0x330   : > { %17956 = vmatpush3.msra.mxu1 %v21254_v14  ;;  %17914 = vmatprep.subr.mxu0 %v21275_v21  ;;  %v22773_v18 = vand.u32 4294901760, %v2022_v23 }
 0x331   : > { %17957 = vmatprep.subr.mxu1 %v21268_v32  ;;  %17915 = vmatpush3.msra.mxu0 %v21275_v21 }
 0x332   : > { %17958 = vmatpush3.msra.mxu1 %v21268_v32  ;;  %17916 = vmatprep.subr.mxu0 %v21292_v26  ;;  %v22784_v54 = vsub.f32 %v2022_v23, %v22773_v18  ;;  %v25961_v23 = vld [vmem:[#allocation91_spill] sm:$0xff] }
 0x333   : > { %17959 = vmatprep.subr.mxu1 %v21294_v27  ;;  %17917 = vmatpush3.msra.mxu0 %v21292_v26 }
 0x334   : > { %17960 = vmatpush3.msra.mxu1 %v21294_v27  ;;  %17918 = vmatprep.subr.mxu0 %v21308_v37  ;;  %v25509_v17 = vand.u32 4294901760, %v22784_v54 }
 0x335   : > { %17961 = vmatprep.subr.mxu1 %v21310_v38  ;;  %17919 = vmatpush3.msra.mxu0 %v21308_v37 }
 0x336   : > { %17962 = vmatpush3.msra.mxu1 %v21310_v38  ;;  %17920 = vmatprep.subr.mxu0 %v21315_v29 }
 0x337   : > { %17963 = vmatprep.subr.mxu1 %v21326_v41  ;;  %17921 = vmatpush3.msra.mxu0 %v21315_v29 }
 0x338   : > { %17964 = vmatpush3.msra.mxu1 %v21326_v41  ;;  %17922 = vmatprep.subr.mxu0 %v25876_v62 }
 0x339   : > { %17965 = vmatprep.subr.mxu1 %v21342_v46  ;;  %17923 = vmatpush3.msra.mxu0 %v25876_v62 }
 0x33a   : > { %17966 = vmatpush3.msra.mxu1 %v21342_v46  ;;  %17924 = vmatprep.subr.mxu0 %v25877_v36 }
 0x33b   : > { %17967 = vmatprep.subr.mxu1 %v21358_v53  ;;  %17925 = vmatpush3.msra.mxu0 %v25877_v36 }
 0x33c   : > { %17968 = vmatpush3.msra.mxu1 %v21358_v53  ;;  %17926 = vmatprep.subr.mxu0 %v25878_v31 }
 0x33d   : > { %17969 = vmatprep.subr.mxu1 %v21374_v59  ;;  %17927 = vmatpush3.msra.mxu0 %v25878_v31 }
 0x33e   : > { %17970 = vmatpush3.msra.mxu1 %v21374_v59  ;;  %17928 = vmatprep.subr.mxu0 %v25879_v2 }
 0x33f   : > { %17971 = vmatprep.subr.mxu1 %v21390_v13  ;;  %17929 = vmatpush3.msra.mxu0 %v25879_v2 }
 0x340   : > { %17972 = vmatpush3.msra.mxu1 %v21390_v13  ;;  %17930 = vmatprep.subr.mxu0 %v25880_v51 }
 0x341   : > { %17973 = vmatprep.subr.mxu1 %v21408_v35  ;;  %17931 = vmatpush3.msra.mxu0 %v25880_v51  ;;  %v25962_v51 = vld [vmem:[#allocation96_spill] sm:$0xff] }
 0x342   : > { %17974 = vmatpush3.msra.mxu1 %v21408_v35  ;;  %17932 = vmatprep.subr.mxu0 %v25958_v39  ;;  %v1679_v2 = vadd.f32 %v25962_v51, %v25961_v23  ;;  %v25964_v51 = vld [vmem:[#allocation99_spill] sm:$0xff] }
 0x343   : > { %17976 = vmatmul.mubr.f32.vlgmr.msra.gmra.mxu1 %v22617_v44  ;;  %18013 = vmatprep.subr.mxu1 %v25959_v63 }
 0x344   : > { %17933 = vmatpush3.msra.mxu0 %v25958_v39  ;;  %18014 = vmatpush3.msra.mxu1 %v25959_v63  ;;  %v8266_v39 = vsub.f32 %v22784_v54, %v25509_v17  ;;  %v25963_v63 = vld [vmem:[#allocation59_spill] sm:$0xff]  ;;  %v1768_v23 = vadd.f32 %v25964_v51, %v1679_v2  ;;  %v25965_v17 = vld [vmem:[#allocation104_spill] sm:$0xff] }
 0x345   : > { %18045 = vmatprep.mubr.f32.mxu1 %v22773_v18  ;;  %17934 = vmatprep.subr.mxu0 %v25884_v56  ;;  %v25966_v2 = vld [vmem:[#allocation107_spill] sm:$0xff]  ;;  %v25968_v51 = vld [vmem:[#allocation64_spill] sm:$0xff] }
 0x346   : > { %18015 = vmatprep.subr.mxu1 %v25960_v30  ;;  %17935 = vmatpush3.msra.mxu0 %v25884_v56 }
 0x347   : > { %18016 = vmatpush3.msra.mxu1 %v25960_v30  ;;  %17936 = vmatprep.subr.mxu0 %v25888_v24  ;;  %v8267_v30 = vand.u32 4294901760, %v8266_v39  ;;  %v25967_v39 = vld [vmem:[#allocation112_spill] sm:$0xff] }
 0x348   : > { %18017 = vmatprep.subr.mxu1 %v25889_v43  ;;  %17937 = vmatpush3.msra.mxu0 %v25888_v24 }
 0x349   : > { %18018 = vmatpush3.msra.mxu1 %v25889_v43  ;;  %17938 = vmatprep.subr.mxu0 %v25963_v63 }
 0x34a   : > { %18019 = vmatprep.subr.mxu1 %v25891_v57  ;;  %17939 = vmatpush3.msra.mxu0 %v25963_v63  ;;  %v1855_v63 = vadd.f32 %v25965_v17, %v1768_v23 }
 0x34b   : > { %18020 = vmatpush3.msra.mxu1 %v25891_v57  ;;  %17941 = vmatmul.mubr.f32.vlgmr.msra.gmra.mxu0 %v22617_v44 }
 0x34c   : > { %17978 = vmatprep.subr.mxu0 %v21207_v61  ;;  %18021 = vmatprep.subr.mxu1 %v25893_v47  ;;  %v1946_v44 = vadd.f32 %v25966_v2, %v1855_v63  ;;  %v25969_v2 = vld [vmem:[#allocation65_spill] sm:$0xff] }
 0x34d   : > { %17979 = vmatpush3.msra.mxu0 %v21207_v61  ;;  %18010 = vmatprep.mubr.f32.mxu0 %v8267_v30 }
 0x34e   : > { %18022 = vmatpush3.msra.mxu1 %v25893_v47  ;;  %17980 = vmatprep.subr.mxu0 %v21213_v1  ;;  %v2029_v17 = vadd.f32 %v25967_v39, %v1946_v44  ;;  %v25970_v39 = vand.u32 4294901760, %v22784_v54 }
 0x34f   : > { %18023 = vmatprep.subr.mxu1 %v25895_v7  ;;  %17981 = vmatpush3.msra.mxu0 %v21213_v1 }
 0x350   : > { %18024 = vmatpush3.msra.mxu1 %v25895_v7  ;;  %17982 = vmatprep.subr.mxu0 %v21222_v4  ;;  %v22851_v63 = vand.u32 4294901760, %v2029_v17 }
 0x351   : > { %18025 = vmatprep.subr.mxu1 %v25920_v50  ;;  %17983 = vmatpush3.msra.mxu0 %v21222_v4 }
 0x352   : > { %18026 = vmatpush3.msra.mxu1 %v25920_v50  ;;  %17984 = vmatprep.subr.mxu0 %v21229_v48  ;;  %v22862_v30 = vsub.f32 %v2029_v17, %v22851_v63 }
 0x353   : > { %18027 = vmatprep.subr.mxu1 %v25898_v34  ;;  %17985 = vmatpush3.msra.mxu0 %v21229_v48 }
 0x354   : > { %18028 = vmatpush3.msra.mxu1 %v25898_v34  ;;  %17986 = vmatprep.subr.mxu0 %v21240_v60  ;;  %v8275_v23 = vand.u32 4294901760, %v22862_v30 }
 0x355   : > { %18029 = vmatprep.subr.mxu1 %v25922_v42  ;;  %17987 = vmatpush3.msra.mxu0 %v21240_v60 }
 0x356   : > { %18030 = vmatpush3.msra.mxu1 %v25922_v42  ;;  %17988 = vmatprep.subr.mxu0 %v21250_v12  ;;  %v8276_v44 = vsub.f32 %v22862_v30, %v8275_v23 }
 0x357   : > { %18031 = vmatprep.subr.mxu1 %v25901_v19  ;;  %17989 = vmatpush3.msra.mxu0 %v21250_v12 }
 0x358   : > { %18032 = vmatpush3.msra.mxu1 %v25901_v19  ;;  %17990 = vmatprep.subr.mxu0 %v21254_v14  ;;  %v8277_v17 = vand.u32 4294901760, %v8276_v44  ;;  %v25972_v44 = vld [vmem:[#allocation52_spill] sm:$0xff] }
 0x359   : > { %18033 = vmatprep.subr.mxu1 %v25945_v49  ;;  %17991 = vmatpush3.msra.mxu0 %v21254_v14 }
 0x35a   : > { %18034 = vmatpush3.msra.mxu1 %v25945_v49  ;;  %17992 = vmatprep.subr.mxu0 %v21268_v32 }
 0x35b   : > { %18035 = vmatprep.subr.mxu1 %v25946_v5  ;;  %17993 = vmatpush3.msra.mxu0 %v21268_v32 }
 0x35c   : > { %18036 = vmatpush3.msra.mxu1 %v25946_v5  ;;  %17994 = vmatprep.subr.mxu0 %v21294_v27 }
 0x35d   : > { %18037 = vmatprep.subr.mxu1 %v25947_v25  ;;  %17995 = vmatpush3.msra.mxu0 %v21294_v27 }
 0x35e   : > { %18038 = vmatpush3.msra.mxu1 %v25947_v25  ;;  %17996 = vmatprep.subr.mxu0 %v21310_v38 }
 0x35f   : > { %18039 = vmatprep.subr.mxu1 %v25927_v20  ;;  %17997 = vmatpush3.msra.mxu0 %v21310_v38 }
 0x360   : > { %18040 = vmatpush3.msra.mxu1 %v25927_v20  ;;  %17998 = vmatprep.subr.mxu0 %v21326_v41 }
 0x361   : > { %18041 = vmatprep.subr.mxu1 %v25968_v51  ;;  %17999 = vmatpush3.msra.mxu0 %v21326_v41 }
 0x362   : > { %18042 = vmatpush3.msra.mxu1 %v25968_v51  ;;  %18000 = vmatprep.subr.mxu0 %v21342_v46 }
 0x363   : > { %18043 = vmatprep.subr.mxu1 %v25969_v2  ;;  %18001 = vmatpush3.msra.mxu0 %v21342_v46 }
 0x364   : > { %18044 = vmatpush3.msra.mxu1 %v25969_v2  ;;  %18002 = vmatprep.subr.mxu0 %v21358_v53 }
 0x365   : > { %18046 = vmatmul.mubr.f32.vlgmr.msra.gmra.mxu1 %v22851_v63  ;;  %18083 = vmatprep.subr.mxu1 %v21207_v61 }
 0x366   : > { %18003 = vmatpush3.msra.mxu0 %v21358_v53  ;;  %18084 = vmatpush3.msra.mxu1 %v21207_v61 }
 0x367   : > { %18115 = vmatprep.mubr.f32.mxu1 %v25970_v39  ;;  %18004 = vmatprep.subr.mxu0 %v21374_v59  ;;  %v25974_v39 = vld [vmem:[#allocation113_spill] sm:$0xff] }
 0x368   : > { %18085 = vmatprep.subr.mxu1 %v21213_v1  ;;  %18005 = vmatpush3.msra.mxu0 %v21374_v59 }
 0x369   : > { %18086 = vmatpush3.msra.mxu1 %v21213_v1  ;;  %18006 = vmatprep.subr.mxu0 %v21390_v13 }
 0x36a   : > { %18087 = vmatprep.subr.mxu1 %v21222_v4  ;;  %18007 = vmatpush3.msra.mxu0 %v21390_v13 }
 0x36b   : > { %18088 = vmatpush3.msra.mxu1 %v21222_v4  ;;  %18008 = vmatprep.subr.mxu0 %v21408_v35 }
 0x36c   : > { %18089 = vmatprep.subr.mxu1 %v21229_v48  ;;  %18009 = vmatpush3.msra.mxu0 %v21408_v35 }
 0x36d   : > { %18090 = vmatpush3.msra.mxu1 %v21229_v48  ;;  %18011 = vmatmul.mubr.f32.vlgmr.msra.gmra.mxu0 %v8277_v17 }
 0x36e   : > { %18048 = vmatprep.subr.mxu0 %v21220_v3  ;;  %18091 = vmatprep.subr.mxu1 %v21240_v60 }
 0x36f   : > { %18049 = vmatpush3.msra.mxu0 %v21220_v3  ;;  %18080 = vmatprep.mubr.f32.mxu0 %v22784_v54  ;;  %v25971_v54 = vld [vmem:[#allocation48_spill] sm:$0xff] }
 0x370   : > { %18092 = vmatpush3.msra.mxu1 %v21240_v60  ;;  %18050 = vmatprep.subr.mxu0 %v21227_v6 }
 0x371   : > { %18093 = vmatprep.subr.mxu1 %v21250_v12  ;;  %18051 = vmatpush3.msra.mxu0 %v21227_v6 }
 0x372   : > { %18094 = vmatpush3.msra.mxu1 %v21250_v12  ;;  %18052 = vmatprep.subr.mxu0 %v21238_v8 }
 0x373   : > { %18095 = vmatprep.subr.mxu1 %v21254_v14  ;;  %18053 = vmatpush3.msra.mxu0 %v21238_v8 }
 0x374   : > { %18096 = vmatpush3.msra.mxu1 %v21254_v14  ;;  %18054 = vmatprep.subr.mxu0 %v21248_v11 }
 0x375   : > { %18097 = vmatprep.subr.mxu1 %v21268_v32  ;;  %18055 = vmatpush3.msra.mxu0 %v21248_v11 }
 0x376   : > { %18098 = vmatpush3.msra.mxu1 %v21268_v32  ;;  %18056 = vmatprep.subr.mxu0 %v21264_v16 }
 0x377   : > { %18099 = vmatprep.subr.mxu1 %v21294_v27  ;;  %18057 = vmatpush3.msra.mxu0 %v21264_v16 }
 0x378   : > { %18100 = vmatpush3.msra.mxu1 %v21294_v27  ;;  %18058 = vmatprep.subr.mxu0 %v21278_v22 }
 0x379   : > { %18101 = vmatprep.subr.mxu1 %v21310_v38  ;;  %18059 = vmatpush3.msra.mxu0 %v21278_v22 }
 0x37a   : > { %18102 = vmatpush3.msra.mxu1 %v21310_v38  ;;  %18060 = vmatprep.subr.mxu0 %v21283_v33 }
 0x37b   : > { %18103 = vmatprep.subr.mxu1 %v21326_v41  ;;  %18061 = vmatpush3.msra.mxu0 %v21283_v33 }
 0x37c   : > { %18104 = vmatpush3.msra.mxu1 %v21326_v41  ;;  %18062 = vmatprep.subr.mxu0 %v21299_v28 }
 0x37d   : > { %18105 = vmatprep.subr.mxu1 %v21342_v46  ;;  %18063 = vmatpush3.msra.mxu0 %v21299_v28 }
 0x37e   : > { %18106 = vmatpush3.msra.mxu1 %v21342_v46  ;;  %18064 = vmatprep.subr.mxu0 %v21324_v40 }
 0x37f   : > { %18107 = vmatprep.subr.mxu1 %v21358_v53  ;;  %18065 = vmatpush3.msra.mxu0 %v21324_v40 }
 0x380   : > { %18108 = vmatpush3.msra.mxu1 %v21358_v53  ;;  %18066 = vmatprep.subr.mxu0 %v21340_v45 }
 0x381   : > { %18109 = vmatprep.subr.mxu1 %v21374_v59  ;;  %18067 = vmatpush3.msra.mxu0 %v21340_v45 }
 0x382   : > { %18110 = vmatpush3.msra.mxu1 %v21374_v59  ;;  %18068 = vmatprep.subr.mxu0 %v21356_v52 }
 0x383   : > { %18111 = vmatprep.subr.mxu1 %v21390_v13  ;;  %18069 = vmatpush3.msra.mxu0 %v21356_v52 }
 0x384   : > { %18112 = vmatpush3.msra.mxu1 %v21390_v13  ;;  %18070 = vmatprep.subr.mxu0 %v21372_v58 }
 0x385   : > { %18113 = vmatprep.subr.mxu1 %v21408_v35  ;;  %18071 = vmatpush3.msra.mxu0 %v21372_v58 }
 0x386   : > { %18114 = vmatpush3.msra.mxu1 %v21408_v35  ;;  %18072 = vmatprep.subr.mxu0 %v21388_v9 }
 0x387   : > { %18116 = vmatmul.mubr.f32.vlgmr.msra.gmra.mxu1 %v8275_v23  ;;  %18153 = vmatprep.subr.mxu1 %v21207_v61  ;;  %v25973_v23 = vld [vmem:[#allocation109_spill] sm:$0xff] }
 0x388   : > { %18073 = vmatpush3.msra.mxu0 %v21388_v9  ;;  %18154 = vmatpush3.msra.mxu1 %v21207_v61  ;;  %v2210_v17 = vadd.f32 %v25974_v39, %v25973_v23 }
 0x389   : > { %18185 = vmatprep.mubr.f32.mxu1 %v22773_v18  ;;  %18074 = vmatprep.subr.mxu0 %v25971_v54 }
 0x38a   : > { %18155 = vmatprep.subr.mxu1 %v21213_v1  ;;  %18075 = vmatpush3.msra.mxu0 %v25971_v54 }
 0x38b   : > { %18156 = vmatpush3.msra.mxu1 %v21213_v1  ;;  %18076 = vmatprep.subr.mxu0 %v25972_v44 }
 0x38c   : > { %18157 = vmatprep.subr.mxu1 %v21222_v4  ;;  %18077 = vmatpush3.msra.mxu0 %v25972_v44  ;;  %v25975_v44 = vld [vmem:[#allocation116_spill] sm:$0xff] }
 0x38d   : > { %18158 = vmatpush3.msra.mxu1 %v21222_v4  ;;  %18078 = vmatprep.subr.mxu0 %v21438_v55  ;;  %v2298_v54 = vadd.f32 %v25975_v44, %v2210_v17 }
 0x38e   : > { %18159 = vmatprep.subr.mxu1 %v21229_v48  ;;  %18079 = vmatpush3.msra.mxu0 %v21438_v55 }
 0x38f   : > { %18160 = vmatpush3.msra.mxu1 %v21229_v48  ;;  %18081 = vmatmul.mubr.f32.vlgmr.msra.gmra.mxu0 %v22862_v30  ;;  %v25976_v30 = vld [vmem:[#allocation119_spill] sm:$0xff] }
 0x390   : > { %18118 = vmatprep.subr.mxu0 %v21235_v0  ;;  %18161 = vmatprep.subr.mxu1 %v21240_v60  ;;  %v2384_v23 = vadd.f32 %v25976_v30, %v2298_v54  ;;  %v25978_v54 = vld [vmem:[#allocation127_spill] sm:$0xff] }
 0x391   : > { %18119 = vmatpush3.msra.mxu0 %v21235_v0  ;;  %18150 = vmatprep.mubr.f32.mxu0 %v22773_v18  ;;  %v25977_v18 = vld [vmem:[#allocation122_spill] sm:$0xff]  ;;  %v25979_v30 = vld [vmem:[#allocation43_spill] sm:$0xff] }
 0x392   : > { %18162 = vmatpush3.msra.mxu1 %v21240_v60  ;;  %18120 = vmatprep.subr.mxu0 %v21245_v10  ;;  %v2477_v44 = vadd.f32 %v25977_v18, %v2384_v23  ;;  %v25980_v18 = vld [vmem:[#allocation47_spill] sm:$0xff] }
 0x393   : > { %18163 = vmatprep.subr.mxu1 %v21250_v12  ;;  %18121 = vmatpush3.msra.mxu0 %v21245_v10 }
 0x394   : > { %18164 = vmatpush3.msra.mxu1 %v21250_v12  ;;  %18122 = vmatprep.subr.mxu0 %v21261_v15  ;;  %v2560_v39 = vadd.f32 %v25978_v54, %v2477_v44  ;;  %v25981_v44 = vld [vmem:[#allocation51_spill] sm:$0xff]  ;;  %v25982_v54 = vld [vmem:[#allocation21_spill] sm:$0xff] }
 0x395   : > { %18165 = vmatprep.subr.mxu1 %v21254_v14  ;;  %18123 = vmatpush3.msra.mxu0 %v21261_v15 }
 0x396   : > { %18166 = vmatpush3.msra.mxu1 %v21254_v14  ;;  %18124 = vmatprep.subr.mxu0 %v21275_v21  ;;  %v23007_v17 = vand.u32 4294901760, %v2560_v39 }
 0x397   : > { %18167 = vmatprep.subr.mxu1 %v21268_v32  ;;  %18125 = vmatpush3.msra.mxu0 %v21275_v21 }
 0x398   : > { %18168 = vmatpush3.msra.mxu1 %v21268_v32  ;;  %18126 = vmatprep.subr.mxu0 %v21292_v26  ;;  %v23018_v23 = vsub.f32 %v2560_v39, %v23007_v17 }
 0x399   : > { %18169 = vmatprep.subr.mxu1 %v21294_v27  ;;  %18127 = vmatpush3.msra.mxu0 %v21292_v26 }
 0x39a   : > { %18170 = vmatpush3.msra.mxu1 %v21294_v27  ;;  %18128 = vmatprep.subr.mxu0 %v21308_v37  ;;  %v25517_v39 = vand.u32 4294901760, %v23018_v23 }
 0x39b   : > { %18171 = vmatprep.subr.mxu1 %v21310_v38  ;;  %18129 = vmatpush3.msra.mxu0 %v21308_v37 }
 0x39c   : > { %18172 = vmatpush3.msra.mxu1 %v21310_v38  ;;  %18130 = vmatprep.subr.mxu0 %v21315_v29 }
 0x39d   : > { %18173 = vmatprep.subr.mxu1 %v21326_v41  ;;  %18131 = vmatpush3.msra.mxu0 %v21315_v29 }
 0x39e   : > { %18174 = vmatpush3.msra.mxu1 %v21326_v41  ;;  %18132 = vmatprep.subr.mxu0 %v25876_v62 }
 0x39f   : > { %18175 = vmatprep.subr.mxu1 %v21342_v46  ;;  %18133 = vmatpush3.msra.mxu0 %v25876_v62 }
 0x3a0   : > { %18176 = vmatpush3.msra.mxu1 %v21342_v46  ;;  %18134 = vmatprep.subr.mxu0 %v25877_v36 }
 0x3a1   : > { %18177 = vmatprep.subr.mxu1 %v21358_v53  ;;  %18135 = vmatpush3.msra.mxu0 %v25877_v36 }
 0x3a2   : > { %18178 = vmatpush3.msra.mxu1 %v21358_v53  ;;  %18136 = vmatprep.subr.mxu0 %v25878_v31 }
 0x3a3   : > { %18179 = vmatprep.subr.mxu1 %v21374_v59  ;;  %18137 = vmatpush3.msra.mxu0 %v25878_v31 }
 0x3a4   : > { %18180 = vmatpush3.msra.mxu1 %v21374_v59  ;;  %18138 = vmatprep.subr.mxu0 %v25979_v30 }
 0x3a5   : > { %18181 = vmatprep.subr.mxu1 %v21390_v13  ;;  %18139 = vmatpush3.msra.mxu0 %v25979_v30  ;;  %v25983_v30 = vld [vmem:[#allocation23_spill] sm:$0xff] }
 0x3a6   : > { %18182 = vmatpush3.msra.mxu1 %v21390_v13  ;;  %18140 = vmatprep.subr.mxu0 %v25980_v18 }
 0x3a7   : > { %18183 = vmatprep.subr.mxu1 %v21408_v35  ;;  %18141 = vmatpush3.msra.mxu0 %v25980_v18  ;;  %v8950_v18 = vsub.f32 %v23018_v23, %v25517_v39  ;;  %v23052_v39 = vpop.f32.mrf.mxu0 }
 0x3a8   : > { %18184 = vmatpush3.msra.mxu1 %v21408_v35  ;;  %18142 = vmatprep.subr.mxu0 %v25981_v44 }
 0x3a9   : > { %18186 = vmatmul.mubr.f32.vlgmr.msra.gmra.mxu1 %v22851_v63  ;;  %18223 = vmatprep.subr.mxu1 %v25982_v54 }
 0x3aa   : > { %18143 = vmatpush3.msra.mxu0 %v25981_v44  ;;  %18224 = vmatpush3.msra.mxu1 %v25982_v54  ;;  %v25984_v54 = vld [vmem:[#allocation59_spill] sm:$0xff] }
 0x3ab   : > { %18255 = vmatprep.mubr.f32.mxu1 %v23007_v17  ;;  %18144 = vmatprep.subr.mxu0 %v25884_v56 }
 0x3ac   : > { %18225 = vmatprep.subr.mxu1 %v25983_v30  ;;  %18145 = vmatpush3.msra.mxu0 %v25884_v56 }
 0x3ad   : > { %18226 = vmatpush3.msra.mxu1 %v25983_v30  ;;  %18146 = vmatprep.subr.mxu0 %v25888_v24  ;;  %v8951_v30 = vand.u32 4294901760, %v8950_v18  ;;  %v23063_v18 = vpop.f32.mrf.mxu0 }
 0x3ae   : > { %18227 = vmatprep.subr.mxu1 %v25889_v43  ;;  %18147 = vmatpush3.msra.mxu0 %v25888_v24 }
 0x3af   : > { %18228 = vmatpush3.msra.mxu1 %v25889_v43  ;;  %18148 = vmatprep.subr.mxu0 %v25984_v54 }
 0x3b0   : > { %18229 = vmatprep.subr.mxu1 %v25891_v57  ;;  %18149 = vmatpush3.msra.mxu0 %v25984_v54  ;;  %v23071_v54 = vpop.f32.mrf.mxu0 }
 0x3b1   : > { %18230 = vmatpush3.msra.mxu1 %v25891_v57  ;;  %18151 = vmatmul.mubr.f32.vlgmr.msra.gmra.mxu0 %v22851_v63  ;;  %v23061_v63 = vpop.f32.mrf.mxu1 }
 0x3b2   : > { %18188 = vmatprep.subr.mxu0 %v21207_v61  ;;  %18231 = vmatprep.subr.mxu1 %v25893_v47  ;;  %v23086_v43 = vpop.f32.mrf.mxu0 }
 0x3b3   : > { %18189 = vmatpush3.msra.mxu0 %v21207_v61  ;;  %18220 = vmatprep.mubr.f32.mxu0 %v8951_v30  ;;  %v25985_v30 = vld [vmem:[#allocation124_spill] sm:$0xff] }
 0x3b4   : > { %18232 = vmatpush3.msra.mxu1 %v25893_v47  ;;  %18190 = vmatprep.subr.mxu0 %v21213_v1  ;;  %v25986_v47 = vld [vmem:[#allocation126_spill] sm:$0xff] }
 0x3b5   : > { %18233 = vmatprep.subr.mxu1 %v25895_v7  ;;  %18191 = vmatpush3.msra.mxu0 %v21213_v1  ;;  %v2484_v57 = vadd.f32 %v25986_v47, %v25985_v30  ;;  %v25987_v47 = vld [vmem:[#allocation130_spill] sm:$0xff] }
 0x3b6   : > { %18234 = vmatpush3.msra.mxu1 %v25895_v7  ;;  %18192 = vmatprep.subr.mxu0 %v21222_v4  ;;  %v23077_v7 = vpop.f32.mrf.mxu1 }
 0x3b7   : > { %18235 = vmatprep.subr.mxu1 %v25920_v50  ;;  %18193 = vmatpush3.msra.mxu0 %v21222_v4  ;;  %v2567_v30 = vadd.f32 %v25987_v47, %v2484_v57 }
 0x3b8   : > { %18236 = vmatpush3.msra.mxu1 %v25920_v50  ;;  %18194 = vmatprep.subr.mxu0 %v21229_v48  ;;  %v23084_v50 = vpop.f32.mrf.mxu1 }
 0x3b9   : > { %18237 = vmatprep.subr.mxu1 %v25898_v34  ;;  %18195 = vmatpush3.msra.mxu0 %v21229_v48  ;;  %v23098_v57 = vand.u32 4294901760, %v2567_v30 }
 0x3ba   : > { %18238 = vmatpush3.msra.mxu1 %v25898_v34  ;;  %18196 = vmatprep.subr.mxu0 %v21240_v60  ;;  %v23092_v34 = vpop.f32.mrf.mxu0  ;;  %v23100_v47 = vpop.f32.mrf.mxu1 }
 0x3bb   : > { %18239 = vmatprep.subr.mxu1 %v25922_v42  ;;  %18197 = vmatpush3.msra.mxu0 %v21240_v60  ;;  %25988 = vst [vmem:[#allocation139_spill] sm:$0xff] %v23098_v57 }
 0x3bc   : > { %18240 = vmatpush3.msra.mxu1 %v25922_v42  ;;  %18198 = vmatprep.subr.mxu0 %v21250_v12  ;;  %v23108_v42 = vpop.f32.mrf.mxu0 }
 0x3bd   : > { %18241 = vmatprep.subr.mxu1 %v25901_v19  ;;  %18199 = vmatpush3.msra.mxu0 %v21250_v12 }
 0x3be   : > { %18242 = vmatpush3.msra.mxu1 %v25901_v19  ;;  %18200 = vmatprep.subr.mxu0 %v21254_v14  ;;  %v23106_v19 = vpop.f32.mrf.mxu1  ;;  %v23117_v24 = vpop.f32.mrf.mxu0 }
 0x3bf   : > { %18243 = vmatprep.subr.mxu1 %v25945_v49  ;;  %18201 = vmatpush3.msra.mxu0 %v21254_v14  ;;  %25989 = vst [vmem:[#allocation69_spill] sm:$0xff] %v23106_v19 }
 0x3c0   : > { %18244 = vmatpush3.msra.mxu1 %v25945_v49  ;;  %18202 = vmatprep.subr.mxu0 %v21268_v32  ;;  %v23115_v49 = vsub.f32 %v2567_v30, %v23098_v57  ;;  %v23132_v56 = vpop.f32.mrf.mxu0 }
 0x3c1   : > { %18245 = vmatprep.subr.mxu1 %v25946_v5  ;;  %18203 = vmatpush3.msra.mxu0 %v21268_v32 }
 0x3c2   : > { %18246 = vmatpush3.msra.mxu1 %v25946_v5  ;;  %18204 = vmatprep.subr.mxu0 %v21294_v27  ;;  %v23123_v5 = vpop.f32.mrf.mxu1  ;;  %v25539_v30 = vand.u32 4294901760, %v23115_v49 }
 0x3c3   : > { %18247 = vmatprep.subr.mxu1 %v25947_v25  ;;  %18205 = vmatpush3.msra.mxu0 %v21294_v27 }
 0x3c4   : > { %18248 = vmatpush3.msra.mxu1 %v25947_v25  ;;  %18206 = vmatprep.subr.mxu0 %v21310_v38  ;;  %v23130_v25 = vpop.f32.mrf.mxu1 }
 0x3c5   : > { %18249 = vmatprep.subr.mxu1 %v25927_v20  ;;  %18207 = vmatpush3.msra.mxu0 %v21310_v38 }
 0x3c6   : > { %18250 = vmatpush3.msra.mxu1 %v25927_v20  ;;  %18208 = vmatprep.subr.mxu0 %v21326_v41  ;;  %v23138_v20 = vpop.f32.mrf.mxu0  ;;  %v23147_v44 = vpop.f32.mrf.mxu1 }
 0x3c7   : > { %18251 = vmatprep.subr.mxu1 %v25968_v51  ;;  %18209 = vmatpush3.msra.mxu0 %v21326_v41 }
 0x3c8   : > { %18252 = vmatpush3.msra.mxu1 %v25968_v51  ;;  %18210 = vmatprep.subr.mxu0 %v21342_v46  ;;  %v8960_v51 = vsub.f32 %v23115_v49, %v25539_v30  ;;  %v23156_v31 = vpop.f32.mrf.mxu0 }
 0x3c9   : > { %18253 = vmatprep.subr.mxu1 %v25969_v2  ;;  %18211 = vmatpush3.msra.mxu0 %v21342_v46 }
 0x3ca   : > { %18254 = vmatpush3.msra.mxu1 %v25969_v2  ;;  %18212 = vmatprep.subr.mxu0 %v21358_v53  ;;  %v25990_v2 = vand.u32 4294901760, %v23018_v23  ;;  %v8961_v30 = vand.u32 4294901760, %v8960_v51 }
 0x3cb   : > { %18256 = vmatmul.mubr.f32.vlgmr.msra.gmra.mxu1 %v23098_v57  ;;  %18293 = vmatprep.subr.mxu1 %v21207_v61  ;;  %v23154_v57 = vpop.f32.mrf.mxu1 }
 0x3cc   : > { %18213 = vmatpush3.msra.mxu0 %v21358_v53  ;;  %18294 = vmatpush3.msra.mxu1 %v21207_v61 }
 0x3cd   : > { %18325 = vmatprep.mubr.f32.mxu1 %v25990_v2  ;;  %18214 = vmatprep.subr.mxu0 %v21374_v59  ;;  %v23162_v2 = vpop.f32.mrf.mxu0  ;;  %v23168_v36 = vpop.f32.mrf.mxu1 }
 0x3ce   : > { %18295 = vmatprep.subr.mxu1 %v21213_v1  ;;  %18215 = vmatpush3.msra.mxu0 %v21374_v59 }
 0x3cf   : > { %18296 = vmatpush3.msra.mxu1 %v21213_v1  ;;  %18216 = vmatprep.subr.mxu0 %v21390_v13  ;;  %v23173_v51 = vpop.f32.mrf.mxu1  ;;  %v23175_v62 = vpop.f32.mrf.mxu0 }
 0x3d0   : > { %18297 = vmatprep.subr.mxu1 %v21222_v4  ;;  %18217 = vmatpush3.msra.mxu0 %v21390_v13 }
 0x3d1   : > { %18298 = vmatpush3.msra.mxu1 %v21222_v4  ;;  %18218 = vmatprep.subr.mxu0 %v21408_v35  ;;  %v23181_v29 = vpop.f32.mrf.mxu0 }
 0x3d2   : > { %18299 = vmatprep.subr.mxu1 %v21229_v48  ;;  %18219 = vmatpush3.msra.mxu0 %v21408_v35 }
 0x3d3   : > { %18300 = vmatpush3.msra.mxu1 %v21229_v48  ;;  %18221 = vmatmul.mubr.f32.vlgmr.msra.gmra.mxu0 %v8961_v30  ;;  %v23187_v30 = vpop.f32.mrf.mxu1 }
 0x3d4   : > { %18258 = vmatprep.subr.mxu0 %v21220_v3  ;;  %18301 = vmatprep.subr.mxu1 %v21240_v60 }
 0x3d5   : > { %18259 = vmatpush3.msra.mxu0 %v21220_v3  ;;  %18290 = vmatprep.mubr.f32.mxu0 %v23018_v23  ;;  %v23193_v23 = vpop.f32.mrf.mxu1  ;;  %v23195_v3 = vpop.f32.mrf.mxu0 }
 0x3d6   : > { %18302 = vmatpush3.msra.mxu1 %v21240_v60  ;;  %18260 = vmatprep.subr.mxu0 %v21227_v6 }
 0x3d7   : > { %18303 = vmatprep.subr.mxu1 %v21250_v12  ;;  %18261 = vmatpush3.msra.mxu0 %v21227_v6  ;;  %v23201_v6 = vpop.f32.mrf.mxu0 }
 0x3d8   : > { %18304 = vmatpush3.msra.mxu1 %v21250_v12  ;;  %18262 = vmatprep.subr.mxu0 %v21238_v8 }
 0x3d9   : > { %18305 = vmatprep.subr.mxu1 %v21254_v14  ;;  %18263 = vmatpush3.msra.mxu0 %v21238_v8  ;;  %v23207_v8 = vpop.f32.mrf.mxu1  ;;  %v23215_v19 = vpop.f32.mrf.mxu0 }
 0x3da   : > { %18306 = vmatpush3.msra.mxu1 %v21254_v14  ;;  %18264 = vmatprep.subr.mxu0 %v21248_v11 }
 0x3db   : > { %18307 = vmatprep.subr.mxu1 %v21268_v32  ;;  %18265 = vmatpush3.msra.mxu0 %v21248_v11  ;;  %v23213_v11 = vpop.f32.mrf.mxu1 }
 0x3dc   : > { %18308 = vmatpush3.msra.mxu1 %v21268_v32  ;;  %18266 = vmatprep.subr.mxu0 %v21264_v16 }
 0x3dd   : > { %18309 = vmatprep.subr.mxu1 %v21294_v27  ;;  %18267 = vmatpush3.msra.mxu0 %v21264_v16  ;;  %v23221_v16 = vpop.f32.mrf.mxu0 }
 0x3de   : > { %18310 = vmatpush3.msra.mxu1 %v21294_v27  ;;  %18268 = vmatprep.subr.mxu0 %v21278_v22 }
 0x3df   : > { %18311 = vmatprep.subr.mxu1 %v21310_v38  ;;  %18269 = vmatpush3.msra.mxu0 %v21278_v22  ;;  %v23227_v22 = vpop.f32.mrf.mxu1 }
 0x3e0   : > { %18312 = vmatpush3.msra.mxu1 %v21310_v38  ;;  %18270 = vmatprep.subr.mxu0 %v21283_v33 }
 0x3e1   : > { %18313 = vmatprep.subr.mxu1 %v21326_v41  ;;  %18271 = vmatpush3.msra.mxu0 %v21283_v33  ;;  %v23233_v33 = vpop.f32.mrf.mxu1 }
 0x3e2   : > { %18314 = vmatpush3.msra.mxu1 %v21326_v41  ;;  %18272 = vmatprep.subr.mxu0 %v21299_v28  ;;  %25991 = vst [vmem:[#allocation73_spill] sm:$0xff] %v23233_v33  ;;  %v23235_v41 = vpop.f32.mrf.mxu0 }
 0x3e3   : > { %18315 = vmatprep.subr.mxu1 %v21342_v46  ;;  %18273 = vmatpush3.msra.mxu0 %v21299_v28 }
 0x3e4   : > { %18316 = vmatpush3.msra.mxu1 %v21342_v46  ;;  %18274 = vmatprep.subr.mxu0 %v21324_v40  ;;  %v17592_v28 = vpop.f32.mrf.mxu0 }
 0x3e5   : > { %18317 = vmatprep.subr.mxu1 %v21358_v53  ;;  %18275 = vmatpush3.msra.mxu0 %v21324_v40  ;;  %v23245_v40 = vpop.f32.mrf.mxu1 }
 0x3e6   : > { %18318 = vmatpush3.msra.mxu1 %v21358_v53  ;;  %18276 = vmatprep.subr.mxu0 %v21340_v45  ;;  %25992 = vst [vmem:[#allocation76_spill] sm:$0xff] %v23245_v40  ;;  %v25993_v53 = vand.u32 4294901760, %v23115_v49 }
 0x3e7   : > { %18319 = vmatprep.subr.mxu1 %v21374_v59  ;;  %18277 = vmatpush3.msra.mxu0 %v21340_v45  ;;  %v17627_v45 = vpop.f32.mrf.mxu1 }
 0x3e8   : > { %18320 = vmatpush3.msra.mxu1 %v21374_v59  ;;  %18278 = vmatprep.subr.mxu0 %v21356_v52  ;;  %v6851_v59 = vpop.f32.mrf.mxu0 }
 0x3e9   : > { %18321 = vmatprep.subr.mxu1 %v21390_v13  ;;  %18279 = vmatpush3.msra.mxu0 %v21356_v52  ;;  %v25994_v52 = vld [vmem:[#allocation111_spill] sm:$0xff] }
 0x3ea   : > { %18322 = vmatpush3.msra.mxu1 %v21390_v13  ;;  %18280 = vmatprep.subr.mxu0 %v21372_v58  ;;  %v25995_v13 = vld [vmem:[#allocation115_spill] sm:$0xff]  ;;  %v17662_v33 = vpop.f32.mrf.mxu0 }
 0x3eb   : > { %18323 = vmatprep.subr.mxu1 %v21408_v35  ;;  %18281 = vmatpush3.msra.mxu0 %v21372_v58  ;;  %v2212_v46 = vadd.f32 %v25995_v13, %v25994_v52  ;;  %v25996_v58 = vld [vmem:[#allocation48_spill] sm:$0xff]  ;;  %v5645_v52 = vadd.f32 %v23147_v44, %v23132_v56  ;;  %v25998_v13 = vld [vmem:[#allocation117_spill] sm:$0xff] }
 0x3ec   : > { %18324 = vmatpush3.msra.mxu1 %v21408_v35  ;;  %18282 = vmatprep.subr.mxu0 %v21388_v9  ;;  %v7012_v35 = vpop.f32.mrf.mxu1  ;;  %v7122_v40 = vpop.f32.mrf.mxu0 }
 0x3ed   : > { %18326 = vmatmul.mubr.f32.vlgmr.msra.gmra.mxu1 %v25993_v53  ;;  %18363 = vmatprep.subr.mxu1 %v21207_v61  ;;  %v25997_v53 = vld [vmem:[#allocation52_spill] sm:$0xff]  ;;  %v5755_v44 = vadd.f32 %v23156_v31, %v5645_v52  ;;  %v26001_v52 = vld [vmem:[#allocation69_spill] sm:$0xff] }
 0x3ee   : > { %18283 = vmatpush3.msra.mxu0 %v21388_v9  ;;  %18364 = vmatpush3.msra.mxu1 %v21207_v61  ;;  %v4967_v9 = vadd.f32 %v23061_v63, %v23052_v39  ;;  %v2300_v61 = vadd.f32 %v25998_v13, %v2212_v46  ;;  %v17697_v38 = vpop.f32.mrf.mxu1  ;;  %v7013_v39 = vadd.f32 %v7012_v35, %v6851_v59  ;;  %v25999_v59 = vld [vmem:[#allocation121_spill] sm:$0xff] }
 0x3ef   : > { %18395 = vmatprep.mubr.f32.mxu1 %v23007_v17  ;;  %18284 = vmatprep.subr.mxu0 %v25996_v58 }
 0x3f0   : > { %18365 = vmatprep.subr.mxu1 %v21213_v1  ;;  %18285 = vmatpush3.msra.mxu0 %v25996_v58  ;;  %v4961_v58 = vadd.f32 %v23077_v7, %v23063_v18  ;;  %v5078_v56 = vadd.f32 %v23071_v54, %v4967_v9  ;;  %v7019_v9 = vadd.f32 %v17627_v45, %v17592_v28 }
 0x3f1   : > { %18366 = vmatpush3.msra.mxu1 %v21213_v1  ;;  %18286 = vmatprep.subr.mxu0 %v25997_v53  ;;  %v5651_v1 = vadd.f32 %v23130_v25, %v23117_v24  ;;  %v6329_v24 = vadd.f32 %v23207_v8, %v23195_v3  ;;  %v17732_v25 = vpop.f32.mrf.mxu0  ;;  %v7123_v54 = vadd.f32 %v7122_v40, %v7013_v39 }
 0x3f2   : > { %18367 = vmatprep.subr.mxu1 %v21222_v4  ;;  %18287 = vmatpush3.msra.mxu0 %v25997_v53  ;;  %v5071_v46 = vadd.f32 %v23086_v43, %v4961_v58  ;;  %v2386_v35 = vadd.f32 %v25999_v59, %v2300_v61  ;;  %v7218_v43 = vpop.f32.mrf.mxu1  ;;  %v6335_v3 = vadd.f32 %v23193_v23, %v23181_v29  ;;  %v26006_v59 = vld [vmem:[#allocation29_spill] sm:$0xff] }
 0x3f3   : > { %18368 = vmatpush3.msra.mxu1 %v21222_v4  ;;  %18288 = vmatprep.subr.mxu0 %v21438_v55  ;;  %v5762_v7 = vadd.f32 %v23138_v20, %v5651_v1  ;;  %v6439_v58 = vadd.f32 %v23215_v19, %v6329_v24  ;;  %v5851_v1 = vadd.f32 %v23168_v36, %v5755_v44  ;;  %v7345_v31 = vpop.f32.mrf.mxu0  ;;  %v26003_v44 = vld [vmem:[#allocation25_spill] sm:$0xff] }
 0x3f4   : > { %18369 = vmatprep.subr.mxu1 %v21229_v48  ;;  %18289 = vmatpush3.msra.mxu0 %v21438_v55  ;;  %v7130_v8 = vadd.f32 %v17662_v33, %v7019_v9  ;;  %v5175_v28 = vadd.f32 %v23084_v50, %v5078_v56  ;;  %v5167_v61 = vadd.f32 %v23100_v47, %v5071_v46  ;;  %v17767_v45 = vpop.f32.mrf.mxu1 }
 0x3f5   : > { %18370 = vmatpush3.msra.mxu1 %v21229_v48  ;;  %18291 = vmatmul.mubr.f32.vlgmr.msra.gmra.mxu0 %v23115_v49  ;;  %v5859_v40 = vadd.f32 %v23154_v57, %v5762_v7  ;;  %v5978_v36 = vadd.f32 %v23175_v62, %v5851_v1  ;;  %v6446_v33 = vadd.f32 %v23201_v6, %v6335_v3  ;;  %v17802_v49 = vpop.f32.mrf.mxu0  ;;  %v26000_v57 = vld [vmem:[#allocation123_spill] sm:$0xff]  ;;  %v26005_v7 = vld [vmem:[#allocation129_spill] sm:$0xff]  ;;  %v26008_v3 = vld [vmem:[#allocation30_spill] sm:$0xff] }
 0x3f6   : > { %18328 = vmatprep.subr.mxu0 %v21235_v0  ;;  %18371 = vmatprep.subr.mxu1 %v21240_v60  ;;  %v7219_v29 = vadd.f32 %v7218_v43, %v7123_v54  ;;  %v5294_v19 = vadd.f32 %v23108_v42, %v5167_v61  ;;  %v6535_v20 = vadd.f32 %v23227_v22, %v6439_v58  ;;  %v7438_v42 = vpop.f32.mrf.mxu1 }
 0x3f7   : > { %18329 = vmatpush3.msra.mxu0 %v21235_v0  ;;  %18360 = vmatprep.mubr.f32.mxu0 %v23007_v17  ;;  %v5984_v50 = vadd.f32 %v23162_v2, %v5859_v40  ;;  %v7227_v17 = vadd.f32 %v17697_v38, %v7130_v8  ;;  %v5300_v6 = vadd.f32 %v23092_v34, %v5175_v28  ;;  %v7535_v23 = vpop.f32.mrf.mxu0 }
 0x3f8   : > { %18372 = vmatpush3.msra.mxu1 %v21240_v60  ;;  %18330 = vmatprep.subr.mxu0 %v21245_v10  ;;  %v7346_v62 = vadd.f32 %v7345_v31, %v7219_v29  ;;  %v6662_v63 = vadd.f32 %v23235_v41, %v6535_v20  ;;  %v23319_v22 = vadd.f32 %v23187_v30, %v5978_v36  ;;  %v17837_v2 = vpop.f32.mrf.mxu1  ;;  %v26010_v29 = vld [vmem:[#allocation35_spill] sm:$0xff] }
 0x3f9   : > { %18373 = vmatprep.subr.mxu1 %v21250_v12  ;;  %18331 = vmatpush3.msra.mxu0 %v21245_v10  ;;  %v6543_v18 = vadd.f32 %v23213_v11, %v6446_v33  ;;  %v7352_v38 = vadd.f32 %v17732_v25, %v7227_v17  ;;  %v2479_v47 = vadd.f32 %v26000_v57, %v2386_v35  ;;  %v26007_v35 = vld [vmem:[#allocation73_spill] sm:$0xff] }
 0x3fa   : > { %18374 = vmatpush3.msra.mxu1 %v21250_v12  ;;  %18332 = vmatprep.subr.mxu0 %v21261_v15  ;;  %v23326_v34 = vadd.f32 %v23123_v5, %v5294_v19  ;;  %v23329_v41 = vadd.f32 %v23173_v51, %v5984_v50  ;;  %v7439_v30 = vadd.f32 %v7438_v42, %v7346_v62  ;;  %v26002_v5 = vld [vmem:[#allocation76_spill] sm:$0xff]  ;;  %v17872_v51 = vpop.f32.mrf.mxu0  ;;  %v7696_v54 = vpop.f32.mrf.mxu1  ;;  %v26011_v50 = vld [vmem:[#allocation37_spill] sm:$0xff]  ;;  %v26012_v62 = vld [vmem:[#allocation39_spill] sm:$0xff] }
 0x3fb   : > { %18375 = vmatprep.subr.mxu1 %v21254_v14  ;;  %18333 = vmatpush3.msra.mxu0 %v21261_v15  ;;  %v6668_v11 = vadd.f32 %v23221_v16, %v6543_v18  ;;  %v23337_v13 = vadd.f32 %v26001_v52, %v5300_v6  ;;  %v6755_v56 = vadd.f32 %v26002_v5, %v6662_v63  ;;  %v26004_v16 = vld [vmem:[#allocation26_spill] sm:$0xff]  ;;  %v26013_v63 = vld [vmem:[#allocation41_spill] sm:$0xff]  ;;  %v26016_v5 = vld [vmem:[#allocation47_spill] sm:$0xff] }
 0x3fc   : > { %18376 = vmatpush3.msra.mxu1 %v21254_v14  ;;  %18334 = vmatprep.subr.mxu0 %v21275_v21  ;;  %v8134_v39 = vmul.f32 %v23319_v22, %v23319_v22  ;;  %v7445_v46 = vadd.f32 %v17767_v45, %v7352_v38  ;;  %v2562_v24 = vadd.f32 %v26005_v7, %v2479_v47  ;;  %v17907_v61 = vpop.f32.mrf.mxu1  ;;  %v7806_v40 = vpop.f32.mrf.mxu0  ;;  %v26009_v45 = vld [vmem:[#allocation33_spill] sm:$0xff]  ;;  %v26014_v38 = vld [vmem:[#allocation43_spill] sm:$0xff] }
 0x3fd   : > { %18377 = vmatprep.subr.mxu1 %v21268_v32  ;;  %18335 = vmatpush3.msra.mxu0 %v21275_v21  ;;  %v8132_v25 = vmul.f32 %v23326_v34, %v23326_v34  ;;  %v8135_v9 = vmul.f32 %v23329_v41, %v23329_v41  ;;  %v6761_v58 = vadd.f32 %v26007_v35, %v6668_v11  ;;  %v26019_v35 = vld [vmem:[#allocation139_spill] sm:$0xff] }
 0x3fe   : > { %18378 = vmatpush3.msra.mxu1 %v21268_v32  ;;  %18336 = vmatprep.subr.mxu0 %v21292_v26  ;;  %v8140_v43 = vsub.f32 %v7439_v30, %v8134_v39  ;;  %v7703_v1 = vadd.f32 %v17837_v2, %v17802_v49  ;;  %v8133_v8 = vmul.f32 %v23337_v13, %v23337_v13  ;;  %v23362_v19 = vand.u32 4294901760, %v2562_v24  ;;  %v7902_v6 = vpop.f32.mrf.mxu1  ;;  %v26015_v2 = vld [vmem:[#allocation45_spill] sm:$0xff] }
 0x3ff   : > { %18379 = vmatprep.subr.mxu1 %v21294_v27  ;;  %18337 = vmatpush3.msra.mxu0 %v21292_v26  ;;  %v8138_v28 = vsub.f32 %v6755_v56, %v8132_v25  ;;  %v8141_v31 = vsub.f32 %v7445_v46, %v8135_v9  ;;  %v7697_v36 = vadd.f32 %v7696_v54, %v7535_v23 }
 0x400   : > { %18380 = vmatpush3.msra.mxu1 %v21294_v27  ;;  %18338 = vmatprep.subr.mxu0 %v21308_v37  ;;  %v7814_v33 = vadd.f32 %v17872_v51, %v7703_v1  ;;  %v8139_v20 = vsub.f32 %v6761_v58, %v8133_v8  ;;  %v8154_v42 = vadd.f32 %v8134_v39, %v8132_v25  ;;  %v26017_v39 = vld [vmem:[#allocation49_spill] sm:$0xff]  ;;  %v26018_v25 = vld [vmem:[#allocation51_spill] sm:$0xff] }
 0x401   : > { %18381 = vmatprep.subr.mxu1 %v26003_v44  ;;  %18339 = vmatpush3.msra.mxu0 %v21308_v37  ;;  %v8158_v49 = vadd.f32 %v8140_v43, %v8138_v28  ;;  %v7807_v17 = vadd.f32 %v7806_v40, %v7697_v36  ;;  %v23373_v47 = vsub.f32 %v2562_v24, %v23362_v19  ;;  %v26020_v58 = vld [vmem:[#allocation21_spill] sm:$0xff]  ;;  %v26022_v36 = vld [vmem:[#allocation23_spill] sm:$0xff] }
 0x402   : > { %18382 = vmatpush3.msra.mxu1 %v26003_v44  ;;  %18340 = vmatprep.subr.mxu0 %v26004_v16  ;;  %v8159_v18 = vadd.f32 %v8141_v31, %v8139_v20  ;;  %v7911_v57 = vadd.f32 %v17907_v61, %v7814_v33  ;;  %v8155_v30 = vadd.f32 %v8135_v9, %v8133_v8  ;;  %v8156_v7 = vadd.f32 0.0001, %v8154_v42  ;;  %v26021_v31 = vld [vmem:[#allocation55_spill] sm:$0xff]  ;;  %v26023_v20 = vld [vmem:[#allocation57_spill] sm:$0xff] }
 0x403   : > { %18383 = vmatprep.subr.mxu1 %v26006_v59  ;;  %18341 = vmatpush3.msra.mxu0 %v26004_v16  ;;  %v17977_v23 = vpop.f32.mrf.mxu1  ;;  %v8160_v52 = vadd.f32 0.0009, %v8158_v49  ;;  %v7903_v51 = vadd.f32 %v7902_v6, %v7807_v17  ;;  %v8136_v9 = vmul.f32 %v23319_v22, %v23326_v34  ;;  %v9633_v1 = vand.u32 4294901760, %v23373_v47  ;;  %v26024_v17 = vld [vmem:[#allocation114_spill] sm:$0xff] }
 0x404   : > { %18384 = vmatpush3.msra.mxu1 %v26006_v59  ;;  %18342 = vmatprep.subr.mxu0 %v26008_v3  ;;  %v8161_v24 = vadd.f32 0.0009, %v8159_v18  ;;  %v8157_v8 = vadd.f32 0.0001, %v8155_v30  ;;  %v8137_v22 = vmul.f32 %v23329_v41, %v23337_v13  ;;  %v26025_v6 = vld [vmem:[#allocation118_spill] sm:$0xff]  ;;  %v26026_v18 = vld [vmem:[#allocation27_spill] sm:$0xff] }
 0x405   : > { %18385 = vmatprep.subr.mxu1 %v26009_v45  ;;  %18343 = vmatpush3.msra.mxu0 %v26008_v3  ;;  %v8122_v43 = vpop.f32.mrf.mxu1  ;;  %v8162_v28 = vmul.f32 %v8160_v52, %v8156_v7  ;;  %v9634_v49 = vsub.f32 %v23373_v47, %v9633_v1  ;;  %v2219_v42 = vadd.f32 %v26025_v6, %v26024_v17  ;;  %v26027_v13 = vld [vmem:[#allocation59_spill] sm:$0xff]  ;;  %v26029_v30 = vld [vmem:[#allocation120_spill] sm:$0xff]  ;;  %v26031_v7 = vld [vmem:[#allocation34_spill] sm:$0xff] }
 0x406   : > { %18386 = vmatpush3.msra.mxu1 %v26009_v45  ;;  %18344 = vmatprep.subr.mxu0 %v26010_v29  ;;  %v8163_v34 = vmul.f32 %v8161_v24, %v8157_v8  ;;  %v8145_v24 = vmul.f32 2.0, %v8137_v22  ;;  %v26033_v8 = vld [vmem:[#allocation38_spill] sm:$0xff]  ;;  %v26037_v17 = vld [vmem:[#allocation128_spill] sm:$0xff] }
 0x407   : > { %18387 = vmatprep.subr.mxu1 %v26011_v50  ;;  %18345 = vmatpush3.msra.mxu0 %v26010_v29  ;;  %20157 = vrcp.f32 %v8162_v28  ;;  %v2308_v52 = vadd.f32 %v26029_v30, %v2219_v42 }
 0x408   : > { %18388 = vmatpush3.msra.mxu1 %v26011_v50  ;;  %18346 = vmatprep.subr.mxu0 %v26012_v62  ;;  %20159 = vrcp.f32 %v8163_v34  ;;  %v8147_v34 = vadd.f32 0.0001, %v8145_v24 }
 0x409   : > { %18389 = vmatprep.subr.mxu1 %v26013_v63  ;;  %18347 = vmatpush3.msra.mxu0 %v26012_v62 }
 0x40a   : > { %18390 = vmatpush3.msra.mxu1 %v26013_v63  ;;  %18348 = vmatprep.subr.mxu0 %v26014_v38 }
 0x40b   : > { %18391 = vmatprep.subr.mxu1 %v26015_v2  ;;  %18349 = vmatpush3.msra.mxu0 %v26014_v38  ;;  %v17942_v11 = vpop.f32.mrf.mxu0 }
 0x40c   : > { %18392 = vmatpush3.msra.mxu1 %v26015_v2  ;;  %18350 = vmatprep.subr.mxu0 %v26016_v5  ;;  %v8036_v56 = vadd.f32 %v17942_v11, %v7911_v57  ;;  %v26028_v57 = vld [vmem:[#allocation31_spill] sm:$0xff]  ;;  %v9635_v11 = vand.u32 4294901760, %v9634_v49  ;;  %v26036_v49 = vld [vmem:[#allocation46_spill] sm:$0xff] }
 0x40d   : > { %18393 = vmatprep.subr.mxu1 %v26017_v39  ;;  %18351 = vmatpush3.msra.mxu0 %v26016_v5  ;;  %v8029_v46 = vpop.f32.mrf.mxu0 }
 0x40e   : > { %18394 = vmatpush3.msra.mxu1 %v26017_v39  ;;  %18352 = vmatprep.subr.mxu0 %v26018_v25  ;;  %v8030_v54 = vadd.f32 %v8029_v46, %v7903_v51  ;;  %v8129_v61 = vadd.f32 %v17977_v23, %v8036_v56  ;;  %v8144_v56 = vmul.f32 2.0, %v8136_v9  ;;  %v26030_v46 = vld [vmem:[#allocation12_spill] sm:$0xff] }
 0x40f   : > { %18396 = vmatmul.mubr.f32.vlgmr.msra.gmra.mxu1 %v26019_v35  ;;  %18433 = vmatprep.subr.mxu1 %v26020_v58 }
 0x410   : > { %18353 = vmatpush3.msra.mxu0 %v26018_v25  ;;  %18434 = vmatpush3.msra.mxu1 %v26020_v58  ;;  %v8123_v40 = vadd.f32 %v8122_v43, %v8030_v54  ;;  %v8143_v41 = vsub.f32 %v8129_v61, %v8137_v22  ;;  %v26032_v43 = vld [vmem:[#allocation13_spill] sm:$0xff]  ;;  %v8146_v61 = vadd.f32 0.0001, %v8144_v56  ;;  %v4709_v22 = vlaneseq  ;;  %v26040_v56 = vld [vmem:[#allocation54_spill] sm:$0xff] }
 0x411   : > { %18465 = vmatprep.mubr.f32.mxu1 %v23362_v19  ;;  %18354 = vmatprep.subr.mxu0 %v26021_v31 }
 0x412   : > { %18435 = vmatprep.subr.mxu1 %v26022_v36  ;;  %18355 = vmatpush3.msra.mxu0 %v26021_v31  ;;  %v8142_v33 = vsub.f32 %v8123_v40, %v8136_v9  ;;  %v8149_v51 = vmul.f32 2.0, %v8143_v41  ;;  %v26035_v40 = vld [vmem:[#allocation42_spill] sm:$0xff] }
 0x413   : > { %18436 = vmatpush3.msra.mxu1 %v26022_v36  ;;  %18356 = vmatprep.subr.mxu0 %v26023_v20 }
 0x414   : > { %18437 = vmatprep.subr.mxu1 %v26026_v18  ;;  %18357 = vmatpush3.msra.mxu0 %v26023_v20  ;;  %v8148_v23 = vmul.f32 2.0, %v8142_v33  ;;  %v8151_v28 = vadd.f32 0.0009, %v8149_v51  ;;  %v20158_v41 = vpop.eup %20157  ;;  %v26041_v51 = vld [vmem:[#allocation132_spill] sm:$0xff] }
 0x415   : > { %18438 = vmatpush3.msra.mxu1 %v26026_v18  ;;  %18358 = vmatprep.subr.mxu0 %v26027_v13 }
 0x416   : > { %18439 = vmatprep.subr.mxu1 %v26028_v57  ;;  %18359 = vmatpush3.msra.mxu0 %v26027_v13  ;;  %v8150_v54 = vadd.f32 0.0009, %v8148_v23  ;;  %v8153_v42 = vmul.f32 %v8151_v28, %v8147_v34  ;;  %v26038_v23 = vld [vmem:[#allocation50_spill] sm:$0xff]  ;;  %v26044_v34 = vld [vmem:[#allocation60_spill] sm:$0xff] }
 0x417   : > { %18440 = vmatpush3.msra.mxu1 %v26028_v57  ;;  %18361 = vmatmul.mubr.f32.vlgmr.msra.gmra.mxu0 %v26019_v35  ;;  %v26034_v35 = vld [vmem:[#allocation125_spill] sm:$0xff]  ;;  %v26043_v28 = vld [vmem:[#allocation58_spill] sm:$0xff] }
 0x418   : > { %18398 = vmatprep.subr.mxu0 %v26030_v46  ;;  %18441 = vmatprep.subr.mxu1 %v26031_v7  ;;  %v2395_v9 = vadd.f32 %v26034_v35, %v2308_v52  ;;  %v8152_v33 = vmul.f32 %v8150_v54, %v8146_v61  ;;  %v20160_v52 = vpop.eup %20159  ;;  %v26042_v35 = vld [vmem:[#allocation56_spill] sm:$0xff] }
 0x419   : > { %18399 = vmatpush3.msra.mxu0 %v26030_v46  ;;  %18430 = vmatprep.mubr.f32.mxu0 %v9635_v11  ;;  %v23433_v11 = vand.u32 127, %v4709_v22  ;;  %v8167_v54 = vmul.f32 %v20160_v52, %v8153_v42  ;;  %v26046_v42 = vld [vmem:[#allocation64_spill] sm:$0xff] }
 0x41a   : > { %18442 = vmatpush3.msra.mxu1 %v26031_v7  ;;  %18400 = vmatprep.subr.mxu0 %v26032_v43  ;;  %v2486_v6 = vadd.f32 %v26037_v17, %v2395_v9  ;;  %v8166_v30 = vmul.f32 %v20158_v41, %v8152_v33  ;;  %v26045_v17 = vld [vmem:[#allocation62_spill] sm:$0xff]  ;;  %v26047_v41 = vld [vmem:[#allocation65_spill] sm:$0xff] }
 0x41b   : > { %18443 = vmatprep.subr.mxu1 %v26033_v8  ;;  %18401 = vmatpush3.msra.mxu0 %v26032_v43  ;;  %26039 = vst [vmem:[#allocation79_spill] sm:$0xff] %v23433_v11  ;;  %vm4711_vm1 = vcmp.lt.s32.totalorder %v23433_v11, 16  ;;  %v26058_v11 = vld [vmem:[#allocation36_spill] sm:$0xff] }
 0x41c   : > { %18444 = vmatpush3.msra.mxu1 %v26033_v8  ;;  %18402 = vmatprep.subr.mxu0 %v21222_v4  ;;  %v2569_v24 = vadd.f32 %v26041_v51, %v2486_v6  ;;  %v8168_v9 = vsel %vm4711_vm1, %v8166_v30, 0.0  ;;  %v8169_v22 = vsel %vm4711_vm1, %v8167_v54, 0.0  ;;  %v26048_v51 = vld [vmem:[#allocation14_spill] sm:$0xff]  ;;  %v26050_v54 = vld [vmem:[#allocation16_spill] sm:$0xff] }
 0x41d   : > { %18445 = vmatprep.subr.mxu1 %v26035_v40  ;;  %18403 = vmatpush3.msra.mxu0 %v21222_v4  ;;  %v8170_v33 = vadd.f32 %v8169_v22, %v8168_v9  ;;  %v26051_v9 = vld [vmem:[#allocation17_spill] sm:$0xff]  ;;  %v26053_v22 = vld [vmem:[#allocation19_spill] sm:$0xff] }
 0x41e   : > { %18446 = vmatpush3.msra.mxu1 %v26035_v40  ;;  %18404 = vmatprep.subr.mxu0 %v21229_v48  ;;  %v23451_v61 = vand.u32 4294901760, %v2569_v24 }
 0x41f   : > { %18447 = vmatprep.subr.mxu1 %v26036_v49  ;;  %18405 = vmatpush3.msra.mxu0 %v21229_v48 }
 0x420   : > { %18448 = vmatpush3.msra.mxu1 %v26036_v49  ;;  %18406 = vmatprep.subr.mxu0 %v21240_v60  ;;  %v23464_v6 = vsub.f32 %v2569_v24, %v23451_v61  ;;  %v26049_v24 = vld [vmem:[#allocation15_spill] sm:$0xff] }
 0x421   : > { %18449 = vmatprep.subr.mxu1 %v26038_v23  ;;  %18407 = vmatpush3.msra.mxu0 %v21240_v60 }
 0x422   : > { %18450 = vmatpush3.msra.mxu1 %v26038_v23  ;;  %18408 = vmatprep.subr.mxu0 %v21250_v12  ;;  %v25589_v30 = vand.u32 4294901760, %v23464_v6 }
 0x423   : > { %18451 = vmatprep.subr.mxu1 %v26040_v56  ;;  %18409 = vmatpush3.msra.mxu0 %v21250_v12 }
 0x424   : > { %18452 = vmatpush3.msra.mxu1 %v26040_v56  ;;  %18410 = vmatprep.subr.mxu0 %v21254_v14  ;;  %v9644_v52 = vsub.f32 %v23464_v6, %v25589_v30  ;;  %v26057_v30 = vld [vmem:[#allocation32_spill] sm:$0xff] }
 0x425   : > { %18453 = vmatprep.subr.mxu1 %v26042_v35  ;;  %18411 = vmatpush3.msra.mxu0 %v21254_v14 }
 0x426   : > { %18454 = vmatpush3.msra.mxu1 %v26042_v35  ;;  %18412 = vmatprep.subr.mxu0 %v21268_v32 }
 0x427   : > { %18455 = vmatprep.subr.mxu1 %v26043_v28  ;;  %18413 = vmatpush3.msra.mxu0 %v21268_v32 }
 0x428   : > { %18456 = vmatpush3.msra.mxu1 %v26043_v28  ;;  %18414 = vmatprep.subr.mxu0 %v21294_v27 }
 0x429   : > { %18457 = vmatprep.subr.mxu1 %v26044_v34  ;;  %18415 = vmatpush3.msra.mxu0 %v21294_v27 }
 0x42a   : > { %18458 = vmatpush3.msra.mxu1 %v26044_v34  ;;  %18416 = vmatprep.subr.mxu0 %v26003_v44 }
 0x42b   : > { %18459 = vmatprep.subr.mxu1 %v26045_v17  ;;  %18417 = vmatpush3.msra.mxu0 %v26003_v44 }
 0x42c   : > { %18460 = vmatpush3.msra.mxu1 %v26045_v17  ;;  %18418 = vmatprep.subr.mxu0 %v26006_v59 }
 0x42d   : > { %18461 = vmatprep.subr.mxu1 %v26046_v42  ;;  %8171 = vadd.xlane.f32.xlu0 %v8170_v33  ;;  %v26054_v33 = vld [vmem:[#allocation20_spill] sm:$0xff] }
 0x42e   : > { %18419 = vmatpush3.msra.mxu0 %v26006_v59  ;;  %18462 = vmatpush3.msra.mxu1 %v26046_v42 }
 0x42f   : > { %18420 = vmatprep.subr.mxu0 %v26009_v45  ;;  %18463 = vmatprep.subr.mxu1 %v26047_v41 }
 0x430   : > { %18421 = vmatpush3.msra.mxu0 %v26009_v45  ;;  %18464 = vmatpush3.msra.mxu1 %v26047_v41 }
 0x431   : > { %18422 = vmatprep.subr.mxu0 %v26011_v50  ;;  %18466 = vmatmul.mubr.f32.vlgmr.msra.gmra.mxu1 %v23451_v61 }
 0x432   : > { %18503 = vmatprep.subr.mxu1 %v26030_v46  ;;  %18423 = vmatpush3.msra.mxu0 %v26011_v50 }
 0x433   : > { %18504 = vmatpush3.msra.mxu1 %v26030_v46  ;;  %18535 = vmatprep.mubr.f32.mxu1 %v9633_v1  ;;  %v9645_v1 = vand.u32 4294901760, %v9644_v52  ;;  %v26055_v52 = vld [vmem:[#allocation22_spill] sm:$0xff] }
 0x434   : > { %18424 = vmatprep.subr.mxu0 %v26013_v63  ;;  %18505 = vmatprep.subr.mxu1 %v26032_v43 }
 0x435   : > { %18425 = vmatpush3.msra.mxu0 %v26013_v63  ;;  %18506 = vmatpush3.msra.mxu1 %v26032_v43 }
 0x436   : > { %18426 = vmatprep.subr.mxu0 %v26015_v2  ;;  %18507 = vmatprep.subr.mxu1 %v21222_v4 }
 0x437   : > { %18427 = vmatpush3.msra.mxu0 %v26015_v2  ;;  %18508 = vmatpush3.msra.mxu1 %v21222_v4 }
 0x438   : > { %18428 = vmatprep.subr.mxu0 %v26017_v39  ;;  %18509 = vmatprep.subr.mxu1 %v21229_v48 }
 0x439   : > { %18429 = vmatpush3.msra.mxu0 %v26017_v39  ;;  %18510 = vmatpush3.msra.mxu1 %v21229_v48 }
 0x43a   : > { %18431 = vmatmul.mubr.f32.vlgmr.msra.gmra.mxu0 %v9645_v1  ;;  %18468 = vmatprep.subr.mxu0 %v26048_v51  ;;  %v26056_v1 = vld [vmem:[#allocation28_spill] sm:$0xff] }
 0x43b   : > { %18511 = vmatprep.subr.mxu1 %v21240_v60  ;;  %18469 = vmatpush3.msra.mxu0 %v26048_v51 }
 0x43c   : > { %18500 = vmatprep.mubr.f32.mxu0 %v23373_v47  ;;  %18512 = vmatpush3.msra.mxu1 %v21240_v60  ;;  %v26052_v47 = vld [vmem:[#allocation18_spill] sm:$0xff] }
 0x43d   : > { %18470 = vmatprep.subr.mxu0 %v26049_v24  ;;  %18513 = vmatprep.subr.mxu1 %v21250_v12 }
 0x43e   : > { %18471 = vmatpush3.msra.mxu0 %v26049_v24  ;;  %18514 = vmatpush3.msra.mxu1 %v21250_v12 }
 0x43f   : > { %18472 = vmatprep.subr.mxu0 %v26050_v54  ;;  %18515 = vmatprep.subr.mxu1 %v21254_v14 }
 0x440   : > { %18473 = vmatpush3.msra.mxu0 %v26050_v54  ;;  %18516 = vmatpush3.msra.mxu1 %v21254_v14 }
 0x441   : > { %18474 = vmatprep.subr.mxu0 %v26051_v9  ;;  %18517 = vmatprep.subr.mxu1 %v21268_v32 }
 0x442   : > { %18475 = vmatpush3.msra.mxu0 %v26051_v9  ;;  %18518 = vmatpush3.msra.mxu1 %v21268_v32 }
 0x443   : > { %18476 = vmatprep.subr.mxu0 %v26052_v47  ;;  %18519 = vmatprep.subr.mxu1 %v21294_v27 }
 0x444   : > { %18477 = vmatpush3.msra.mxu0 %v26052_v47  ;;  %18520 = vmatpush3.msra.mxu1 %v21294_v27 }
 0x445   : > { %18478 = vmatprep.subr.mxu0 %v26053_v22  ;;  %18521 = vmatprep.subr.mxu1 %v26003_v44 }
 0x446   : > { %18479 = vmatpush3.msra.mxu0 %v26053_v22  ;;  %18522 = vmatpush3.msra.mxu1 %v26003_v44 }
 0x447   : > { %18480 = vmatprep.subr.mxu0 %v26054_v33  ;;  %18523 = vmatprep.subr.mxu1 %v26006_v59 }
 0x448   : > { %18481 = vmatpush3.msra.mxu0 %v26054_v33  ;;  %18524 = vmatpush3.msra.mxu1 %v26006_v59 }
 0x449   : > { %18482 = vmatprep.subr.mxu0 %v26055_v52  ;;  %18525 = vmatprep.subr.mxu1 %v26009_v45 }
 0x44a   : > { %18483 = vmatpush3.msra.mxu0 %v26055_v52  ;;  %18526 = vmatpush3.msra.mxu1 %v26009_v45  ;;  %v26059_v52 = vld [vmem:[#allocation40_spill] sm:$0xff] }
 0x44b   : > { %18484 = vmatprep.subr.mxu0 %v26056_v1  ;;  %18527 = vmatprep.subr.mxu1 %v26011_v50 }
 0x44c   : > { %18485 = vmatpush3.msra.mxu0 %v26056_v1  ;;  %18528 = vmatpush3.msra.mxu1 %v26011_v50  ;;  %v26060_v1 = vld [vmem:[#allocation44_spill] sm:$0xff] }
 0x44d   : > { %18486 = vmatprep.subr.mxu0 %v26057_v30  ;;  %18529 = vmatprep.subr.mxu1 %v26013_v63 }
 0x44e   : > { %18487 = vmatpush3.msra.mxu0 %v26057_v30  ;;  %18530 = vmatpush3.msra.mxu1 %v26013_v63  ;;  %v26061_v30 = vand.u32 4294901760, %v23464_v6 }
 0x44f   : > { %18488 = vmatprep.subr.mxu0 %v26058_v11  ;;  %18531 = vmatprep.subr.mxu1 %v26015_v2 }
 0x450   : > { %18489 = vmatpush3.msra.mxu0 %v26058_v11  ;;  %18532 = vmatpush3.msra.mxu1 %v26015_v2  ;;  %v26062_v11 = vld [vmem:[#allocation48_spill] sm:$0xff] }
 0x451   : > { %18490 = vmatprep.subr.mxu0 %v26059_v52  ;;  %18533 = vmatprep.subr.mxu1 %v26017_v39 }
 0x452   : > { %18491 = vmatpush3.msra.mxu0 %v26059_v52  ;;  %18534 = vmatpush3.msra.mxu1 %v26017_v39 }
 0x453   : > { %18492 = vmatprep.subr.mxu0 %v26060_v1  ;;  %18536 = vmatmul.mubr.f32.vlgmr.msra.gmra.mxu1 %v26061_v30 }
 0x454   : > { %18573 = vmatprep.subr.mxu1 %v26030_v46  ;;  %18493 = vmatpush3.msra.mxu0 %v26060_v1 }
 0x455   : > { %18574 = vmatpush3.msra.mxu1 %v26030_v46  ;;  %18605 = vmatprep.mubr.f32.mxu1 %v23362_v19 }
 0x456   : > { %18494 = vmatprep.subr.mxu0 %v26062_v11  ;;  %18575 = vmatprep.subr.mxu1 %v26032_v43 }
 0x457   : > { %18495 = vmatpush3.msra.mxu0 %v26062_v11  ;;  %18576 = vmatpush3.msra.mxu1 %v26032_v43 }
 0x458   : > { %18496 = vmatprep.subr.mxu0 %v25997_v53  ;;  %18577 = vmatprep.subr.mxu1 %v21222_v4 }
 0x459   : > { %18497 = vmatpush3.msra.mxu0 %v25997_v53  ;;  %18578 = vmatpush3.msra.mxu1 %v21222_v4 }
 0x45a   : > { %18498 = vmatprep.subr.mxu0 %v21438_v55  ;;  %18579 = vmatprep.subr.mxu1 %v21229_v48 }
 0x45b   : > { %18499 = vmatpush3.msra.mxu0 %v21438_v55  ;;  %18580 = vmatpush3.msra.mxu1 %v21229_v48 }
 0x45c   : > { %18501 = vmatmul.mubr.f32.vlgmr.msra.gmra.mxu0 %v23464_v6  ;;  %18538 = vmatprep.subr.mxu0 %v21235_v0 }
 0x45d   : > { %18581 = vmatprep.subr.mxu1 %v21240_v60  ;;  %18539 = vmatpush3.msra.mxu0 %v21235_v0 }
 0x45e   : > { %18570 = vmatprep.mubr.f32.mxu0 %v23362_v19  ;;  %18582 = vmatpush3.msra.mxu1 %v21240_v60  ;;  %v26063_v19 = vld [vmem:[#allocation137_spill] sm:$0xff] }
 0x45f   : > { %18540 = vmatprep.subr.mxu0 %v21245_v10  ;;  %18583 = vmatprep.subr.mxu1 %v21250_v12  ;;  %v23603_v6 = vand.u32 4294901760, %v26063_v19 }
 0x460   : > { %18541 = vmatpush3.msra.mxu0 %v21245_v10  ;;  %18584 = vmatpush3.msra.mxu1 %v21250_v12 }
 0x461   : > { %18542 = vmatprep.subr.mxu0 %v21261_v15  ;;  %18585 = vmatprep.subr.mxu1 %v21254_v14  ;;  %v23615_v30 = vsub.f32 %v26063_v19, %v23603_v6 }
 0x462   : > { %18543 = vmatpush3.msra.mxu0 %v21261_v15  ;;  %18586 = vmatpush3.msra.mxu1 %v21254_v14 }
 0x463   : > { %18544 = vmatprep.subr.mxu0 %v21275_v21  ;;  %18587 = vmatprep.subr.mxu1 %v21268_v32  ;;  %v25598_v19 = vand.u32 4294901760, %v23615_v30 }
 0x464   : > { %18545 = vmatpush3.msra.mxu0 %v21275_v21  ;;  %18588 = vmatpush3.msra.mxu1 %v21268_v32 }
 0x465   : > { %18546 = vmatprep.subr.mxu0 %v21292_v26  ;;  %18589 = vmatprep.subr.mxu1 %v21294_v27 }
 0x466   : > { %18547 = vmatpush3.msra.mxu0 %v21292_v26  ;;  %18590 = vmatpush3.msra.mxu1 %v21294_v27 }
 0x467   : > { %18548 = vmatprep.subr.mxu0 %v21308_v37  ;;  %18591 = vmatprep.subr.mxu1 %v26003_v44 }
 0x468   : > { %18549 = vmatpush3.msra.mxu0 %v21308_v37  ;;  %18592 = vmatpush3.msra.mxu1 %v26003_v44 }
 0x469   : > { %18550 = vmatprep.subr.mxu0 %v26004_v16  ;;  %18593 = vmatprep.subr.mxu1 %v26006_v59 }
 0x46a   : > { %18551 = vmatpush3.msra.mxu0 %v26004_v16  ;;  %18594 = vmatpush3.msra.mxu1 %v26006_v59 }
 0x46b   : > { %18552 = vmatprep.subr.mxu0 %v26008_v3  ;;  %18595 = vmatprep.subr.mxu1 %v26009_v45 }
 0x46c   : > { %18553 = vmatpush3.msra.mxu0 %v26008_v3  ;;  %18596 = vmatpush3.msra.mxu1 %v26009_v45 }
 0x46d   : > { %18554 = vmatprep.subr.mxu0 %v26010_v29  ;;  %18597 = vmatprep.subr.mxu1 %v26011_v50 }
 0x46e   : > { %18555 = vmatpush3.msra.mxu0 %v26010_v29  ;;  %18598 = vmatpush3.msra.mxu1 %v26011_v50 }
 0x46f   : > { %18556 = vmatprep.subr.mxu0 %v26012_v62  ;;  %18599 = vmatprep.subr.mxu1 %v26013_v63 }
 0x470   : > { %18557 = vmatpush3.msra.mxu0 %v26012_v62  ;;  %18600 = vmatpush3.msra.mxu1 %v26013_v63 }
 0x471   : > { %18558 = vmatprep.subr.mxu0 %v26014_v38  ;;  %18601 = vmatprep.subr.mxu1 %v26015_v2 }
 0x472   : > { %18559 = vmatpush3.msra.mxu0 %v26014_v38  ;;  %18602 = vmatpush3.msra.mxu1 %v26015_v2 }
 0x473   : > { %18560 = vmatprep.subr.mxu0 %v26016_v5  ;;  %18603 = vmatprep.subr.mxu1 %v26017_v39 }
 0x474   : > { %18561 = vmatpush3.msra.mxu0 %v26016_v5  ;;  %18604 = vmatpush3.msra.mxu1 %v26017_v39 }
 0x475   : > { %18562 = vmatprep.subr.mxu0 %v26018_v25  ;;  %18606 = vmatmul.mubr.f32.vlgmr.msra.gmra.mxu1 %v23451_v61 }
 0x476   : > { %18643 = vmatprep.subr.mxu1 %v26020_v58  ;;  %18563 = vmatpush3.msra.mxu0 %v26018_v25  ;;  %v10318_v25 = vsub.f32 %v23615_v30, %v25598_v19 }
 0x477   : > { %18644 = vmatpush3.msra.mxu1 %v26020_v58  ;;  %18675 = vmatprep.mubr.f32.mxu1 %v23603_v6 }
 0x478   : > { %18564 = vmatprep.subr.mxu0 %v26021_v31  ;;  %18645 = vmatprep.subr.mxu1 %v26022_v36 }
 0x479   : > { %18565 = vmatpush3.msra.mxu0 %v26021_v31  ;;  %18646 = vmatpush3.msra.mxu1 %v26022_v36  ;;  %v10319_v36 = vand.u32 4294901760, %v10318_v25  ;;  %v26064_v25 = vld [vmem:[#allocation140_spill] sm:$0xff] }
 0x47a   : > { %18566 = vmatprep.subr.mxu0 %v26023_v20  ;;  %18647 = vmatprep.subr.mxu1 %v26026_v18 }
 0x47b   : > { %18567 = vmatpush3.msra.mxu0 %v26023_v20  ;;  %18648 = vmatpush3.msra.mxu1 %v26026_v18 }
 0x47c   : > { %18568 = vmatprep.subr.mxu0 %v26027_v13  ;;  %18649 = vmatprep.subr.mxu1 %v26028_v57 }
 0x47d   : > { %18569 = vmatpush3.msra.mxu0 %v26027_v13  ;;  %18650 = vmatpush3.msra.mxu1 %v26028_v57 }
 0x47e   : > { %18571 = vmatmul.mubr.f32.vlgmr.msra.gmra.mxu0 %v23451_v61  ;;  %18608 = vmatprep.subr.mxu0 %v26030_v46 }
 0x47f   : > { %18651 = vmatprep.subr.mxu1 %v26031_v7  ;;  %18609 = vmatpush3.msra.mxu0 %v26030_v46 }
 0x480   : > { %18640 = vmatprep.mubr.f32.mxu0 %v10319_v36  ;;  %18652 = vmatpush3.msra.mxu1 %v26031_v7  ;;  %v23677_v36 = vand.u32 4294901760, %v26064_v25 }
 0x481   : > { %18610 = vmatprep.subr.mxu0 %v26032_v43  ;;  %18653 = vmatprep.subr.mxu1 %v26033_v8 }
 0x482   : > { %18611 = vmatpush3.msra.mxu0 %v26032_v43  ;;  %18654 = vmatpush3.msra.mxu1 %v26033_v8  ;;  %v23689_v61 = vsub.f32 %v26064_v25, %v23677_v36  ;;  %v26065_v25 = vand.u32 4294901760, %v23615_v30 }
 0x483   : > { %18612 = vmatprep.subr.mxu0 %v21222_v4  ;;  %18655 = vmatprep.subr.mxu1 %v26035_v40 }
 0x484   : > { %18613 = vmatpush3.msra.mxu0 %v21222_v4  ;;  %18656 = vmatpush3.msra.mxu1 %v26035_v40  ;;  %v25600_v19 = vand.u32 4294901760, %v23689_v61 }
 0x485   : > { %18614 = vmatprep.subr.mxu0 %v21229_v48  ;;  %18657 = vmatprep.subr.mxu1 %v26036_v49 }
 0x486   : > { %18615 = vmatpush3.msra.mxu0 %v21229_v48  ;;  %18658 = vmatpush3.msra.mxu1 %v26036_v49 }
 0x487   : > { %18616 = vmatprep.subr.mxu0 %v21240_v60  ;;  %18659 = vmatprep.subr.mxu1 %v26038_v23 }
 0x488   : > { %18617 = vmatpush3.msra.mxu0 %v21240_v60  ;;  %18660 = vmatpush3.msra.mxu1 %v26038_v23 }
 0x489   : > { %18618 = vmatprep.subr.mxu0 %v21250_v12  ;;  %18661 = vmatprep.subr.mxu1 %v26040_v56 }
 0x48a   : > { %18619 = vmatpush3.msra.mxu0 %v21250_v12  ;;  %18662 = vmatpush3.msra.mxu1 %v26040_v56 }
 0x48b   : > { %18620 = vmatprep.subr.mxu0 %v21254_v14  ;;  %18663 = vmatprep.subr.mxu1 %v26042_v35 }
 0x48c   : > { %18621 = vmatpush3.msra.mxu0 %v21254_v14  ;;  %18664 = vmatpush3.msra.mxu1 %v26042_v35 }
 0x48d   : > { %18622 = vmatprep.subr.mxu0 %v21268_v32  ;;  %18665 = vmatprep.subr.mxu1 %v26043_v28 }
 0x48e   : > { %18623 = vmatpush3.msra.mxu0 %v21268_v32  ;;  %18666 = vmatpush3.msra.mxu1 %v26043_v28 }
 0x48f   : > { %18624 = vmatprep.subr.mxu0 %v21294_v27  ;;  %18667 = vmatprep.subr.mxu1 %v26044_v34 }
 0x490   : > { %18625 = vmatpush3.msra.mxu0 %v21294_v27  ;;  %18668 = vmatpush3.msra.mxu1 %v26044_v34 }
 0x491   : > { %18626 = vmatprep.subr.mxu0 %v26003_v44  ;;  %18669 = vmatprep.subr.mxu1 %v26045_v17 }
 0x492   : > { %18627 = vmatpush3.msra.mxu0 %v26003_v44  ;;  %18670 = vmatpush3.msra.mxu1 %v26045_v17 }
 0x493   : > { %18628 = vmatprep.subr.mxu0 %v26006_v59  ;;  %18671 = vmatprep.subr.mxu1 %v26046_v42 }
 0x494   : > { %18629 = vmatpush3.msra.mxu0 %v26006_v59  ;;  %18672 = vmatpush3.msra.mxu1 %v26046_v42  ;;  %v10328_v42 = vsub.f32 %v23689_v61, %v25600_v19  ;;  %v26069_v19 = vld [vmem:[#allocation36_spill] sm:$0xff] }
 0x495   : > { %18630 = vmatprep.subr.mxu0 %v26009_v45  ;;  %18673 = vmatprep.subr.mxu1 %v26047_v41 }
 0x496   : > { %18631 = vmatpush3.msra.mxu0 %v26009_v45  ;;  %18674 = vmatpush3.msra.mxu1 %v26047_v41 }
 0x497   : > { %18632 = vmatprep.subr.mxu0 %v26011_v50  ;;  %18676 = vmatmul.mubr.f32.vlgmr.msra.gmra.mxu1 %v23677_v36 }
 0x498   : > { %18713 = vmatprep.subr.mxu1 %v26030_v46  ;;  %18633 = vmatpush3.msra.mxu0 %v26011_v50 }
 0x499   : > { %18714 = vmatpush3.msra.mxu1 %v26030_v46  ;;  %18745 = vmatprep.mubr.f32.mxu1 %v26065_v25  ;;  %v10329_v25 = vand.u32 4294901760, %v10328_v42  ;;  %v26066_v42 = vld [vmem:[#allocation22_spill] sm:$0xff] }
 0x49a   : > { %18634 = vmatprep.subr.mxu0 %v26013_v63  ;;  %18715 = vmatprep.subr.mxu1 %v26032_v43 }
 0x49b   : > { %18635 = vmatpush3.msra.mxu0 %v26013_v63  ;;  %18716 = vmatpush3.msra.mxu1 %v26032_v43 }
 0x49c   : > { %18636 = vmatprep.subr.mxu0 %v26015_v2  ;;  %18717 = vmatprep.subr.mxu1 %v21222_v4 }
 0x49d   : > { %18637 = vmatpush3.msra.mxu0 %v26015_v2  ;;  %18718 = vmatpush3.msra.mxu1 %v21222_v4 }
 0x49e   : > { %18638 = vmatprep.subr.mxu0 %v26017_v39  ;;  %18719 = vmatprep.subr.mxu1 %v21229_v48 }
 0x49f   : > { %18639 = vmatpush3.msra.mxu0 %v26017_v39  ;;  %18720 = vmatpush3.msra.mxu1 %v21229_v48 }
 0x4a0   : > { %18641 = vmatmul.mubr.f32.vlgmr.msra.gmra.mxu0 %v10329_v25  ;;  %18678 = vmatprep.subr.mxu0 %v26048_v51  ;;  %v26068_v25 = vld [vmem:[#allocation32_spill] sm:$0xff] }
 0x4a1   : > { %18721 = vmatprep.subr.mxu1 %v21240_v60  ;;  %18679 = vmatpush3.msra.mxu0 %v26048_v51 }
 0x4a2   : > { %18710 = vmatprep.mubr.f32.mxu0 %v23615_v30  ;;  %18722 = vmatpush3.msra.mxu1 %v21240_v60  ;;  %v26067_v30 = vld [vmem:[#allocation28_spill] sm:$0xff] }
 0x4a3   : > { %18680 = vmatprep.subr.mxu0 %v26049_v24  ;;  %18723 = vmatprep.subr.mxu1 %v21250_v12 }
 0x4a4   : > { %18681 = vmatpush3.msra.mxu0 %v26049_v24  ;;  %18724 = vmatpush3.msra.mxu1 %v21250_v12 }
 0x4a5   : > { %18682 = vmatprep.subr.mxu0 %v26050_v54  ;;  %18725 = vmatprep.subr.mxu1 %v21254_v14 }
 0x4a6   : > { %18683 = vmatpush3.msra.mxu0 %v26050_v54  ;;  %18726 = vmatpush3.msra.mxu1 %v21254_v14 }
 0x4a7   : > { %18684 = vmatprep.subr.mxu0 %v26051_v9  ;;  %18727 = vmatprep.subr.mxu1 %v21268_v32 }
 0x4a8   : > { %18685 = vmatpush3.msra.mxu0 %v26051_v9  ;;  %18728 = vmatpush3.msra.mxu1 %v21268_v32 }
 0x4a9   : > { %18686 = vmatprep.subr.mxu0 %v26052_v47  ;;  %18729 = vmatprep.subr.mxu1 %v21294_v27 }
 0x4aa   : > { %18687 = vmatpush3.msra.mxu0 %v26052_v47  ;;  %18730 = vmatpush3.msra.mxu1 %v21294_v27 }
 0x4ab   : > { %18688 = vmatprep.subr.mxu0 %v26053_v22  ;;  %18731 = vmatprep.subr.mxu1 %v26003_v44 }
 0x4ac   : > { %18689 = vmatpush3.msra.mxu0 %v26053_v22  ;;  %18732 = vmatpush3.msra.mxu1 %v26003_v44 }
 0x4ad   : > { %18690 = vmatprep.subr.mxu0 %v26054_v33  ;;  %18733 = vmatprep.subr.mxu1 %v26006_v59 }
 0x4ae   : > { %18691 = vmatpush3.msra.mxu0 %v26054_v33  ;;  %18734 = vmatpush3.msra.mxu1 %v26006_v59 }
 0x4af   : > { %18692 = vmatprep.subr.mxu0 %v26066_v42  ;;  %18735 = vmatprep.subr.mxu1 %v26009_v45 }
 0x4b0   : > { %18693 = vmatpush3.msra.mxu0 %v26066_v42  ;;  %18736 = vmatpush3.msra.mxu1 %v26009_v45 }
 0x4b1   : > { %18694 = vmatprep.subr.mxu0 %v26067_v30  ;;  %18737 = vmatprep.subr.mxu1 %v26011_v50 }
 0x4b2   : > { %18695 = vmatpush3.msra.mxu0 %v26067_v30  ;;  %18738 = vmatpush3.msra.mxu1 %v26011_v50 }
 0x4b3   : > { %18696 = vmatprep.subr.mxu0 %v26068_v25  ;;  %18739 = vmatprep.subr.mxu1 %v26013_v63 }
 0x4b4   : > { %18697 = vmatpush3.msra.mxu0 %v26068_v25  ;;  %18740 = vmatpush3.msra.mxu1 %v26013_v63  ;;  %v26070_v25 = vand.u32 4294901760, %v23689_v61 }
 0x4b5   : > { %18698 = vmatprep.subr.mxu0 %v26069_v19  ;;  %18741 = vmatprep.subr.mxu1 %v26015_v2 }
 0x4b6   : > { %18699 = vmatpush3.msra.mxu0 %v26069_v19  ;;  %18742 = vmatpush3.msra.mxu1 %v26015_v2  ;;  %v8172_v42 = vpop.xlane.xlu0 %8171 }
 0x4b7   : > { %18700 = vmatprep.subr.mxu0 %v26059_v52  ;;  %18743 = vmatprep.subr.mxu1 %v26017_v39  ;;  %v8173_v30 = vrot.slane %v8172_v42, 4 }
 0x4b8   : > { %18701 = vmatpush3.msra.mxu0 %v26059_v52  ;;  %18744 = vmatpush3.msra.mxu1 %v26017_v39 }
 0x4b9   : > { %18702 = vmatprep.subr.mxu0 %v26060_v1  ;;  %18746 = vmatmul.mubr.f32.vlgmr.msra.gmra.mxu1 %v26070_v25  ;;  %v8174_v33 = vadd.f32 %v8173_v30, %v8172_v42  ;;  %v26071_v30 = vld [vmem:[#allocation131_spill] sm:$0xff]  ;;  %v26072_v25 = vld [vmem:[#allocation134_spill] sm:$0xff] }
 0x4ba   : > { %18783 = vmatprep.subr.mxu1 %v26030_v46  ;;  %18703 = vmatpush3.msra.mxu0 %v26060_v1  ;;  %v2752_v1 = vadd.f32 %v26072_v25, %v26071_v30 }
 0x4bb   : > { %18784 = vmatpush3.msra.mxu1 %v26030_v46  ;;  %18815 = vmatprep.mubr.f32.mxu1 %v23603_v6  ;;  %v8175_v19 = vrot.slane %v8174_v33, 2 }
 0x4bc   : > { %18704 = vmatprep.subr.mxu0 %v26062_v11  ;;  %18785 = vmatprep.subr.mxu1 %v26032_v43 }
 0x4bd   : > { %18705 = vmatpush3.msra.mxu0 %v26062_v11  ;;  %18786 = vmatpush3.msra.mxu1 %v26032_v43  ;;  %v8176_v52 = vadd.f32 %v8175_v19, %v8174_v33  ;;  %v26073_v19 = vld [vmem:[#allocation53_spill] sm:$0xff] }
 0x4be   : > { %18706 = vmatprep.subr.mxu0 %v25997_v53  ;;  %18787 = vmatprep.subr.mxu1 %v21222_v4  ;;  %v2840_v30 = vadd.f32 %v26073_v19, %v2752_v1  ;;  %v26075_v1 = vld [vmem:[#allocation135_spill] sm:$0xff] }
 0x4bf   : > { %18707 = vmatpush3.msra.mxu0 %v25997_v53  ;;  %18788 = vmatpush3.msra.mxu1 %v21222_v4  ;;  %v8177_v42 = vrot.slane %v8176_v52, 1 }
 0x4c0   : > { %18708 = vmatprep.subr.mxu0 %v21438_v55  ;;  %18789 = vmatprep.subr.mxu1 %v21229_v48 }
 0x4c1   : > { %18709 = vmatpush3.msra.mxu0 %v21438_v55  ;;  %18790 = vmatpush3.msra.mxu1 %v21229_v48  ;;  %v8178_v33 = vadd.f32 %v8177_v42, %v8176_v52  ;;  %v26074_v52 = vld [vmem:[#allocation66_spill] sm:$0xff] }
 0x4c2   : > { %18711 = vmatmul.mubr.f32.vlgmr.msra.gmra.mxu0 %v23689_v61  ;;  %18748 = vmatprep.subr.mxu0 %v21235_v0  ;;  %v2926_v61 = vadd.f32 %v26074_v52, %v2840_v30  ;;  %v26076_v42 = vld [vmem:[#allocation138_spill] sm:$0xff]  ;;  %v26077_v30 = vld [vmem:[#allocation51_spill] sm:$0xff] }
 0x4c3   : > { %18791 = vmatprep.subr.mxu1 %v21240_v60  ;;  %18749 = vmatpush3.msra.mxu0 %v21235_v0  ;;  %20083 = vpush %v8178_v33 }
 0x4c4   : > { %18780 = vmatprep.mubr.f32.mxu0 %v23603_v6  ;;  %18792 = vmatpush3.msra.mxu1 %v21240_v60  ;;  %v3019_v6 = vadd.f32 %v26075_v1, %v2926_v61  ;;  %v26078_v61 = vld [vmem:[#allocation23_spill] sm:$0xff]  ;;  %v26079_v1 = vld [vmem:[#allocation133_spill] sm:$0xff] }
 0x4c5   : > { %18750 = vmatprep.subr.mxu0 %v21245_v10  ;;  %18793 = vmatprep.subr.mxu1 %v21250_v12 }
 0x4c6   : > { %18751 = vmatpush3.msra.mxu0 %v21245_v10  ;;  %18794 = vmatpush3.msra.mxu1 %v21250_v12  ;;  %v3102_v25 = vadd.f32 %v26076_v42, %v3019_v6  ;;  %v26080_v6 = vld [vmem:[#allocation61_spill] sm:$0xff] }
 0x4c7   : > { %18752 = vmatprep.subr.mxu0 %v21261_v15  ;;  %18795 = vmatprep.subr.mxu1 %v21254_v14  ;;  %v2759_v42 = vadd.f32 %v26080_v6, %v26079_v1  ;;  %v26081_v1 = vld [vmem:[#allocation63_spill] sm:$0xff] }
 0x4c8   : > { %18753 = vmatpush3.msra.mxu0 %v21261_v15  ;;  %18796 = vmatpush3.msra.mxu1 %v21254_v14  ;;  %v23834_v33 = vand.u32 4294901760, %v3102_v25 }
 0x4c9   : > { %18754 = vmatprep.subr.mxu0 %v21275_v21  ;;  %18797 = vmatprep.subr.mxu1 %v21268_v32  ;;  %v2848_v6 = vadd.f32 %v26081_v1, %v2759_v42  ;;  %v26085_v1 = vld [vmem:[#allocation64_spill] sm:$0xff] }
 0x4ca   : > { %18755 = vmatpush3.msra.mxu0 %v21275_v21  ;;  %18798 = vmatpush3.msra.mxu1 %v21268_v32  ;;  %v23845_v19 = vsub.f32 %v3102_v25, %v23834_v33 }
 0x4cb   : > { %18756 = vmatprep.subr.mxu0 %v21292_v26  ;;  %18799 = vmatprep.subr.mxu1 %v21294_v27 }
 0x4cc   : > { %18757 = vmatpush3.msra.mxu0 %v21292_v26  ;;  %18800 = vmatpush3.msra.mxu1 %v21294_v27  ;;  %v25609_v52 = vand.u32 4294901760, %v23845_v19 }
 0x4cd   : > { %18758 = vmatprep.subr.mxu0 %v21308_v37  ;;  %18801 = vmatprep.subr.mxu1 %v26003_v44 }
 0x4ce   : > { %18759 = vmatpush3.msra.mxu0 %v21308_v37  ;;  %18802 = vmatpush3.msra.mxu1 %v26003_v44  ;;  %v11002_v25 = vsub.f32 %v23845_v19, %v25609_v52  ;;  %v26082_v52 = vld [vmem:[#allocation67_spill] sm:$0xff] }
 0x4cf   : > { %18760 = vmatprep.subr.mxu0 %v26004_v16  ;;  %18803 = vmatprep.subr.mxu1 %v26006_v59 }
 0x4d0   : > { %18761 = vmatpush3.msra.mxu0 %v26004_v16  ;;  %18804 = vmatpush3.msra.mxu1 %v26006_v59 }
 0x4d1   : > { %18762 = vmatprep.subr.mxu0 %v26008_v3  ;;  %18805 = vmatprep.subr.mxu1 %v26009_v45 }
 0x4d2   : > { %18763 = vmatpush3.msra.mxu0 %v26008_v3  ;;  %18806 = vmatpush3.msra.mxu1 %v26009_v45 }
 0x4d3   : > { %18764 = vmatprep.subr.mxu0 %v26010_v29  ;;  %18807 = vmatprep.subr.mxu1 %v26011_v50 }
 0x4d4   : > { %18765 = vmatpush3.msra.mxu0 %v26010_v29  ;;  %18808 = vmatpush3.msra.mxu1 %v26011_v50 }
 0x4d5   : > { %18766 = vmatprep.subr.mxu0 %v26012_v62  ;;  %18809 = vmatprep.subr.mxu1 %v26013_v63 }
 0x4d6   : > { %18767 = vmatpush3.msra.mxu0 %v26012_v62  ;;  %18810 = vmatpush3.msra.mxu1 %v26013_v63 }
 0x4d7   : > { %18768 = vmatprep.subr.mxu0 %v26014_v38  ;;  %18811 = vmatprep.subr.mxu1 %v26015_v2 }
 0x4d8   : > { %18769 = vmatpush3.msra.mxu0 %v26014_v38  ;;  %18812 = vmatpush3.msra.mxu1 %v26015_v2 }
 0x4d9   : > { %18770 = vmatprep.subr.mxu0 %v26016_v5  ;;  %18813 = vmatprep.subr.mxu1 %v26017_v39 }
 0x4da   : > { %18771 = vmatpush3.msra.mxu0 %v26016_v5  ;;  %18814 = vmatpush3.msra.mxu1 %v26017_v39 }
 0x4db   : > { %18772 = vmatprep.subr.mxu0 %v26077_v30  ;;  %18816 = vmatmul.mubr.f32.vlgmr.msra.gmra.mxu1 %v23677_v36 }
 0x4dc   : > { %18853 = vmatprep.subr.mxu1 %v26020_v58  ;;  %18773 = vmatpush3.msra.mxu0 %v26077_v30 }
 0x4dd   : > { %18854 = vmatpush3.msra.mxu1 %v26020_v58  ;;  %18885 = vmatprep.mubr.f32.mxu1 %v23834_v33 }
 0x4de   : > { %18774 = vmatprep.subr.mxu0 %v26021_v31  ;;  %18855 = vmatprep.subr.mxu1 %v26078_v61 }
 0x4df   : > { %18775 = vmatpush3.msra.mxu0 %v26021_v31  ;;  %18856 = vmatpush3.msra.mxu1 %v26078_v61  ;;  %v11003_v61 = vand.u32 4294901760, %v11002_v25 }
 0x4e0   : > { %18776 = vmatprep.subr.mxu0 %v26023_v20  ;;  %18857 = vmatprep.subr.mxu1 %v26026_v18 }
 0x4e1   : > { %18777 = vmatpush3.msra.mxu0 %v26023_v20  ;;  %18858 = vmatpush3.msra.mxu1 %v26026_v18 }
 0x4e2   : > { %18778 = vmatprep.subr.mxu0 %v26027_v13  ;;  %18859 = vmatprep.subr.mxu1 %v26028_v57 }
 0x4e3   : > { %18779 = vmatpush3.msra.mxu0 %v26027_v13  ;;  %18860 = vmatpush3.msra.mxu1 %v26028_v57  ;;  %v2935_v57 = vadd.f32 %v26082_v52, %v2848_v6  ;;  %v26084_v52 = vld [vmem:[#allocation141_spill] sm:$0xff] }
 0x4e4   : > { %18781 = vmatmul.mubr.f32.vlgmr.msra.gmra.mxu0 %v23677_v36  ;;  %18818 = vmatprep.subr.mxu0 %v26030_v46  ;;  %v26083_v36 = vld [vmem:[#allocation136_spill] sm:$0xff] }
 0x4e5   : > { %18861 = vmatprep.subr.mxu1 %v26031_v7  ;;  %18819 = vmatpush3.msra.mxu0 %v26030_v46 }
 0x4e6   : > { %18850 = vmatprep.mubr.f32.mxu0 %v11003_v61  ;;  %18862 = vmatpush3.msra.mxu1 %v26031_v7  ;;  %v3026_v61 = vadd.f32 %v26083_v36, %v2935_v57  ;;  %v26086_v36 = vand.u32 4294901760, %v23845_v19 }
 0x4e7   : > { %18820 = vmatprep.subr.mxu0 %v26032_v43  ;;  %18863 = vmatprep.subr.mxu1 %v26033_v8 }
 0x4e8   : > { %18821 = vmatpush3.msra.mxu0 %v26032_v43  ;;  %18864 = vmatpush3.msra.mxu1 %v26033_v8  ;;  %v3109_v42 = vadd.f32 %v26084_v52, %v3026_v61 }
 0x4e9   : > { %18822 = vmatprep.subr.mxu0 %v21222_v4  ;;  %18865 = vmatprep.subr.mxu1 %v26035_v40 }
 0x4ea   : > { %18823 = vmatpush3.msra.mxu0 %v21222_v4  ;;  %18866 = vmatpush3.msra.mxu1 %v26035_v40  ;;  %v23912_v57 = vand.u32 4294901760, %v3109_v42 }
 0x4eb   : > { %18824 = vmatprep.subr.mxu0 %v21229_v48  ;;  %18867 = vmatprep.subr.mxu1 %v26036_v49 }
 0x4ec   : > { %18825 = vmatpush3.msra.mxu0 %v21229_v48  ;;  %18868 = vmatpush3.msra.mxu1 %v26036_v49  ;;  %v23923_v25 = vsub.f32 %v3109_v42, %v23912_v57  ;;  %v26088_v42 = vld [vmem:[#allocation22_spill] sm:$0xff] }
 0x4ed   : > { %18826 = vmatprep.subr.mxu0 %v21240_v60  ;;  %18869 = vmatprep.subr.mxu1 %v26038_v23 }
 0x4ee   : > { %18827 = vmatpush3.msra.mxu0 %v21240_v60  ;;  %18870 = vmatpush3.msra.mxu1 %v26038_v23  ;;  %v25611_v6 = vand.u32 4294901760, %v23923_v25 }
 0x4ef   : > { %18828 = vmatprep.subr.mxu0 %v21250_v12  ;;  %18871 = vmatprep.subr.mxu1 %v26040_v56 }
 0x4f0   : > { %18829 = vmatpush3.msra.mxu0 %v21250_v12  ;;  %18872 = vmatpush3.msra.mxu1 %v26040_v56  ;;  %v11012_v61 = vsub.f32 %v23923_v25, %v25611_v6  ;;  %v26092_v6 = vld [vmem:[#allocation40_spill] sm:$0xff] }
 0x4f1   : > { %18830 = vmatprep.subr.mxu0 %v21254_v14  ;;  %18873 = vmatprep.subr.mxu1 %v26042_v35 }
 0x4f2   : > { %18831 = vmatpush3.msra.mxu0 %v21254_v14  ;;  %18874 = vmatpush3.msra.mxu1 %v26042_v35  ;;  %v11013_v52 = vand.u32 4294901760, %v11012_v61  ;;  %v26090_v61 = vld [vmem:[#allocation32_spill] sm:$0xff] }
 0x4f3   : > { %18832 = vmatprep.subr.mxu0 %v21268_v32  ;;  %18875 = vmatprep.subr.mxu1 %v26043_v28 }
 0x4f4   : > { %18833 = vmatpush3.msra.mxu0 %v21268_v32  ;;  %18876 = vmatpush3.msra.mxu1 %v26043_v28  ;;  %s20084_s7 = spop %20083 }
 0x4f5   : > { %18834 = vmatprep.subr.mxu0 %v21294_v27  ;;  %18877 = vmatprep.subr.mxu1 %v26044_v34 }
 0x4f6   : > { %18835 = vmatpush3.msra.mxu0 %v21294_v27  ;;  %18878 = vmatpush3.msra.mxu1 %v26044_v34 }
 0x4f7   : > { %18836 = vmatprep.subr.mxu0 %v26003_v44  ;;  %18879 = vmatprep.subr.mxu1 %v26045_v17 }
 0x4f8   : > { %18837 = vmatpush3.msra.mxu0 %v26003_v44  ;;  %18880 = vmatpush3.msra.mxu1 %v26045_v17 }
 0x4f9   : > { %18838 = vmatprep.subr.mxu0 %v26006_v59  ;;  %18881 = vmatprep.subr.mxu1 %v26085_v1 }
 0x4fa   : > { %18839 = vmatpush3.msra.mxu0 %v26006_v59  ;;  %18882 = vmatpush3.msra.mxu1 %v26085_v1 }
 0x4fb   : > { %18840 = vmatprep.subr.mxu0 %v26009_v45  ;;  %18883 = vmatprep.subr.mxu1 %v26047_v41 }
 0x4fc   : > { %18841 = vmatpush3.msra.mxu0 %v26009_v45  ;;  %18884 = vmatpush3.msra.mxu1 %v26047_v41 }
 0x4fd   : > { %18842 = vmatprep.subr.mxu0 %v26011_v50  ;;  %18886 = vmatmul.mubr.f32.vlgmr.msra.gmra.mxu1 %v23912_v57 }
 0x4fe   : > { %18923 = vmatprep.subr.mxu1 %v26030_v46  ;;  %18843 = vmatpush3.msra.mxu0 %v26011_v50 }
 0x4ff   : > { %18924 = vmatpush3.msra.mxu1 %v26030_v46  ;;  %18955 = vmatprep.mubr.f32.mxu1 %v26086_v36  ;;  %v26089_v36 = vld [vmem:[#allocation28_spill] sm:$0xff] }
 0x500   : > { %18844 = vmatprep.subr.mxu0 %v26013_v63  ;;  %18925 = vmatprep.subr.mxu1 %v26032_v43 }
 0x501   : > { %18845 = vmatpush3.msra.mxu0 %v26013_v63  ;;  %18926 = vmatpush3.msra.mxu1 %v26032_v43 }
 0x502   : > { %18846 = vmatprep.subr.mxu0 %v26015_v2  ;;  %18927 = vmatprep.subr.mxu1 %v21222_v4 }
 0x503   : > { %18847 = vmatpush3.msra.mxu0 %v26015_v2  ;;  %18928 = vmatpush3.msra.mxu1 %v21222_v4 }
 0x504   : > { %18848 = vmatprep.subr.mxu0 %v26017_v39  ;;  %18929 = vmatprep.subr.mxu1 %v21229_v48 }
 0x505   : > { %18849 = vmatpush3.msra.mxu0 %v26017_v39  ;;  %18930 = vmatpush3.msra.mxu1 %v21229_v48 }
 0x506   : > { %18851 = vmatmul.mubr.f32.vlgmr.msra.gmra.mxu0 %v11013_v52  ;;  %18888 = vmatprep.subr.mxu0 %v26048_v51  ;;  %v26091_v52 = vld [vmem:[#allocation36_spill] sm:$0xff] }
 0x507   : > { %18931 = vmatprep.subr.mxu1 %v21240_v60  ;;  %18889 = vmatpush3.msra.mxu0 %v26048_v51 }
 0x508   : > { %18920 = vmatprep.mubr.f32.mxu0 %v23845_v19  ;;  %18932 = vmatpush3.msra.mxu1 %v21240_v60  ;;  %v26087_v19 = vld [vmem:[#allocation20_spill] sm:$0xff] }
 0x509   : > { %18890 = vmatprep.subr.mxu0 %v26049_v24  ;;  %18933 = vmatprep.subr.mxu1 %v21250_v12 }
 0x50a   : > { %18891 = vmatpush3.msra.mxu0 %v26049_v24  ;;  %18934 = vmatpush3.msra.mxu1 %v21250_v12 }
 0x50b   : > { %18892 = vmatprep.subr.mxu0 %v26050_v54  ;;  %18935 = vmatprep.subr.mxu1 %v21254_v14 }
 0x50c   : > { %18893 = vmatpush3.msra.mxu0 %v26050_v54  ;;  %18936 = vmatpush3.msra.mxu1 %v21254_v14 }
 0x50d   : > { %18894 = vmatprep.subr.mxu0 %v26051_v9  ;;  %18937 = vmatprep.subr.mxu1 %v21268_v32 }
 0x50e   : > { %18895 = vmatpush3.msra.mxu0 %v26051_v9  ;;  %18938 = vmatpush3.msra.mxu1 %v21268_v32 }
 0x50f   : > { %18896 = vmatprep.subr.mxu0 %v26052_v47  ;;  %18939 = vmatprep.subr.mxu1 %v21294_v27 }
 0x510   : > { %18897 = vmatpush3.msra.mxu0 %v26052_v47  ;;  %18940 = vmatpush3.msra.mxu1 %v21294_v27 }
 0x511   : > { %18898 = vmatprep.subr.mxu0 %v26053_v22  ;;  %18941 = vmatprep.subr.mxu1 %v26003_v44 }
 0x512   : > { %18899 = vmatpush3.msra.mxu0 %v26053_v22  ;;  %18942 = vmatpush3.msra.mxu1 %v26003_v44 }
 0x513   : > { %18900 = vmatprep.subr.mxu0 %v26087_v19  ;;  %18943 = vmatprep.subr.mxu1 %v26006_v59 }
 0x514   : > { %18901 = vmatpush3.msra.mxu0 %v26087_v19  ;;  %18944 = vmatpush3.msra.mxu1 %v26006_v59 }
 0x515   : > { %18902 = vmatprep.subr.mxu0 %v26088_v42  ;;  %18945 = vmatprep.subr.mxu1 %v26009_v45 }
 0x516   : > { %18903 = vmatpush3.msra.mxu0 %v26088_v42  ;;  %18946 = vmatpush3.msra.mxu1 %v26009_v45 }
 0x517   : > { %18904 = vmatprep.subr.mxu0 %v26089_v36  ;;  %18947 = vmatprep.subr.mxu1 %v26011_v50 }
 0x518   : > { %18905 = vmatpush3.msra.mxu0 %v26089_v36  ;;  %18948 = vmatpush3.msra.mxu1 %v26011_v50  ;;  %v26093_v36 = vld [vmem:[#allocation44_spill] sm:$0xff] }
 0x519   : > { %18906 = vmatprep.subr.mxu0 %v26090_v61  ;;  %18949 = vmatprep.subr.mxu1 %v26013_v63 }
 0x51a   : > { %18907 = vmatpush3.msra.mxu0 %v26090_v61  ;;  %18950 = vmatpush3.msra.mxu1 %v26013_v63  ;;  %v26094_v61 = vand.u32 4294901760, %v23923_v25 }
 0x51b   : > { %18908 = vmatprep.subr.mxu0 %v26091_v52  ;;  %18951 = vmatprep.subr.mxu1 %v26015_v2 }
 0x51c   : > { %18909 = vmatpush3.msra.mxu0 %v26091_v52  ;;  %18952 = vmatpush3.msra.mxu1 %v26015_v2 }
 0x51d   : > { %18910 = vmatprep.subr.mxu0 %v26092_v6  ;;  %18953 = vmatprep.subr.mxu1 %v26017_v39 }
 0x51e   : > { %18911 = vmatpush3.msra.mxu0 %v26092_v6  ;;  %18954 = vmatpush3.msra.mxu1 %v26017_v39 }
 0x51f   : > { %18912 = vmatprep.subr.mxu0 %v26093_v36  ;;  %18956 = vmatmul.mubr.f32.vlgmr.msra.gmra.mxu1 %v26094_v61 }
 0x520   : > { %18993 = vmatprep.subr.mxu1 %v26030_v46  ;;  %18913 = vmatpush3.msra.mxu0 %v26093_v36 }
 0x521   : > { %18994 = vmatpush3.msra.mxu1 %v26030_v46  ;;  %19025 = vmatprep.mubr.f32.mxu1 %v23834_v33 }
 0x522   : > { %18914 = vmatprep.subr.mxu0 %v26062_v11  ;;  %18995 = vmatprep.subr.mxu1 %v26032_v43 }
 0x523   : > { %18915 = vmatpush3.msra.mxu0 %v26062_v11  ;;  %18996 = vmatpush3.msra.mxu1 %v26032_v43 }
 0x524   : > { %18916 = vmatprep.subr.mxu0 %v25997_v53  ;;  %18997 = vmatprep.subr.mxu1 %v21222_v4 }
 0x525   : > { %18917 = vmatpush3.msra.mxu0 %v25997_v53  ;;  %18998 = vmatpush3.msra.mxu1 %v21222_v4 }
 0x526   : > { %18918 = vmatprep.subr.mxu0 %v21438_v55  ;;  %18999 = vmatprep.subr.mxu1 %v21229_v48 }
 0x527   : > { %18919 = vmatpush3.msra.mxu0 %v21438_v55  ;;  %19000 = vmatpush3.msra.mxu1 %v21229_v48 }
 0x528   : > { %18921 = vmatmul.mubr.f32.vlgmr.msra.gmra.mxu0 %v23923_v25  ;;  %18958 = vmatprep.subr.mxu0 %v21235_v0 }
 0x529   : > { %19001 = vmatprep.subr.mxu1 %v21240_v60  ;;  %18959 = vmatpush3.msra.mxu0 %v21235_v0 }
 0x52a   : > { %18990 = vmatprep.mubr.f32.mxu0 %v23834_v33  ;;  %19002 = vmatpush3.msra.mxu1 %v21240_v60  ;;  %v26095_v33 = vld [vmem:[#allocation142_spill] sm:$0xff] }
 0x52b   : > { %18960 = vmatprep.subr.mxu0 %v21245_v10  ;;  %19003 = vmatprep.subr.mxu1 %v21250_v12  ;;  %v24063_v25 = vand.u32 4294901760, %v26095_v33 }
 0x52c   : > { %18961 = vmatpush3.msra.mxu0 %v21245_v10  ;;  %19004 = vmatpush3.msra.mxu1 %v21250_v12 }
 0x52d   : > { %18962 = vmatprep.subr.mxu0 %v21261_v15  ;;  %19005 = vmatprep.subr.mxu1 %v21254_v14  ;;  %v24075_v61 = vsub.f32 %v26095_v33, %v24063_v25 }
 0x52e   : > { %18963 = vmatpush3.msra.mxu0 %v21261_v15  ;;  %19006 = vmatpush3.msra.mxu1 %v21254_v14 }
 0x52f   : > { %18964 = vmatprep.subr.mxu0 %v21275_v21  ;;  %19007 = vmatprep.subr.mxu1 %v21268_v32  ;;  %v25618_v33 = vand.u32 4294901760, %v24075_v61 }
 0x530   : > { %18965 = vmatpush3.msra.mxu0 %v21275_v21  ;;  %19008 = vmatpush3.msra.mxu1 %v21268_v32 }
 0x531   : > { %18966 = vmatprep.subr.mxu0 %v21292_v26  ;;  %19009 = vmatprep.subr.mxu1 %v21294_v27 }
 0x532   : > { %18967 = vmatpush3.msra.mxu0 %v21292_v26  ;;  %19010 = vmatpush3.msra.mxu1 %v21294_v27 }
 0x533   : > { %18968 = vmatprep.subr.mxu0 %v21308_v37  ;;  %19011 = vmatprep.subr.mxu1 %v26003_v44 }
 0x534   : > { %18969 = vmatpush3.msra.mxu0 %v21308_v37  ;;  %19012 = vmatpush3.msra.mxu1 %v26003_v44 }
 0x535   : > { %18970 = vmatprep.subr.mxu0 %v26004_v16  ;;  %19013 = vmatprep.subr.mxu1 %v26006_v59 }
 0x536   : > { %18971 = vmatpush3.msra.mxu0 %v26004_v16  ;;  %19014 = vmatpush3.msra.mxu1 %v26006_v59 }
 0x537   : > { %18972 = vmatprep.subr.mxu0 %v26008_v3  ;;  %19015 = vmatprep.subr.mxu1 %v26009_v45 }
 0x538   : > { %18973 = vmatpush3.msra.mxu0 %v26008_v3  ;;  %19016 = vmatpush3.msra.mxu1 %v26009_v45 }
 0x539   : > { %18974 = vmatprep.subr.mxu0 %v26010_v29  ;;  %19017 = vmatprep.subr.mxu1 %v26011_v50 }
 0x53a   : > { %18975 = vmatpush3.msra.mxu0 %v26010_v29  ;;  %19018 = vmatpush3.msra.mxu1 %v26011_v50 }
 0x53b   : > { %18976 = vmatprep.subr.mxu0 %v26012_v62  ;;  %19019 = vmatprep.subr.mxu1 %v26013_v63 }
 0x53c   : > { %18977 = vmatpush3.msra.mxu0 %v26012_v62  ;;  %19020 = vmatpush3.msra.mxu1 %v26013_v63 }
 0x53d   : > { %18978 = vmatprep.subr.mxu0 %v26014_v38  ;;  %19021 = vmatprep.subr.mxu1 %v26015_v2 }
 0x53e   : > { %18979 = vmatpush3.msra.mxu0 %v26014_v38  ;;  %19022 = vmatpush3.msra.mxu1 %v26015_v2  ;;  %v26096_v38 = vld [vmem:[#allocation23_spill] sm:$0xff] }
 0x53f   : > { %18980 = vmatprep.subr.mxu0 %v26016_v5  ;;  %19023 = vmatprep.subr.mxu1 %v26017_v39 }
 0x540   : > { %18981 = vmatpush3.msra.mxu0 %v26016_v5  ;;  %19024 = vmatpush3.msra.mxu1 %v26017_v39 }
 0x541   : > { %18982 = vmatprep.subr.mxu0 %v26077_v30  ;;  %19026 = vmatmul.mubr.f32.vlgmr.msra.gmra.mxu1 %v23912_v57 }
 0x542   : > { %19063 = vmatprep.subr.mxu1 %v26020_v58  ;;  %18983 = vmatpush3.msra.mxu0 %v26077_v30  ;;  %v11736_v30 = vsub.f32 %v24075_v61, %v25618_v33 }
 0x543   : > { %19064 = vmatpush3.msra.mxu1 %v26020_v58  ;;  %19095 = vmatprep.mubr.f32.mxu1 %v24063_v25  ;;  %v26097_v58 = vld [vmem:[#allocation31_spill] sm:$0xff] }
 0x544   : > { %18984 = vmatprep.subr.mxu0 %v26021_v31  ;;  %19065 = vmatprep.subr.mxu1 %v26096_v38 }
 0x545   : > { %18985 = vmatpush3.msra.mxu0 %v26021_v31  ;;  %19066 = vmatpush3.msra.mxu1 %v26096_v38  ;;  %v11737_v38 = vand.u32 4294901760, %v11736_v30 }
 0x546   : > { %18986 = vmatprep.subr.mxu0 %v26023_v20  ;;  %19067 = vmatprep.subr.mxu1 %v26026_v18 }
 0x547   : > { %18987 = vmatpush3.msra.mxu0 %v26023_v20  ;;  %19068 = vmatpush3.msra.mxu1 %v26026_v18 }
 0x548   : > { %18988 = vmatprep.subr.mxu0 %v26027_v13  ;;  %19069 = vmatprep.subr.mxu1 %v26097_v58 }
 0x549   : > { %18989 = vmatpush3.msra.mxu0 %v26027_v13  ;;  %19070 = vmatpush3.msra.mxu1 %v26097_v58 }
 0x54a   : > { %18991 = vmatmul.mubr.f32.vlgmr.msra.gmra.mxu0 %v23912_v57  ;;  %19028 = vmatprep.subr.mxu0 %v26030_v46 }
 0x54b   : > { %19071 = vmatprep.subr.mxu1 %v26031_v7  ;;  %19029 = vmatpush3.msra.mxu0 %v26030_v46 }
 0x54c   : > { %19060 = vmatprep.mubr.f32.mxu0 %v11737_v38  ;;  %19072 = vmatpush3.msra.mxu1 %v26031_v7  ;;  %v26098_v38 = vld [vmem:[#allocation144_spill] sm:$0xff] }
 0x54d   : > { %19030 = vmatprep.subr.mxu0 %v26032_v43  ;;  %19073 = vmatprep.subr.mxu1 %v26033_v8  ;;  %v24137_v30 = vand.u32 4294901760, %v26098_v38 }
 0x54e   : > { %19031 = vmatpush3.msra.mxu0 %v26032_v43  ;;  %19074 = vmatpush3.msra.mxu1 %v26033_v8 }
 0x54f   : > { %19032 = vmatprep.subr.mxu0 %v21222_v4  ;;  %19075 = vmatprep.subr.mxu1 %v26035_v40  ;;  %v24149_v57 = vsub.f32 %v26098_v38, %v24137_v30  ;;  %v26099_v38 = vand.u32 4294901760, %v24075_v61 }
 0x550   : > { %19033 = vmatpush3.msra.mxu0 %v21222_v4  ;;  %19076 = vmatpush3.msra.mxu1 %v26035_v40 }
 0x551   : > { %19034 = vmatprep.subr.mxu0 %v21229_v48  ;;  %19077 = vmatprep.subr.mxu1 %v26036_v49  ;;  %v11745_v33 = vand.u32 4294901760, %v24149_v57 }
 0x552   : > { %19035 = vmatpush3.msra.mxu0 %v21229_v48  ;;  %19078 = vmatpush3.msra.mxu1 %v26036_v49 }
 0x553   : > { %19036 = vmatprep.subr.mxu0 %v21240_v60  ;;  %19079 = vmatprep.subr.mxu1 %v26038_v23 }
 0x554   : > { %19037 = vmatpush3.msra.mxu0 %v21240_v60  ;;  %19080 = vmatpush3.msra.mxu1 %v26038_v23 }
 0x555   : > { %19038 = vmatprep.subr.mxu0 %v21250_v12  ;;  %19081 = vmatprep.subr.mxu1 %v26040_v56 }
 0x556   : > { %19039 = vmatpush3.msra.mxu0 %v21250_v12  ;;  %19082 = vmatpush3.msra.mxu1 %v26040_v56 }
 0x557   : > { %19040 = vmatprep.subr.mxu0 %v21254_v14  ;;  %19083 = vmatprep.subr.mxu1 %v26042_v35 }
 0x558   : > { %19041 = vmatpush3.msra.mxu0 %v21254_v14  ;;  %19084 = vmatpush3.msra.mxu1 %v26042_v35 }
 0x559   : > { %19042 = vmatprep.subr.mxu0 %v21268_v32  ;;  %19085 = vmatprep.subr.mxu1 %v26043_v28 }
 0x55a   : > { %19043 = vmatpush3.msra.mxu0 %v21268_v32  ;;  %19086 = vmatpush3.msra.mxu1 %v26043_v28 }
 0x55b   : > { %19044 = vmatprep.subr.mxu0 %v21294_v27  ;;  %19087 = vmatprep.subr.mxu1 %v26044_v34 }
 0x55c   : > { %19045 = vmatpush3.msra.mxu0 %v21294_v27  ;;  %19088 = vmatpush3.msra.mxu1 %v26044_v34 }
 0x55d   : > { %19046 = vmatprep.subr.mxu0 %v26003_v44  ;;  %19089 = vmatprep.subr.mxu1 %v26045_v17 }
 0x55e   : > { %19047 = vmatpush3.msra.mxu0 %v26003_v44  ;;  %19090 = vmatpush3.msra.mxu1 %v26045_v17 }
 0x55f   : > { %19048 = vmatprep.subr.mxu0 %v26006_v59  ;;  %19091 = vmatprep.subr.mxu1 %v26085_v1 }
 0x560   : > { %19049 = vmatpush3.msra.mxu0 %v26006_v59  ;;  %19092 = vmatpush3.msra.mxu1 %v26085_v1  ;;  %v11746_v1 = vsub.f32 %v24149_v57, %v11745_v33 }
 0x561   : > { %19050 = vmatprep.subr.mxu0 %v26009_v45  ;;  %19093 = vmatprep.subr.mxu1 %v26047_v41 }
 0x562   : > { %19051 = vmatpush3.msra.mxu0 %v26009_v45  ;;  %19094 = vmatpush3.msra.mxu1 %v26047_v41 }
 0x563   : > { %19052 = vmatprep.subr.mxu0 %v26011_v50  ;;  %19096 = vmatmul.mubr.f32.vlgmr.msra.gmra.mxu1 %v24137_v30 }
 0x564   : > { %19133 = vmatprep.subr.mxu1 %v26030_v46  ;;  %19053 = vmatpush3.msra.mxu0 %v26011_v50 }
 0x565   : > { %19134 = vmatpush3.msra.mxu1 %v26030_v46  ;;  %19165 = vmatprep.mubr.f32.mxu1 %v26099_v38  ;;  %v11747_v38 = vand.u32 4294901760, %v11746_v1  ;;  %v26100_v1 = vld [vmem:[#allocation28_spill] sm:$0xff] }
 0x566   : > { %19054 = vmatprep.subr.mxu0 %v26013_v63  ;;  %19135 = vmatprep.subr.mxu1 %v26032_v43 }
 0x567   : > { %19055 = vmatpush3.msra.mxu0 %v26013_v63  ;;  %19136 = vmatpush3.msra.mxu1 %v26032_v43 }
 0x568   : > { %19056 = vmatprep.subr.mxu0 %v26015_v2  ;;  %19137 = vmatprep.subr.mxu1 %v21222_v4 }
 0x569   : > { %19057 = vmatpush3.msra.mxu0 %v26015_v2  ;;  %19138 = vmatpush3.msra.mxu1 %v21222_v4 }
 0x56a   : > { %19058 = vmatprep.subr.mxu0 %v26017_v39  ;;  %19139 = vmatprep.subr.mxu1 %v21229_v48 }
 0x56b   : > { %19059 = vmatpush3.msra.mxu0 %v26017_v39  ;;  %19140 = vmatpush3.msra.mxu1 %v21229_v48 }
 0x56c   : > { %19061 = vmatmul.mubr.f32.vlgmr.msra.gmra.mxu0 %v11747_v38  ;;  %19098 = vmatprep.subr.mxu0 %v26048_v51 }
 0x56d   : > { %19141 = vmatprep.subr.mxu1 %v21240_v60  ;;  %19099 = vmatpush3.msra.mxu0 %v26048_v51 }
 0x56e   : > { %19130 = vmatprep.mubr.f32.mxu0 %v24075_v61  ;;  %19142 = vmatpush3.msra.mxu1 %v21240_v60  ;;  %v26101_v61 = vld [vmem:[#allocation32_spill] sm:$0xff] }
 0x56f   : > { %19100 = vmatprep.subr.mxu0 %v26049_v24  ;;  %19143 = vmatprep.subr.mxu1 %v21250_v12 }
 0x570   : > { %19101 = vmatpush3.msra.mxu0 %v26049_v24  ;;  %19144 = vmatpush3.msra.mxu1 %v21250_v12 }
 0x571   : > { %19102 = vmatprep.subr.mxu0 %v26050_v54  ;;  %19145 = vmatprep.subr.mxu1 %v21254_v14 }
 0x572   : > { %19103 = vmatpush3.msra.mxu0 %v26050_v54  ;;  %19146 = vmatpush3.msra.mxu1 %v21254_v14 }
 0x573   : > { %19104 = vmatprep.subr.mxu0 %v26051_v9  ;;  %19147 = vmatprep.subr.mxu1 %v21268_v32 }
 0x574   : > { %19105 = vmatpush3.msra.mxu0 %v26051_v9  ;;  %19148 = vmatpush3.msra.mxu1 %v21268_v32 }
 0x575   : > { %19106 = vmatprep.subr.mxu0 %v26052_v47  ;;  %19149 = vmatprep.subr.mxu1 %v21294_v27 }
 0x576   : > { %19107 = vmatpush3.msra.mxu0 %v26052_v47  ;;  %19150 = vmatpush3.msra.mxu1 %v21294_v27 }
 0x577   : > { %19108 = vmatprep.subr.mxu0 %v26053_v22  ;;  %19151 = vmatprep.subr.mxu1 %v26003_v44 }
 0x578   : > { %19109 = vmatpush3.msra.mxu0 %v26053_v22  ;;  %19152 = vmatpush3.msra.mxu1 %v26003_v44 }
 0x579   : > { %19110 = vmatprep.subr.mxu0 %v26087_v19  ;;  %19153 = vmatprep.subr.mxu1 %v26006_v59 }
 0x57a   : > { %19111 = vmatpush3.msra.mxu0 %v26087_v19  ;;  %19154 = vmatpush3.msra.mxu1 %v26006_v59 }
 0x57b   : > { %19112 = vmatprep.subr.mxu0 %v26088_v42  ;;  %19155 = vmatprep.subr.mxu1 %v26009_v45 }
 0x57c   : > { %19113 = vmatpush3.msra.mxu0 %v26088_v42  ;;  %19156 = vmatpush3.msra.mxu1 %v26009_v45 }
 0x57d   : > { %19114 = vmatprep.subr.mxu0 %v26100_v1  ;;  %19157 = vmatprep.subr.mxu1 %v26011_v50 }
 0x57e   : > { %19115 = vmatpush3.msra.mxu0 %v26100_v1  ;;  %19158 = vmatpush3.msra.mxu1 %v26011_v50 }
 0x57f   : > { %19116 = vmatprep.subr.mxu0 %v26101_v61  ;;  %19159 = vmatprep.subr.mxu1 %v26013_v63 }
 0x580   : > { %19117 = vmatpush3.msra.mxu0 %v26101_v61  ;;  %19160 = vmatpush3.msra.mxu1 %v26013_v63 }
 0x581   : > { %19118 = vmatprep.subr.mxu0 %v26091_v52  ;;  %19161 = vmatprep.subr.mxu1 %v26015_v2 }
 0x582   : > { %19119 = vmatpush3.msra.mxu0 %v26091_v52  ;;  %19162 = vmatpush3.msra.mxu1 %v26015_v2 }
 0x583   : > { %19120 = vmatprep.subr.mxu0 %v26092_v6  ;;  %19163 = vmatprep.subr.mxu1 %v26017_v39 }
 0x584   : > { %19121 = vmatpush3.msra.mxu0 %v26092_v6  ;;  %19164 = vmatpush3.msra.mxu1 %v26017_v39 }
 0x585   : > { %19122 = vmatprep.subr.mxu0 %v26093_v36  ;;  %19166 = vmatmul.mubr.f32.vlgmr.msra.gmra.mxu1 %v11745_v33 }
 0x586   : > { %19203 = vmatprep.subr.mxu1 %v26030_v46  ;;  %19123 = vmatpush3.msra.mxu0 %v26093_v36 }
 0x587   : > { %19204 = vmatpush3.msra.mxu1 %v26030_v46  ;;  %19235 = vmatprep.mubr.f32.mxu1 %v24063_v25 }
 0x588   : > { %19124 = vmatprep.subr.mxu0 %v26062_v11  ;;  %19205 = vmatprep.subr.mxu1 %v26032_v43 }
 0x589   : > { %19125 = vmatpush3.msra.mxu0 %v26062_v11  ;;  %19206 = vmatpush3.msra.mxu1 %v26032_v43 }
 0x58a   : > { %19126 = vmatprep.subr.mxu0 %v25997_v53  ;;  %19207 = vmatprep.subr.mxu1 %v21222_v4 }
 0x58b   : > { %19127 = vmatpush3.msra.mxu0 %v25997_v53  ;;  %19208 = vmatpush3.msra.mxu1 %v21222_v4 }
 0x58c   : > { %19128 = vmatprep.subr.mxu0 %v21438_v55  ;;  %19209 = vmatprep.subr.mxu1 %v21229_v48 }
 0x58d   : > { %19129 = vmatpush3.msra.mxu0 %v21438_v55  ;;  %19210 = vmatpush3.msra.mxu1 %v21229_v48 }
 0x58e   : > { %19131 = vmatmul.mubr.f32.vlgmr.msra.gmra.mxu0 %v24149_v57  ;;  %19168 = vmatprep.subr.mxu0 %v21235_v0  ;;  %v26103_v57 = vld [vmem:[#allocation43_spill] sm:$0xff] }
 0x58f   : > { %19211 = vmatprep.subr.mxu1 %v21240_v60  ;;  %19169 = vmatpush3.msra.mxu0 %v21235_v0 }
 0x590   : > { %19200 = vmatprep.mubr.f32.mxu0 %v24063_v25  ;;  %19212 = vmatpush3.msra.mxu1 %v21240_v60  ;;  %v26102_v25 = vld [vmem:[#allocation143_spill] sm:$0xff] }
 0x591   : > { %19170 = vmatprep.subr.mxu0 %v21245_v10  ;;  %19213 = vmatprep.subr.mxu1 %v21250_v12  ;;  %v24289_v33 = vand.u32 4294901760, %v26102_v25 }
 0x592   : > { %19171 = vmatpush3.msra.mxu0 %v21245_v10  ;;  %19214 = vmatpush3.msra.mxu1 %v21250_v12 }
 0x593   : > { %19172 = vmatprep.subr.mxu0 %v21261_v15  ;;  %19215 = vmatprep.subr.mxu1 %v21254_v14  ;;  %v24301_v38 = vsub.f32 %v26102_v25, %v24289_v33 }
 0x594   : > { %19173 = vmatpush3.msra.mxu0 %v21261_v15  ;;  %19216 = vmatpush3.msra.mxu1 %v21254_v14 }
 0x595   : > { %19174 = vmatprep.subr.mxu0 %v21275_v21  ;;  %19217 = vmatprep.subr.mxu1 %v21268_v32  ;;  %v25625_v25 = vand.u32 4294901760, %v24301_v38 }
 0x596   : > { %19175 = vmatpush3.msra.mxu0 %v21275_v21  ;;  %19218 = vmatpush3.msra.mxu1 %v21268_v32 }
 0x597   : > { %19176 = vmatprep.subr.mxu0 %v21292_v26  ;;  %19219 = vmatprep.subr.mxu1 %v21294_v27 }
 0x598   : > { %19177 = vmatpush3.msra.mxu0 %v21292_v26  ;;  %19220 = vmatpush3.msra.mxu1 %v21294_v27 }
 0x599   : > { %19178 = vmatprep.subr.mxu0 %v21308_v37  ;;  %19221 = vmatprep.subr.mxu1 %v26003_v44 }
 0x59a   : > { %19179 = vmatpush3.msra.mxu0 %v21308_v37  ;;  %19222 = vmatpush3.msra.mxu1 %v26003_v44 }
 0x59b   : > { %19180 = vmatprep.subr.mxu0 %v26004_v16  ;;  %19223 = vmatprep.subr.mxu1 %v26006_v59 }
 0x59c   : > { %19181 = vmatpush3.msra.mxu0 %v26004_v16  ;;  %19224 = vmatpush3.msra.mxu1 %v26006_v59 }
 0x59d   : > { %19182 = vmatprep.subr.mxu0 %v26008_v3  ;;  %19225 = vmatprep.subr.mxu1 %v26009_v45 }
 0x59e   : > { %19183 = vmatpush3.msra.mxu0 %v26008_v3  ;;  %19226 = vmatpush3.msra.mxu1 %v26009_v45 }
 0x59f   : > { %19184 = vmatprep.subr.mxu0 %v26010_v29  ;;  %19227 = vmatprep.subr.mxu1 %v26011_v50 }
 0x5a0   : > { %19185 = vmatpush3.msra.mxu0 %v26010_v29  ;;  %19228 = vmatpush3.msra.mxu1 %v26011_v50  ;;  %v26105_v29 = vld [vmem:[#allocation21_spill] sm:$0xff] }
 0x5a1   : > { %19186 = vmatprep.subr.mxu0 %v26012_v62  ;;  %19229 = vmatprep.subr.mxu1 %v26013_v63 }
 0x5a2   : > { %19187 = vmatpush3.msra.mxu0 %v26012_v62  ;;  %19230 = vmatpush3.msra.mxu1 %v26013_v63  ;;  %v26104_v62 = vld [vmem:[#allocation51_spill] sm:$0xff] }
 0x5a3   : > { %19188 = vmatprep.subr.mxu0 %v26103_v57  ;;  %19231 = vmatprep.subr.mxu1 %v26015_v2 }
 0x5a4   : > { %19189 = vmatpush3.msra.mxu0 %v26103_v57  ;;  %19232 = vmatpush3.msra.mxu1 %v26015_v2  ;;  %v26106_v57 = vld [vmem:[#allocation23_spill] sm:$0xff] }
 0x5a5   : > { %19190 = vmatprep.subr.mxu0 %v26016_v5  ;;  %19233 = vmatprep.subr.mxu1 %v26017_v39 }
 0x5a6   : > { %19191 = vmatpush3.msra.mxu0 %v26016_v5  ;;  %19234 = vmatpush3.msra.mxu1 %v26017_v39 }
 0x5a7   : > { %19192 = vmatprep.subr.mxu0 %v26104_v62  ;;  %19236 = vmatmul.mubr.f32.vlgmr.msra.gmra.mxu1 %v24137_v30 }
 0x5a8   : > { %19273 = vmatprep.subr.mxu1 %v26105_v29  ;;  %19193 = vmatpush3.msra.mxu0 %v26104_v62  ;;  %v12420_v62 = vsub.f32 %v24301_v38, %v25625_v25  ;;  %v24335_v25 = vpop.f32.mrf.mxu0 }
 0x5a9   : > { %19274 = vmatpush3.msra.mxu1 %v26105_v29  ;;  %19305 = vmatprep.mubr.f32.mxu1 %v24289_v33 }
 0x5aa   : > { %19194 = vmatprep.subr.mxu0 %v26021_v31  ;;  %19275 = vmatprep.subr.mxu1 %v26106_v57 }
 0x5ab   : > { %19195 = vmatpush3.msra.mxu0 %v26021_v31  ;;  %19276 = vmatpush3.msra.mxu1 %v26106_v57  ;;  %v12421_v57 = vand.u32 4294901760, %v12420_v62  ;;  %v24344_v62 = vpop.f32.mrf.mxu1 }
 0x5ac   : > { %19196 = vmatprep.subr.mxu0 %v26023_v20  ;;  %19277 = vmatprep.subr.mxu1 %v26026_v18 }
 0x5ad   : > { %19197 = vmatpush3.msra.mxu0 %v26023_v20  ;;  %19278 = vmatpush3.msra.mxu1 %v26026_v18  ;;  %v26110_v20 = vld [vmem:[#allocation64_spill] sm:$0xff] }
 0x5ae   : > { %19198 = vmatprep.subr.mxu0 %v26027_v13  ;;  %19279 = vmatprep.subr.mxu1 %v26097_v58 }
 0x5af   : > { %19199 = vmatpush3.msra.mxu0 %v26027_v13  ;;  %19280 = vmatpush3.msra.mxu1 %v26097_v58 }
 0x5b0   : > { %19201 = vmatmul.mubr.f32.vlgmr.msra.gmra.mxu0 %v24137_v30  ;;  %19238 = vmatprep.subr.mxu0 %v26030_v46  ;;  %v24346_v30 = vpop.f32.mrf.mxu0 }
 0x5b1   : > { %19281 = vmatprep.subr.mxu1 %v26031_v7  ;;  %19239 = vmatpush3.msra.mxu0 %v26030_v46 }
 0x5b2   : > { %19270 = vmatprep.mubr.f32.mxu0 %v12421_v57  ;;  %19282 = vmatpush3.msra.mxu1 %v26031_v7  ;;  %v24352_v57 = vpop.f32.mrf.mxu0 }
 0x5b3   : > { %19240 = vmatprep.subr.mxu0 %v26032_v43  ;;  %19283 = vmatprep.subr.mxu1 %v26033_v8 }
 0x5b4   : > { %19241 = vmatpush3.msra.mxu0 %v26032_v43  ;;  %19284 = vmatpush3.msra.mxu1 %v26033_v8  ;;  %v24358_v8 = vpop.f32.mrf.mxu1  ;;  %v24366_v7 = vpop.f32.mrf.mxu0 }
 0x5b5   : > { %19242 = vmatprep.subr.mxu0 %v21222_v4  ;;  %19285 = vmatprep.subr.mxu1 %v26035_v40 }
 0x5b6   : > { %19243 = vmatpush3.msra.mxu0 %v21222_v4  ;;  %19286 = vmatpush3.msra.mxu1 %v26035_v40  ;;  %v24364_v40 = vpop.f32.mrf.mxu1 }
 0x5b7   : > { %19244 = vmatprep.subr.mxu0 %v21229_v48  ;;  %19287 = vmatprep.subr.mxu1 %v26036_v49 }
 0x5b8   : > { %19245 = vmatpush3.msra.mxu0 %v21229_v48  ;;  %19288 = vmatpush3.msra.mxu1 %v26036_v49  ;;  %v24372_v49 = vpop.f32.mrf.mxu0  ;;  %v24381_v13 = vpop.f32.mrf.mxu1 }
 0x5b9   : > { %19246 = vmatprep.subr.mxu0 %v21240_v60  ;;  %19289 = vmatprep.subr.mxu1 %v26038_v23 }
 0x5ba   : > { %19247 = vmatpush3.msra.mxu0 %v21240_v60  ;;  %19290 = vmatpush3.msra.mxu1 %v26038_v23  ;;  %v26107_v23 = vld [vmem:[#allocation145_spill] sm:$0xff] }
 0x5bb   : > { %19248 = vmatprep.subr.mxu0 %v21250_v12  ;;  %19291 = vmatprep.subr.mxu1 %v26040_v56  ;;  %v24379_v58 = vand.u32 4294901760, %v26107_v23 }
 0x5bc   : > { %19249 = vmatpush3.msra.mxu0 %v21250_v12  ;;  %19292 = vmatpush3.msra.mxu1 %v26040_v56  ;;  %v24387_v56 = vpop.f32.mrf.mxu1 }
 0x5bd   : > { %19250 = vmatprep.subr.mxu0 %v21254_v14  ;;  %19293 = vmatprep.subr.mxu1 %v26042_v35  ;;  %26108 = vst [vmem:[#allocation82_spill] sm:$0xff] %v24379_v58  ;;  %26109 = vst [vmem:[#allocation86_spill] sm:$0xff] %v24387_v56  ;;  %v24397_v18 = vsub.f32 %v26107_v23, %v24379_v58  ;;  %v26111_v23 = vand.u32 4294901760, %v24301_v38 }
 0x5be   : > { %19251 = vmatpush3.msra.mxu0 %v21254_v14  ;;  %19294 = vmatpush3.msra.mxu1 %v26042_v35  ;;  %v24389_v35 = vpop.f32.mrf.mxu0  ;;  %v24405_v31 = vpop.f32.mrf.mxu1 }
 0x5bf   : > { %19252 = vmatprep.subr.mxu0 %v21268_v32  ;;  %19295 = vmatprep.subr.mxu1 %v26043_v28 }
 0x5c0   : > { %19253 = vmatpush3.msra.mxu0 %v21268_v32  ;;  %19296 = vmatpush3.msra.mxu1 %v26043_v28  ;;  %v24399_v28 = vpop.f32.mrf.mxu0 }
 0x5c1   : > { %19254 = vmatprep.subr.mxu0 %v21294_v27  ;;  %19297 = vmatprep.subr.mxu1 %v26044_v34 }
 0x5c2   : > { %19255 = vmatpush3.msra.mxu0 %v21294_v27  ;;  %19298 = vmatpush3.msra.mxu1 %v26044_v34  ;;  %v24412_v34 = vpop.f32.mrf.mxu1  ;;  %v24414_v29 = vpop.f32.mrf.mxu0 }
 0x5c3   : > { %19256 = vmatprep.subr.mxu0 %v26003_v44  ;;  %19299 = vmatprep.subr.mxu1 %v26045_v17 }
 0x5c4   : > { %19257 = vmatpush3.msra.mxu0 %v26003_v44  ;;  %19300 = vmatpush3.msra.mxu1 %v26045_v17  ;;  %v24420_v17 = vpop.f32.mrf.mxu0 }
 0x5c5   : > { %19258 = vmatprep.subr.mxu0 %v26006_v59  ;;  %19301 = vmatprep.subr.mxu1 %v26110_v20 }
 0x5c6   : > { %19259 = vmatpush3.msra.mxu0 %v26006_v59  ;;  %19302 = vmatpush3.msra.mxu1 %v26110_v20  ;;  %v26112_v20 = vand.u32 4294901760, %v24397_v18  ;;  %v24438_v3 = vpop.f32.mrf.mxu0 }
 0x5c7   : > { %19260 = vmatprep.subr.mxu0 %v26009_v45  ;;  %19303 = vmatprep.subr.mxu1 %v26047_v41 }
 0x5c8   : > { %19261 = vmatpush3.msra.mxu0 %v26009_v45  ;;  %19304 = vmatpush3.msra.mxu1 %v26047_v41  ;;  %v12430_v5 = vsub.f32 %v24397_v18, %v26112_v20  ;;  %v24430_v41 = vpop.f32.mrf.mxu1 }
 0x5c9   : > { %19262 = vmatprep.subr.mxu0 %v26011_v50  ;;  %19306 = vmatmul.mubr.f32.vlgmr.msra.gmra.mxu1 %v24379_v58 }
 0x5ca   : > { %19343 = vmatprep.subr.mxu1 %v26030_v46  ;;  %19263 = vmatpush3.msra.mxu0 %v26011_v50  ;;  %v24436_v58 = vpop.f32.mrf.mxu1  ;;  %v12431_v20 = vand.u32 4294901760, %v12430_v5 }
 0x5cb   : > { %19344 = vmatpush3.msra.mxu1 %v26030_v46  ;;  %19375 = vmatprep.mubr.f32.mxu1 %v26111_v23  ;;  %v24444_v23 = vpop.f32.mrf.mxu0 }
 0x5cc   : > { %19264 = vmatprep.subr.mxu0 %v26013_v63  ;;  %19345 = vmatprep.subr.mxu1 %v26032_v43  ;;  %v24450_v16 = vpop.f32.mrf.mxu1 }
 0x5cd   : > { %19265 = vmatpush3.msra.mxu0 %v26013_v63  ;;  %19346 = vmatpush3.msra.mxu1 %v26032_v43  ;;  %v24457_v56 = vpop.f32.mrf.mxu0 }
 0x5ce   : > { %19266 = vmatprep.subr.mxu0 %v26015_v2  ;;  %19347 = vmatprep.subr.mxu1 %v21222_v4  ;;  %v24455_v5 = vpop.f32.mrf.mxu1 }
 0x5cf   : > { %19267 = vmatpush3.msra.mxu0 %v26015_v2  ;;  %19348 = vmatpush3.msra.mxu1 %v21222_v4  ;;  %26113 = vst [vmem:[#allocation68_spill] sm:$0xff] %v24455_v5  ;;  %v24463_v37 = vpop.f32.mrf.mxu0 }
 0x5d0   : > { %19268 = vmatprep.subr.mxu0 %v26017_v39  ;;  %19349 = vmatprep.subr.mxu1 %v21229_v48 }
 0x5d1   : > { %19269 = vmatpush3.msra.mxu0 %v26017_v39  ;;  %19350 = vmatpush3.msra.mxu1 %v21229_v48 }
 0x5d2   : > { %19271 = vmatmul.mubr.f32.vlgmr.msra.gmra.mxu0 %v12431_v20  ;;  %19308 = vmatprep.subr.mxu0 %v26048_v51  ;;  %v24469_v20 = vpop.f32.mrf.mxu1 }
 0x5d3   : > { %19351 = vmatprep.subr.mxu1 %v21240_v60  ;;  %19309 = vmatpush3.msra.mxu0 %v26048_v51  ;;  %v24477_v51 = vpop.f32.mrf.mxu0 }
 0x5d4   : > { %19340 = vmatprep.mubr.f32.mxu0 %v24301_v38  ;;  %19352 = vmatpush3.msra.mxu1 %v21240_v60  ;;  %v24475_v38 = vpop.f32.mrf.mxu1 }
 0x5d5   : > { %19310 = vmatprep.subr.mxu0 %v26049_v24  ;;  %19353 = vmatprep.subr.mxu1 %v21250_v12 }
 0x5d6   : > { %19311 = vmatpush3.msra.mxu0 %v26049_v24  ;;  %19354 = vmatpush3.msra.mxu1 %v21250_v12  ;;  %v24483_v24 = vpop.f32.mrf.mxu0 }
 0x5d7   : > { %19312 = vmatprep.subr.mxu0 %v26050_v54  ;;  %19355 = vmatprep.subr.mxu1 %v21254_v14 }
 0x5d8   : > { %19313 = vmatpush3.msra.mxu0 %v26050_v54  ;;  %19356 = vmatpush3.msra.mxu1 %v21254_v14  ;;  %v24489_v54 = vpop.f32.mrf.mxu1  ;;  %v24497_v5 = vpop.f32.mrf.mxu0 }
 0x5d9   : > { %19314 = vmatprep.subr.mxu0 %v26051_v9  ;;  %19357 = vmatprep.subr.mxu1 %v21268_v32 }
 0x5da   : > { %19315 = vmatpush3.msra.mxu0 %v26051_v9  ;;  %19358 = vmatpush3.msra.mxu1 %v21268_v32  ;;  %v24495_v9 = vpop.f32.mrf.mxu1 }
 0x5db   : > { %19316 = vmatprep.subr.mxu0 %v26052_v47  ;;  %19359 = vmatprep.subr.mxu1 %v21294_v27 }
 0x5dc   : > { %19317 = vmatpush3.msra.mxu0 %v26052_v47  ;;  %19360 = vmatpush3.msra.mxu1 %v21294_v27  ;;  %v24503_v47 = vpop.f32.mrf.mxu0 }
 0x5dd   : > { %19318 = vmatprep.subr.mxu0 %v26053_v22  ;;  %19361 = vmatprep.subr.mxu1 %v26003_v44 }
 0x5de   : > { %19319 = vmatpush3.msra.mxu0 %v26053_v22  ;;  %19362 = vmatpush3.msra.mxu1 %v26003_v44  ;;  %v24509_v22 = vpop.f32.mrf.mxu1 }
 0x5df   : > { %19320 = vmatprep.subr.mxu0 %v26087_v19  ;;  %19363 = vmatprep.subr.mxu1 %v26006_v59 }
 0x5e0   : > { %19321 = vmatpush3.msra.mxu0 %v26087_v19  ;;  %19364 = vmatpush3.msra.mxu1 %v26006_v59  ;;  %v24515_v19 = vpop.f32.mrf.mxu1  ;;  %v24517_v59 = vpop.f32.mrf.mxu0 }
 0x5e1   : > { %19322 = vmatprep.subr.mxu0 %v26088_v42  ;;  %19365 = vmatprep.subr.mxu1 %v26009_v45 }
 0x5e2   : > { %19323 = vmatpush3.msra.mxu0 %v26088_v42  ;;  %19366 = vmatpush3.msra.mxu1 %v26009_v45  ;;  %v18642_v42 = vpop.f32.mrf.mxu0 }
 0x5e3   : > { %19324 = vmatprep.subr.mxu0 %v26100_v1  ;;  %19367 = vmatprep.subr.mxu1 %v26011_v50 }
 0x5e4   : > { %19325 = vmatpush3.msra.mxu0 %v26100_v1  ;;  %19368 = vmatpush3.msra.mxu1 %v26011_v50  ;;  %v24527_v1 = vpop.f32.mrf.mxu1  ;;  %v10321_v50 = vpop.f32.mrf.mxu0 }
 0x5e5   : > { %19326 = vmatprep.subr.mxu0 %v26101_v61  ;;  %19369 = vmatprep.subr.mxu1 %v26013_v63 }
 0x5e6   : > { %19327 = vmatpush3.msra.mxu0 %v26101_v61  ;;  %19370 = vmatpush3.msra.mxu1 %v26013_v63  ;;  %v26114_v61 = vand.u32 4294901760, %v24397_v18  ;;  %v18677_v63 = vpop.f32.mrf.mxu1 }
 0x5e7   : > { %19328 = vmatprep.subr.mxu0 %v26091_v52  ;;  %19371 = vmatprep.subr.mxu1 %v26015_v2 }
 0x5e8   : > { %19329 = vmatpush3.msra.mxu0 %v26091_v52  ;;  %19372 = vmatpush3.msra.mxu1 %v26015_v2  ;;  %v18712_v52 = vpop.f32.mrf.mxu0 }
 0x5e9   : > { %19330 = vmatprep.subr.mxu0 %v26092_v6  ;;  %19373 = vmatprep.subr.mxu1 %v26017_v39 }
 0x5ea   : > { %19331 = vmatpush3.msra.mxu0 %v26092_v6  ;;  %19374 = vmatpush3.msra.mxu1 %v26017_v39  ;;  %v9115_v6 = vadd.f32 %v24430_v41, %v24414_v29  ;;  %v10592_v39 = vpop.f32.mrf.mxu0 }
 0x5eb   : > { %19332 = vmatprep.subr.mxu0 %v26093_v36  ;;  %19376 = vmatmul.mubr.f32.vlgmr.msra.gmra.mxu1 %v26114_v61  ;;  %v10482_v61 = vpop.f32.mrf.mxu1 }
 0x5ec   : > { %19413 = vmatprep.subr.mxu1 %v26030_v46  ;;  %19333 = vmatpush3.msra.mxu0 %v26093_v36  ;;  %v8437_v36 = vadd.f32 %v24344_v62, %v24335_v25  ;;  %v9225_v29 = vadd.f32 %v24438_v3, %v9115_v6  ;;  %v10483_v41 = vadd.f32 %v10482_v61, %v10321_v50  ;;  %v26117_v61 = vld [vmem:[#allocation86_spill] sm:$0xff] }
 0x5ed   : > { %19414 = vmatpush3.msra.mxu1 %v26030_v46  ;;  %19445 = vmatprep.mubr.f32.mxu1 %v24289_v33  ;;  %v18747_v46 = vpop.f32.mrf.mxu1 }
 0x5ee   : > { %19334 = vmatprep.subr.mxu0 %v26062_v11  ;;  %19415 = vmatprep.subr.mxu1 %v26032_v43  ;;  %v8548_v25 = vadd.f32 %v24352_v57, %v8437_v36  ;;  %v10489_v36 = vadd.f32 %v18677_v63, %v18642_v42 }
 0x5ef   : > { %19335 = vmatpush3.msra.mxu0 %v26062_v11  ;;  %19416 = vmatpush3.msra.mxu1 %v26032_v43  ;;  %v8431_v11 = vadd.f32 %v24358_v8, %v24346_v30  ;;  %v9121_v43 = vadd.f32 %v24412_v34, %v24399_v28  ;;  %v9799_v28 = vadd.f32 %v24489_v54, %v24477_v51  ;;  %v18782_v34 = vpop.f32.mrf.mxu0  ;;  %v10688_v50 = vpop.f32.mrf.mxu1 }
 0x5f0   : > { %19336 = vmatprep.subr.mxu0 %v25997_v53  ;;  %19417 = vmatprep.subr.mxu1 %v21222_v4  ;;  %v10593_v30 = vadd.f32 %v10592_v39, %v10483_v41  ;;  %v8645_v63 = vadd.f32 %v24364_v40, %v8548_v25 }
 0x5f1   : > { %19337 = vmatpush3.msra.mxu0 %v25997_v53  ;;  %19418 = vmatpush3.msra.mxu1 %v21222_v4  ;;  %v8541_v8 = vadd.f32 %v24366_v7, %v8431_v11  ;;  %v9232_v62 = vadd.f32 %v24420_v17, %v9121_v43  ;;  %v9909_v3 = vadd.f32 %v24497_v5, %v9799_v28  ;;  %v18817_v17 = vpop.f32.mrf.mxu1  ;;  %v10815_v51 = vpop.f32.mrf.mxu0 }
 0x5f2   : > { %19338 = vmatprep.subr.mxu0 %v21438_v55  ;;  %19419 = vmatprep.subr.mxu1 %v21229_v48  ;;  %v9321_v7 = vadd.f32 %v24450_v16, %v9225_v29  ;;  %v10600_v43 = vadd.f32 %v18712_v52, %v10489_v36  ;;  %v10689_v54 = vadd.f32 %v10688_v50, %v10593_v30  ;;  %v26120_v50 = vld [vmem:[#allocation30_spill] sm:$0xff] }
 0x5f3   : > { %19339 = vmatpush3.msra.mxu0 %v21438_v55  ;;  %19420 = vmatpush3.msra.mxu1 %v21229_v48  ;;  %v8637_v39 = vadd.f32 %v24381_v13, %v8541_v8  ;;  %v9329_v11 = vadd.f32 %v24436_v58, %v9232_v62  ;;  %v10005_v58 = vadd.f32 %v24509_v22, %v9909_v3  ;;  %v18852_v6 = vpop.f32.mrf.mxu0  ;;  %v26119_v62 = vld [vmem:[#allocation29_spill] sm:$0xff] }
 0x5f4   : > { %19341 = vmatmul.mubr.f32.vlgmr.msra.gmra.mxu0 %v24397_v18  ;;  %19378 = vmatprep.subr.mxu0 %v21235_v0  ;;  %v9805_v18 = vadd.f32 %v24475_v38, %v24463_v37  ;;  %v9448_v16 = vadd.f32 %v24457_v56, %v9321_v7  ;;  %v10697_v42 = vadd.f32 %v18747_v46, %v10600_v43  ;;  %v26116_v38 = vld [vmem:[#allocation24_spill] sm:$0xff] }
 0x5f5   : > { %19421 = vmatprep.subr.mxu1 %v21240_v60  ;;  %19379 = vmatpush3.msra.mxu0 %v21235_v0  ;;  %v8764_v40 = vadd.f32 %v24389_v35, %v8637_v39  ;;  %v9454_v13 = vadd.f32 %v24444_v23, %v9329_v11  ;;  %v10816_v56 = vadd.f32 %v10815_v51, %v10689_v54  ;;  %v10908_v35 = vpop.f32.mrf.mxu1  ;;  %v11005_v5 = vpop.f32.mrf.mxu0  ;;  %v26122_v51 = vld [vmem:[#allocation37_spill] sm:$0xff] }
 0x5f6   : > { %19410 = vmatprep.mubr.f32.mxu0 %v24289_v33  ;;  %19422 = vmatpush3.msra.mxu1 %v21240_v60  ;;  %v9916_v37 = vadd.f32 %v24483_v24, %v9805_v18  ;;  %v8770_v24 = vadd.f32 %v24372_v49, %v8645_v63  ;;  %v10132_v52 = vadd.f32 %v24517_v59, %v10005_v58  ;;  %v26115_v49 = vld [vmem:[#allocation68_spill] sm:$0xff]  ;;  %v26124_v58 = vld [vmem:[#allocation39_spill] sm:$0xff] }
 0x5f7   : > { %19380 = vmatprep.subr.mxu0 %v21245_v10  ;;  %19423 = vmatprep.subr.mxu1 %v21250_v12  ;;  %v24597_v22 = vadd.f32 %v24469_v20, %v9448_v16  ;;  %v10822_v46 = vadd.f32 %v18782_v34, %v10697_v42  ;;  %v24603_v57 = vadd.f32 %v24405_v31, %v8764_v40  ;;  %v18887_v23 = vpop.f32.mrf.mxu1  ;;  %v18922_v29 = vpop.f32.mrf.mxu0  ;;  %v26123_v16 = vld [vmem:[#allocation146_spill] sm:$0xff] }
 0x5f8   : > { %19381 = vmatpush3.msra.mxu0 %v21245_v10  ;;  %19424 = vmatpush3.msra.mxu1 %v21250_v12  ;;  %v10013_v33 = vadd.f32 %v24495_v9, %v9916_v37  ;;  %v24606_v59 = vadd.f32 %v26115_v49, %v9454_v13  ;;  %v10909_v9 = vadd.f32 %v10908_v35, %v10816_v56  ;;  %v24639_v37 = vand.u32 4294901760, %v26123_v16 }
 0x5f9   : > { %19382 = vmatprep.subr.mxu0 %v21261_v15  ;;  %19425 = vmatprep.subr.mxu1 %v21254_v14  ;;  %v24614_v25 = vadd.f32 %v26117_v61, %v8770_v24  ;;  %v10225_v31 = vadd.f32 %v24527_v1, %v10132_v52  ;;  %v11604_v41 = vmul.f32 %v24597_v22, %v24597_v22  ;;  %v11166_v1 = vpop.f32.mrf.mxu1  ;;  %v11276_v63 = vpop.f32.mrf.mxu0  ;;  %v26126_v52 = vld [vmem:[#allocation43_spill] sm:$0xff] }
 0x5fa   : > { %19383 = vmatpush3.msra.mxu0 %v21261_v15  ;;  %19426 = vmatpush3.msra.mxu1 %v21254_v14  ;;  %v10138_v20 = vadd.f32 %v24503_v47, %v10013_v33  ;;  %v10915_v8 = vadd.f32 %v18817_v17, %v10822_v46  ;;  %v26118_v47 = vld [vmem:[#allocation26_spill] sm:$0xff]  ;;  %v11602_v28 = vmul.f32 %v24603_v57, %v24603_v57 }
 0x5fb   : > { %19384 = vmatprep.subr.mxu0 %v21275_v21  ;;  %19427 = vmatprep.subr.mxu1 %v21268_v32  ;;  %v11605_v34 = vmul.f32 %v24606_v59, %v24606_v59  ;;  %v11610_v30 = vsub.f32 %v10909_v9, %v11604_v41  ;;  %v11173_v3 = vadd.f32 %v18887_v23, %v18852_v6  ;;  %v18957_v43 = vpop.f32.mrf.mxu1  ;;  %v26125_v6 = vld [vmem:[#allocation41_spill] sm:$0xff] }
 0x5fc   : > { %19385 = vmatpush3.msra.mxu0 %v21275_v21  ;;  %19428 = vmatpush3.msra.mxu1 %v21268_v32  ;;  %v10231_v36 = vadd.f32 %v24515_v19, %v10138_v20  ;;  %v11603_v7 = vmul.f32 %v24614_v25, %v24614_v25  ;;  %v11608_v18 = vsub.f32 %v10225_v31, %v11602_v28  ;;  %v26121_v19 = vld [vmem:[#allocation35_spill] sm:$0xff]  ;;  %v26128_v9 = vld [vmem:[#allocation49_spill] sm:$0xff] }
 0x5fd   : > { %19386 = vmatprep.subr.mxu0 %v21292_v26  ;;  %19429 = vmatprep.subr.mxu1 %v21294_v27  ;;  %v11611_v39 = vsub.f32 %v10915_v8, %v11605_v34  ;;  %v11167_v11 = vadd.f32 %v11166_v1, %v11005_v5  ;;  %v11284_v17 = vadd.f32 %v18922_v29, %v11173_v3  ;;  %v11372_v42 = vpop.f32.mrf.mxu1  ;;  %v26127_v20 = vld [vmem:[#allocation47_spill] sm:$0xff]  ;;  %v26130_v1 = vld [vmem:[#allocation82_spill] sm:$0xff] }
 0x5fe   : > { %19387 = vmatpush3.msra.mxu0 %v21292_v26  ;;  %19430 = vmatpush3.msra.mxu1 %v21294_v27  ;;  %v11609_v54 = vsub.f32 %v10231_v36, %v11603_v7  ;;  %v11628_v40 = vadd.f32 %v11610_v30, %v11608_v18  ;;  %v11624_v56 = vadd.f32 %v11604_v41, %v11602_v28  ;;  %v26129_v28 = vld [vmem:[#allocation51_spill] sm:$0xff]  ;;  %v26131_v30 = vld [vmem:[#allocation21_spill] sm:$0xff] }
 0x5ff   : > { %19388 = vmatprep.subr.mxu0 %v26116_v38  ;;  %19431 = vmatprep.subr.mxu1 %v26003_v44  ;;  %v11277_v13 = vadd.f32 %v11276_v63, %v11167_v11  ;;  %v11381_v35 = vadd.f32 %v18957_v43, %v11284_v17  ;;  %v24651_v33 = vsub.f32 %v26123_v16, %v24639_v37  ;;  %v26132_v11 = vld [vmem:[#allocation55_spill] sm:$0xff] }
 0x600   : > { %19389 = vmatpush3.msra.mxu0 %v26116_v38  ;;  %19432 = vmatpush3.msra.mxu1 %v26003_v44  ;;  %v11629_v24 = vadd.f32 %v11611_v39, %v11609_v54  ;;  %v11625_v23 = vadd.f32 %v11605_v34, %v11603_v7  ;;  %v11630_v5 = vadd.f32 0.0009, %v11628_v40  ;;  %v11626_v41 = vadd.f32 0.0001, %v11624_v56  ;;  %v26133_v17 = vld [vmem:[#allocation23_spill] sm:$0xff]  ;;  %v26134_v54 = vld [vmem:[#allocation57_spill] sm:$0xff] }
 0x601   : > { %19390 = vmatprep.subr.mxu0 %v26118_v47  ;;  %19433 = vmatprep.subr.mxu1 %v26119_v62  ;;  %v19027_v46 = vpop.f32.mrf.mxu1  ;;  %v11373_v31 = vadd.f32 %v11372_v42, %v11277_v13  ;;  %v11606_v34 = vmul.f32 %v24597_v22, %v24603_v57  ;;  %v13103_v7 = vand.u32 4294901760, %v24651_v33  ;;  %v11607_v22 = vmul.f32 %v24606_v59, %v24614_v25  ;;  %v26135_v40 = vld [vmem:[#allocation27_spill] sm:$0xff] }
 0x602   : > { %19391 = vmatpush3.msra.mxu0 %v26118_v47  ;;  %19434 = vmatpush3.msra.mxu1 %v26119_v62  ;;  %v11631_v8 = vadd.f32 0.0009, %v11629_v24  ;;  %v11627_v18 = vadd.f32 0.0001, %v11625_v23  ;;  %v11632_v43 = vmul.f32 %v11630_v5, %v11626_v41  ;;  %v26136_v25 = vld [vmem:[#allocation59_spill] sm:$0xff]  ;;  %v26138_v24 = vld [vmem:[#allocation12_spill] sm:$0xff] }
 0x603   : > { %19392 = vmatprep.subr.mxu0 %v26120_v50  ;;  %19435 = vmatprep.subr.mxu1 %v26009_v45  ;;  %v11592_v3 = vpop.f32.mrf.mxu1  ;;  %v13104_v13 = vsub.f32 %v24651_v33, %v13103_v7  ;;  %v26137_v42 = vld [vmem:[#allocation31_spill] sm:$0xff]  ;;  %v26139_v23 = vld [vmem:[#allocation34_spill] sm:$0xff]  ;;  %v11615_v5 = vmul.f32 2.0, %v11607_v22 }
 0x604   : > { %19393 = vmatpush3.msra.mxu0 %v26120_v50  ;;  %19436 = vmatpush3.msra.mxu1 %v26009_v45  ;;  %v11633_v57 = vmul.f32 %v11631_v8, %v11627_v18  ;;  %20161 = vrcp.f32 %v11632_v43  ;;  %v26144_v18 = vld [vmem:[#allocation50_spill] sm:$0xff] }
 0x605   : > { %19394 = vmatprep.subr.mxu0 %v26121_v19  ;;  %19437 = vmatprep.subr.mxu1 %v26122_v51 }
 0x606   : > { %19395 = vmatpush3.msra.mxu0 %v26121_v19  ;;  %19438 = vmatpush3.msra.mxu1 %v26122_v51  ;;  %20163 = vrcp.f32 %v11633_v57 }
 0x607   : > { %19396 = vmatprep.subr.mxu0 %v26124_v58  ;;  %19439 = vmatprep.subr.mxu1 %v26125_v6 }
 0x608   : > { %19397 = vmatpush3.msra.mxu0 %v26124_v58  ;;  %19440 = vmatpush3.msra.mxu1 %v26125_v6 }
 0x609   : > { %19398 = vmatprep.subr.mxu0 %v26126_v52  ;;  %19441 = vmatprep.subr.mxu1 %v26015_v2 }
 0x60a   : > { %19399 = vmatpush3.msra.mxu0 %v26126_v52  ;;  %19442 = vmatpush3.msra.mxu1 %v26015_v2  ;;  %v18992_v49 = vpop.f32.mrf.mxu0 }
 0x60b   : > { %19400 = vmatprep.subr.mxu0 %v26127_v20  ;;  %19443 = vmatprep.subr.mxu1 %v26128_v9  ;;  %v11506_v61 = vadd.f32 %v18992_v49, %v11381_v35  ;;  %v13105_v35 = vand.u32 4294901760, %v13104_v13 }
 0x60c   : > { %19401 = vmatpush3.msra.mxu0 %v26127_v20  ;;  %19444 = vmatpush3.msra.mxu1 %v26128_v9  ;;  %v11499_v29 = vpop.f32.mrf.mxu0 }
 0x60d   : > { %19402 = vmatprep.subr.mxu0 %v26129_v28  ;;  %19446 = vmatmul.mubr.f32.vlgmr.msra.gmra.mxu1 %v26130_v1  ;;  %v11500_v36 = vadd.f32 %v11499_v29, %v11373_v31  ;;  %v11599_v63 = vadd.f32 %v19027_v46, %v11506_v61  ;;  %v11614_v46 = vmul.f32 2.0, %v11606_v34  ;;  %v26140_v31 = vld [vmem:[#allocation13_spill] sm:$0xff]  ;;  %v26141_v29 = vld [vmem:[#allocation38_spill] sm:$0xff] }
 0x60e   : > { %19483 = vmatprep.subr.mxu1 %v26131_v30  ;;  %19403 = vmatpush3.msra.mxu0 %v26129_v28 }
 0x60f   : > { %19484 = vmatpush3.msra.mxu1 %v26131_v30  ;;  %19515 = vmatprep.mubr.f32.mxu1 %v24639_v37  ;;  %v11593_v39 = vadd.f32 %v11592_v3, %v11500_v36  ;;  %v11613_v59 = vsub.f32 %v11599_v63, %v11607_v22  ;;  %v11616_v41 = vadd.f32 0.0001, %v11614_v46  ;;  %v11617_v36 = vadd.f32 0.0001, %v11615_v5  ;;  %v26149_v46 = vld [vmem:[#allocation148_spill] sm:$0xff] }
 0x610   : > { %19404 = vmatprep.subr.mxu0 %v26132_v11  ;;  %19485 = vmatprep.subr.mxu1 %v26133_v17  ;;  %v26150_v5 = vld [vmem:[#allocation60_spill] sm:$0xff] }
 0x611   : > { %19405 = vmatpush3.msra.mxu0 %v26132_v11  ;;  %19486 = vmatpush3.msra.mxu1 %v26133_v17  ;;  %v11612_v16 = vsub.f32 %v11593_v39, %v11606_v34  ;;  %v11619_v49 = vmul.f32 2.0, %v11613_v59  ;;  %v26143_v34 = vld [vmem:[#allocation46_spill] sm:$0xff]  ;;  %v20162_v63 = vpop.eup %20161 }
 0x612   : > { %19406 = vmatprep.subr.mxu0 %v26134_v54  ;;  %19487 = vmatprep.subr.mxu1 %v26135_v40  ;;  %v26145_v39 = vld [vmem:[#allocation54_spill] sm:$0xff] }
 0x613   : > { %19407 = vmatpush3.msra.mxu0 %v26134_v54  ;;  %19488 = vmatpush3.msra.mxu1 %v26135_v40  ;;  %v11618_v56 = vmul.f32 2.0, %v11612_v16  ;;  %v11621_v8 = vadd.f32 0.0009, %v11619_v49  ;;  %v20164_v57 = vpop.eup %20163  ;;  %v26146_v16 = vld [vmem:[#allocation56_spill] sm:$0xff]  ;;  %v26147_v59 = vld [vmem:[#allocation58_spill] sm:$0xff]  ;;  %v24719_v49 = vand.u32 4294901760, %v26149_v46 }
 0x614   : > { %19408 = vmatprep.subr.mxu0 %v26136_v25  ;;  %19489 = vmatprep.subr.mxu1 %v26137_v42 }
 0x615   : > { %19409 = vmatpush3.msra.mxu0 %v26136_v25  ;;  %19490 = vmatpush3.msra.mxu1 %v26137_v42  ;;  %v11620_v61 = vadd.f32 0.0009, %v11618_v56  ;;  %v11623_v43 = vmul.f32 %v11621_v8, %v11617_v36  ;;  %v26151_v8 = vld [vmem:[#allocation62_spill] sm:$0xff]  ;;  %v24733_v36 = vsub.f32 %v26149_v46, %v24719_v49  ;;  %v26157_v46 = vld [vmem:[#allocation17_spill] sm:$0xff]  ;;  %v26164_v56 = vld [vmem:[#allocation36_spill] sm:$0xff] }
 0x616   : > { %19411 = vmatmul.mubr.f32.vlgmr.msra.gmra.mxu0 %v26130_v1  ;;  %19448 = vmatprep.subr.mxu0 %v26138_v24  ;;  %v26142_v1 = vld [vmem:[#allocation42_spill] sm:$0xff] }
 0x617   : > { %19491 = vmatprep.subr.mxu1 %v26139_v23  ;;  %19449 = vmatpush3.msra.mxu0 %v26138_v24  ;;  %v11622_v3 = vmul.f32 %v11620_v61, %v11616_v41  ;;  %v11637_v13 = vmul.f32 %v20164_v57, %v11623_v43  ;;  %v25671_v43 = vand.u32 4294901760, %v24733_v36 }
 0x618   : > { %19480 = vmatprep.mubr.f32.mxu0 %v13105_v35  ;;  %19492 = vmatpush3.msra.mxu1 %v26139_v23 }
 0x619   : > { %19450 = vmatprep.subr.mxu0 %v26140_v31  ;;  %19493 = vmatprep.subr.mxu1 %v26141_v29  ;;  %v11636_v22 = vmul.f32 %v20162_v63, %v11622_v3  ;;  %v11639_v61 = vsel %vm4711_vm1, %v11637_v13, 0.0  ;;  %v26152_v3 = vld [vmem:[#allocation64_spill] sm:$0xff]  ;;  %v26153_v63 = vld [vmem:[#allocation65_spill] sm:$0xff]  ;;  %v26155_v13 = vld [vmem:[#allocation15_spill] sm:$0xff] }
 0x61a   : > { %19451 = vmatpush3.msra.mxu0 %v26140_v31  ;;  %19494 = vmatpush3.msra.mxu1 %v26141_v29 }
 0x61b   : > { %19452 = vmatprep.subr.mxu0 %v21222_v4  ;;  %19495 = vmatprep.subr.mxu1 %v26142_v1  ;;  %v11638_v35 = vsel %vm4711_vm1, %v11636_v22, 0.0  ;;  %v13114_v22 = vsub.f32 %v24733_v36, %v25671_v43  ;;  %v26163_v43 = vld [vmem:[#allocation32_spill] sm:$0xff] }
 0x61c   : > { %19453 = vmatpush3.msra.mxu0 %v21222_v4  ;;  %19496 = vmatpush3.msra.mxu1 %v26142_v1  ;;  %v11640_v41 = vadd.f32 %v11639_v61, %v11638_v35  ;;  %v26156_v35 = vld [vmem:[#allocation16_spill] sm:$0xff]  ;;  %v26159_v61 = vld [vmem:[#allocation19_spill] sm:$0xff] }
 0x61d   : > { %19454 = vmatprep.subr.mxu0 %v21229_v48  ;;  %19497 = vmatprep.subr.mxu1 %v26143_v34  ;;  %v13115_v57 = vand.u32 4294901760, %v13114_v22  ;;  %v26161_v22 = vld [vmem:[#allocation22_spill] sm:$0xff] }
 0x61e   : > { %19455 = vmatpush3.msra.mxu0 %v21229_v48  ;;  %19498 = vmatpush3.msra.mxu1 %v26143_v34 }
 0x61f   : > { %19456 = vmatprep.subr.mxu0 %v21240_v60  ;;  %19499 = vmatprep.subr.mxu1 %v26144_v18 }
 0x620   : > { %19457 = vmatpush3.msra.mxu0 %v21240_v60  ;;  %19500 = vmatpush3.msra.mxu1 %v26144_v18 }
 0x621   : > { %19458 = vmatprep.subr.mxu0 %v21250_v12  ;;  %19501 = vmatprep.subr.mxu1 %v26145_v39 }
 0x622   : > { %19459 = vmatpush3.msra.mxu0 %v21250_v12  ;;  %19502 = vmatpush3.msra.mxu1 %v26145_v39 }
 0x623   : > { %19460 = vmatprep.subr.mxu0 %v21254_v14  ;;  %19503 = vmatprep.subr.mxu1 %v26146_v16 }
 0x624   : > { %19461 = vmatpush3.msra.mxu0 %v21254_v14  ;;  %19504 = vmatpush3.msra.mxu1 %v26146_v16 }
 0x625   : > { %19462 = vmatprep.subr.mxu0 %v21268_v32  ;;  %19505 = vmatprep.subr.mxu1 %v26147_v59 }
 0x626   : > { %19463 = vmatpush3.msra.mxu0 %v21268_v32  ;;  %19506 = vmatpush3.msra.mxu1 %v26147_v59 }
 0x627   : > { %19464 = vmatprep.subr.mxu0 %v21294_v27  ;;  %19507 = vmatprep.subr.mxu1 %v26150_v5 }
 0x628   : > { %19465 = vmatpush3.msra.mxu0 %v21294_v27  ;;  %19508 = vmatpush3.msra.mxu1 %v26150_v5 }
 0x629   : > { %19466 = vmatprep.subr.mxu0 %v26003_v44  ;;  %19509 = vmatprep.subr.mxu1 %v26151_v8 }
 0x62a   : > { %19467 = vmatpush3.msra.mxu0 %v26003_v44  ;;  %19510 = vmatpush3.msra.mxu1 %v26151_v8 }
 0x62b   : > { %19468 = vmatprep.subr.mxu0 %v26119_v62  ;;  %19511 = vmatprep.subr.mxu1 %v26152_v3 }
 0x62c   : > { %11641 = vadd.xlane.f32.xlu0 %v11640_v41  ;;  %19469 = vmatpush3.msra.mxu0 %v26119_v62  ;;  %v26160_v41 = vld [vmem:[#allocation20_spill] sm:$0xff] }
 0x62d   : > { %19512 = vmatpush3.msra.mxu1 %v26152_v3  ;;  %19470 = vmatprep.subr.mxu0 %v26009_v45 }
 0x62e   : > { %19513 = vmatprep.subr.mxu1 %v26153_v63  ;;  %19471 = vmatpush3.msra.mxu0 %v26009_v45 }
 0x62f   : > { %19514 = vmatpush3.msra.mxu1 %v26153_v63  ;;  %19472 = vmatprep.subr.mxu0 %v26122_v51 }
 0x630   : > { %19516 = vmatmul.mubr.f32.vlgmr.msra.gmra.mxu1 %v24719_v49  ;;  %19553 = vmatprep.subr.mxu1 %v26138_v24 }
 0x631   : > { %19473 = vmatpush3.msra.mxu0 %v26122_v51  ;;  %19554 = vmatpush3.msra.mxu1 %v26138_v24 }
 0x632   : > { %19585 = vmatprep.mubr.f32.mxu1 %v13103_v7  ;;  %19474 = vmatprep.subr.mxu0 %v26125_v6  ;;  %v26154_v7 = vld [vmem:[#allocation14_spill] sm:$0xff] }
 0x633   : > { %19555 = vmatprep.subr.mxu1 %v26140_v31  ;;  %19475 = vmatpush3.msra.mxu0 %v26125_v6 }
 0x634   : > { %19556 = vmatpush3.msra.mxu1 %v26140_v31  ;;  %19476 = vmatprep.subr.mxu0 %v26015_v2 }
 0x635   : > { %19557 = vmatprep.subr.mxu1 %v21222_v4  ;;  %19477 = vmatpush3.msra.mxu0 %v26015_v2 }
 0x636   : > { %19558 = vmatpush3.msra.mxu1 %v21222_v4  ;;  %19478 = vmatprep.subr.mxu0 %v26128_v9 }
 0x637   : > { %19559 = vmatprep.subr.mxu1 %v21229_v48  ;;  %19479 = vmatpush3.msra.mxu0 %v26128_v9 }
 0x638   : > { %19560 = vmatpush3.msra.mxu1 %v21229_v48  ;;  %19481 = vmatmul.mubr.f32.vlgmr.msra.gmra.mxu0 %v13115_v57  ;;  %v26162_v57 = vld [vmem:[#allocation28_spill] sm:$0xff] }
 0x639   : > { %19518 = vmatprep.subr.mxu0 %v26154_v7  ;;  %19561 = vmatprep.subr.mxu1 %v21240_v60 }
 0x63a   : > { %19519 = vmatpush3.msra.mxu0 %v26154_v7  ;;  %19550 = vmatprep.mubr.f32.mxu0 %v24651_v33  ;;  %v26158_v33 = vld [vmem:[#allocation18_spill] sm:$0xff] }
 0x63b   : > { %19562 = vmatpush3.msra.mxu1 %v21240_v60  ;;  %19520 = vmatprep.subr.mxu0 %v26155_v13 }
 0x63c   : > { %19563 = vmatprep.subr.mxu1 %v21250_v12  ;;  %19521 = vmatpush3.msra.mxu0 %v26155_v13 }
 0x63d   : > { %19564 = vmatpush3.msra.mxu1 %v21250_v12  ;;  %19522 = vmatprep.subr.mxu0 %v26156_v35 }
 0x63e   : > { %19565 = vmatprep.subr.mxu1 %v21254_v14  ;;  %19523 = vmatpush3.msra.mxu0 %v26156_v35 }
 0x63f   : > { %19566 = vmatpush3.msra.mxu1 %v21254_v14  ;;  %19524 = vmatprep.subr.mxu0 %v26157_v46 }
 0x640   : > { %19567 = vmatprep.subr.mxu1 %v21268_v32  ;;  %19525 = vmatpush3.msra.mxu0 %v26157_v46 }
 0x641   : > { %19568 = vmatpush3.msra.mxu1 %v21268_v32  ;;  %19526 = vmatprep.subr.mxu0 %v26158_v33 }
 0x642   : > { %19569 = vmatprep.subr.mxu1 %v21294_v27  ;;  %19527 = vmatpush3.msra.mxu0 %v26158_v33 }
 0x643   : > { %19570 = vmatpush3.msra.mxu1 %v21294_v27  ;;  %19528 = vmatprep.subr.mxu0 %v26159_v61 }
 0x644   : > { %19571 = vmatprep.subr.mxu1 %v26003_v44  ;;  %19529 = vmatpush3.msra.mxu0 %v26159_v61 }
 0x645   : > { %19572 = vmatpush3.msra.mxu1 %v26003_v44  ;;  %19530 = vmatprep.subr.mxu0 %v26160_v41 }
 0x646   : > { %19573 = vmatprep.subr.mxu1 %v26119_v62  ;;  %19531 = vmatpush3.msra.mxu0 %v26160_v41 }
 0x647   : > { %19574 = vmatpush3.msra.mxu1 %v26119_v62  ;;  %19532 = vmatprep.subr.mxu0 %v26161_v22 }
 0x648   : > { %19575 = vmatprep.subr.mxu1 %v26009_v45  ;;  %19533 = vmatpush3.msra.mxu0 %v26161_v22  ;;  %v26165_v22 = vld [vmem:[#allocation40_spill] sm:$0xff] }
 0x649   : > { %19576 = vmatpush3.msra.mxu1 %v26009_v45  ;;  %19534 = vmatprep.subr.mxu0 %v26162_v57 }
 0x64a   : > { %19577 = vmatprep.subr.mxu1 %v26122_v51  ;;  %19535 = vmatpush3.msra.mxu0 %v26162_v57  ;;  %v26166_v57 = vld [vmem:[#allocation44_spill] sm:$0xff] }
 0x64b   : > { %19578 = vmatpush3.msra.mxu1 %v26122_v51  ;;  %19536 = vmatprep.subr.mxu0 %v26163_v43 }
 0x64c   : > { %19579 = vmatprep.subr.mxu1 %v26125_v6  ;;  %19537 = vmatpush3.msra.mxu0 %v26163_v43  ;;  %v26167_v43 = vand.u32 4294901760, %v24733_v36 }
 0x64d   : > { %19580 = vmatpush3.msra.mxu1 %v26125_v6  ;;  %19538 = vmatprep.subr.mxu0 %v26164_v56 }
 0x64e   : > { %19581 = vmatprep.subr.mxu1 %v26015_v2  ;;  %19539 = vmatpush3.msra.mxu0 %v26164_v56  ;;  %v26168_v56 = vld [vmem:[#allocation48_spill] sm:$0xff] }
 0x64f   : > { %19582 = vmatpush3.msra.mxu1 %v26015_v2  ;;  %19540 = vmatprep.subr.mxu0 %v26165_v22 }
 0x650   : > { %19583 = vmatprep.subr.mxu1 %v26128_v9  ;;  %19541 = vmatpush3.msra.mxu0 %v26165_v22 }
 0x651   : > { %19584 = vmatpush3.msra.mxu1 %v26128_v9  ;;  %19542 = vmatprep.subr.mxu0 %v26166_v57 }
 0x652   : > { %19586 = vmatmul.mubr.f32.vlgmr.msra.gmra.mxu1 %v26167_v43  ;;  %19623 = vmatprep.subr.mxu1 %v26138_v24 }
 0x653   : > { %19543 = vmatpush3.msra.mxu0 %v26166_v57  ;;  %19624 = vmatpush3.msra.mxu1 %v26138_v24 }
 0x654   : > { %19655 = vmatprep.mubr.f32.mxu1 %v24639_v37  ;;  %19544 = vmatprep.subr.mxu0 %v26168_v56 }
 0x655   : > { %19625 = vmatprep.subr.mxu1 %v26140_v31  ;;  %19545 = vmatpush3.msra.mxu0 %v26168_v56 }
 0x656   : > { %19626 = vmatpush3.msra.mxu1 %v26140_v31  ;;  %19546 = vmatprep.subr.mxu0 %v25997_v53 }
 0x657   : > { %19627 = vmatprep.subr.mxu1 %v21222_v4  ;;  %19547 = vmatpush3.msra.mxu0 %v25997_v53 }
 0x658   : > { %19628 = vmatpush3.msra.mxu1 %v21222_v4  ;;  %19548 = vmatprep.subr.mxu0 %v21438_v55 }
 0x659   : > { %19629 = vmatprep.subr.mxu1 %v21229_v48  ;;  %19549 = vmatpush3.msra.mxu0 %v21438_v55 }
 0x65a   : > { %19630 = vmatpush3.msra.mxu1 %v21229_v48  ;;  %19551 = vmatmul.mubr.f32.vlgmr.msra.gmra.mxu0 %v24733_v36 }
 0x65b   : > { %19588 = vmatprep.subr.mxu0 %v21235_v0  ;;  %19631 = vmatprep.subr.mxu1 %v21240_v60 }
 0x65c   : > { %19589 = vmatpush3.msra.mxu0 %v21235_v0  ;;  %19620 = vmatprep.mubr.f32.mxu0 %v24639_v37  ;;  %v26169_v37 = vld [vmem:[#allocation147_spill] sm:$0xff] }
 0x65d   : > { %19632 = vmatpush3.msra.mxu1 %v21240_v60  ;;  %19590 = vmatprep.subr.mxu0 %v21245_v10  ;;  %v24872_v36 = vand.u32 4294901760, %v26169_v37 }
 0x65e   : > { %19633 = vmatprep.subr.mxu1 %v21250_v12  ;;  %19591 = vmatpush3.msra.mxu0 %v21245_v10 }
 0x65f   : > { %19634 = vmatpush3.msra.mxu1 %v21250_v12  ;;  %19592 = vmatprep.subr.mxu0 %v21261_v15  ;;  %v24884_v43 = vsub.f32 %v26169_v37, %v24872_v36 }
 0x660   : > { %19635 = vmatprep.subr.mxu1 %v21254_v14  ;;  %19593 = vmatpush3.msra.mxu0 %v21261_v15 }
 0x661   : > { %19636 = vmatpush3.msra.mxu1 %v21254_v14  ;;  %19594 = vmatprep.subr.mxu0 %v21275_v21  ;;  %v25679_v37 = vand.u32 4294901760, %v24884_v43 }
 0x662   : > { %19637 = vmatprep.subr.mxu1 %v21268_v32  ;;  %19595 = vmatpush3.msra.mxu0 %v21275_v21 }
 0x663   : > { %19638 = vmatpush3.msra.mxu1 %v21268_v32  ;;  %19596 = vmatprep.subr.mxu0 %v21292_v26 }
 0x664   : > { %19639 = vmatprep.subr.mxu1 %v21294_v27  ;;  %19597 = vmatpush3.msra.mxu0 %v21292_v26 }
 0x665   : > { %19640 = vmatpush3.msra.mxu1 %v21294_v27  ;;  %19598 = vmatprep.subr.mxu0 %v26116_v38 }
 0x666   : > { %19641 = vmatprep.subr.mxu1 %v26003_v44  ;;  %19599 = vmatpush3.msra.mxu0 %v26116_v38 }
 0x667   : > { %19642 = vmatpush3.msra.mxu1 %v26003_v44  ;;  %19600 = vmatprep.subr.mxu0 %v26118_v47 }
 0x668   : > { %19643 = vmatprep.subr.mxu1 %v26119_v62  ;;  %19601 = vmatpush3.msra.mxu0 %v26118_v47 }
 0x669   : > { %19644 = vmatpush3.msra.mxu1 %v26119_v62  ;;  %19602 = vmatprep.subr.mxu0 %v26120_v50 }
 0x66a   : > { %19645 = vmatprep.subr.mxu1 %v26009_v45  ;;  %19603 = vmatpush3.msra.mxu0 %v26120_v50 }
 0x66b   : > { %19646 = vmatpush3.msra.mxu1 %v26009_v45  ;;  %19604 = vmatprep.subr.mxu0 %v26121_v19 }
 0x66c   : > { %19647 = vmatprep.subr.mxu1 %v26122_v51  ;;  %19605 = vmatpush3.msra.mxu0 %v26121_v19 }
 0x66d   : > { %19648 = vmatpush3.msra.mxu1 %v26122_v51  ;;  %19606 = vmatprep.subr.mxu0 %v26124_v58 }
 0x66e   : > { %19649 = vmatprep.subr.mxu1 %v26125_v6  ;;  %19607 = vmatpush3.msra.mxu0 %v26124_v58 }
 0x66f   : > { %19650 = vmatpush3.msra.mxu1 %v26125_v6  ;;  %19608 = vmatprep.subr.mxu0 %v26126_v52 }
 0x670   : > { %19651 = vmatprep.subr.mxu1 %v26015_v2  ;;  %19609 = vmatpush3.msra.mxu0 %v26126_v52 }
 0x671   : > { %19652 = vmatpush3.msra.mxu1 %v26015_v2  ;;  %19610 = vmatprep.subr.mxu0 %v26127_v20 }
 0x672   : > { %19653 = vmatprep.subr.mxu1 %v26128_v9  ;;  %19611 = vmatpush3.msra.mxu0 %v26127_v20  ;;  %v13788_v20 = vsub.f32 %v24884_v43, %v25679_v37 }
 0x673   : > { %19654 = vmatpush3.msra.mxu1 %v26128_v9  ;;  %19612 = vmatprep.subr.mxu0 %v26129_v28 }
 0x674   : > { %19656 = vmatmul.mubr.f32.vlgmr.msra.gmra.mxu1 %v24719_v49  ;;  %19693 = vmatprep.subr.mxu1 %v26131_v30 }
 0x675   : > { %19613 = vmatpush3.msra.mxu0 %v26129_v28  ;;  %19694 = vmatpush3.msra.mxu1 %v26131_v30 }
 0x676   : > { %19725 = vmatprep.mubr.f32.mxu1 %v24872_v36  ;;  %19614 = vmatprep.subr.mxu0 %v26132_v11 }
 0x677   : > { %19695 = vmatprep.subr.mxu1 %v26133_v17  ;;  %19615 = vmatpush3.msra.mxu0 %v26132_v11 }
 0x678   : > { %19696 = vmatpush3.msra.mxu1 %v26133_v17  ;;  %19616 = vmatprep.subr.mxu0 %v26134_v54  ;;  %v13789_v17 = vand.u32 4294901760, %v13788_v20  ;;  %v26170_v20 = vld [vmem:[#allocation70_spill] sm:$0xff] }
 0x679   : > { %19697 = vmatprep.subr.mxu1 %v26135_v40  ;;  %19617 = vmatpush3.msra.mxu0 %v26134_v54 }
 0x67a   : > { %19698 = vmatpush3.msra.mxu1 %v26135_v40  ;;  %19618 = vmatprep.subr.mxu0 %v26136_v25 }
 0x67b   : > { %19699 = vmatprep.subr.mxu1 %v26137_v42  ;;  %19619 = vmatpush3.msra.mxu0 %v26136_v25 }
 0x67c   : > { %19700 = vmatpush3.msra.mxu1 %v26137_v42  ;;  %19621 = vmatmul.mubr.f32.vlgmr.msra.gmra.mxu0 %v24719_v49 }
 0x67d   : > { %19658 = vmatprep.subr.mxu0 %v26138_v24  ;;  %19701 = vmatprep.subr.mxu1 %v26139_v23 }
 0x67e   : > { %19659 = vmatpush3.msra.mxu0 %v26138_v24  ;;  %19690 = vmatprep.mubr.f32.mxu0 %v13789_v17  ;;  %v24946_v17 = vand.u32 4294901760, %v26170_v20 }
 0x67f   : > { %19702 = vmatpush3.msra.mxu1 %v26139_v23  ;;  %19660 = vmatprep.subr.mxu0 %v26140_v31 }
 0x680   : > { %19703 = vmatprep.subr.mxu1 %v26141_v29  ;;  %19661 = vmatpush3.msra.mxu0 %v26140_v31  ;;  %v24958_v49 = vsub.f32 %v26170_v20, %v24946_v17 }
 0x681   : > { %19704 = vmatpush3.msra.mxu1 %v26141_v29  ;;  %19662 = vmatprep.subr.mxu0 %v21222_v4 }
 0x682   : > { %19705 = vmatprep.subr.mxu1 %v26142_v1  ;;  %19663 = vmatpush3.msra.mxu0 %v21222_v4  ;;  %v25682_v37 = vand.u32 4294901760, %v24958_v49 }
 0x683   : > { %19706 = vmatpush3.msra.mxu1 %v26142_v1  ;;  %19664 = vmatprep.subr.mxu0 %v21229_v48 }
 0x684   : > { %19707 = vmatprep.subr.mxu1 %v26143_v34  ;;  %19665 = vmatpush3.msra.mxu0 %v21229_v48  ;;  %v13798_v20 = vsub.f32 %v24958_v49, %v25682_v37 }
 0x685   : > { %19708 = vmatpush3.msra.mxu1 %v26143_v34  ;;  %19666 = vmatprep.subr.mxu0 %v21240_v60 }
 0x686   : > { %19709 = vmatprep.subr.mxu1 %v26144_v18  ;;  %19667 = vmatpush3.msra.mxu0 %v21240_v60 }
 0x687   : > { %19710 = vmatpush3.msra.mxu1 %v26144_v18  ;;  %19668 = vmatprep.subr.mxu0 %v21250_v12 }
 0x688   : > { %19711 = vmatprep.subr.mxu1 %v26145_v39  ;;  %19669 = vmatpush3.msra.mxu0 %v21250_v12 }
 0x689   : > { %19712 = vmatpush3.msra.mxu1 %v26145_v39  ;;  %19670 = vmatprep.subr.mxu0 %v21254_v14 }
 0x68a   : > { %19713 = vmatprep.subr.mxu1 %v26146_v16  ;;  %19671 = vmatpush3.msra.mxu0 %v21254_v14 }
 0x68b   : > { %19714 = vmatpush3.msra.mxu1 %v26146_v16  ;;  %19672 = vmatprep.subr.mxu0 %v21268_v32 }
 0x68c   : > { %19715 = vmatprep.subr.mxu1 %v26147_v59  ;;  %19673 = vmatpush3.msra.mxu0 %v21268_v32 }
 0x68d   : > { %19716 = vmatpush3.msra.mxu1 %v26147_v59  ;;  %19674 = vmatprep.subr.mxu0 %v21294_v27 }
 0x68e   : > { %19717 = vmatprep.subr.mxu1 %v26150_v5  ;;  %19675 = vmatpush3.msra.mxu0 %v21294_v27 }
 0x68f   : > { %19718 = vmatpush3.msra.mxu1 %v26150_v5  ;;  %19676 = vmatprep.subr.mxu0 %v26003_v44 }
 0x690   : > { %19719 = vmatprep.subr.mxu1 %v26151_v8  ;;  %19677 = vmatpush3.msra.mxu0 %v26003_v44 }
 0x691   : > { %19720 = vmatpush3.msra.mxu1 %v26151_v8  ;;  %19678 = vmatprep.subr.mxu0 %v26119_v62 }
 0x692   : > { %19721 = vmatprep.subr.mxu1 %v26152_v3  ;;  %19679 = vmatpush3.msra.mxu0 %v26119_v62 }
 0x693   : > { %19722 = vmatpush3.msra.mxu1 %v26152_v3  ;;  %19680 = vmatprep.subr.mxu0 %v26009_v45  ;;  %v26171_v3 = vand.u32 4294901760, %v24884_v43 }
 0x694   : > { %19723 = vmatprep.subr.mxu1 %v26153_v63  ;;  %19681 = vmatpush3.msra.mxu0 %v26009_v45 }
 0x695   : > { %19724 = vmatpush3.msra.mxu1 %v26153_v63  ;;  %19682 = vmatprep.subr.mxu0 %v26122_v51  ;;  %v13799_v63 = vand.u32 4294901760, %v13798_v20  ;;  %v26175_v20 = vld [vmem:[#allocation36_spill] sm:$0xff] }
 0x696   : > { %19726 = vmatmul.mubr.f32.vlgmr.msra.gmra.mxu1 %v24946_v17  ;;  %19763 = vmatprep.subr.mxu1 %v26138_v24 }
 0x697   : > { %19683 = vmatpush3.msra.mxu0 %v26122_v51  ;;  %19764 = vmatpush3.msra.mxu1 %v26138_v24 }
 0x698   : > { %19795 = vmatprep.mubr.f32.mxu1 %v26171_v3  ;;  %19684 = vmatprep.subr.mxu0 %v26125_v6  ;;  %v26172_v3 = vld [vmem:[#allocation22_spill] sm:$0xff] }
 0x699   : > { %19765 = vmatprep.subr.mxu1 %v26140_v31  ;;  %19685 = vmatpush3.msra.mxu0 %v26125_v6 }
 0x69a   : > { %19766 = vmatpush3.msra.mxu1 %v26140_v31  ;;  %19686 = vmatprep.subr.mxu0 %v26015_v2 }
 0x69b   : > { %19767 = vmatprep.subr.mxu1 %v21222_v4  ;;  %19687 = vmatpush3.msra.mxu0 %v26015_v2 }
 0x69c   : > { %19768 = vmatpush3.msra.mxu1 %v21222_v4  ;;  %19688 = vmatprep.subr.mxu0 %v26128_v9 }
 0x69d   : > { %19769 = vmatprep.subr.mxu1 %v21229_v48  ;;  %19689 = vmatpush3.msra.mxu0 %v26128_v9 }
 0x69e   : > { %19770 = vmatpush3.msra.mxu1 %v21229_v48  ;;  %19691 = vmatmul.mubr.f32.vlgmr.msra.gmra.mxu0 %v13799_v63  ;;  %v26173_v63 = vld [vmem:[#allocation28_spill] sm:$0xff] }
 0x69f   : > { %19728 = vmatprep.subr.mxu0 %v26154_v7  ;;  %19771 = vmatprep.subr.mxu1 %v21240_v60 }
 0x6a0   : > { %19729 = vmatpush3.msra.mxu0 %v26154_v7  ;;  %19760 = vmatprep.mubr.f32.mxu0 %v24884_v43  ;;  %v26174_v43 = vld [vmem:[#allocation32_spill] sm:$0xff] }
 0x6a1   : > { %19772 = vmatpush3.msra.mxu1 %v21240_v60  ;;  %19730 = vmatprep.subr.mxu0 %v26155_v13 }
 0x6a2   : > { %19773 = vmatprep.subr.mxu1 %v21250_v12  ;;  %19731 = vmatpush3.msra.mxu0 %v26155_v13 }
 0x6a3   : > { %19774 = vmatpush3.msra.mxu1 %v21250_v12  ;;  %19732 = vmatprep.subr.mxu0 %v26156_v35 }
 0x6a4   : > { %19775 = vmatprep.subr.mxu1 %v21254_v14  ;;  %19733 = vmatpush3.msra.mxu0 %v26156_v35 }
 0x6a5   : > { %19776 = vmatpush3.msra.mxu1 %v21254_v14  ;;  %19734 = vmatprep.subr.mxu0 %v26157_v46 }
 0x6a6   : > { %19777 = vmatprep.subr.mxu1 %v21268_v32  ;;  %19735 = vmatpush3.msra.mxu0 %v26157_v46 }
 0x6a7   : > { %19778 = vmatpush3.msra.mxu1 %v21268_v32  ;;  %19736 = vmatprep.subr.mxu0 %v26158_v33 }
 0x6a8   : > { %19779 = vmatprep.subr.mxu1 %v21294_v27  ;;  %19737 = vmatpush3.msra.mxu0 %v26158_v33 }
 0x6a9   : > { %19780 = vmatpush3.msra.mxu1 %v21294_v27  ;;  %19738 = vmatprep.subr.mxu0 %v26159_v61 }
 0x6aa   : > { %19781 = vmatprep.subr.mxu1 %v26003_v44  ;;  %19739 = vmatpush3.msra.mxu0 %v26159_v61 }
 0x6ab   : > { %19782 = vmatpush3.msra.mxu1 %v26003_v44  ;;  %19740 = vmatprep.subr.mxu0 %v26160_v41 }
 0x6ac   : > { %19783 = vmatprep.subr.mxu1 %v26119_v62  ;;  %19741 = vmatpush3.msra.mxu0 %v26160_v41 }
 0x6ad   : > { %19784 = vmatpush3.msra.mxu1 %v26119_v62  ;;  %19742 = vmatprep.subr.mxu0 %v26172_v3 }
 0x6ae   : > { %19785 = vmatprep.subr.mxu1 %v26009_v45  ;;  %19743 = vmatpush3.msra.mxu0 %v26172_v3 }
 0x6af   : > { %19786 = vmatpush3.msra.mxu1 %v26009_v45  ;;  %19744 = vmatprep.subr.mxu0 %v26173_v63 }
 0x6b0   : > { %19787 = vmatprep.subr.mxu1 %v26122_v51  ;;  %19745 = vmatpush3.msra.mxu0 %v26173_v63 }
 0x6b1   : > { %19788 = vmatpush3.msra.mxu1 %v26122_v51  ;;  %19746 = vmatprep.subr.mxu0 %v26174_v43 }
 0x6b2   : > { %19789 = vmatprep.subr.mxu1 %v26125_v6  ;;  %19747 = vmatpush3.msra.mxu0 %v26174_v43  ;;  %v26176_v43 = vand.u32 4294901760, %v24958_v49 }
 0x6b3   : > { %19790 = vmatpush3.msra.mxu1 %v26125_v6  ;;  %19748 = vmatprep.subr.mxu0 %v26175_v20 }
 0x6b4   : > { %19791 = vmatprep.subr.mxu1 %v26015_v2  ;;  %19749 = vmatpush3.msra.mxu0 %v26175_v20 }
 0x6b5   : > { %19792 = vmatpush3.msra.mxu1 %v26015_v2  ;;  %19750 = vmatprep.subr.mxu0 %v26165_v22  ;;  %v11642_v37 = vpop.xlane.xlu0 %11641 }
 0x6b6   : > { %19793 = vmatprep.subr.mxu1 %v26128_v9  ;;  %19751 = vmatpush3.msra.mxu0 %v26165_v22  ;;  %v11643_v63 = vrot.slane %v11642_v37, 4 }
 0x6b7   : > { %19794 = vmatpush3.msra.mxu1 %v26128_v9  ;;  %19752 = vmatprep.subr.mxu0 %v26166_v57 }
 0x6b8   : > { %19796 = vmatmul.mubr.f32.vlgmr.msra.gmra.mxu1 %v26176_v43  ;;  %19833 = vmatprep.subr.mxu1 %v26138_v24  ;;  %v11644_v20 = vadd.f32 %v11643_v63, %v11642_v37 }
 0x6b9   : > { %19753 = vmatpush3.msra.mxu0 %v26166_v57  ;;  %19834 = vmatpush3.msra.mxu1 %v26138_v24 }
 0x6ba   : > { %19865 = vmatprep.mubr.f32.mxu1 %v24872_v36  ;;  %19754 = vmatprep.subr.mxu0 %v26168_v56  ;;  %v11645_v22 = vrot.slane %v11644_v20, 2 }
 0x6bb   : > { %19835 = vmatprep.subr.mxu1 %v26140_v31  ;;  %19755 = vmatpush3.msra.mxu0 %v26168_v56 }
 0x6bc   : > { %19836 = vmatpush3.msra.mxu1 %v26140_v31  ;;  %19756 = vmatprep.subr.mxu0 %v25997_v53  ;;  %v11646_v43 = vadd.f32 %v11645_v22, %v11644_v20  ;;  %v26177_v22 = vld [vmem:[#allocation150_spill] sm:$0xff]  ;;  %v26178_v20 = vld [vmem:[#allocation47_spill] sm:$0xff] }
 0x6bd   : > { %19837 = vmatprep.subr.mxu1 %v21222_v4  ;;  %19757 = vmatpush3.msra.mxu0 %v25997_v53 }
 0x6be   : > { %19838 = vmatpush3.msra.mxu1 %v21222_v4  ;;  %19758 = vmatprep.subr.mxu0 %v21438_v55  ;;  %v11647_v37 = vrot.slane %v11646_v43, 1 }
 0x6bf   : > { %19839 = vmatprep.subr.mxu1 %v21229_v48  ;;  %19759 = vmatpush3.msra.mxu0 %v21438_v55 }
 0x6c0   : > { %19840 = vmatpush3.msra.mxu1 %v21229_v48  ;;  %19761 = vmatmul.mubr.f32.vlgmr.msra.gmra.mxu0 %v24958_v49  ;;  %v11648_v63 = vadd.f32 %v11647_v37, %v11646_v43  ;;  %v26179_v37 = vld [vmem:[#allocation23_spill] sm:$0xff] }
 0x6c1   : > { %19798 = vmatprep.subr.mxu0 %v21235_v0  ;;  %19841 = vmatprep.subr.mxu1 %v21240_v60 }
 0x6c2   : > { %19799 = vmatpush3.msra.mxu0 %v21235_v0  ;;  %19830 = vmatprep.mubr.f32.mxu0 %v24872_v36  ;;  %20085 = vpush %v11648_v63  ;;  %v25098_v36 = vand.u32 4294901760, %v26177_v22 }
 0x6c3   : > { %19842 = vmatpush3.msra.mxu1 %v21240_v60  ;;  %19800 = vmatprep.subr.mxu0 %v21245_v10 }
 0x6c4   : > { %19843 = vmatprep.subr.mxu1 %v21250_v12  ;;  %19801 = vmatpush3.msra.mxu0 %v21245_v10  ;;  %v25110_v49 = vsub.f32 %v26177_v22, %v25098_v36 }
 0x6c5   : > { %19844 = vmatpush3.msra.mxu1 %v21250_v12  ;;  %19802 = vmatprep.subr.mxu0 %v21261_v15 }
 0x6c6   : > { %19845 = vmatprep.subr.mxu1 %v21254_v14  ;;  %19803 = vmatpush3.msra.mxu0 %v21261_v15  ;;  %v14471_v43 = vand.u32 4294901760, %v25110_v49 }
 0x6c7   : > { %19846 = vmatpush3.msra.mxu1 %v21254_v14  ;;  %19804 = vmatprep.subr.mxu0 %v21275_v21 }
 0x6c8   : > { %19847 = vmatprep.subr.mxu1 %v21268_v32  ;;  %19805 = vmatpush3.msra.mxu0 %v21275_v21  ;;  %v14472_v63 = vsub.f32 %v25110_v49, %v14471_v43 }
 0x6c9   : > { %19848 = vmatpush3.msra.mxu1 %v21268_v32  ;;  %19806 = vmatprep.subr.mxu0 %v21292_v26 }
 0x6ca   : > { %19849 = vmatprep.subr.mxu1 %v21294_v27  ;;  %19807 = vmatpush3.msra.mxu0 %v21292_v26 }
 0x6cb   : > { %19850 = vmatpush3.msra.mxu1 %v21294_v27  ;;  %19808 = vmatprep.subr.mxu0 %v26116_v38 }
 0x6cc   : > { %19851 = vmatprep.subr.mxu1 %v26003_v44  ;;  %19809 = vmatpush3.msra.mxu0 %v26116_v38 }
 0x6cd   : > { %19852 = vmatpush3.msra.mxu1 %v26003_v44  ;;  %19810 = vmatprep.subr.mxu0 %v26118_v47 }
 0x6ce   : > { %19853 = vmatprep.subr.mxu1 %v26119_v62  ;;  %19811 = vmatpush3.msra.mxu0 %v26118_v47 }
 0x6cf   : > { %19854 = vmatpush3.msra.mxu1 %v26119_v62  ;;  %19812 = vmatprep.subr.mxu0 %v26120_v50 }
 0x6d0   : > { %19855 = vmatprep.subr.mxu1 %v26009_v45  ;;  %19813 = vmatpush3.msra.mxu0 %v26120_v50 }
 0x6d1   : > { %19856 = vmatpush3.msra.mxu1 %v26009_v45  ;;  %19814 = vmatprep.subr.mxu0 %v26121_v19 }
 0x6d2   : > { %19857 = vmatprep.subr.mxu1 %v26122_v51  ;;  %19815 = vmatpush3.msra.mxu0 %v26121_v19 }
 0x6d3   : > { %19858 = vmatpush3.msra.mxu1 %v26122_v51  ;;  %19816 = vmatprep.subr.mxu0 %v26124_v58 }
 0x6d4   : > { %19859 = vmatprep.subr.mxu1 %v26125_v6  ;;  %19817 = vmatpush3.msra.mxu0 %v26124_v58 }
 0x6d5   : > { %19860 = vmatpush3.msra.mxu1 %v26125_v6  ;;  %19818 = vmatprep.subr.mxu0 %v26126_v52 }
 0x6d6   : > { %19861 = vmatprep.subr.mxu1 %v26015_v2  ;;  %19819 = vmatpush3.msra.mxu0 %v26126_v52 }
 0x6d7   : > { %19862 = vmatpush3.msra.mxu1 %v26015_v2  ;;  %19820 = vmatprep.subr.mxu0 %v26178_v20 }
 0x6d8   : > { %19863 = vmatprep.subr.mxu1 %v26128_v9  ;;  %19821 = vmatpush3.msra.mxu0 %v26178_v20 }
 0x6d9   : > { %19864 = vmatpush3.msra.mxu1 %v26128_v9  ;;  %19822 = vmatprep.subr.mxu0 %v26129_v28 }
 0x6da   : > { %19866 = vmatmul.mubr.f32.vlgmr.msra.gmra.mxu1 %v24946_v17  ;;  %19903 = vmatprep.subr.mxu1 %v26131_v30 }
 0x6db   : > { %19823 = vmatpush3.msra.mxu0 %v26129_v28  ;;  %19904 = vmatpush3.msra.mxu1 %v26131_v30  ;;  %v14473_v30 = vand.u32 4294901760, %v14472_v63 }
 0x6dc   : > { %19935 = vmatprep.mubr.f32.mxu1 %v25098_v36  ;;  %19824 = vmatprep.subr.mxu0 %v26132_v11 }
 0x6dd   : > { %19905 = vmatprep.subr.mxu1 %v26179_v37  ;;  %19825 = vmatpush3.msra.mxu0 %v26132_v11 }
 0x6de   : > { %19906 = vmatpush3.msra.mxu1 %v26179_v37  ;;  %19826 = vmatprep.subr.mxu0 %v26134_v54 }
 0x6df   : > { %19907 = vmatprep.subr.mxu1 %v26135_v40  ;;  %19827 = vmatpush3.msra.mxu0 %v26134_v54 }
 0x6e0   : > { %19908 = vmatpush3.msra.mxu1 %v26135_v40  ;;  %19828 = vmatprep.subr.mxu0 %v26136_v25  ;;  %v26180_v40 = vld [vmem:[#allocation149_spill] sm:$0xff] }
 0x6e1   : > { %19909 = vmatprep.subr.mxu1 %v26137_v42  ;;  %19829 = vmatpush3.msra.mxu0 %v26136_v25 }
 0x6e2   : > { %19910 = vmatpush3.msra.mxu1 %v26137_v42  ;;  %19831 = vmatmul.mubr.f32.vlgmr.msra.gmra.mxu0 %v24946_v17  ;;  %v25172_v42 = vand.u32 4294901760, %v26180_v40 }
 0x6e3   : > { %19868 = vmatprep.subr.mxu0 %v26138_v24  ;;  %19911 = vmatprep.subr.mxu1 %v26139_v23 }
 0x6e4   : > { %19869 = vmatpush3.msra.mxu0 %v26138_v24  ;;  %19900 = vmatprep.mubr.f32.mxu0 %v14473_v30 }
 0x6e5   : > { %19912 = vmatpush3.msra.mxu1 %v26139_v23  ;;  %19870 = vmatprep.subr.mxu0 %v26140_v31  ;;  %v25184_v23 = vsub.f32 %v26180_v40, %v25172_v42 }
 0x6e6   : > { %19913 = vmatprep.subr.mxu1 %v26141_v29  ;;  %19871 = vmatpush3.msra.mxu0 %v26140_v31 }
 0x6e7   : > { %19914 = vmatpush3.msra.mxu1 %v26141_v29  ;;  %19872 = vmatprep.subr.mxu0 %v21222_v4  ;;  %v26181_v29 = vld [vmem:[#allocation64_spill] sm:$0xff] }
 0x6e8   : > { %19915 = vmatprep.subr.mxu1 %v26142_v1  ;;  %19873 = vmatpush3.msra.mxu0 %v21222_v4 }
 0x6e9   : > { %19916 = vmatpush3.msra.mxu1 %v26142_v1  ;;  %19874 = vmatprep.subr.mxu0 %v21229_v48  ;;  %v14481_v1 = vand.u32 4294901760, %v25184_v23 }
 0x6ea   : > { %19917 = vmatprep.subr.mxu1 %v26143_v34  ;;  %19875 = vmatpush3.msra.mxu0 %v21229_v48 }
 0x6eb   : > { %19918 = vmatpush3.msra.mxu1 %v26143_v34  ;;  %19876 = vmatprep.subr.mxu0 %v21240_v60  ;;  %v26182_v34 = vld [vmem:[#allocation65_spill] sm:$0xff] }
 0x6ec   : > { %19919 = vmatprep.subr.mxu1 %v26144_v18  ;;  %19877 = vmatpush3.msra.mxu0 %v21240_v60 }
 0x6ed   : > { %19920 = vmatpush3.msra.mxu1 %v26144_v18  ;;  %19878 = vmatprep.subr.mxu0 %v21250_v12  ;;  %v14482_v18 = vsub.f32 %v25184_v23, %v14481_v1 }
 0x6ee   : > { %19921 = vmatprep.subr.mxu1 %v26145_v39  ;;  %19879 = vmatpush3.msra.mxu0 %v21250_v12 }
 0x6ef   : > { %19922 = vmatpush3.msra.mxu1 %v26145_v39  ;;  %19880 = vmatprep.subr.mxu0 %v21254_v14  ;;  %v14483_v39 = vand.u32 4294901760, %v14482_v18 }
 0x6f0   : > { %19923 = vmatprep.subr.mxu1 %v26146_v16  ;;  %19881 = vmatpush3.msra.mxu0 %v21254_v14 }
 0x6f1   : > { %19924 = vmatpush3.msra.mxu1 %v26146_v16  ;;  %19882 = vmatprep.subr.mxu0 %v21268_v32  ;;  %v26183_v16 = vld [vmem:[#allocation28_spill] sm:$0xff] }
 0x6f2   : > { %19925 = vmatprep.subr.mxu1 %v26147_v59  ;;  %19883 = vmatpush3.msra.mxu0 %v21268_v32 }
 0x6f3   : > { %19926 = vmatpush3.msra.mxu1 %v26147_v59  ;;  %19884 = vmatprep.subr.mxu0 %v21294_v27  ;;  %v26184_v59 = vld [vmem:[#allocation32_spill] sm:$0xff]  ;;  %s20086_s21 = spop %20085 }
 0x6f4   : > { %19927 = vmatprep.subr.mxu1 %v26150_v5  ;;  %19885 = vmatpush3.msra.mxu0 %v21294_v27 }
 0x6f5   : > { %19928 = vmatpush3.msra.mxu1 %v26150_v5  ;;  %19886 = vmatprep.subr.mxu0 %v26003_v44  ;;  %v26185_v5 = vld [vmem:[#allocation36_spill] sm:$0xff] }
 0x6f6   : > { %19929 = vmatprep.subr.mxu1 %v26151_v8  ;;  %19887 = vmatpush3.msra.mxu0 %v26003_v44 }
 0x6f7   : > { %19930 = vmatpush3.msra.mxu1 %v26151_v8  ;;  %19888 = vmatprep.subr.mxu0 %v26119_v62  ;;  %v26186_v8 = vld [vmem:[#allocation40_spill] sm:$0xff] }
 0x6f8   : > { %19931 = vmatprep.subr.mxu1 %v26181_v29  ;;  %19889 = vmatpush3.msra.mxu0 %v26119_v62 }
 0x6f9   : > { %19932 = vmatpush3.msra.mxu1 %v26181_v29  ;;  %19890 = vmatprep.subr.mxu0 %v26009_v45 }
 0x6fa   : > { %19933 = vmatprep.subr.mxu1 %v26182_v34  ;;  %19891 = vmatpush3.msra.mxu0 %v26009_v45 }
 0x6fb   : > { %19934 = vmatpush3.msra.mxu1 %v26182_v34  ;;  %19892 = vmatprep.subr.mxu0 %v26122_v51 }
 0x6fc   : > { %19936 = vmatmul.mubr.f32.vlgmr.msra.gmra.mxu1 %v25172_v42  ;;  %19973 = vmatprep.subr.mxu1 %v26138_v24 }
 0x6fd   : > { %19893 = vmatpush3.msra.mxu0 %v26122_v51  ;;  %19974 = vmatpush3.msra.mxu1 %v26138_v24 }
 0x6fe   : > { %20005 = vmatprep.mubr.f32.mxu1 %v14471_v43  ;;  %19894 = vmatprep.subr.mxu0 %v26125_v6 }
 0x6ff   : > { %19975 = vmatprep.subr.mxu1 %v26140_v31  ;;  %19895 = vmatpush3.msra.mxu0 %v26125_v6 }
 0x700   : > { %19976 = vmatpush3.msra.mxu1 %v26140_v31  ;;  %19896 = vmatprep.subr.mxu0 %v26015_v2 }
 0x701   : > { %19977 = vmatprep.subr.mxu1 %v21222_v4  ;;  %19897 = vmatpush3.msra.mxu0 %v26015_v2 }
 0x702   : > { %19978 = vmatpush3.msra.mxu1 %v21222_v4  ;;  %19898 = vmatprep.subr.mxu0 %v26128_v9 }
 0x703   : > { %19979 = vmatprep.subr.mxu1 %v21229_v48  ;;  %19899 = vmatpush3.msra.mxu0 %v26128_v9 }
 0x704   : > { %19980 = vmatpush3.msra.mxu1 %v21229_v48  ;;  %19901 = vmatmul.mubr.f32.vlgmr.msra.gmra.mxu0 %v14483_v39 }
 0x705   : > { %19938 = vmatprep.subr.mxu0 %v26154_v7  ;;  %19981 = vmatprep.subr.mxu1 %v21240_v60 }
 0x706   : > { %19939 = vmatpush3.msra.mxu0 %v26154_v7  ;;  %19970 = vmatprep.mubr.f32.mxu0 %v25110_v49 }
 0x707   : > { %19982 = vmatpush3.msra.mxu1 %v21240_v60  ;;  %19940 = vmatprep.subr.mxu0 %v26155_v13 }
 0x708   : > { %19983 = vmatprep.subr.mxu1 %v21250_v12  ;;  %19941 = vmatpush3.msra.mxu0 %v26155_v13 }
 0x709   : > { %19984 = vmatpush3.msra.mxu1 %v21250_v12  ;;  %19942 = vmatprep.subr.mxu0 %v26156_v35 }
 0x70a   : > { %19985 = vmatprep.subr.mxu1 %v21254_v14  ;;  %19943 = vmatpush3.msra.mxu0 %v26156_v35 }
 0x70b   : > { %19986 = vmatpush3.msra.mxu1 %v21254_v14  ;;  %19944 = vmatprep.subr.mxu0 %v26157_v46 }
 0x70c   : > { %19987 = vmatprep.subr.mxu1 %v21268_v32  ;;  %19945 = vmatpush3.msra.mxu0 %v26157_v46 }
 0x70d   : > { %19988 = vmatpush3.msra.mxu1 %v21268_v32  ;;  %19946 = vmatprep.subr.mxu0 %v26158_v33 }
 0x70e   : > { %19989 = vmatprep.subr.mxu1 %v21294_v27  ;;  %19947 = vmatpush3.msra.mxu0 %v26158_v33 }
 0x70f   : > { %19990 = vmatpush3.msra.mxu1 %v21294_v27  ;;  %19948 = vmatprep.subr.mxu0 %v26159_v61 }
 0x710   : > { %19991 = vmatprep.subr.mxu1 %v26003_v44  ;;  %19949 = vmatpush3.msra.mxu0 %v26159_v61 }
 0x711   : > { %19992 = vmatpush3.msra.mxu1 %v26003_v44  ;;  %19950 = vmatprep.subr.mxu0 %v26160_v41 }
 0x712   : > { %19993 = vmatprep.subr.mxu1 %v26119_v62  ;;  %19951 = vmatpush3.msra.mxu0 %v26160_v41 }
 0x713   : > { %19994 = vmatpush3.msra.mxu1 %v26119_v62  ;;  %19952 = vmatprep.subr.mxu0 %v26172_v3 }
 0x714   : > { %19995 = vmatprep.subr.mxu1 %v26009_v45  ;;  %19953 = vmatpush3.msra.mxu0 %v26172_v3 }
 0x715   : > { %19996 = vmatpush3.msra.mxu1 %v26009_v45  ;;  %19954 = vmatprep.subr.mxu0 %v26183_v16 }
 0x716   : > { %19997 = vmatprep.subr.mxu1 %v26122_v51  ;;  %19955 = vmatpush3.msra.mxu0 %v26183_v16 }
 0x717   : > { %19998 = vmatpush3.msra.mxu1 %v26122_v51  ;;  %19956 = vmatprep.subr.mxu0 %v26184_v59 }
 0x718   : > { %19999 = vmatprep.subr.mxu1 %v26125_v6  ;;  %19957 = vmatpush3.msra.mxu0 %v26184_v59 }
 0x719   : > { %20000 = vmatpush3.msra.mxu1 %v26125_v6  ;;  %19958 = vmatprep.subr.mxu0 %v26185_v5 }
 0x71a   : > { %20001 = vmatprep.subr.mxu1 %v26015_v2  ;;  %19959 = vmatpush3.msra.mxu0 %v26185_v5 }
 0x71b   : > { %20002 = vmatpush3.msra.mxu1 %v26015_v2  ;;  %19960 = vmatprep.subr.mxu0 %v26186_v8 }
 0x71c   : > { %20003 = vmatprep.subr.mxu1 %v26128_v9  ;;  %19961 = vmatpush3.msra.mxu0 %v26186_v8 }
 0x71d   : > { %20004 = vmatpush3.msra.mxu1 %v26128_v9  ;;  %19962 = vmatprep.subr.mxu0 %v26166_v57 }
 0x71e   : > { %20006 = vmatmul.mubr.f32.vlgmr.msra.gmra.mxu1 %v14481_v1  ;;  %20043 = vmatprep.subr.mxu1 %v26138_v24 }
 0x71f   : > { %19963 = vmatpush3.msra.mxu0 %v26166_v57  ;;  %20044 = vmatpush3.msra.mxu1 %v26138_v24 }
 0x720   : > { %20075 = vmatprep.mubr.f32.mxu1 %v25098_v36  ;;  %19964 = vmatprep.subr.mxu0 %v26168_v56 }
 0x721   : > { %20045 = vmatprep.subr.mxu1 %v26140_v31  ;;  %19965 = vmatpush3.msra.mxu0 %v26168_v56 }
 0x722   : > { %20046 = vmatpush3.msra.mxu1 %v26140_v31  ;;  %19966 = vmatprep.subr.mxu0 %v25997_v53 }
 0x723   : > { %20047 = vmatprep.subr.mxu1 %v21222_v4  ;;  %19967 = vmatpush3.msra.mxu0 %v25997_v53 }
 0x724   : > { %20048 = vmatpush3.msra.mxu1 %v21222_v4  ;;  %19968 = vmatprep.subr.mxu0 %v21438_v55  ;;  %v19062_v4 = vpop.f32.mrf.mxu0 }
 0x725   : > { %20049 = vmatprep.subr.mxu1 %v21229_v48  ;;  %19969 = vmatpush3.msra.mxu0 %v21438_v55 }
 0x726   : > { %20050 = vmatpush3.msra.mxu1 %v21229_v48  ;;  %19971 = vmatmul.mubr.f32.vlgmr.msra.gmra.mxu0 %v25184_v23  ;;  %v11739_v48 = vpop.f32.mrf.mxu0 }
 0x727   : > { %20008 = vmatprep.subr.mxu0 %v21235_v0  ;;  %20051 = vmatprep.subr.mxu1 %v21240_v60 }
 0x728   : > { %20009 = vmatpush3.msra.mxu0 %v21235_v0  ;;  %20040 = vmatprep.mubr.f32.mxu0 %v25098_v36  ;;  %v19097_v0 = vpop.f32.mrf.mxu1 }
 0x729   : > { %20052 = vmatpush3.msra.mxu1 %v21240_v60  ;;  %20010 = vmatprep.subr.mxu0 %v21245_v10  ;;  %v19132_v60 = vpop.f32.mrf.mxu0  ;;  %v11907_v57 = vadd.f32 %v19097_v0, %v19062_v4 }
 0x72a   : > { %20053 = vmatprep.subr.mxu1 %v21250_v12  ;;  %20011 = vmatpush3.msra.mxu0 %v21245_v10  ;;  %v11900_v10 = vpop.f32.mrf.mxu1 }
 0x72b   : > { %20054 = vmatpush3.msra.mxu1 %v21250_v12  ;;  %20012 = vmatprep.subr.mxu0 %v21261_v15  ;;  %v12010_v12 = vpop.f32.mrf.mxu0  ;;  %v11901_v36 = vadd.f32 %v11900_v10, %v11739_v48  ;;  %v12018_v49 = vadd.f32 %v19132_v60, %v11907_v57 }
 0x72c   : > { %20055 = vmatprep.subr.mxu1 %v21254_v14  ;;  %20013 = vmatpush3.msra.mxu0 %v21261_v15 }
 0x72d   : > { %20056 = vmatpush3.msra.mxu1 %v21254_v14  ;;  %20014 = vmatprep.subr.mxu0 %v21275_v21  ;;  %v19167_v14 = vpop.f32.mrf.mxu1  ;;  %v19202_v15 = vpop.f32.mrf.mxu0 }
 0x72e   : > { %20057 = vmatprep.subr.mxu1 %v21268_v32  ;;  %20015 = vmatpush3.msra.mxu0 %v21275_v21  ;;  %v12115_v16 = vadd.f32 %v19167_v14, %v12018_v49 }
 0x72f   : > { %20058 = vmatpush3.msra.mxu1 %v21268_v32  ;;  %20016 = vmatprep.subr.mxu0 %v21292_v26  ;;  %v12106_v32 = vpop.f32.mrf.mxu1  ;;  %v25348_v21 = vpop.f32.mrf.mxu0 }
 0x730   : > { %20059 = vmatprep.subr.mxu1 %v21294_v27  ;;  %20017 = vmatpush3.msra.mxu0 %v21292_v26  ;;  %v12240_v48 = vadd.f32 %v19202_v15, %v12115_v16 }
 0x731   : > { %20060 = vmatpush3.msra.mxu1 %v21294_v27  ;;  %20018 = vmatprep.subr.mxu0 %v26116_v38  ;;  %v25350_v26 = vpop.f32.mrf.mxu1  ;;  %v19272_v27 = vpop.f32.mrf.mxu0 }
 0x732   : > { %20061 = vmatprep.subr.mxu1 %v26003_v44  ;;  %20019 = vmatpush3.msra.mxu0 %v26116_v38  ;;  %v12333_v14 = vadd.f32 %v25350_v26, %v12240_v48 }
 0x733   : > { %20062 = vmatpush3.msra.mxu1 %v26003_v44  ;;  %20020 = vmatprep.subr.mxu0 %v26118_v47  ;;  %v25352_v55 = vpop.f32.mrf.mxu1  ;;  %v12423_v53 = vpop.f32.mrf.mxu0 }
 0x734   : > { %20063 = vmatprep.subr.mxu1 %v26119_v62  ;;  %20021 = vmatpush3.msra.mxu0 %v26118_v47 }
 0x735   : > { %20064 = vmatpush3.msra.mxu1 %v26119_v62  ;;  %20022 = vmatprep.subr.mxu0 %v26120_v50  ;;  %v19307_v44 = vpop.f32.mrf.mxu1 }
 0x736   : > { %20065 = vmatprep.subr.mxu1 %v26009_v45  ;;  %20023 = vmatpush3.msra.mxu0 %v26120_v50  ;;  %v12591_v41 = vadd.f32 %v19307_v44, %v19272_v27 }
 0x737   : > { %20066 = vmatpush3.msra.mxu1 %v26009_v45  ;;  %20024 = vmatprep.subr.mxu0 %v26121_v19  ;;  %v19342_v45 = vpop.f32.mrf.mxu0 }
 0x738   : > { %20067 = vmatprep.subr.mxu1 %v26122_v51  ;;  %20025 = vmatpush3.msra.mxu0 %v26121_v19  ;;  %v12702_v3 = vadd.f32 %v19342_v45, %v12591_v41 }
 0x739   : > { %20068 = vmatpush3.msra.mxu1 %v26122_v51  ;;  %20026 = vmatprep.subr.mxu0 %v26124_v58  ;;  %v12694_v38 = vpop.f32.mrf.mxu0 }
 0x73a   : > { %20069 = vmatprep.subr.mxu1 %v26125_v6  ;;  %20027 = vmatpush3.msra.mxu0 %v26124_v58 }
 0x73b   : > { %20070 = vmatpush3.msra.mxu1 %v26125_v6  ;;  %20028 = vmatprep.subr.mxu0 %v26126_v52  ;;  %v19412_v62 = vpop.f32.mrf.mxu0 }
 0x73c   : > { %20071 = vmatprep.subr.mxu1 %v26015_v2  ;;  %20029 = vmatpush3.msra.mxu0 %v26126_v52 }
 0x73d   : > { %20072 = vmatpush3.msra.mxu1 %v26015_v2  ;;  %20030 = vmatprep.subr.mxu0 %v26178_v20  ;;  %v12584_v2 = vpop.f32.mrf.mxu1  ;;  %v12917_v19 = vpop.f32.mrf.mxu0 }
 0x73e   : > { %20073 = vmatprep.subr.mxu1 %v26128_v9  ;;  %20031 = vmatpush3.msra.mxu0 %v26178_v20  ;;  %v12585_v17 = vadd.f32 %v12584_v2, %v12423_v53 }
 0x73f   : > { %20074 = vmatpush3.msra.mxu1 %v26128_v9  ;;  %20032 = vmatprep.subr.mxu0 %v26129_v28  ;;  %v19377_v47 = vpop.f32.mrf.mxu1  ;;  %v19482_v58 = vpop.f32.mrf.mxu0 }
 0x740   : > { %20076 = vmatmul.mubr.f32.vlgmr.msra.gmra.mxu1 %v25172_v42  ;;  %20033 = vmatpush3.msra.mxu0 %v26129_v28  ;;  %v12695_v37 = vadd.f32 %v12694_v38, %v12585_v17  ;;  %v12799_v1 = vadd.f32 %v19377_v47, %v12702_v3 }
 0x741   : > { %20034 = vmatprep.subr.mxu0 %v26132_v11  ;;  %v12790_v50 = vpop.f32.mrf.mxu1  ;;  %v13107_v52 = vpop.f32.mrf.mxu0 }
 0x742   : > { %20035 = vmatpush3.msra.mxu0 %v26132_v11  ;;  %v12924_v59 = vadd.f32 %v19412_v62, %v12799_v1  ;;  %v12791_v5 = vadd.f32 %v12790_v50, %v12695_v37 }
 0x743   : > { %20036 = vmatprep.subr.mxu0 %v26134_v54  ;;  %v19447_v51 = vpop.f32.mrf.mxu1  ;;  %v19552_v28 = vpop.f32.mrf.mxu0 }
 0x744   : > { %20037 = vmatpush3.msra.mxu0 %v26134_v54  ;;  %v12918_v27 = vadd.f32 %v12917_v19, %v12791_v5  ;;  %v13017_v38 = vadd.f32 %v19447_v51, %v12924_v59 }
 0x745   : > { %20038 = vmatprep.subr.mxu0 %v26136_v25  ;;  %v13010_v6 = vpop.f32.mrf.mxu1  ;;  %v13378_v54 = vpop.f32.mrf.mxu0 }
 0x746   : > { %20039 = vmatpush3.msra.mxu0 %v26136_v25  ;;  %v13011_v62 = vadd.f32 %v13010_v6, %v12918_v27 }
 0x747   : > { %20041 = vmatmul.mubr.f32.vlgmr.msra.gmra.mxu0 %v25172_v42  ;;  %v19517_v9 = vpop.f32.mrf.mxu1  ;;  %v19622_v24 = vpop.f32.mrf.mxu0  ;;  %v12011_v42 = vadd.f32 %v12010_v12, %v11901_v36 }
 0x748   : > { %v13275_v63 = vadd.f32 %v19517_v9, %v19482_v58 }
 0x749   : > { %v13268_v11 = vpop.f32.mrf.mxu1  ;;  %v13601_v56 = vpop.f32.mrf.mxu0  ;;  %v12107_v0 = vadd.f32 %v12106_v32, %v12011_v42 }
 0x74a   : > { %v13269_v34 = vadd.f32 %v13268_v11, %v13107_v52  ;;  %v13386_v18 = vadd.f32 %v19552_v28, %v13275_v63  ;;  %v15075_v28 = vmul.f32 %v13017_v38, %v13017_v38 }
 0x74b   : > { %v19587_v25 = vpop.f32.mrf.mxu1  ;;  %v12234_v12 = vadd.f32 %v25348_v21, %v12107_v0 }
 0x74c   : > { %v13379_v8 = vadd.f32 %v13378_v54, %v13269_v34  ;;  %v13483_v53 = vadd.f32 %v19587_v25, %v13386_v18  ;;  %v15073_v54 = vmul.f32 %v12333_v14, %v12333_v14  ;;  %v15074_v25 = vmul.f32 %v13011_v62, %v13011_v62 }
 0x74d   : > { %v13474_v31 = vpop.f32.mrf.mxu1  ;;  %v12327_v32 = vadd.f32 %v25352_v55, %v12234_v12  ;;  %v15077_v34 = vmul.f32 %v13017_v38, %v12333_v14 }
 0x74e   : > { %v13608_v47 = vadd.f32 %v19622_v24, %v13483_v53  ;;  %v13475_v58 = vadd.f32 %v13474_v31, %v13379_v8 }
 0x74f   : > { %v19657_v7 = vpop.f32.mrf.mxu1  ;;  %v15072_v51 = vmul.f32 %v12327_v32, %v12327_v32  ;;  %v15076_v59 = vmul.f32 %v13011_v62, %v12327_v32  ;;  %v15085_v48 = vmul.f32 2.0, %v15077_v34 }
 0x750   : > { %v13602_v50 = vadd.f32 %v13601_v56, %v13475_v58  ;;  %v13701_v19 = vadd.f32 %v19657_v7, %v13608_v47  ;;  %v15095_v56 = vadd.f32 %v15075_v28, %v15073_v54 }
 0x751   : > { %v13694_v35 = vpop.f32.mrf.mxu1  ;;  %v15094_v17 = vadd.f32 %v15074_v25, %v15072_v51  ;;  %v15087_v12 = vadd.f32 0.0001, %v15085_v48 }
 0x752   : > { %v15079_v24 = vsub.f32 %v13701_v19, %v15073_v54  ;;  %v15097_v7 = vadd.f32 0.0001, %v15095_v56 }
 0x756   : > { %v19727_v33 = vpop.f32.mrf.mxu1 }
 0x758   : > { %v13952_v20 = vpop.f32.mrf.mxu1 }
 0x75e   : > { %v19692_v13 = vpop.f32.mrf.mxu0 }
 0x75f   : > { %v13959_v22 = vadd.f32 %v19727_v33, %v19692_v13  ;;  %v13695_v13 = vadd.f32 %v13694_v35, %v13602_v50 }
 0x760   : > { %v13791_v46 = vpop.f32.mrf.mxu0 }
 0x761   : > { %v13953_v30 = vadd.f32 %v13952_v20, %v13791_v46  ;;  %v15078_v33 = vsub.f32 %v13695_v13, %v15072_v51  ;;  %v15096_v20 = vadd.f32 0.0001, %v15094_v17  ;;  %v11650_v51 = vstv %s20086_s21 }
 0x778   : > { %v19797_v23 = vpop.f32.mrf.mxu1 }
 0x77a   : > { %v14158_v60 = vpop.f32.mrf.mxu1 }
 0x780   : > { %v19762_v61 = vpop.f32.mrf.mxu0 }
 0x781   : > { %v14070_v40 = vadd.f32 %v19762_v61, %v13959_v22 }
 0x782   : > { %v14062_v43 = vpop.f32.mrf.mxu0 }
 0x783   : > { %v14063_v39 = vadd.f32 %v14062_v43, %v13953_v30  ;;  %v14167_v4 = vadd.f32 %v19797_v23, %v14070_v40 }
 0x785   : > { %v14159_v45 = vadd.f32 %v14158_v60, %v14063_v39 }
 0x79a   : > { %v19867_v2 = vpop.f32.mrf.mxu1 }
 0x79c   : > { %v14378_v15 = vpop.f32.mrf.mxu1 }
 0x7a2   : > { %v19832_v29 = vpop.f32.mrf.mxu0 }
 0x7a3   : > { %v14292_v44 = vadd.f32 %v19832_v29, %v14167_v4 }
 0x7a4   : > { %v14285_v10 = vpop.f32.mrf.mxu0 }
 0x7a5   : > { %v14286_v52 = vadd.f32 %v14285_v10, %v14159_v45  ;;  %v14385_v9 = vadd.f32 %v19867_v2, %v14292_v44  ;;  %v15084_v10 = vmul.f32 2.0, %v15076_v59 }
 0x7a7   : > { %v14379_v11 = vadd.f32 %v14378_v15, %v14286_v52  ;;  %v15081_v21 = vsub.f32 %v14385_v9, %v15075_v28  ;;  %v15086_v47 = vadd.f32 0.0001, %v15084_v10 }
 0x7a9   : > { %v15080_v31 = vsub.f32 %v14379_v11, %v15074_v25  ;;  %v15099_v61 = vadd.f32 %v15081_v21, %v15079_v24  ;;  %v8180_v24 = vstv %s20084_s7 }
 0x7ab   : > { %v15098_v41 = vadd.f32 %v15080_v31, %v15078_v33  ;;  %v15101_v55 = vadd.f32 0.0009, %v15099_v61  ;;  %v11651_v31 = vadd.f32 %v11650_v51, %v8180_v24 }
 0x7ad   : > { %v15100_v22 = vadd.f32 0.0009, %v15098_v41  ;;  %v15103_v43 = vmul.f32 %v15101_v55, %v15097_v7 }
 0x7af   : > { %v15102_v30 = vmul.f32 %v15100_v22, %v15096_v20  ;;  %20165 = vrcp.f32 %v15103_v43 }
 0x7b1   : > { %20167 = vrcp.f32 %v15102_v30 }
 0x7bc   : > { %v19937_v26 = vpop.f32.mrf.mxu1  ;;  %v20166_v58 = vpop.eup %20165 }
 0x7be   : > { %v14636_v3 = vpop.f32.mrf.mxu1  ;;  %v20168_v62 = vpop.eup %20167 }
 0x7c4   : > { %v19902_v46 = vpop.f32.mrf.mxu0 }
 0x7c5   : > { %v14643_v36 = vadd.f32 %v19937_v26, %v19902_v46 }
 0x7c6   : > { %v14475_v6 = vpop.f32.mrf.mxu0 }
 0x7c7   : > { %v14637_v37 = vadd.f32 %v14636_v3, %v14475_v6 }
 0x7de   : > { %v20007_v49 = vpop.f32.mrf.mxu1 }
 0x7e0   : > { %v14842_v42 = vpop.f32.mrf.mxu1 }
 0x7e6   : > { %v19972_v57 = vpop.f32.mrf.mxu0 }
 0x7e7   : > { %v14754_v63 = vadd.f32 %v19972_v57, %v14643_v36 }
 0x7e8   : > { %v14746_v35 = vpop.f32.mrf.mxu0 }
 0x7e9   : > { %v14747_v40 = vadd.f32 %v14746_v35, %v14637_v37  ;;  %v14851_v23 = vadd.f32 %v20007_v49, %v14754_v63 }
 0x7eb   : > { %v14843_v39 = vadd.f32 %v14842_v42, %v14747_v40 }
 0x800   : > { %v20077_v29 = vpop.f32.mrf.mxu1 }
 0x802   : > { %v15062_v4 = vpop.f32.mrf.mxu1 }
 0x807   : > { %v20042_v1 = vpop.f32.mrf.mxu0 }
 0x808   : > { %v14976_v18 = vadd.f32 %v20042_v1, %v14851_v23 }
 0x809   : > { %v14969_v16 = vpop.f32.mrf.mxu0 }
 0x80a   : > { %v15069_v5 = vadd.f32 %v20077_v29, %v14976_v18  ;;  %v14970_v8 = vadd.f32 %v14969_v16, %v14843_v39 }
 0x80c   : > { %v15083_v0 = vsub.f32 %v15069_v5, %v15077_v34  ;;  %v15063_v60 = vadd.f32 %v15062_v4, %v14970_v8 }
 0x80e   : > { %v15089_v27 = vmul.f32 2.0, %v15083_v0  ;;  %v15082_v53 = vsub.f32 %v15063_v60, %v15076_v59 }
 0x810   : > { %v15091_v44 = vadd.f32 0.0009, %v15089_v27  ;;  %v15088_v45 = vmul.f32 2.0, %v15082_v53 }
 0x812   : > { %v15090_v2 = vadd.f32 0.0009, %v15088_v45  ;;  %v15093_v38 = vmul.f32 %v15091_v44, %v15087_v12 }
 0x814   : > { %v15092_v52 = vmul.f32 %v15090_v2, %v15086_v47  ;;  %v15107_v14 = vmul.f32 %v20166_v58, %v15093_v38 }
 0x816   : > { %v15106_v50 = vmul.f32 %v20168_v62, %v15092_v52  ;;  %v15109_v32 = vsel %vm4711_vm1, %v15107_v14, 0.0 }
 0x818   : > { %v15108_v15 = vsel %vm4711_vm1, %v15106_v50, 0.0 }
 0x819   : > { %v15110_v28 = vadd.f32 %v15109_v32, %v15108_v15 }
 0x81b   : > { %15111 = vadd.xlane.f32.xlu1 %v15110_v28 }
 0x8a4   : > { %v15112_v19 = vpop.xlane.xlu1 %15111 }
 0x8a5   : > { %v15113_v11 = vrot.slane %v15112_v19, 4 }
 0x8a7   : > { %v15114_v54 = vadd.f32 %v15113_v11, %v15112_v19 }
 0x8a9   : > { %v15115_v25 = vrot.slane %v15114_v54, 2 }
 0x8ab   : > { %v15116_v13 = vadd.f32 %v15115_v25, %v15114_v54 }
 0x8ad   : > { %v15117_v21 = vrot.slane %v15116_v13, 1 }
 0x8af   : > { %v15118_v46 = vadd.f32 %v15117_v21, %v15116_v13 }
 0x8b1   : > { %20087 = vpush %v15118_v46 }
 0x8e2   : > { %s20088_s22 = spop %20087 }
 0x8e3   : > { %v15120_v33 = vstv %s20088_s22 }
 0x8e4   : > { %v15121_v61 = vadd.f32 %v15120_v33, %v11651_v31 }
 0x8e6   : > { %15123 = vst.msk [vmem:[%s277_s27] sm:$0x1] %vm15122_vm2, %v15121_v61 }
 0x8e7 PF: > { %p13_p9 = scmp.ge.s32.totalorder %s20375_s20, 4   ;;  %s26188_s15 = smov %s20311_s16 }
 0x8e8   : > { %s26189_s16 = smov %s20315_s17  ;;  %s26190_s17 = smov %s20385_s23 }
 0x8e9   : > { %s26191_s18 = smov %s20375_s20  ;;  %15 = sbr.rel (!%p13_p9) target bundleno = 3 (0x3), region = 98 }
 0x8ee   :  { %15141 = vsyncpa [#allocation4], 1 }
 0x8ef   :  { %15143 = vsyncpa [#allocation4 + $0x1], 1 }
 0x8f0   :  { %15144 = vsyncpa [#allocation6], 1 }

</bundles_post_ra>
